<compile_context>
chip_gen: v5e
topology: v5e:2x2
jax: 0.10.0
libtpu: 0.0.40
codegen_flags: <defaults>
</compile_context>

<pallas_src>
import functools

import jax
import jax.numpy as jnp
from jax.experimental import pallas as pl
from jax.experimental.pallas import tpu as pltpu

_LPAD = 8      # left halo offset along W inside the scratch -> aligned writes
_EPS = 1e-5    # BatchNorm2d default eps


# ---------------------------------------------------------------------------
# Fused kernel
# ---------------------------------------------------------------------------
def _make_mynet_kernel(n_conv, N, H, W, Cin, C):
    """Build a kernel for the whole MyNet forward pass (n_conv is static)."""
    n_mid = n_conv - 1
    M = N * H * W
    inv_m = 1.0 / M

    def kernel(*refs):
        if n_mid > 0:
            patches_ref, w1_ref, w2_ref, w3_ref, bnp_ref, o_ref, pad_ref = refs
        else:
            patches_ref, w1_ref, w3_ref, bnp_ref, o_ref = refs
            w2_ref = pad_ref = None

        def bias_relu_bn(y, layer, relu):
            # conv bias + optional ReLU + training-mode BatchNorm.
            # Single-pass batch stats: E[x], E[x^2] over the M = N*H*W rows.
            b = bnp_ref[pl.ds(3 * layer + 0, 1), :]
            g = bnp_ref[pl.ds(3 * layer + 1, 1), :]
            be = bnp_ref[pl.ds(3 * layer + 2, 1), :]
            y = y + b
            if relu:
                y = jnp.maximum(y, 0.0)
            s1 = jnp.sum(y, axis=0, keepdims=True)
            s2 = jnp.sum(y * y, axis=0, keepdims=True)
            mean = s1 * inv_m
            var = s2 * inv_m - mean * mean           # biased variance
            return (y - mean) * (jax.lax.rsqrt(var + _EPS) * g) + be

        # --- layer 1: hoisted im2col -> one (M,9Cin)@(9Cin,C) dot ----------
        y = jnp.dot(patches_ref[...], w1_ref[...],
                    preferred_element_type=jnp.float32)
        y = bias_relu_bn(y, 0, relu=True)

        # --- middle layers: 3x3 conv = 9 accumulating shifted dots ---------
        if n_mid > 0:
            # Zero the halo scratch ONCE; every layer only rewrites the
            # (sublane-aligned) interior, so the halo stays zero throughout.
            pad_ref[...] = jnp.zeros_like(pad_ref)

        for i in range(n_mid):
            pad_ref[:, 1:H + 1, _LPAD:_LPAD + W, :] = y.reshape(N, H, W, C)
            acc = None
            for k in range(9):
                dy, dx = divmod(k, 3)
                s = pad_ref[:, dy:dy + H,
                            _LPAD - 1 + dx:_LPAD - 1 + dx + W, :]
                d = jnp.dot(s.reshape(M, C), w2_ref[i, k, :, :],
                            preferred_element_type=jnp.float32)
                acc = d if acc is None else acc + d
            y = bias_relu_bn(acc, 1 + i, relu=True)

        # --- final: conv1x1(C->C) + BN --------------------------------------
        y = jnp.dot(y, w3_ref[...], preferred_element_type=jnp.float32)
        y = bias_relu_bn(y, n_conv, relu=False)

        o_ref[...] = y        # (M, C); wrapper reshapes/transposes to NCHW

    return kernel


# ---------------------------------------------------------------------------
# Wrapper (one pallas_call for the whole network)
# ---------------------------------------------------------------------------
def mynet_forward(x_nchw, params, n_conv):
    """Matches MyNet.forward: conv1->relu->bn1, (conv2->relu->bn2)*, conv3->bn3."""
    x = jnp.transpose(x_nchw, (0, 2, 3, 1)).astype(jnp.float32)   # NCHW -> NHWC
    N, H, W, Cin = x.shape
    C = params["w1"].shape[-1]
    n_mid = n_conv - 1
    M = N * H * W

    # Layer-1 im2col hoisted to XLA (pure layout plumbing on an ~8 KiB array).
    # Column order (k = dy*3+dx, cin innermost) matches w1.reshape(9*Cin, C).
    xp = jnp.pad(x, ((0, 0), (1, 1), (1, 1), (0, 0)))
    patches = jnp.concatenate(
        [xp[:, dy:dy + H, dx:dx + W, :] for dy in range(3) for dx in range(3)],
        axis=-1).reshape(M, 9 * Cin)

    # Packed parameters: one (3*(nConv+1), C) bias/gamma/beta matrix and one
    # (n_mid, 9, C, C) mid-layer weight stack -> few prologue DMAs.
    bn_rows = [params["b1"], params["g1"], params["be1"]]
    for i in range(n_mid):
        bn_rows += [params["b2"][i], params["g2"][i], params["be2"][i]]
    bn_rows += [params["b3"], params["g3"], params["be3"]]
    bnp = jnp.stack(bn_rows, axis=0).astype(jnp.float32)

    inputs = [patches, params["w1"].reshape(9 * Cin, C)]
    if n_mid > 0:
        w2p = jnp.stack([params["w2"][i].reshape(9, C, C) for i in range(n_mid)])
        inputs.append(w2p)
    inputs += [params["w3"], bnp]

    def full_spec(shape):
        rank = len(shape)
        return pl.BlockSpec(shape, lambda i, _r=rank: (0,) * _r)

    scratch = []
    if n_mid > 0:
        # zero-halo activation scratch; valid region at W offset _LPAD (aligned)
        scratch.append(pltpu.VMEM((N, H + 2, _LPAD + W + 1, C), jnp.float32))

    out = pl.pallas_call(
        _make_mynet_kernel(n_conv, N, H, W, Cin, C),
        out_shape=jax.ShapeDtypeStruct((M, C), jnp.float32),
        grid_spec=pltpu.PrefetchScalarGridSpec(
            num_scalar_prefetch=0,
            grid=(1,),
            in_specs=[full_spec(a.shape) for a in inputs],
            out_specs=full_spec((M, C)),
            scratch_shapes=scratch,
        ),
        compiler_params=pltpu.CompilerParams(
            dimension_semantics=("arbitrary",)),
    )(*inputs)
    out = out.reshape(N, H, W, C)
    return jnp.transpose(out, (0, 3, 1, 2))   # back to NCHW like PyTorch


# ---------------------------------------------------------------------------
# Parameter construction (PyTorch shapes transposed to NHWC/HWIO)
# ---------------------------------------------------------------------------
def init_mynet_params(key, input_dim, n_channel, n_conv):
    keys = jax.random.split(key, 2 * (n_conv + 1))

    def conv_w(k, cout, cin, ksz):
        # PyTorch layout (Cout, Cin, k, k) -> HWIO (k, k, Cin, Cout)
        w = 0.1 * jax.random.normal(k, (cout, cin, ksz, ksz), jnp.float32)
        return jnp.transpose(w, (2, 3, 1, 0))

    params = {
        "w1": conv_w(keys[0], n_channel, input_dim, 3),
        "b1": 0.1 * jax.random.normal(keys[1], (n_channel,), jnp.float32),
        "g1": jnp.ones((n_channel,), jnp.float32),    # BatchNorm2d default weight
        "be1": jnp.zeros((n_channel,), jnp.float32),  # BatchNorm2d default bias
        "w2": [], "b2": [], "g2": [], "be2": [],
    }
    for i in range(n_conv - 1):
        params["w2"].append(conv_w(keys[2 + 2 * i], n_channel, n_channel, 3))
        params["b2"].append(
            0.1 * jax.random.normal(keys[3 + 2 * i], (n_channel,), jnp.float32))
        params["g2"].append(jnp.ones((n_channel,), jnp.float32))
        params["be2"].append(jnp.zeros((n_channel,), jnp.float32))
    kw3, kb3 = keys[-2], keys[-1]
    w3 = 0.1 * jax.random.normal(kw3, (n_channel, n_channel, 1, 1), jnp.float32)
    params["w3"] = jnp.transpose(w3[:, :, 0, 0], (1, 0))   # (Cin, Cout)
    params["b3"] = 0.1 * jax.random.normal(kb3, (n_channel,), jnp.float32)
    params["g3"] = jnp.ones((n_channel,), jnp.float32)
    params["be3"] = jnp.zeros((n_channel,), jnp.float32)
    return params


# ---------------------------------------------------------------------------
# Pure-JAX reference (correctness check)
# ---------------------------------------------------------------------------
def _ref_forward(x_nchw, params, n_conv):
    def conv(x, w_hwio, b, pad):
        y = jax.lax.conv_general_dilated(
            x, w_hwio, window_strides=(1, 1), padding=pad,
            dimension_numbers=("NHWC", "HWIO", "NHWC"))
        return y + b[None, None, None, :]

    def bn(x, g, be):
        m = jnp.mean(x, axis=(0, 1, 2), keepdims=True)
        v = jnp.mean((x - m) ** 2, axis=(0, 1, 2), keepdims=True)
        return (x - m) * jax.lax.rsqrt(v + _EPS) * g + be

    x = jnp.transpose(x_nchw, (0, 2, 3, 1))
    x = bn(jnp.maximum(conv(x, params["w1"], params["b1"], "SAME"), 0.0),
           params["g1"], params["be1"])
    for i in range(n_conv - 1):
        x = bn(jnp.maximum(conv(x, params["w2"][i], params["b2"][i], "SAME"), 0.0),
               params["g2"][i], params["be2"][i])
    w3 = params["w3"][None, None, :, :]
    x = bn(conv(x, w3, params["b3"], "VALID"), params["g3"], params["be3"])
    return jnp.transpose(x, (0, 3, 1, 2))


# ---------------------------------------------------------------------------
if __name__ == "__main__":
    # Shapes consistent with the module: input_dim=4, nChannel=32, nConv=2
    N, INPUT_DIM, H, W = 2, 4, 16, 16
    N_CHANNEL, N_CONV = 32, 2

    key = jax.random.PRNGKey(0)
    kx, kp = jax.random.split(key)
    x = jax.random.normal(kx, (N, INPUT_DIM, H, W), jnp.float32)
    params = init_mynet_params(kp, INPUT_DIM, N_CHANNEL, N_CONV)

    fwd = jax.jit(functools.partial(mynet_forward, n_conv=N_CONV))
    out = jax.block_until_ready(fwd(x, params))
    assert out.shape == (N, N_CHANNEL, H, W), out.shape

    ref = jax.block_until_ready(_ref_forward(x, params, N_CONV))
    assert jnp.allclose(out, ref, rtol=1e-3, atol=1e-3), (
        float(jnp.max(jnp.abs(out - ref))))

    print("KERNEL_OK")
</pallas_src>

<mosaic_0001>
module attributes {stable_mosaic.version = 11 : i64} {
  func.func @kernel(%arg0: i32, %arg1: memref<512x36xf32, #tpu.memory_space<vmem>>, %arg2: memref<36x32xf32, #tpu.memory_space<vmem>>, %arg3: memref<1x9x32x32xf32, #tpu.memory_space<vmem>>, %arg4: memref<32x32xf32, #tpu.memory_space<vmem>>, %arg5: memref<9x32xf32, #tpu.memory_space<vmem>>, %arg6: memref<512x32xf32, #tpu.memory_space<vmem>>, %arg7: memref<2x18x25x32xf32, #tpu.memory_space<vmem>>) attributes {dimension_semantics = [#tpu.dimension_semantics<arbitrary>], iteration_bounds = array<i64: 1>, scalar_prefetch = 0 : i64, scratch_operands = 1 : i64, tpu.core_type = #tpu.core_type<tc>, window_params = [{pipeline_mode = #tpu.pipeline_mode<synchronous>, transform_indices = @transform_0, window_bounds = array<i64: 512, 36>}, {pipeline_mode = #tpu.pipeline_mode<synchronous>, transform_indices = @transform_1, window_bounds = array<i64: 36, 32>}, {pipeline_mode = #tpu.pipeline_mode<synchronous>, transform_indices = @transform_2, window_bounds = array<i64: 1, 9, 32, 32>}, {pipeline_mode = #tpu.pipeline_mode<synchronous>, transform_indices = @transform_3, window_bounds = array<i64: 32, 32>}, {pipeline_mode = #tpu.pipeline_mode<synchronous>, transform_indices = @transform_4, window_bounds = array<i64: 9, 32>}, {pipeline_mode = #tpu.pipeline_mode<synchronous>, transform_indices = @transform_5, window_bounds = array<i64: 512, 32>}]} {
    %c0 = arith.constant 0 : index
    %c0_0 = arith.constant 0 : index
    %0 = vector.load %arg1[%c0, %c0_0] : memref<512x36xf32, #tpu.memory_space<vmem>>, vector<512x36xf32>
    %c0_1 = arith.constant 0 : index
    %c0_2 = arith.constant 0 : index
    %1 = vector.load %arg2[%c0_1, %c0_2] : memref<36x32xf32, #tpu.memory_space<vmem>>, vector<36x32xf32>
    %cst = arith.constant dense<0.000000e+00> : vector<512x32xf32>
    %2 = tpu.matmul %0, %1, %cst {dimension_numbers = #tpu.dot_dimension_numbers<[1], [0], [0], [1], [0, 0, 1, 1], [], []>} : vector<512x36xf32>, vector<36x32xf32>, vector<512x32xf32> -> vector<512x32xf32>
    %c0_3 = arith.constant 0 : index
    %c0_4 = arith.constant 0 : index
    %3 = vector.load %arg5[%c0_3, %c0_4] : memref<9x32xf32, #tpu.memory_space<vmem>>, vector<1x32xf32>
    %c1 = arith.constant 1 : index
    %c0_5 = arith.constant 0 : index
    %4 = vector.load %arg5[%c1, %c0_5] : memref<9x32xf32, #tpu.memory_space<vmem>>, vector<1x32xf32>
    %c2 = arith.constant 2 : index
    %c0_6 = arith.constant 0 : index
    %5 = vector.load %arg5[%c2, %c0_6] : memref<9x32xf32, #tpu.memory_space<vmem>>, vector<1x32xf32>
    %6 = vector.broadcast %3 : vector<1x32xf32> to vector<512x32xf32>
    %7 = arith.addf %2, %6 : vector<512x32xf32>
    %cst_7 = arith.constant 0.000000e+00 : f32
    %8 = vector.broadcast %cst_7 : f32 to vector<512x32xf32>
    %9 = arith.maximumf %7, %8 : vector<512x32xf32>
    %cst_8 = arith.constant dense<0.000000e+00> : vector<32xf32>
    %10 = vector.multi_reduction <add>, %9, %cst_8 [0] : vector<512x32xf32> to vector<32xf32>
    %11 = vector.shape_cast %10 : vector<32xf32> to vector<1x32xf32>
    %12 = arith.mulf %9, %9 : vector<512x32xf32>
    %cst_9 = arith.constant dense<0.000000e+00> : vector<32xf32>
    %13 = vector.multi_reduction <add>, %12, %cst_9 [0] : vector<512x32xf32> to vector<32xf32>
    %14 = vector.shape_cast %13 : vector<32xf32> to vector<1x32xf32>
    %cst_10 = arith.constant 0.001953125 : f32
    %15 = vector.broadcast %cst_10 : f32 to vector<1x32xf32>
    %16 = arith.mulf %11, %15 : vector<1x32xf32>
    %cst_11 = arith.constant 0.001953125 : f32
    %17 = vector.broadcast %cst_11 : f32 to vector<1x32xf32>
    %18 = arith.mulf %14, %17 : vector<1x32xf32>
    %19 = arith.mulf %16, %16 : vector<1x32xf32>
    %20 = arith.subf %18, %19 : vector<1x32xf32>
    %21 = vector.broadcast %16 : vector<1x32xf32> to vector<512x32xf32>
    %22 = arith.subf %9, %21 : vector<512x32xf32>
    %cst_12 = arith.constant 9.99999974E-6 : f32
    %23 = vector.broadcast %cst_12 : f32 to vector<1x32xf32>
    %24 = arith.addf %20, %23 : vector<1x32xf32>
    %25 = math.rsqrt %24 : vector<1x32xf32>
    %26 = arith.mulf %25, %4 : vector<1x32xf32>
    %27 = vector.broadcast %26 : vector<1x32xf32> to vector<512x32xf32>
    %28 = arith.mulf %22, %27 : vector<512x32xf32>
    %29 = vector.broadcast %5 : vector<1x32xf32> to vector<512x32xf32>
    %30 = arith.addf %28, %29 : vector<512x32xf32>
    %cst_13 = arith.constant 0.000000e+00 : f32
    %31 = vector.broadcast %cst_13 : f32 to vector<2x18x25x32xf32>
    %c0_14 = arith.constant 0 : index
    %c0_15 = arith.constant 0 : index
    %c0_16 = arith.constant 0 : index
    %c0_17 = arith.constant 0 : index
    %32 = vector.load %arg7[%c0_14, %c0_15, %c0_16, %c0_17] : memref<2x18x25x32xf32, #tpu.memory_space<vmem>>, vector<2x18x25x32xf32>
    tpu.vector_store %arg7[%c0_14, %c0_15, %c0_16, %c0_17], %31 {strides = array<i32>} : memref<2x18x25x32xf32, #tpu.memory_space<vmem>>, vector<2x18x25x32xf32>,
    %33 = vector.shape_cast %30 : vector<512x32xf32> to vector<2x16x16x32xf32>
    %c0_18 = arith.constant 0 : index
    %c1_19 = arith.constant 1 : index
    %c8 = arith.constant 8 : index
    %c0_20 = arith.constant 0 : index
    %34 = vector.load %arg7[%c0_18, %c1_19, %c8, %c0_20] : memref<2x18x25x32xf32, #tpu.memory_space<vmem>>, vector<2x16x16x32xf32>
    tpu.vector_store %arg7[%c0_18, %c1_19, %c8, %c0_20], %33 {strides = array<i32>} : memref<2x18x25x32xf32, #tpu.memory_space<vmem>>, vector<2x16x16x32xf32>,
    %c0_21 = arith.constant 0 : index
    %c0_22 = arith.constant 0 : index
    %c7 = arith.constant 7 : index
    %c0_23 = arith.constant 0 : index
    %35 = vector.load %arg7[%c0_21, %c0_22, %c7, %c0_23] : memref<2x18x25x32xf32, #tpu.memory_space<vmem>>, vector<2x16x16x32xf32>
    %36 = vector.shape_cast %35 : vector<2x16x16x32xf32> to vector<512x32xf32>
    %c0_24 = arith.constant 0 : index
    %c0_25 = arith.constant 0 : index
    %c0_26 = arith.constant 0 : index
    %c0_27 = arith.constant 0 : index
    %37 = vector.load %arg3[%c0_24, %c0_25, %c0_26, %c0_27] : memref<1x9x32x32xf32, #tpu.memory_space<vmem>>, vector<1x1x32x32xf32>
    %38 = vector.shape_cast %37 : vector<1x1x32x32xf32> to vector<32x32xf32>
    %cst_28 = arith.constant dense<0.000000e+00> : vector<512x32xf32>
    %39 = tpu.matmul %36, %38, %cst_28 {dimension_numbers = #tpu.dot_dimension_numbers<[1], [0], [0], [1], [0, 0, 1, 1], [], []>} : vector<512x32xf32>, vector<32x32xf32>, vector<512x32xf32> -> vector<512x32xf32>
    %c0_29 = arith.constant 0 : index
    %c0_30 = arith.constant 0 : index
    %c8_31 = arith.constant 8 : index
    %c0_32 = arith.constant 0 : index
    %40 = vector.load %arg7[%c0_29, %c0_30, %c8_31, %c0_32] : memref<2x18x25x32xf32, #tpu.memory_space<vmem>>, vector<2x16x16x32xf32>
    %41 = vector.shape_cast %40 : vector<2x16x16x32xf32> to vector<512x32xf32>
    %c0_33 = arith.constant 0 : index
    %c1_34 = arith.constant 1 : index
    %c0_35 = arith.constant 0 : index
    %c0_36 = arith.constant 0 : index
    %42 = vector.load %arg3[%c0_33, %c1_34, %c0_35, %c0_36] : memref<1x9x32x32xf32, #tpu.memory_space<vmem>>, vector<1x1x32x32xf32>
    %43 = vector.shape_cast %42 : vector<1x1x32x32xf32> to vector<32x32xf32>
    %cst_37 = arith.constant dense<0.000000e+00> : vector<512x32xf32>
    %44 = tpu.matmul %41, %43, %cst_37 {dimension_numbers = #tpu.dot_dimension_numbers<[1], [0], [0], [1], [0, 0, 1, 1], [], []>} : vector<512x32xf32>, vector<32x32xf32>, vector<512x32xf32> -> vector<512x32xf32>
    %45 = arith.addf %39, %44 : vector<512x32xf32>
    %c0_38 = arith.constant 0 : index
    %c0_39 = arith.constant 0 : index
    %c9 = arith.constant 9 : index
    %c0_40 = arith.constant 0 : index
    %46 = vector.load %arg7[%c0_38, %c0_39, %c9, %c0_40] : memref<2x18x25x32xf32, #tpu.memory_space<vmem>>, vector<2x16x16x32xf32>
    %47 = vector.shape_cast %46 : vector<2x16x16x32xf32> to vector<512x32xf32>
    %c0_41 = arith.constant 0 : index
    %c2_42 = arith.constant 2 : index
    %c0_43 = arith.constant 0 : index
    %c0_44 = arith.constant 0 : index
    %48 = vector.load %arg3[%c0_41, %c2_42, %c0_43, %c0_44] : memref<1x9x32x32xf32, #tpu.memory_space<vmem>>, vector<1x1x32x32xf32>
    %49 = vector.shape_cast %48 : vector<1x1x32x32xf32> to vector<32x32xf32>
    %cst_45 = arith.constant dense<0.000000e+00> : vector<512x32xf32>
    %50 = tpu.matmul %47, %49, %cst_45 {dimension_numbers = #tpu.dot_dimension_numbers<[1], [0], [0], [1], [0, 0, 1, 1], [], []>} : vector<512x32xf32>, vector<32x32xf32>, vector<512x32xf32> -> vector<512x32xf32>
    %51 = arith.addf %45, %50 : vector<512x32xf32>
    %c0_46 = arith.constant 0 : index
    %c1_47 = arith.constant 1 : index
    %c7_48 = arith.constant 7 : index
    %c0_49 = arith.constant 0 : index
    %52 = vector.load %arg7[%c0_46, %c1_47, %c7_48, %c0_49] : memref<2x18x25x32xf32, #tpu.memory_space<vmem>>, vector<2x16x16x32xf32>
    %53 = vector.shape_cast %52 : vector<2x16x16x32xf32> to vector<512x32xf32>
    %c0_50 = arith.constant 0 : index
    %c3 = arith.constant 3 : index
    %c0_51 = arith.constant 0 : index
    %c0_52 = arith.constant 0 : index
    %54 = vector.load %arg3[%c0_50, %c3, %c0_51, %c0_52] : memref<1x9x32x32xf32, #tpu.memory_space<vmem>>, vector<1x1x32x32xf32>
    %55 = vector.shape_cast %54 : vector<1x1x32x32xf32> to vector<32x32xf32>
    %cst_53 = arith.constant dense<0.000000e+00> : vector<512x32xf32>
    %56 = tpu.matmul %53, %55, %cst_53 {dimension_numbers = #tpu.dot_dimension_numbers<[1], [0], [0], [1], [0, 0, 1, 1], [], []>} : vector<512x32xf32>, vector<32x32xf32>, vector<512x32xf32> -> vector<512x32xf32>
    %57 = arith.addf %51, %56 : vector<512x32xf32>
    %c0_54 = arith.constant 0 : index
    %c1_55 = arith.constant 1 : index
    %c8_56 = arith.constant 8 : index
    %c0_57 = arith.constant 0 : index
    %58 = vector.load %arg7[%c0_54, %c1_55, %c8_56, %c0_57] : memref<2x18x25x32xf32, #tpu.memory_space<vmem>>, vector<2x16x16x32xf32>
    %59 = vector.shape_cast %58 : vector<2x16x16x32xf32> to vector<512x32xf32>
    %c0_58 = arith.constant 0 : index
    %c4 = arith.constant 4 : index
    %c0_59 = arith.constant 0 : index
    %c0_60 = arith.constant 0 : index
    %60 = vector.load %arg3[%c0_58, %c4, %c0_59, %c0_60] : memref<1x9x32x32xf32, #tpu.memory_space<vmem>>, vector<1x1x32x32xf32>
    %61 = vector.shape_cast %60 : vector<1x1x32x32xf32> to vector<32x32xf32>
    %cst_61 = arith.constant dense<0.000000e+00> : vector<512x32xf32>
    %62 = tpu.matmul %59, %61, %cst_61 {dimension_numbers = #tpu.dot_dimension_numbers<[1], [0], [0], [1], [0, 0, 1, 1], [], []>} : vector<512x32xf32>, vector<32x32xf32>, vector<512x32xf32> -> vector<512x32xf32>
    %63 = arith.addf %57, %62 : vector<512x32xf32>
    %c0_62 = arith.constant 0 : index
    %c1_63 = arith.constant 1 : index
    %c9_64 = arith.constant 9 : index
    %c0_65 = arith.constant 0 : index
    %64 = vector.load %arg7[%c0_62, %c1_63, %c9_64, %c0_65] : memref<2x18x25x32xf32, #tpu.memory_space<vmem>>, vector<2x16x16x32xf32>
    %65 = vector.shape_cast %64 : vector<2x16x16x32xf32> to vector<512x32xf32>
    %c0_66 = arith.constant 0 : index
    %c5 = arith.constant 5 : index
    %c0_67 = arith.constant 0 : index
    %c0_68 = arith.constant 0 : index
    %66 = vector.load %arg3[%c0_66, %c5, %c0_67, %c0_68] : memref<1x9x32x32xf32, #tpu.memory_space<vmem>>, vector<1x1x32x32xf32>
    %67 = vector.shape_cast %66 : vector<1x1x32x32xf32> to vector<32x32xf32>
    %cst_69 = arith.constant dense<0.000000e+00> : vector<512x32xf32>
    %68 = tpu.matmul %65, %67, %cst_69 {dimension_numbers = #tpu.dot_dimension_numbers<[1], [0], [0], [1], [0, 0, 1, 1], [], []>} : vector<512x32xf32>, vector<32x32xf32>, vector<512x32xf32> -> vector<512x32xf32>
    %69 = arith.addf %63, %68 : vector<512x32xf32>
    %c0_70 = arith.constant 0 : index
    %c2_71 = arith.constant 2 : index
    %c7_72 = arith.constant 7 : index
    %c0_73 = arith.constant 0 : index
    %70 = vector.load %arg7[%c0_70, %c2_71, %c7_72, %c0_73] : memref<2x18x25x32xf32, #tpu.memory_space<vmem>>, vector<2x16x16x32xf32>
    %71 = vector.shape_cast %70 : vector<2x16x16x32xf32> to vector<512x32xf32>
    %c0_74 = arith.constant 0 : index
    %c6 = arith.constant 6 : index
    %c0_75 = arith.constant 0 : index
    %c0_76 = arith.constant 0 : index
    %72 = vector.load %arg3[%c0_74, %c6, %c0_75, %c0_76] : memref<1x9x32x32xf32, #tpu.memory_space<vmem>>, vector<1x1x32x32xf32>
    %73 = vector.shape_cast %72 : vector<1x1x32x32xf32> to vector<32x32xf32>
    %cst_77 = arith.constant dense<0.000000e+00> : vector<512x32xf32>
    %74 = tpu.matmul %71, %73, %cst_77 {dimension_numbers = #tpu.dot_dimension_numbers<[1], [0], [0], [1], [0, 0, 1, 1], [], []>} : vector<512x32xf32>, vector<32x32xf32>, vector<512x32xf32> -> vector<512x32xf32>
    %75 = arith.addf %69, %74 : vector<512x32xf32>
    %c0_78 = arith.constant 0 : index
    %c2_79 = arith.constant 2 : index
    %c8_80 = arith.constant 8 : index
    %c0_81 = arith.constant 0 : index
    %76 = vector.load %arg7[%c0_78, %c2_79, %c8_80, %c0_81] : memref<2x18x25x32xf32, #tpu.memory_space<vmem>>, vector<2x16x16x32xf32>
    %77 = vector.shape_cast %76 : vector<2x16x16x32xf32> to vector<512x32xf32>
    %c0_82 = arith.constant 0 : index
    %c7_83 = arith.constant 7 : index
    %c0_84 = arith.constant 0 : index
    %c0_85 = arith.constant 0 : index
    %78 = vector.load %arg3[%c0_82, %c7_83, %c0_84, %c0_85] : memref<1x9x32x32xf32, #tpu.memory_space<vmem>>, vector<1x1x32x32xf32>
    %79 = vector.shape_cast %78 : vector<1x1x32x32xf32> to vector<32x32xf32>
    %cst_86 = arith.constant dense<0.000000e+00> : vector<512x32xf32>
    %80 = tpu.matmul %77, %79, %cst_86 {dimension_numbers = #tpu.dot_dimension_numbers<[1], [0], [0], [1], [0, 0, 1, 1], [], []>} : vector<512x32xf32>, vector<32x32xf32>, vector<512x32xf32> -> vector<512x32xf32>
    %81 = arith.addf %75, %80 : vector<512x32xf32>
    %c0_87 = arith.constant 0 : index
    %c2_88 = arith.constant 2 : index
    %c9_89 = arith.constant 9 : index
    %c0_90 = arith.constant 0 : index
    %82 = vector.load %arg7[%c0_87, %c2_88, %c9_89, %c0_90] : memref<2x18x25x32xf32, #tpu.memory_space<vmem>>, vector<2x16x16x32xf32>
    %83 = vector.shape_cast %82 : vector<2x16x16x32xf32> to vector<512x32xf32>
    %c0_91 = arith.constant 0 : index
    %c8_92 = arith.constant 8 : index
    %c0_93 = arith.constant 0 : index
    %c0_94 = arith.constant 0 : index
    %84 = vector.load %arg3[%c0_91, %c8_92, %c0_93, %c0_94] : memref<1x9x32x32xf32, #tpu.memory_space<vmem>>, vector<1x1x32x32xf32>
    %85 = vector.shape_cast %84 : vector<1x1x32x32xf32> to vector<32x32xf32>
    %cst_95 = arith.constant dense<0.000000e+00> : vector<512x32xf32>
    %86 = tpu.matmul %83, %85, %cst_95 {dimension_numbers = #tpu.dot_dimension_numbers<[1], [0], [0], [1], [0, 0, 1, 1], [], []>} : vector<512x32xf32>, vector<32x32xf32>, vector<512x32xf32> -> vector<512x32xf32>
    %87 = arith.addf %81, %86 : vector<512x32xf32>
    %c3_96 = arith.constant 3 : index
    %c0_97 = arith.constant 0 : index
    %88 = vector.load %arg5[%c3_96, %c0_97] : memref<9x32xf32, #tpu.memory_space<vmem>>, vector<1x32xf32>
    %c4_98 = arith.constant 4 : index
    %c0_99 = arith.constant 0 : index
    %89 = vector.load %arg5[%c4_98, %c0_99] : memref<9x32xf32, #tpu.memory_space<vmem>>, vector<1x32xf32>
    %c5_100 = arith.constant 5 : index
    %c0_101 = arith.constant 0 : index
    %90 = vector.load %arg5[%c5_100, %c0_101] : memref<9x32xf32, #tpu.memory_space<vmem>>, vector<1x32xf32>
    %91 = vector.broadcast %88 : vector<1x32xf32> to vector<512x32xf32>
    %92 = arith.addf %87, %91 : vector<512x32xf32>
    %cst_102 = arith.constant 0.000000e+00 : f32
    %93 = vector.broadcast %cst_102 : f32 to vector<512x32xf32>
    %94 = arith.maximumf %92, %93 : vector<512x32xf32>
    %cst_103 = arith.constant dense<0.000000e+00> : vector<32xf32>
    %95 = vector.multi_reduction <add>, %94, %cst_103 [0] : vector<512x32xf32> to vector<32xf32>
    %96 = vector.shape_cast %95 : vector<32xf32> to vector<1x32xf32>
    %97 = arith.mulf %94, %94 : vector<512x32xf32>
    %cst_104 = arith.constant dense<0.000000e+00> : vector<32xf32>
    %98 = vector.multi_reduction <add>, %97, %cst_104 [0] : vector<512x32xf32> to vector<32xf32>
    %99 = vector.shape_cast %98 : vector<32xf32> to vector<1x32xf32>
    %cst_105 = arith.constant 0.001953125 : f32
    %100 = vector.broadcast %cst_105 : f32 to vector<1x32xf32>
    %101 = arith.mulf %96, %100 : vector<1x32xf32>
    %cst_106 = arith.constant 0.001953125 : f32
    %102 = vector.broadcast %cst_106 : f32 to vector<1x32xf32>
    %103 = arith.mulf %99, %102 : vector<1x32xf32>
    %104 = arith.mulf %101, %101 : vector<1x32xf32>
    %105 = arith.subf %103, %104 : vector<1x32xf32>
    %106 = vector.broadcast %101 : vector<1x32xf32> to vector<512x32xf32>
    %107 = arith.subf %94, %106 : vector<512x32xf32>
    %cst_107 = arith.constant 9.99999974E-6 : f32
    %108 = vector.broadcast %cst_107 : f32 to vector<1x32xf32>
    %109 = arith.addf %105, %108 : vector<1x32xf32>
    %110 = math.rsqrt %109 : vector<1x32xf32>
    %111 = arith.mulf %110, %89 : vector<1x32xf32>
    %112 = vector.broadcast %111 : vector<1x32xf32> to vector<512x32xf32>
    %113 = arith.mulf %107, %112 : vector<512x32xf32>
    %114 = vector.broadcast %90 : vector<1x32xf32> to vector<512x32xf32>
    %115 = arith.addf %113, %114 : vector<512x32xf32>
    %c0_108 = arith.constant 0 : index
    %c0_109 = arith.constant 0 : index
    %116 = vector.load %arg4[%c0_108, %c0_109] : memref<32x32xf32, #tpu.memory_space<vmem>>, vector<32x32xf32>
    %cst_110 = arith.constant dense<0.000000e+00> : vector<512x32xf32>
    %117 = tpu.matmul %115, %116, %cst_110 {dimension_numbers = #tpu.dot_dimension_numbers<[1], [0], [0], [1], [0, 0, 1, 1], [], []>} : vector<512x32xf32>, vector<32x32xf32>, vector<512x32xf32> -> vector<512x32xf32>
    %c6_111 = arith.constant 6 : index
    %c0_112 = arith.constant 0 : index
    %118 = vector.load %arg5[%c6_111, %c0_112] : memref<9x32xf32, #tpu.memory_space<vmem>>, vector<1x32xf32>
    %c7_113 = arith.constant 7 : index
    %c0_114 = arith.constant 0 : index
    %119 = vector.load %arg5[%c7_113, %c0_114] : memref<9x32xf32, #tpu.memory_space<vmem>>, vector<1x32xf32>
    %c8_115 = arith.constant 8 : index
    %c0_116 = arith.constant 0 : index
    %120 = vector.load %arg5[%c8_115, %c0_116] : memref<9x32xf32, #tpu.memory_space<vmem>>, vector<1x32xf32>
    %121 = vector.broadcast %118 : vector<1x32xf32> to vector<512x32xf32>
    %122 = arith.addf %117, %121 : vector<512x32xf32>
    %cst_117 = arith.constant dense<0.000000e+00> : vector<32xf32>
    %123 = vector.multi_reduction <add>, %122, %cst_117 [0] : vector<512x32xf32> to vector<32xf32>
    %124 = vector.shape_cast %123 : vector<32xf32> to vector<1x32xf32>
    %125 = arith.mulf %122, %122 : vector<512x32xf32>
    %cst_118 = arith.constant dense<0.000000e+00> : vector<32xf32>
    %126 = vector.multi_reduction <add>, %125, %cst_118 [0] : vector<512x32xf32> to vector<32xf32>
    %127 = vector.shape_cast %126 : vector<32xf32> to vector<1x32xf32>
    %cst_119 = arith.constant 0.001953125 : f32
    %128 = vector.broadcast %cst_119 : f32 to vector<1x32xf32>
    %129 = arith.mulf %124, %128 : vector<1x32xf32>
    %cst_120 = arith.constant 0.001953125 : f32
    %130 = vector.broadcast %cst_120 : f32 to vector<1x32xf32>
    %131 = arith.mulf %127, %130 : vector<1x32xf32>
    %132 = arith.mulf %129, %129 : vector<1x32xf32>
    %133 = arith.subf %131, %132 : vector<1x32xf32>
    %134 = vector.broadcast %129 : vector<1x32xf32> to vector<512x32xf32>
    %135 = arith.subf %122, %134 : vector<512x32xf32>
    %cst_121 = arith.constant 9.99999974E-6 : f32
    %136 = vector.broadcast %cst_121 : f32 to vector<1x32xf32>
    %137 = arith.addf %133, %136 : vector<1x32xf32>
    %138 = math.rsqrt %137 : vector<1x32xf32>
    %139 = arith.mulf %138, %119 : vector<1x32xf32>
    %140 = vector.broadcast %139 : vector<1x32xf32> to vector<512x32xf32>
    %141 = arith.mulf %135, %140 : vector<512x32xf32>
    %142 = vector.broadcast %120 : vector<1x32xf32> to vector<512x32xf32>
    %143 = arith.addf %141, %142 : vector<512x32xf32>
    %c0_122 = arith.constant 0 : index
    %c0_123 = arith.constant 0 : index
    %144 = vector.load %arg6[%c0_122, %c0_123] : memref<512x32xf32, #tpu.memory_space<vmem>>, vector<512x32xf32>
    tpu.vector_store %arg6[%c0_122, %c0_123], %143 {strides = array<i32>} : memref<512x32xf32, #tpu.memory_space<vmem>>, vector<512x32xf32>,
    return
  }
  func.func @transform_0(%arg0: i32) -> (i32, i32) {
    %c0_i32 = arith.constant 0 : i32
    %c0_i32_0 = arith.constant 0 : i32
    %c0_i32_1 = arith.constant 0 : i32
    return %c0_i32, %c0_i32_0 : i32, i32
  }
  func.func @transform_1(%arg0: i32) -> (i32, i32) {
    %c0_i32 = arith.constant 0 : i32
    %c0_i32_0 = arith.constant 0 : i32
    %c0_i32_1 = arith.constant 0 : i32
    return %c0_i32, %c0_i32_0 : i32, i32
  }
  func.func @transform_2(%arg0: i32) -> (i32, i32, i32, i32) {
    %c0_i32 = arith.constant 0 : i32
    %c0_i32_0 = arith.constant 0 : i32
    %c0_i32_1 = arith.constant 0 : i32
    %c0_i32_2 = arith.constant 0 : i32
    %c0_i32_3 = arith.constant 0 : i32
    return %c0_i32, %c0_i32_0, %c0_i32_1, %c0_i32_2 : i32, i32, i32, i32
  }
  func.func @transform_3(%arg0: i32) -> (i32, i32) {
    %c0_i32 = arith.constant 0 : i32
    %c0_i32_0 = arith.constant 0 : i32
    %c0_i32_1 = arith.constant 0 : i32
    return %c0_i32, %c0_i32_0 : i32, i32
  }
  func.func @transform_4(%arg0: i32) -> (i32, i32) {
    %c0_i32 = arith.constant 0 : i32
    %c0_i32_0 = arith.constant 0 : i32
    %c0_i32_1 = arith.constant 0 : i32
    return %c0_i32, %c0_i32_0 : i32, i32
  }
  func.func @transform_5(%arg0: i32) -> (i32, i32) {
    %c0_i32 = arith.constant 0 : i32
    %c0_i32_0 = arith.constant 0 : i32
    %c0_i32_1 = arith.constant 0 : i32
    return %c0_i32, %c0_i32_0 : i32, i32
  }
}

</mosaic_0001>

<bundles_post_ra>
// kernel: mynet_forward.1
= control target key start
LH: loop header
LB: loop body
LE: loop exit
PB: predicated region body
PF: predicated region fallthrough
CT: control target
= control target key end

     0   :  { %vm287_vm0 = vcmask 1043456   ;;  %s13971_s0 = inlined_call_operand.vmem [shape: f32[512,36], index: 0, kind: input, shape index: {}]   ;;  %s13972_s1 = inlined_call_operand.vmem [shape: f32[36,32], index: 1, kind: input, shape index: {}]   ;;  %s13973_s2 = inlined_call_operand.vmem [shape: f32[1,9,32,32], index: 2, kind: input, shape index: {}]   ;;  %s13974_s3 = inlined_call_operand.vmem [shape: f32[32,32], index: 3, kind: input, shape index: {}]   ;;  %s13975_s4 = inlined_call_operand.vmem [shape: f32[9,32], index: 4, kind: input, shape index: {}]   ;;  %s13976_s5 = inlined_call_operand.hbm [shape: f32[512,32], index: 5, kind: output, shape index: {}]  }
   0x1   :  { %v89_v0 = vld [vmem:[%s13972_s1 + $0x20] sm:$0xf]  ;;  %v88_v1 = vld [vmem:[%s13972_s1 + $0x18] sm:$0xff]  ;;  %v87_v2 = vld [vmem:[%s13972_s1 + $0x10] sm:$0xff] }
   0x2   :  { %7696 = vmatpush.msk.msra.mxu0 %vm287_vm0, %v89_v0  ;;  %v86_v3 = vld [vmem:[%s13972_s1 + $0x8] sm:$0xff] }
   0x4   :  { %303 = vmatpush.msra.mxu0 %v88_v1 }
   0x6   :  { %304 = vmatpush.msra.mxu0 %v87_v2 }
   0x7   :  { %10 = vsyncpa [#allocation4], 0  ;;  %v85_v4 = vld [vmem:[%s13972_s1] sm:$0xff]  ;;  %vm94_vm1 = vcmask 293888   ;;  %v22_v6 = vld [vmem:[%s13971_s0 + $0x8] sm:$0xff]  ;;  %vm564_vm2 = vcmask 261120  }
   0x8   :  { %305 = vmatpush.msra.mxu0 %v86_v3  ;;  %v21_v5 = vld [vmem:[%s13971_s0] sm:$0xff]  ;;  %v23_v7 = vld [vmem:[%s13971_s0 + $0x10] sm:$0xff]  ;;  %v24_v8 = vld [vmem:[%s13971_s0 + $0x18] sm:$0xff]  ;;  %v13977_v19 = vmov 0.0   ;;  %vm1108_vm6 = vcmask 253952   ;;  %s7684_s19 = sshll.u32 %s13976_s5, 4  ;;  %s7685_s19 = int_to_ptr.hbm [resolvable:$true] %s7684_s19 }
   0x9   :  { %v25_v9 = vld [vmem:[%s13971_s0 + $0x20] sm:$0xff]  ;;  %v26_v10 = vld [vmem:[%s13971_s0 + $0x28] sm:$0xff]  ;;  %v27_v11 = vld [vmem:[%s13971_s0 + $0x30] sm:$0xff]  ;;  %1111 = vst.msk [vmem:[#allocation2 + $0x28] sm:$0xff] %vm564_vm2, %v13977_v19  ;;  %s8490_s5 = smov 128   ;;  %s8491_s20 = smov 8  }
   0xa   :  { %306 = vmatpush.msra.mxu0 %v85_v4  ;;  %v28_v12 = vld [vmem:[%s13971_s0 + $0x38] sm:$0xff]  ;;  %v29_v13 = vld [vmem:[%s13971_s0 + $0x40] sm:$0xff]  ;;  %v30_v14 = vld [vmem:[%s13971_s0 + $0x48] sm:$0xff]  ;;  %1105 = vst.msk [vmem:[#allocation2] sm:$0xff] %vm564_vm2, %v13977_v19 }
   0xb   :  { %7697 = vmatmul.msk.f32.vlgmr.msra.gmra.mxu0 %vm94_vm1, %v21_v5  ;;  %v31_v15 = vld [vmem:[%s13971_s0 + $0x50] sm:$0xff]  ;;  %v32_v16 = vld [vmem:[%s13971_s0 + $0x58] sm:$0xff]  ;;  %v33_v17 = vld [vmem:[%s13971_s0 + $0x60] sm:$0xff]  ;;  %1106 = vst.msk [vmem:[#allocation2 + $0x8] sm:$0xff] %vm564_vm2, %v13977_v19 }
   0xc   :  { %v34_v18 = vld [vmem:[%s13971_s0 + $0x68] sm:$0xff]  ;;  %1107 = vst.msk [vmem:[#allocation2 + $0x10] sm:$0xff] %vm564_vm2, %v13977_v19  ;;  %v35_v20 = vld [vmem:[%s13971_s0 + $0x70] sm:$0xff]  ;;  %v36_v21 = vld [vmem:[%s13971_s0 + $0x78] sm:$0xff] }
   0xd   :  { %1110 = vst.msk [vmem:[#allocation2 + $0x20] sm:$0xff] %vm564_vm2, %v13977_v19  ;;  %v37_v23 = vld [vmem:[%s13971_s0 + $0x80] sm:$0xff]  ;;  %v38_v25 = vld [vmem:[%s13971_s0 + $0x88] sm:$0xff]  ;;  %v39_v27 = vld [vmem:[%s13971_s0 + $0x90] sm:$0xff] }
   0xe   :  { %1112 = vst.msk [vmem:[#allocation2 + $0x30] sm:$0xff] %vm564_vm2, %v13977_v19  ;;  %v40_v29 = vld [vmem:[%s13971_s0 + $0x98] sm:$0xff]  ;;  %v41_v31 = vld [vmem:[%s13971_s0 + $0xa0] sm:$0xff]  ;;  %v42_v33 = vld [vmem:[%s13971_s0 + $0xa8] sm:$0xff] }
   0xf   :  { %1114 = vst.msk [vmem:[#allocation2 + $0x40] sm:$0xff] %vm564_vm2, %v13977_v19  ;;  %v43_v35 = vld [vmem:[%s13971_s0 + $0xb0] sm:$0xff]  ;;  %v44_v37 = vld [vmem:[%s13971_s0 + $0xb8] sm:$0xff]  ;;  %v45_v39 = vld [vmem:[%s13971_s0 + $0xc0] sm:$0xff] }
  0x10   :  { %1115 = vst.msk [vmem:[#allocation2 + $0x48] sm:$0xff] %vm564_vm2, %v13977_v19  ;;  %v46_v41 = vld [vmem:[%s13971_s0 + $0xc8] sm:$0xff]  ;;  %v47_v43 = vld [vmem:[%s13971_s0 + $0xd0] sm:$0xff]  ;;  %v48_v45 = vld [vmem:[%s13971_s0 + $0xd8] sm:$0xff] }
  0x11   :  { %1116 = vst.msk [vmem:[#allocation2 + $0x50] sm:$0xff] %vm564_vm2, %v13977_v19  ;;  %v49_v47 = vld [vmem:[%s13971_s0 + $0xe0] sm:$0xff]  ;;  %v50_v49 = vld [vmem:[%s13971_s0 + $0xe8] sm:$0xff]  ;;  %v51_v51 = vld [vmem:[%s13971_s0 + $0xf0] sm:$0xff] }
  0x12   :  { %1118 = vst.msk [vmem:[#allocation2 + $0x60] sm:$0xff] %vm564_vm2, %v13977_v19  ;;  %v52_v53 = vld [vmem:[%s13971_s0 + $0xf8] sm:$0xff]  ;;  %v53_v55 = vld [vmem:[%s13971_s0 + $0x100] sm:$0xff]  ;;  %v54_v57 = vld [vmem:[%s13971_s0 + $0x108] sm:$0xff] }
  0x13   :  { %7698 = vmatmul.msk.f32.gmra.mxu0 %vm94_vm1, %v22_v6  ;;  %1119 = vst.msk [vmem:[#allocation2 + $0x68] sm:$0xff] %vm564_vm2, %v13977_v19  ;;  %v55_v59 = vld [vmem:[%s13971_s0 + $0x110] sm:$0xff]  ;;  %v56_v61 = vld [vmem:[%s13971_s0 + $0x118] sm:$0xff]  ;;  %v57_v63 = vld [vmem:[%s13971_s0 + $0x120] sm:$0xff] }
  0x14   :  { %1120 = vst.msk [vmem:[#allocation2 + $0x70] sm:$0xff] %vm564_vm2, %v13977_v19  ;;  %v58_v1 = vld [vmem:[%s13971_s0 + $0x128] sm:$0xff]  ;;  %v59_v3 = vld [vmem:[%s13971_s0 + $0x130] sm:$0xff]  ;;  %v60_v5 = vld [vmem:[%s13971_s0 + $0x138] sm:$0xff] }
  0x15   :  { %1122 = vst.msk [vmem:[#allocation2 + $0x80] sm:$0xff] %vm564_vm2, %v13977_v19 }
  0x16   :  { %1123 = vst.msk [vmem:[#allocation2 + $0x88] sm:$0xff] %vm564_vm2, %v13977_v19 }
  0x17   :  { %1124 = vst.msk [vmem:[#allocation2 + $0x90] sm:$0xff] %vm564_vm2, %v13977_v19 }
  0x18   :  { %1126 = vst.msk [vmem:[#allocation2 + $0xa0] sm:$0xff] %vm564_vm2, %v13977_v19 }
  0x19   :  { %1127 = vst.msk [vmem:[#allocation2 + $0xa8] sm:$0xff] %vm564_vm2, %v13977_v19 }
  0x1a   :  { %1128 = vst.msk [vmem:[#allocation2 + $0xb0] sm:$0xff] %vm564_vm2, %v13977_v19 }
  0x1b   :  { %7699 = vmatmul.msk.f32.gmra.mxu0 %vm94_vm1, %v23_v7  ;;  %1130 = vst.msk [vmem:[#allocation2 + $0xc0] sm:$0xff] %vm564_vm2, %v13977_v19  ;;  %v61_v7 = vld [vmem:[%s13971_s0 + $0x140] sm:$0xff] }
  0x1c   :  { %1131 = vst.msk [vmem:[#allocation2 + $0xc8] sm:$0xff] %vm564_vm2, %v13977_v19 }
  0x1d   :  { %1132 = vst.msk [vmem:[#allocation2 + $0xd0] sm:$0xff] %vm564_vm2, %v13977_v19 }
  0x1e   :  { %1134 = vst.msk [vmem:[#allocation2 + $0xe0] sm:$0xff] %vm564_vm2, %v13977_v19 }
  0x1f   :  { %1135 = vst.msk [vmem:[#allocation2 + $0xe8] sm:$0xff] %vm564_vm2, %v13977_v19 }
  0x20   :  { %1136 = vst.msk [vmem:[#allocation2 + $0xf0] sm:$0xff] %vm564_vm2, %v13977_v19 }
  0x21   :  { %1138 = vst.msk [vmem:[#allocation2 + $0x100] sm:$0xff] %vm564_vm2, %v13977_v19 }
  0x22   :  { %1139 = vst.msk [vmem:[#allocation2 + $0x108] sm:$0xff] %vm564_vm2, %v13977_v19 }
  0x23   :  { %7700 = vmatmul.msk.f32.gmra.mxu0 %vm94_vm1, %v24_v8  ;;  %1140 = vst.msk [vmem:[#allocation2 + $0x110] sm:$0xff] %vm564_vm2, %v13977_v19 }
  0x24   :  { %1142 = vst.msk [vmem:[#allocation2 + $0x120] sm:$0xff] %vm564_vm2, %v13977_v19 }
  0x25   :  { %1143 = vst.msk [vmem:[#allocation2 + $0x128] sm:$0xff] %vm564_vm2, %v13977_v19 }
  0x26   :  { %1144 = vst.msk [vmem:[#allocation2 + $0x130] sm:$0xff] %vm564_vm2, %v13977_v19 }
  0x27   :  { %1146 = vst.msk [vmem:[#allocation2 + $0x140] sm:$0xff] %vm564_vm2, %v13977_v19 }
  0x28   :  { %1147 = vst.msk [vmem:[#allocation2 + $0x148] sm:$0xff] %vm564_vm2, %v13977_v19 }
  0x29   :  { %1148 = vst.msk [vmem:[#allocation2 + $0x150] sm:$0xff] %vm564_vm2, %v13977_v19 }
  0x2a   :  { %1150 = vst.msk [vmem:[#allocation2 + $0x160] sm:$0xff] %vm564_vm2, %v13977_v19 }
  0x2b   :  { %7701 = vmatmul.msk.f32.gmra.mxu0 %vm94_vm1, %v25_v9  ;;  %1151 = vst.msk [vmem:[#allocation2 + $0x168] sm:$0xff] %vm564_vm2, %v13977_v19  ;;  %v62_v9 = vld [vmem:[%s13971_s0 + $0x148] sm:$0xff] }
  0x2c   :  { %1152 = vst.msk [vmem:[#allocation2 + $0x170] sm:$0xff] %vm564_vm2, %v13977_v19 }
  0x2d   :  { %1154 = vst.msk [vmem:[#allocation2 + $0x180] sm:$0xff] %vm564_vm2, %v13977_v19 }
  0x2e   :  { %1155 = vst.msk [vmem:[#allocation2 + $0x188] sm:$0xff] %vm564_vm2, %v13977_v19 }
  0x2f   :  { %1156 = vst.msk [vmem:[#allocation2 + $0x190] sm:$0xff] %vm564_vm2, %v13977_v19 }
  0x30   :  { %1158 = vst.msk [vmem:[#allocation2 + $0x1a0] sm:$0xff] %vm564_vm2, %v13977_v19 }
  0x31   :  { %1159 = vst.msk [vmem:[#allocation2 + $0x1a8] sm:$0xff] %vm564_vm2, %v13977_v19 }
  0x32   :  { %1160 = vst.msk [vmem:[#allocation2 + $0x1b0] sm:$0xff] %vm564_vm2, %v13977_v19 }
  0x33   :  { %7702 = vmatmul.msk.f32.gmra.mxu0 %vm94_vm1, %v26_v10  ;;  %1162 = vst.msk [vmem:[#allocation2 + $0x1c0] sm:$0xff] %vm564_vm2, %v13977_v19 }
  0x34   :  { %1163 = vst.msk [vmem:[#allocation2 + $0x1c8] sm:$0xff] %vm564_vm2, %v13977_v19 }
  0x35   :  { %1164 = vst.msk [vmem:[#allocation2 + $0x1d0] sm:$0xff] %vm564_vm2, %v13977_v19 }
  0x36   :  { %1166 = vst.msk [vmem:[#allocation2 + $0x1e0] sm:$0xff] %vm564_vm2, %v13977_v19 }
  0x37   :  { %1167 = vst.msk [vmem:[#allocation2 + $0x1e8] sm:$0xff] %vm564_vm2, %v13977_v19 }
  0x38   :  { %1168 = vst.msk [vmem:[#allocation2 + $0x1f0] sm:$0xff] %vm564_vm2, %v13977_v19 }
  0x39   :  { %1170 = vst.msk [vmem:[#allocation2 + $0x200] sm:$0xff] %vm564_vm2, %v13977_v19 }
  0x3a   :  { %1171 = vst.msk [vmem:[#allocation2 + $0x208] sm:$0xff] %vm564_vm2, %v13977_v19 }
  0x3b   :  { %7703 = vmatmul.msk.f32.gmra.mxu0 %vm94_vm1, %v27_v11  ;;  %1172 = vst.msk [vmem:[#allocation2 + $0x210] sm:$0xff] %vm564_vm2, %v13977_v19  ;;  %v63_v11 = vld [vmem:[%s13971_s0 + $0x150] sm:$0xff] }
  0x3c   :  { %1174 = vst.msk [vmem:[#allocation2 + $0x220] sm:$0xff] %vm564_vm2, %v13977_v19 }
  0x3d   :  { %1175 = vst.msk [vmem:[#allocation2 + $0x228] sm:$0xff] %vm564_vm2, %v13977_v19 }
  0x3e   :  { %1176 = vst.msk [vmem:[#allocation2 + $0x230] sm:$0xff] %vm564_vm2, %v13977_v19 }
  0x3f   :  { %1178 = vst.msk [vmem:[#allocation2 + $0x240] sm:$0xff] %vm564_vm2, %v13977_v19 }
  0x40   :  { %1179 = vst.msk [vmem:[#allocation2 + $0x248] sm:$0xff] %vm564_vm2, %v13977_v19 }
  0x41   :  { %1180 = vst.msk [vmem:[#allocation2 + $0x250] sm:$0xff] %vm564_vm2, %v13977_v19 }
  0x42   :  { %1182 = vst.msk [vmem:[#allocation2 + $0x260] sm:$0xff] %vm564_vm2, %v13977_v19 }
  0x43   :  { %7704 = vmatmul.msk.f32.gmra.mxu0 %vm94_vm1, %v28_v12  ;;  %1183 = vst.msk [vmem:[#allocation2 + $0x268] sm:$0xff] %vm564_vm2, %v13977_v19 }
  0x44   :  { %1184 = vst.msk [vmem:[#allocation2 + $0x270] sm:$0xff] %vm564_vm2, %v13977_v19 }
  0x45   :  { %1186 = vst.msk [vmem:[#allocation2 + $0x280] sm:$0xff] %vm564_vm2, %v13977_v19 }
  0x46   :  { %1187 = vst.msk [vmem:[#allocation2 + $0x288] sm:$0xff] %vm564_vm2, %v13977_v19 }
  0x47   :  { %1188 = vst.msk [vmem:[#allocation2 + $0x290] sm:$0xff] %vm564_vm2, %v13977_v19 }
  0x48   :  { %1190 = vst.msk [vmem:[#allocation2 + $0x2a0] sm:$0xff] %vm564_vm2, %v13977_v19 }
  0x49   :  { %1191 = vst.msk [vmem:[#allocation2 + $0x2a8] sm:$0xff] %vm564_vm2, %v13977_v19 }
  0x4a   :  { %1192 = vst.msk [vmem:[#allocation2 + $0x2b0] sm:$0xff] %vm564_vm2, %v13977_v19 }
  0x4b   :  { %7705 = vmatmul.msk.f32.gmra.mxu0 %vm94_vm1, %v29_v13  ;;  %1194 = vst.msk [vmem:[#allocation2 + $0x2c0] sm:$0xff] %vm564_vm2, %v13977_v19  ;;  %v64_v13 = vld [vmem:[%s13971_s0 + $0x158] sm:$0xff] }
  0x4c   :  { %1195 = vst.msk [vmem:[#allocation2 + $0x2c8] sm:$0xff] %vm564_vm2, %v13977_v19 }
  0x4d   :  { %1196 = vst.msk [vmem:[#allocation2 + $0x2d0] sm:$0xff] %vm564_vm2, %v13977_v19 }
  0x4e   :  { %1198 = vst.msk [vmem:[#allocation2 + $0x2e0] sm:$0xff] %vm564_vm2, %v13977_v19 }
  0x4f   :  { %1199 = vst.msk [vmem:[#allocation2 + $0x2e8] sm:$0xff] %vm564_vm2, %v13977_v19 }
  0x50   :  { %1200 = vst.msk [vmem:[#allocation2 + $0x2f0] sm:$0xff] %vm564_vm2, %v13977_v19 }
  0x51   :  { %1202 = vst.msk [vmem:[#allocation2 + $0x300] sm:$0xff] %vm564_vm2, %v13977_v19 }
  0x52   :  { %1203 = vst.msk [vmem:[#allocation2 + $0x308] sm:$0xff] %vm564_vm2, %v13977_v19 }
  0x53   :  { %7706 = vmatmul.msk.f32.gmra.mxu0 %vm94_vm1, %v30_v14  ;;  %1204 = vst.msk [vmem:[#allocation2 + $0x310] sm:$0xff] %vm564_vm2, %v13977_v19 }
  0x54   :  { %1206 = vst.msk [vmem:[#allocation2 + $0x320] sm:$0xff] %vm564_vm2, %v13977_v19 }
  0x55   :  { %1207 = vst.msk [vmem:[#allocation2 + $0x328] sm:$0xff] %vm564_vm2, %v13977_v19 }
  0x56   :  { %1208 = vst.msk [vmem:[#allocation2 + $0x330] sm:$0xff] %vm564_vm2, %v13977_v19 }
  0x57   :  { %1210 = vst.msk [vmem:[#allocation2 + $0x340] sm:$0xff] %vm564_vm2, %v13977_v19 }
  0x58   :  { %1211 = vst.msk [vmem:[#allocation2 + $0x348] sm:$0xff] %vm564_vm2, %v13977_v19 }
  0x59   :  { %1212 = vst.msk [vmem:[#allocation2 + $0x350] sm:$0xff] %vm564_vm2, %v13977_v19 }
  0x5a   :  { %1214 = vst.msk [vmem:[#allocation2 + $0x360] sm:$0xff] %vm564_vm2, %v13977_v19 }
  0x5b   :  { %7707 = vmatmul.msk.f32.gmra.mxu0 %vm94_vm1, %v31_v15  ;;  %1215 = vst.msk [vmem:[#allocation2 + $0x368] sm:$0xff] %vm564_vm2, %v13977_v19  ;;  %v65_v15 = vld [vmem:[%s13971_s0 + $0x160] sm:$0xff] }
  0x5c   :  { %1216 = vst.msk [vmem:[#allocation2 + $0x370] sm:$0xff] %vm564_vm2, %v13977_v19 }
  0x5d   :  { %1218 = vst.msk [vmem:[#allocation2 + $0x380] sm:$0xff] %vm564_vm2, %v13977_v19 }
  0x5e   :  { %1219 = vst.msk [vmem:[#allocation2 + $0x388] sm:$0xff] %vm564_vm2, %v13977_v19 }
  0x5f   :  { %1220 = vst.msk [vmem:[#allocation2 + $0x390] sm:$0xff] %vm564_vm2, %v13977_v19 }
  0x60   :  { %1222 = vst.msk [vmem:[#allocation2 + $0x3a0] sm:$0xff] %vm564_vm2, %v13977_v19 }
  0x61   :  { %1223 = vst.msk [vmem:[#allocation2 + $0x3a8] sm:$0xff] %vm564_vm2, %v13977_v19 }
  0x62   :  { %1224 = vst.msk [vmem:[#allocation2 + $0x3b0] sm:$0xff] %vm564_vm2, %v13977_v19 }
  0x63   :  { %7708 = vmatmul.msk.f32.gmra.mxu0 %vm94_vm1, %v32_v16  ;;  %1226 = vst.msk [vmem:[#allocation2 + $0x3c0] sm:$0xff] %vm564_vm2, %v13977_v19 }
  0x64   :  { %1227 = vst.msk [vmem:[#allocation2 + $0x3c8] sm:$0xff] %vm564_vm2, %v13977_v19 }
  0x65   :  { %1228 = vst.msk [vmem:[#allocation2 + $0x3d0] sm:$0xff] %vm564_vm2, %v13977_v19 }
  0x66   :  { %1230 = vst.msk [vmem:[#allocation2 + $0x3e0] sm:$0xff] %vm564_vm2, %v13977_v19 }
  0x67   :  { %1231 = vst.msk [vmem:[#allocation2 + $0x3e8] sm:$0xff] %vm564_vm2, %v13977_v19 }
  0x68   :  { %1232 = vst.msk [vmem:[#allocation2 + $0x3f0] sm:$0xff] %vm564_vm2, %v13977_v19 }
  0x69   :  { %1234 = vst.msk [vmem:[#allocation2 + $0x400] sm:$0xff] %vm564_vm2, %v13977_v19 }
  0x6a   :  { %1235 = vst.msk [vmem:[#allocation2 + $0x408] sm:$0xff] %vm564_vm2, %v13977_v19 }
  0x6b   :  { %7709 = vmatmul.msk.f32.gmra.mxu0 %vm94_vm1, %v33_v17  ;;  %1236 = vst.msk [vmem:[#allocation2 + $0x410] sm:$0xff] %vm564_vm2, %v13977_v19  ;;  %v66_v17 = vld [vmem:[%s13971_s0 + $0x168] sm:$0xff] }
  0x6c   :  { %1238 = vst.msk [vmem:[#allocation2 + $0x420] sm:$0xff] %vm564_vm2, %v13977_v19 }
  0x6d   :  { %1239 = vst.msk [vmem:[#allocation2 + $0x428] sm:$0xff] %vm564_vm2, %v13977_v19 }
  0x6e   :  { %1240 = vst.msk [vmem:[#allocation2 + $0x430] sm:$0xff] %vm564_vm2, %v13977_v19 }
  0x6f   :  { %1242 = vst.msk [vmem:[#allocation2 + $0x440] sm:$0xff] %vm564_vm2, %v13977_v19 }
  0x70   :  { %1243 = vst.msk [vmem:[#allocation2 + $0x448] sm:$0xff] %vm564_vm2, %v13977_v19 }
  0x71   :  { %1244 = vst.msk [vmem:[#allocation2 + $0x450] sm:$0xff] %vm564_vm2, %v13977_v19 }
  0x72   :  { %1246 = vst.msk [vmem:[#allocation2 + $0x460] sm:$0xff] %vm564_vm2, %v13977_v19 }
  0x73   :  { %7710 = vmatmul.msk.f32.gmra.mxu0 %vm94_vm1, %v34_v18  ;;  %1247 = vst.msk [vmem:[#allocation2 + $0x468] sm:$0xff] %vm564_vm2, %v13977_v19 }
  0x74   :  { %1248 = vst.msk [vmem:[#allocation2 + $0x470] sm:$0xff] %vm564_vm2, %v13977_v19 }
  0x7b   :  { %7711 = vmatmul.msk.f32.gmra.mxu0 %vm94_vm1, %v35_v20  ;;  %v67_v20 = vld [vmem:[%s13971_s0 + $0x170] sm:$0xff] }
  0x83   :  { %7712 = vmatmul.msk.f32.gmra.mxu0 %vm94_vm1, %v36_v21 }
  0x88   :  { %v8649_v22 = vpop.f32.mrf.mxu0 }
  0x8b   :  { %7713 = vmatmul.msk.f32.gmra.mxu0 %vm94_vm1, %v37_v23  ;;  %v68_v23 = vld [vmem:[%s13971_s0 + $0x178] sm:$0xff] }
  0x90   :  { %v8673_v24 = vpop.f32.mrf.mxu0 }
  0x93   :  { %7714 = vmatmul.msk.f32.gmra.mxu0 %vm94_vm1, %v38_v25 }
  0x98   :  { %v8695_v26 = vpop.f32.mrf.mxu0 }
  0x9b   :  { %7715 = vmatmul.msk.f32.gmra.mxu0 %vm94_vm1, %v39_v27  ;;  %v69_v27 = vld [vmem:[%s13971_s0 + $0x180] sm:$0xff] }
  0xa0   :  { %v8717_v28 = vpop.f32.mrf.mxu0 }
  0xa3   :  { %7716 = vmatmul.msk.f32.gmra.mxu0 %vm94_vm1, %v40_v29 }
  0xa8   :  { %v8739_v30 = vpop.f32.mrf.mxu0 }
  0xab   :  { %7717 = vmatmul.msk.f32.gmra.mxu0 %vm94_vm1, %v41_v31  ;;  %v70_v31 = vld [vmem:[%s13971_s0 + $0x188] sm:$0xff] }
  0xb0   :  { %v8761_v32 = vpop.f32.mrf.mxu0 }
  0xb3   :  { %7718 = vmatmul.msk.f32.gmra.mxu0 %vm94_vm1, %v42_v33 }
  0xb8   :  { %v8783_v34 = vpop.f32.mrf.mxu0 }
  0xbb   :  { %7719 = vmatmul.msk.f32.gmra.mxu0 %vm94_vm1, %v43_v35  ;;  %v71_v35 = vld [vmem:[%s13971_s0 + $0x190] sm:$0xff] }
  0xc0   :  { %v8805_v36 = vpop.f32.mrf.mxu0 }
  0xc3   :  { %7720 = vmatmul.msk.f32.gmra.mxu0 %vm94_vm1, %v44_v37 }
  0xc8   :  { %v8827_v38 = vpop.f32.mrf.mxu0 }
  0xcb   :  { %7721 = vmatmul.msk.f32.gmra.mxu0 %vm94_vm1, %v45_v39  ;;  %v72_v39 = vld [vmem:[%s13971_s0 + $0x198] sm:$0xff] }
  0xd0   :  { %v8849_v40 = vpop.f32.mrf.mxu0 }
  0xd3   :  { %7722 = vmatmul.msk.f32.gmra.mxu0 %vm94_vm1, %v46_v41 }
  0xd8   :  { %v8871_v42 = vpop.f32.mrf.mxu0 }
  0xdb   :  { %7723 = vmatmul.msk.f32.gmra.mxu0 %vm94_vm1, %v47_v43  ;;  %v73_v43 = vld [vmem:[%s13971_s0 + $0x1a0] sm:$0xff] }
  0xe0   :  { %v8883_v44 = vpop.f32.mrf.mxu0 }
  0xe3   :  { %7724 = vmatmul.msk.f32.gmra.mxu0 %vm94_vm1, %v48_v45 }
  0xe8   :  { %v8889_v46 = vpop.f32.mrf.mxu0 }
  0xeb   :  { %7725 = vmatmul.msk.f32.gmra.mxu0 %vm94_vm1, %v49_v47  ;;  %v74_v47 = vld [vmem:[%s13971_s0 + $0x1a8] sm:$0xff] }
  0xf0   :  { %v8895_v48 = vpop.f32.mrf.mxu0 }
  0xf3   :  { %7726 = vmatmul.msk.f32.gmra.mxu0 %vm94_vm1, %v50_v49 }
  0xf8   :  { %v8901_v50 = vpop.f32.mrf.mxu0 }
  0xfb   :  { %7727 = vmatmul.msk.f32.gmra.mxu0 %vm94_vm1, %v51_v51  ;;  %v75_v51 = vld [vmem:[%s13971_s0 + $0x1b0] sm:$0xff] }
 0x100   :  { %v8907_v52 = vpop.f32.mrf.mxu0 }
 0x103   :  { %7728 = vmatmul.msk.f32.gmra.mxu0 %vm94_vm1, %v52_v53 }
 0x108   :  { %v8913_v54 = vpop.f32.mrf.mxu0 }
 0x10b   :  { %7729 = vmatmul.msk.f32.gmra.mxu0 %vm94_vm1, %v53_v55  ;;  %v76_v55 = vld [vmem:[%s13971_s0 + $0x1b8] sm:$0xff] }
 0x110   :  { %v8919_v56 = vpop.f32.mrf.mxu0 }
 0x113   :  { %7730 = vmatmul.msk.f32.gmra.mxu0 %vm94_vm1, %v54_v57 }
 0x118   :  { %v8925_v58 = vpop.f32.mrf.mxu0 }
 0x11b   :  { %7731 = vmatmul.msk.f32.gmra.mxu0 %vm94_vm1, %v55_v59  ;;  %v77_v59 = vld [vmem:[%s13971_s0 + $0x1c0] sm:$0xff] }
 0x120   :  { %v8931_v60 = vpop.f32.mrf.mxu0 }
 0x123   :  { %7732 = vmatmul.msk.f32.gmra.mxu0 %vm94_vm1, %v56_v61 }
 0x128   :  { %v8937_v62 = vpop.f32.mrf.mxu0 }
 0x12b   :  { %7733 = vmatmul.msk.f32.gmra.mxu0 %vm94_vm1, %v57_v63  ;;  %v78_v63 = vld [vmem:[%s13971_s0 + $0x1c8] sm:$0xff] }
 0x130   :  { %v8943_v0 = vpop.f32.mrf.mxu0 }
 0x133   :  { %7734 = vmatmul.msk.f32.gmra.mxu0 %vm94_vm1, %v58_v1 }
 0x138   :  { %v8949_v2 = vpop.f32.mrf.mxu0 }
 0x13b   :  { %7735 = vmatmul.msk.f32.gmra.mxu0 %vm94_vm1, %v59_v3  ;;  %v79_v3 = vld [vmem:[%s13971_s0 + $0x1d0] sm:$0xff] }
 0x140   :  { %v8955_v4 = vpop.f32.mrf.mxu0 }
 0x143   :  { %7736 = vmatmul.msk.f32.gmra.mxu0 %vm94_vm1, %v60_v5 }
 0x148   :  { %v8961_v6 = vpop.f32.mrf.mxu0 }
 0x14b   :  { %7737 = vmatmul.msk.f32.gmra.mxu0 %vm94_vm1, %v61_v7  ;;  %v80_v7 = vld [vmem:[%s13971_s0 + $0x1d8] sm:$0xff] }
 0x150   :  { %v8967_v8 = vpop.f32.mrf.mxu0 }
 0x153   :  { %7738 = vmatmul.msk.f32.gmra.mxu0 %vm94_vm1, %v62_v9 }
 0x158   :  { %v8973_v10 = vpop.f32.mrf.mxu0 }
 0x15b   :  { %7739 = vmatmul.msk.f32.gmra.mxu0 %vm94_vm1, %v63_v11  ;;  %v81_v11 = vld [vmem:[%s13971_s0 + $0x1e0] sm:$0xff] }
 0x160   :  { %v8979_v12 = vpop.f32.mrf.mxu0 }
 0x163   :  { %7740 = vmatmul.msk.f32.gmra.mxu0 %vm94_vm1, %v64_v13 }
 0x168   :  { %v8985_v14 = vpop.f32.mrf.mxu0 }
 0x16b   :  { %7741 = vmatmul.msk.f32.gmra.mxu0 %vm94_vm1, %v65_v15  ;;  %v82_v15 = vld [vmem:[%s13971_s0 + $0x1e8] sm:$0xff] }
 0x170   :  { %v8991_v16 = vpop.f32.mrf.mxu0 }
 0x173   :  { %7742 = vmatmul.msk.f32.gmra.mxu0 %vm94_vm1, %v66_v17 }
 0x178   :  { %v8997_v18 = vpop.f32.mrf.mxu0 }
 0x17b   :  { %7743 = vmatmul.msk.f32.gmra.mxu0 %vm94_vm1, %v67_v20  ;;  %v83_v20 = vld [vmem:[%s13971_s0 + $0x1f0] sm:$0xff] }
 0x180   :  { %v9003_v21 = vpop.f32.mrf.mxu0 }
 0x183   :  { %7744 = vmatmul.msk.f32.gmra.mxu0 %vm94_vm1, %v68_v23  ;;  %v9101_v23 = vld [vmem:[%s13975_s4] ss:$0 sm:$0xff] }
 0x188   :  { %v9009_v25 = vpop.f32.mrf.mxu0 }
 0x18b   :  { %7745 = vmatmul.msk.f32.gmra.mxu0 %vm94_vm1, %v69_v27  ;;  %v312_v27 = vadd.f32 %v9101_v23, %v8673_v24 }
 0x190   :  { %v9015_v29 = vpop.f32.mrf.mxu0 }
 0x193   :  { %7746 = vmatmul.msk.f32.gmra.mxu0 %vm94_vm1, %v70_v31  ;;  %v309_v31 = vadd.f32 %v9101_v23, %v8649_v22  ;;  %v321_v22 = vadd.f32 %v9101_v23, %v8739_v30 }
 0x198   :  { %v9021_v33 = vpop.f32.mrf.mxu0 }
 0x19b   :  { %7747 = vmatmul.msk.f32.gmra.mxu0 %vm94_vm1, %v71_v35  ;;  %v315_v35 = vadd.f32 %v9101_v23, %v8695_v26 }
 0x19d   :  { %v9121_v24 = vmax.f32 %v315_v35, 0.0  ;;  %v330_v35 = vadd.f32 %v9101_v23, %v8805_v36  ;;  %v336_v36 = vadd.f32 %v9101_v23, %v8849_v40 }
 0x19f   :  { %14063 = vst [vmem:[#allocation8_spill] sm:$0xff] %v9121_v24  ;;  %v700_v30 = vmul.f32 %v9121_v24, %v9121_v24 }
 0x1a0   :  { %v9027_v37 = vpop.f32.mrf.mxu0 }
 0x1a3   :  { %7748 = vmatmul.msk.f32.gmra.mxu0 %vm94_vm1, %v72_v39  ;;  %v9110_v39 = vmax.f32 %v312_v27, 0.0  ;;  %v568_v27 = vsel %vm564_vm2, %v9121_v24, 0.0 }
 0x1a5   :  { %14061 = vst [vmem:[#allocation6_spill] sm:$0xff] %v9110_v39  ;;  %v699_v26 = vmul.f32 %v9110_v39, %v9110_v39 }
 0x1a8   :  { %v9033_v41 = vpop.f32.mrf.mxu0 }
 0x1ab   :  { %7749 = vmatmul.msk.f32.gmra.mxu0 %vm94_vm1, %v73_v43 }
 0x1b0   :  { %v9039_v45 = vpop.f32.mrf.mxu0 }
 0x1b3   :  { %7750 = vmatmul.msk.f32.gmra.mxu0 %vm94_vm1, %v74_v47  ;;  %v84_v47 = vld [vmem:[%s13971_s0 + $0x1f8] sm:$0xff] }
 0x1b8   :  { %v9045_v49 = vpop.f32.mrf.mxu0 }
 0x1bb   :  { %7751 = vmatmul.msk.f32.gmra.mxu0 %vm94_vm1, %v75_v51  ;;  %v318_v51 = vadd.f32 %v9101_v23, %v8717_v28 }
 0x1c0   :  { %v9051_v53 = vpop.f32.mrf.mxu0 }
 0x1c3   :  { %7752 = vmatmul.msk.f32.gmra.mxu0 %vm94_vm1, %v76_v55  ;;  %v9119_v55 = vmax.f32 %v309_v31, 0.0 }
 0x1c5   :  { %14062 = vst [vmem:[#allocation7_spill] sm:$0xff] %v9119_v55  ;;  %v698_v28 = vmul.f32 %v9119_v55, %v9119_v55 }
 0x1c8   :  { %v9057_v57 = vpop.f32.mrf.mxu0 }
 0x1cb   :  { %7753 = vmatmul.msk.f32.gmra.mxu0 %vm94_vm1, %v77_v59  ;;  %v9128_v59 = vmax.f32 %v318_v51, 0.0 }
 0x1cd   :  { %14064 = vst [vmem:[#allocation9_spill] sm:$0xff] %v9128_v59  ;;  %v570_v19 = vsel %vm564_vm2, %v9128_v59, 0.0 }
 0x1d0   :  { %v9063_v61 = vpop.f32.mrf.mxu0 }
 0x1d3   :  { %7754 = vmatmul.msk.f32.gmra.mxu0 %vm94_vm1, %v78_v63  ;;  %v324_v63 = vadd.f32 %v9101_v23, %v8761_v32 }
 0x1d5   :  { %v9151_v31 = vmax.f32 %v324_v63, 0.0  ;;  %v333_v63 = vadd.f32 %v9101_v23, %v8827_v38 }
 0x1d7   :  { %v574_v40 = vsel %vm564_vm2, %v9151_v31, 0.0 }
 0x1d8   :  { %v9069_v1 = vpop.f32.mrf.mxu0 }
 0x1db   :  { %7755 = vmatmul.msk.f32.gmra.mxu0 %vm94_vm1, %v79_v3  ;;  %v327_v3 = vadd.f32 %v9101_v23, %v8783_v34  ;;  %v701_v34 = vmul.f32 %v9128_v59, %v9128_v59 }
 0x1e0   :  { %v9075_v5 = vpop.f32.mrf.mxu0 }
 0x1e3   :  { %7756 = vmatmul.msk.f32.gmra.mxu0 %vm94_vm1, %v80_v7  ;;  %v566_v7 = vsel %vm564_vm2, %v9110_v39, 0.0 }
 0x1e8   :  { %v9081_v9 = vpop.f32.mrf.mxu0 }
 0x1eb   :  { %7757 = vmatmul.msk.f32.gmra.mxu0 %vm94_vm1, %v81_v11  ;;  %v9140_v11 = vmax.f32 %v321_v22, 0.0  ;;  %v9156_v22 = vmax.f32 %v327_v3, 0.0 }
 0x1ed   :  { %14065 = vst [vmem:[#allocation10_spill] sm:$0xff] %v9140_v11  ;;  %v702_v24 = vmul.f32 %v9140_v11, %v9140_v11  ;;  %v572_v3 = vsel %vm564_vm2, %v9140_v11, 0.0  ;;  %v704_v38 = vmul.f32 %v9156_v22, %v9156_v22  ;;  %v9183_v11 = vmax.f32 %v336_v36, 0.0 }
 0x1f0   :  { %v9087_v13 = vpop.f32.mrf.mxu0 }
 0x1f3   :  { %7758 = vmatmul.msk.f32.gmra.mxu0 %vm94_vm1, %v82_v15  ;;  %v565_v15 = vsel %vm564_vm2, %v9119_v55, 0.0 }
 0x1f4   :  { %v567_v51 = vadd.f32 %v566_v7, %v565_v15  ;;  %v703_v7 = vmul.f32 %v9151_v31, %v9151_v31 }
 0x1f6   :  { %v569_v55 = vadd.f32 %v568_v27, %v567_v51  ;;  %v9179_v27 = vmax.f32 %v333_v63, 0.0 }
 0x1f8   :  { %v9093_v17 = vpop.f32.mrf.mxu0  ;;  %v571_v59 = vadd.f32 %v570_v19, %v569_v55  ;;  %14066 = vst [vmem:[#allocation11_spill] sm:$0xff] %v9179_v27  ;;  %v771_v19 = vsel %vm564_vm2, %v703_v7, 0.0  ;;  %v706_v36 = vmul.f32 %v9179_v27, %v9179_v27 }
 0x1fa   :  { %v573_v51 = vadd.f32 %v572_v3, %v571_v59  ;;  %v345_v3 = vadd.f32 %v9101_v23, %v8889_v46  ;;  %v351_v46 = vadd.f32 %v9101_v23, %v8901_v50 }
 0x1fb   :  { %7759 = vmatmul.msk.f32.gmra.mxu0 %vm94_vm1, %v83_v20  ;;  %v763_v20 = vsel %vm564_vm2, %v699_v26, 0.0  ;;  %v765_v26 = vsel %vm564_vm2, %v700_v30, 0.0  ;;  %v9172_v30 = vmax.f32 %v330_v35, 0.0 }
 0x1fc   :  { %v575_v63 = vadd.f32 %v574_v40, %v573_v51 }
 0x1fd   :  { %v705_v55 = vmul.f32 %v9172_v30, %v9172_v30  ;;  %v578_v59 = vsel %vm564_vm2, %v9172_v30, 0.0 }
 0x200   :  { %v9112_v43 = vpop.f32.mrf.mxu0 }
 0x203   :  { %7760 = vmatmul.msk.f32.gmra.mxu0 %vm94_vm1, %v84_v47  ;;  %v762_v47 = vsel %vm564_vm2, %v698_v28, 0.0  ;;  %v767_v28 = vsel %vm564_vm2, %v701_v34, 0.0  ;;  %v339_v34 = vadd.f32 %v9101_v23, %v8871_v42  ;;  %v773_v42 = vsel %vm564_vm2, %v704_v38, 0.0 }
 0x204   :  { %v764_v39 = vadd.f32 %v763_v20, %v762_v47  ;;  %v769_v20 = vsel %vm564_vm2, %v702_v24, 0.0  ;;  %v342_v24 = vadd.f32 %v9101_v23, %v8883_v44  ;;  %v707_v44 = vmul.f32 %v9183_v11, %v9183_v11 }
 0x205   :  { %v580_v38 = vsel %vm564_vm2, %v9179_v27, 0.0 }
 0x206   :  { %v766_v15 = vadd.f32 %v765_v26, %v764_v39  ;;  %v576_v39 = vsel %vm564_vm2, %v9156_v22, 0.0  ;;  %v9208_v40 = vmax.f32 %v342_v24, 0.0  ;;  %v779_v27 = vsel %vm564_vm2, %v707_v44, 0.0 }
 0x208   :  { %v9145_v32 = vpop.f32.mrf.mxu0  ;;  %v768_v47 = vadd.f32 %v767_v28, %v766_v15  ;;  %v9199_v28 = vmax.f32 %v339_v34, 0.0  ;;  %v577_v15 = vadd.f32 %v576_v39, %v575_v63  ;;  %v582_v39 = vsel %vm564_vm2, %v9183_v11, 0.0 }
 0x209   :  { %v709_v50 = vmul.f32 %v9208_v40, %v9208_v40  ;;  %v586_v44 = vsel %vm564_vm2, %v9208_v40, 0.0 }
 0x20a   :  { %v770_v26 = vadd.f32 %v769_v20, %v768_v47  ;;  %v775_v20 = vsel %vm564_vm2, %v705_v55, 0.0  ;;  %v348_v47 = vadd.f32 %v9101_v23, %v8895_v48  ;;  %v579_v51 = vadd.f32 %v578_v59, %v577_v15 }
 0x20b   :  { %v708_v55 = vmul.f32 %v9199_v28, %v9199_v28  ;;  %v9232_v15 = vmax.f32 %v351_v46, 0.0 }
 0x20c   :  { %v772_v7 = vadd.f32 %v771_v19, %v770_v26  ;;  %v777_v19 = vsel %vm564_vm2, %v706_v36, 0.0  ;;  %v9219_v26 = vmax.f32 %v345_v3, 0.0  ;;  %v581_v63 = vadd.f32 %v580_v38, %v579_v51 }
 0x20d   :  { %v9228_v59 = vmax.f32 %v348_v47, 0.0  ;;  %v354_v36 = vadd.f32 %v9101_v23, %v8907_v52  ;;  %v360_v52 = vadd.f32 %v9101_v23, %v8919_v56 }
 0x20e   :  { %v774_v34 = vadd.f32 %v773_v42, %v772_v7  ;;  %14067 = vst [vmem:[#allocation12_spill] sm:$0xff] %v9219_v26  ;;  %v584_v42 = vsel %vm564_vm2, %v9199_v28, 0.0  ;;  %v583_v3 = vadd.f32 %v582_v39, %v581_v63  ;;  %v710_v38 = vmul.f32 %v9219_v26, %v9219_v26 }
 0x20f   :  { %v588_v46 = vsel %vm564_vm2, %v9219_v26, 0.0  ;;  %v711_v39 = vmul.f32 %v9228_v59, %v9228_v59  ;;  %v590_v56 = vsel %vm564_vm2, %v9228_v59, 0.0  ;;  %v9259_v26 = vmax.f32 %v360_v52, 0.0 }
 0x210   :  { %v9185_v35 = vpop.f32.mrf.mxu0  ;;  %v776_v24 = vadd.f32 %v775_v20, %v774_v34  ;;  %v781_v20 = vsel %vm564_vm2, %v708_v55, 0.0  ;;  %v357_v34 = vadd.f32 %v9101_v23, %v8913_v54  ;;  %v585_v51 = vadd.f32 %v584_v42, %v583_v3 }
 0x211   :  { %v9248_v55 = vmax.f32 %v354_v36, 0.0  ;;  %v712_v54 = vmul.f32 %v9232_v15, %v9232_v15 }
 0x212   :  { %v778_v7 = vadd.f32 %v777_v19, %v776_v24  ;;  %v783_v19 = vsel %vm564_vm2, %v709_v50, 0.0  ;;  %v587_v63 = vadd.f32 %v586_v44, %v585_v51  ;;  %v9255_v42 = vmax.f32 %v357_v34, 0.0 }
 0x213   :  { %v363_v50 = vadd.f32 %v9101_v23, %v8925_v58  ;;  %v592_v44 = vsel %vm564_vm2, %v9232_v15, 0.0  ;;  %v366_v34 = vadd.f32 %v9101_v23, %v8931_v60  ;;  %v789_v58 = vsel %vm564_vm2, %v712_v54, 0.0 }
 0x214   :  { %v780_v47 = vadd.f32 %v779_v27, %v778_v7  ;;  %v785_v27 = vsel %vm564_vm2, %v710_v38, 0.0  ;;  %14068 = vst [vmem:[#allocation13_spill] sm:$0xff] %v9255_v42  ;;  %v589_v3 = vadd.f32 %v588_v46, %v587_v63  ;;  %v713_v38 = vmul.f32 %v9248_v55, %v9248_v55 }
 0x215   :  { %v594_v52 = vsel %vm564_vm2, %v9248_v55, 0.0  ;;  %v9275_v46 = vmax.f32 %v363_v50, 0.0  ;;  %v715_v60 = vmul.f32 %v9259_v26, %v9259_v26  ;;  %v596_v54 = vsel %vm564_vm2, %v9255_v42, 0.0 }
 0x216   :  { %v782_v24 = vadd.f32 %v781_v20, %v780_v47  ;;  %v787_v20 = vsel %vm564_vm2, %v711_v39, 0.0  ;;  %v591_v51 = vadd.f32 %v590_v56, %v589_v3  ;;  %v369_v39 = vadd.f32 %v9101_v23, %v8937_v62 }
 0x217   :  { %v9284_v56 = vmax.f32 %v366_v34, 0.0  ;;  %v375_v62 = vadd.f32 %v9101_v23, %v8949_v2 }
 0x218   :  { %v9222_v48 = vpop.f32.mrf.mxu0  ;;  %v784_v7 = vadd.f32 %v783_v19, %v782_v24  ;;  %v714_v19 = vmul.f32 %v9255_v42, %v9255_v42  ;;  %v593_v63 = vadd.f32 %v592_v44, %v591_v51  ;;  %v598_v44 = vsel %vm564_vm2, %v9259_v26, 0.0 }
 0x219   :  { %v795_v42 = vsel %vm564_vm2, %v715_v60, 0.0  ;;  %v717_v2 = vmul.f32 %v9284_v56, %v9284_v56  ;;  %v602_v60 = vsel %vm564_vm2, %v9284_v56, 0.0 }
 0x21a   :  { %v786_v47 = vadd.f32 %v785_v27, %v784_v7  ;;  %v791_v27 = vsel %vm564_vm2, %v713_v38, 0.0  ;;  %v372_v7 = vadd.f32 %v9101_v23, %v8943_v0  ;;  %v595_v3 = vadd.f32 %v594_v52, %v593_v63 }
 0x21b   :  { %v716_v38 = vmul.f32 %v9275_v46, %v9275_v46  ;;  %v9308_v63 = vmax.f32 %v375_v62, 0.0 }
 0x21c   :  { %v788_v24 = vadd.f32 %v787_v20, %v786_v47  ;;  %v793_v20 = vsel %vm564_vm2, %v714_v19, 0.0  ;;  %v9295_v47 = vmax.f32 %v369_v39, 0.0  ;;  %v597_v51 = vadd.f32 %v596_v54, %v595_v3 }
 0x21d   :  { %v9304_v52 = vmax.f32 %v372_v7, 0.0  ;;  %v378_v19 = vadd.f32 %v9101_v23, %v8955_v4  ;;  %v384_v4 = vadd.f32 %v9101_v23, %v8967_v8 }
 0x21e   :  { %v790_v50 = vadd.f32 %v789_v58, %v788_v24  ;;  %14069 = vst [vmem:[#allocation14_spill] sm:$0xff] %v9295_v47  ;;  %v600_v58 = vsel %vm564_vm2, %v9275_v46, 0.0  ;;  %v599_v39 = vadd.f32 %v598_v44, %v597_v51  ;;  %v718_v54 = vmul.f32 %v9295_v47, %v9295_v47 }
 0x21f   :  { %v604_v62 = vsel %vm564_vm2, %v9295_v47, 0.0  ;;  %v719_v44 = vmul.f32 %v9304_v52, %v9304_v52  ;;  %v606_v8 = vsel %vm564_vm2, %v9304_v52, 0.0  ;;  %v9335_v47 = vmax.f32 %v384_v4, 0.0 }
 0x220   :  { %v9261_v36 = vpop.f32.mrf.mxu0  ;;  %v792_v34 = vadd.f32 %v791_v27, %v790_v50  ;;  %v797_v27 = vsel %vm564_vm2, %v716_v38, 0.0  ;;  %v381_v50 = vadd.f32 %v9101_v23, %v8961_v6  ;;  %v601_v3 = vadd.f32 %v600_v58, %v599_v39 }
 0x221   :  { %v9324_v38 = vmax.f32 %v378_v19, 0.0  ;;  %v720_v6 = vmul.f32 %v9308_v63, %v9308_v63 }
 0x222   :  { %v794_v24 = vadd.f32 %v793_v20, %v792_v34  ;;  %v799_v20 = vsel %vm564_vm2, %v717_v2, 0.0  ;;  %v603_v51 = vadd.f32 %v602_v60, %v601_v3  ;;  %v9331_v58 = vmax.f32 %v381_v50, 0.0 }
 0x223   :  { %v387_v2 = vadd.f32 %v9101_v23, %v8973_v10  ;;  %v608_v60 = vsel %vm564_vm2, %v9308_v63, 0.0  ;;  %v390_v50 = vadd.f32 %v9101_v23, %v8979_v12  ;;  %v805_v10 = vsel %vm564_vm2, %v720_v6, 0.0 }
 0x224   :  { %v796_v7 = vadd.f32 %v795_v42, %v794_v24  ;;  %v801_v42 = vsel %vm564_vm2, %v718_v54, 0.0  ;;  %14070 = vst [vmem:[#allocation15_spill] sm:$0xff] %v9331_v58  ;;  %v605_v39 = vadd.f32 %v604_v62, %v603_v51  ;;  %v721_v54 = vmul.f32 %v9324_v38, %v9324_v38 }
 0x225   :  { %v610_v4 = vsel %vm564_vm2, %v9324_v38, 0.0  ;;  %v9351_v62 = vmax.f32 %v387_v2, 0.0  ;;  %v723_v12 = vmul.f32 %v9335_v47, %v9335_v47  ;;  %v612_v6 = vsel %vm564_vm2, %v9331_v58, 0.0 }
 0x226   :  { %v798_v34 = vadd.f32 %v797_v27, %v796_v7  ;;  %v803_v27 = vsel %vm564_vm2, %v719_v44, 0.0  ;;  %v607_v3 = vadd.f32 %v606_v8, %v605_v39  ;;  %v393_v44 = vadd.f32 %v9101_v23, %v8985_v14 }
 0x227   :  { %v9360_v8 = vmax.f32 %v390_v50, 0.0  ;;  %v399_v14 = vadd.f32 %v9101_v23, %v8997_v18 }
 0x228   :  { %v9298_v0 = vpop.f32.mrf.mxu0  ;;  %v800_v24 = vadd.f32 %v799_v20, %v798_v34  ;;  %v722_v20 = vmul.f32 %v9331_v58, %v9331_v58  ;;  %v609_v51 = vadd.f32 %v608_v60, %v607_v3  ;;  %v614_v60 = vsel %vm564_vm2, %v9335_v47, 0.0 }
 0x229   :  { %v811_v58 = vsel %vm564_vm2, %v723_v12, 0.0  ;;  %v725_v18 = vmul.f32 %v9360_v8, %v9360_v8  ;;  %v618_v12 = vsel %vm564_vm2, %v9360_v8, 0.0 }
 0x22a   :  { %v802_v7 = vadd.f32 %v801_v42, %v800_v24  ;;  %v807_v42 = vsel %vm564_vm2, %v721_v54, 0.0  ;;  %v396_v24 = vadd.f32 %v9101_v23, %v8991_v16  ;;  %v611_v39 = vadd.f32 %v610_v4, %v609_v51 }
 0x22b   :  { %v724_v54 = vmul.f32 %v9351_v62, %v9351_v62  ;;  %v9384_v51 = vmax.f32 %v399_v14, 0.0 }
 0x22c   :  { %v804_v34 = vadd.f32 %v803_v27, %v802_v7  ;;  %v809_v27 = vsel %vm564_vm2, %v722_v20, 0.0  ;;  %v9371_v7 = vmax.f32 %v393_v44, 0.0  ;;  %v613_v3 = vadd.f32 %v612_v6, %v611_v39 }
 0x22d   :  { %v9380_v4 = vmax.f32 %v396_v24, 0.0  ;;  %v402_v20 = vadd.f32 %v9101_v23, %v9003_v21  ;;  %v408_v21 = vadd.f32 %v9101_v23, %v9015_v29 }
 0x22e   :  { %v806_v2 = vadd.f32 %v805_v10, %v804_v34  ;;  %14071 = vst [vmem:[#allocation16_spill] sm:$0xff] %v9371_v7  ;;  %v616_v10 = vsel %vm564_vm2, %v9351_v62, 0.0  ;;  %v615_v44 = vadd.f32 %v614_v60, %v613_v3  ;;  %v726_v6 = vmul.f32 %v9371_v7, %v9371_v7 }
 0x22f   :  { %v620_v14 = vsel %vm564_vm2, %v9371_v7, 0.0  ;;  %v727_v60 = vmul.f32 %v9380_v4, %v9380_v4  ;;  %v622_v29 = vsel %vm564_vm2, %v9380_v4, 0.0  ;;  %v9411_v7 = vmax.f32 %v408_v21, 0.0 }
 0x230   :  { %v9337_v19 = vpop.f32.mrf.mxu0  ;;  %v808_v50 = vadd.f32 %v807_v42, %v806_v2  ;;  %v813_v42 = vsel %vm564_vm2, %v724_v54, 0.0  ;;  %v405_v2 = vadd.f32 %v9101_v23, %v9009_v25  ;;  %v617_v39 = vadd.f32 %v616_v10, %v615_v44 }
 0x231   :  { %v9400_v54 = vmax.f32 %v402_v20, 0.0  ;;  %v728_v25 = vmul.f32 %v9384_v51, %v9384_v51 }
 0x232   :  { %v810_v34 = vadd.f32 %v809_v27, %v808_v50  ;;  %v815_v27 = vsel %vm564_vm2, %v725_v18, 0.0  ;;  %v619_v3 = vadd.f32 %v618_v12, %v617_v39  ;;  %v9407_v10 = vmax.f32 %v405_v2, 0.0 }
 0x233   :  { %v411_v18 = vadd.f32 %v9101_v23, %v9021_v33  ;;  %v624_v12 = vsel %vm564_vm2, %v9384_v51, 0.0  ;;  %v414_v2 = vadd.f32 %v9101_v23, %v9027_v37  ;;  %v821_v33 = vsel %vm564_vm2, %v728_v25, 0.0 }
 0x234   :  { %v812_v24 = vadd.f32 %v811_v58, %v810_v34  ;;  %v817_v58 = vsel %vm564_vm2, %v726_v6, 0.0  ;;  %14072 = vst [vmem:[#allocation17_spill] sm:$0xff] %v9407_v10  ;;  %v621_v44 = vadd.f32 %v620_v14, %v619_v3  ;;  %v729_v6 = vmul.f32 %v9400_v54, %v9400_v54 }
 0x235   :  { %v626_v21 = vsel %vm564_vm2, %v9400_v54, 0.0  ;;  %v9427_v14 = vmax.f32 %v411_v18, 0.0  ;;  %v731_v37 = vmul.f32 %v9411_v7, %v9411_v7  ;;  %v628_v25 = vsel %vm564_vm2, %v9407_v10, 0.0 }
 0x236   :  { %v814_v50 = vadd.f32 %v813_v42, %v812_v24  ;;  %v819_v42 = vsel %vm564_vm2, %v727_v60, 0.0  ;;  %v623_v39 = vadd.f32 %v622_v29, %v621_v44  ;;  %v417_v60 = vadd.f32 %v9101_v23, %v9033_v41 }
 0x237   :  { %v9436_v29 = vmax.f32 %v414_v2, 0.0  ;;  %v423_v41 = vadd.f32 %v9101_v23, %v9045_v49 }
 0x238   :  { %v9374_v16 = vpop.f32.mrf.mxu0  ;;  %v816_v34 = vadd.f32 %v815_v27, %v814_v50  ;;  %v730_v27 = vmul.f32 %v9407_v10, %v9407_v10  ;;  %v625_v3 = vadd.f32 %v624_v12, %v623_v39  ;;  %v630_v12 = vsel %vm564_vm2, %v9411_v7, 0.0 }
 0x239   :  { %v827_v10 = vsel %vm564_vm2, %v731_v37, 0.0  ;;  %v733_v49 = vmul.f32 %v9436_v29, %v9436_v29  ;;  %v634_v37 = vsel %vm564_vm2, %v9436_v29, 0.0 }
 0x23a   :  { %v818_v24 = vadd.f32 %v817_v58, %v816_v34  ;;  %v823_v58 = vsel %vm564_vm2, %v729_v6, 0.0  ;;  %v420_v34 = vadd.f32 %v9101_v23, %v9039_v45  ;;  %v627_v44 = vadd.f32 %v626_v21, %v625_v3 }
 0x23b   :  { %v732_v6 = vmul.f32 %v9427_v14, %v9427_v14  ;;  %v9460_v3 = vmax.f32 %v423_v41, 0.0 }
 0x23c   :  { %v820_v50 = vadd.f32 %v819_v42, %v818_v24  ;;  %v825_v42 = vsel %vm564_vm2, %v730_v27, 0.0  ;;  %v9447_v24 = vmax.f32 %v417_v60, 0.0  ;;  %v629_v39 = vadd.f32 %v628_v25, %v627_v44 }
 0x23d   :  { %v9456_v21 = vmax.f32 %v420_v34, 0.0  ;;  %v426_v27 = vadd.f32 %v9101_v23, %v9051_v53  ;;  %14075 = vst [vmem:[#allocation20_spill] sm:$0xff] %v9460_v3  ;;  %v432_v53 = vadd.f32 %v9101_v23, %v9063_v61 }
 0x23e   :  { %v822_v18 = vadd.f32 %v821_v33, %v820_v50  ;;  %14073 = vst [vmem:[#allocation18_spill] sm:$0xff] %v9447_v24  ;;  %v632_v33 = vsel %vm564_vm2, %v9427_v14, 0.0  ;;  %v631_v60 = vadd.f32 %v630_v12, %v629_v39  ;;  %v734_v25 = vmul.f32 %v9447_v24, %v9447_v24 }
 0x23f   :  { %14074 = vst [vmem:[#allocation19_spill] sm:$0xff] %v9456_v21  ;;  %v636_v41 = vsel %vm564_vm2, %v9447_v24, 0.0  ;;  %v735_v12 = vmul.f32 %v9456_v21, %v9456_v21  ;;  %v638_v61 = vsel %vm564_vm2, %v9456_v21, 0.0  ;;  %v9487_v24 = vmax.f32 %v432_v53, 0.0 }
 0x240   :  { %v9413_v20 = vpop.f32.mrf.mxu0  ;;  %v824_v2 = vadd.f32 %v823_v58, %v822_v18  ;;  %v829_v58 = vsel %vm564_vm2, %v732_v6, 0.0  ;;  %v429_v18 = vadd.f32 %v9101_v23, %v9057_v57  ;;  %v633_v44 = vadd.f32 %v632_v33, %v631_v60 }
 0x241   :  { %v9476_v6 = vmax.f32 %v426_v27, 0.0  ;;  %v736_v57 = vmul.f32 %v9460_v3, %v9460_v3  ;;  %14078 = vst [vmem:[#allocation23_spill] sm:$0xff] %v9487_v24 }
 0x242   :  { %v826_v50 = vadd.f32 %v825_v42, %v824_v2  ;;  %v831_v42 = vsel %vm564_vm2, %v733_v49, 0.0  ;;  %v635_v39 = vadd.f32 %v634_v37, %v633_v44  ;;  %v9483_v33 = vmax.f32 %v429_v18, 0.0 }
 0x243   :  { %14076 = vst [vmem:[#allocation21_spill] sm:$0xff] %v9476_v6  ;;  %v435_v49 = vadd.f32 %v9101_v23, %v9069_v1  ;;  %v640_v37 = vsel %vm564_vm2, %v9460_v3, 0.0  ;;  %v438_v18 = vadd.f32 %v9101_v23, %v9075_v5  ;;  %v837_v1 = vsel %vm564_vm2, %v736_v57, 0.0 }
 0x244   :  { %v828_v34 = vadd.f32 %v827_v10, %v826_v50  ;;  %v833_v10 = vsel %vm564_vm2, %v734_v25, 0.0  ;;  %14077 = vst [vmem:[#allocation22_spill] sm:$0xff] %v9483_v33  ;;  %v637_v60 = vadd.f32 %v636_v41, %v635_v39  ;;  %v737_v25 = vmul.f32 %v9476_v6, %v9476_v6 }
 0x245   :  { %v642_v53 = vsel %vm564_vm2, %v9476_v6, 0.0  ;;  %v9503_v41 = vmax.f32 %v435_v49, 0.0  ;;  %v739_v5 = vmul.f32 %v9487_v24, %v9487_v24  ;;  %v644_v57 = vsel %vm564_vm2, %v9483_v33, 0.0 }
 0x246   :  { %v830_v2 = vadd.f32 %v829_v58, %v828_v34  ;;  %v835_v58 = vsel %vm564_vm2, %v735_v12, 0.0  ;;  %v639_v44 = vadd.f32 %v638_v61, %v637_v60  ;;  %v441_v12 = vadd.f32 %v9101_v23, %v9081_v9 }
 0x247   :  { %14079 = vst [vmem:[#allocation24_spill] sm:$0xff] %v9503_v41  ;;  %v9512_v61 = vmax.f32 %v438_v18, 0.0  ;;  %v447_v9 = vadd.f32 %v9101_v23, %v9093_v17 }
 0x248   :  { %v9450_v45 = vpop.f32.mrf.mxu0  ;;  %v832_v50 = vadd.f32 %v831_v42, %v830_v2  ;;  %v738_v42 = vmul.f32 %v9483_v33, %v9483_v33  ;;  %v641_v39 = vadd.f32 %v640_v37, %v639_v44  ;;  %v646_v37 = vsel %vm564_vm2, %v9487_v24, 0.0 }
 0x249   :  { %14080 = vst [vmem:[#allocation25_spill] sm:$0xff] %v9512_v61  ;;  %v843_v33 = vsel %vm564_vm2, %v739_v5, 0.0  ;;  %v741_v17 = vmul.f32 %v9512_v61, %v9512_v61  ;;  %v650_v5 = vsel %vm564_vm2, %v9512_v61, 0.0 }
 0x24a   :  { %v834_v34 = vadd.f32 %v833_v10, %v832_v50  ;;  %v839_v10 = vsel %vm564_vm2, %v737_v25, 0.0  ;;  %v444_v50 = vadd.f32 %v9101_v23, %v9087_v13  ;;  %v643_v60 = vadd.f32 %v642_v53, %v641_v39 }
 0x24b   :  { %v740_v25 = vmul.f32 %v9503_v41, %v9503_v41  ;;  %v9536_v39 = vmax.f32 %v447_v9, 0.0 }
 0x24c   :  { %v836_v2 = vadd.f32 %v835_v58, %v834_v34  ;;  %v841_v58 = vsel %vm564_vm2, %v738_v42, 0.0  ;;  %v9523_v34 = vmax.f32 %v441_v12, 0.0  ;;  %v645_v44 = vadd.f32 %v644_v57, %v643_v60 }
 0x24d   :  { %v9532_v53 = vmax.f32 %v444_v50, 0.0  ;;  %v450_v42 = vadd.f32 %v9101_v23, %v9112_v43  ;;  %14083 = vst [vmem:[#allocation28_spill] sm:$0xff] %v9536_v39  ;;  %v456_v43 = vadd.f32 %v9101_v23, %v9185_v35 }
 0x24e   :  { %v838_v49 = vadd.f32 %v837_v1, %v836_v2  ;;  %14081 = vst [vmem:[#allocation26_spill] sm:$0xff] %v9523_v34  ;;  %v648_v1 = vsel %vm564_vm2, %v9503_v41, 0.0  ;;  %v647_v12 = vadd.f32 %v646_v37, %v645_v44  ;;  %v742_v57 = vmul.f32 %v9523_v34, %v9523_v34 }
 0x24f   :  { %14082 = vst [vmem:[#allocation27_spill] sm:$0xff] %v9532_v53  ;;  %v652_v9 = vsel %vm564_vm2, %v9523_v34, 0.0  ;;  %v743_v37 = vmul.f32 %v9532_v53, %v9532_v53  ;;  %v654_v35 = vsel %vm564_vm2, %v9532_v53, 0.0  ;;  %v9563_v34 = vmax.f32 %v456_v43, 0.0 }
 0x250   :  { %v9489_v27 = vpop.f32.mrf.mxu0  ;;  %v840_v18 = vadd.f32 %v839_v10, %v838_v49  ;;  %v845_v10 = vsel %vm564_vm2, %v740_v25, 0.0  ;;  %v453_v49 = vadd.f32 %v9101_v23, %v9145_v32  ;;  %v649_v60 = vadd.f32 %v648_v1, %v647_v12 }
 0x251   :  { %v9552_v25 = vmax.f32 %v450_v42, 0.0  ;;  %v744_v32 = vmul.f32 %v9536_v39, %v9536_v39 }
 0x252   :  { %v842_v2 = vadd.f32 %v841_v58, %v840_v18  ;;  %v847_v58 = vsel %vm564_vm2, %v741_v17, 0.0  ;;  %v651_v44 = vadd.f32 %v650_v5, %v649_v60  ;;  %v9559_v1 = vmax.f32 %v453_v49, 0.0 }
 0x253   :  { %14084 = vst [vmem:[#allocation29_spill] sm:$0xff] %v9552_v25  ;;  %v459_v17 = vadd.f32 %v9101_v23, %v9222_v48  ;;  %v656_v5 = vsel %vm564_vm2, %v9536_v39, 0.0  ;;  %v462_v49 = vadd.f32 %v9101_v23, %v9261_v36  ;;  %v853_v48 = vsel %vm564_vm2, %v744_v32, 0.0 }
 0x254   :  { %v844_v50 = vadd.f32 %v843_v33, %v842_v2  ;;  %v849_v33 = vsel %vm564_vm2, %v742_v57, 0.0  ;;  %14085 = vst [vmem:[#allocation30_spill] sm:$0xff] %v9559_v1  ;;  %v653_v12 = vadd.f32 %v652_v9, %v651_v44  ;;  %v745_v57 = vmul.f32 %v9552_v25, %v9552_v25 }
 0x255   :  { %v658_v43 = vsel %vm564_vm2, %v9552_v25, 0.0  ;;  %v9577_v9 = vmax.f32 %v459_v17, 0.0  ;;  %v747_v36 = vmul.f32 %v9563_v34, %v9563_v34  ;;  %v660_v32 = vsel %vm564_vm2, %v9559_v1, 0.0 }
 0x256   :  { %v846_v18 = vadd.f32 %v845_v10, %v844_v50  ;;  %v851_v10 = vsel %vm564_vm2, %v743_v37, 0.0  ;;  %v655_v60 = vadd.f32 %v654_v35, %v653_v12  ;;  %v465_v37 = vadd.f32 %v9101_v23, %v9298_v0 }
 0x257   :  { %v9586_v35 = vmax.f32 %v462_v49, 0.0  ;;  %v471_v0 = vadd.f32 %v9101_v23, %v9374_v16 }
 0x258   :  { %v9526_v13 = vpop.f32.mrf.mxu0  ;;  %v848_v2 = vadd.f32 %v847_v58, %v846_v18  ;;  %v746_v58 = vmul.f32 %v9559_v1, %v9559_v1  ;;  %v657_v44 = vadd.f32 %v656_v5, %v655_v60  ;;  %v662_v5 = vsel %vm564_vm2, %v9563_v34, 0.0 }
 0x259   :  { %v859_v1 = vsel %vm564_vm2, %v747_v36, 0.0  ;;  %v749_v16 = vmul.f32 %v9586_v35, %v9586_v35  ;;  %v666_v36 = vsel %vm564_vm2, %v9586_v35, 0.0 }
 0x25a   :  { %v850_v50 = vadd.f32 %v849_v33, %v848_v2  ;;  %v855_v33 = vsel %vm564_vm2, %v745_v57, 0.0  ;;  %v468_v2 = vadd.f32 %v9101_v23, %v9337_v19  ;;  %v659_v12 = vadd.f32 %v658_v43, %v657_v44 }
 0x25b   :  { %v748_v57 = vmul.f32 %v9577_v9, %v9577_v9 }
 0x25c   :  { %v852_v18 = vadd.f32 %v851_v10, %v850_v50  ;;  %v857_v10 = vsel %vm564_vm2, %v746_v58, 0.0  ;;  %v9597_v50 = vmax.f32 %v465_v37, 0.0  ;;  %v661_v60 = vadd.f32 %v660_v32, %v659_v12 }
 0x25d   :  { %v9604_v43 = vmax.f32 %v468_v2, 0.0  ;;  %v474_v58 = vadd.f32 %v9101_v23, %v9413_v20  ;;  %v9608_v37 = vmax.f32 %v471_v0, 0.0  ;;  %v480_v20 = vadd.f32 %v9101_v23, %v9489_v27 }
 0x25e   :  { %v854_v17 = vadd.f32 %v853_v48, %v852_v18  ;;  %v664_v48 = vsel %vm564_vm2, %v9577_v9, 0.0  ;;  %v663_v44 = vadd.f32 %v662_v5, %v661_v60  ;;  %v750_v32 = vmul.f32 %v9597_v50, %v9597_v50 }
 0x25f   :  { %v668_v0 = vsel %vm564_vm2, %v9597_v50, 0.0  ;;  %v751_v5 = vmul.f32 %v9604_v43, %v9604_v43  ;;  %v670_v27 = vsel %vm564_vm2, %v9604_v43, 0.0  ;;  %v9635_v25 = vmax.f32 %v480_v20, 0.0 }
 0x260   :  { %v485_v42 = vpop.f32.mrf.mxu0  ;;  %v856_v49 = vadd.f32 %v855_v33, %v854_v17  ;;  %v861_v33 = vsel %vm564_vm2, %v748_v57, 0.0  ;;  %v477_v17 = vadd.f32 %v9101_v23, %v9450_v45  ;;  %v665_v12 = vadd.f32 %v664_v48, %v663_v44 }
 0x261   :  { %v9624_v57 = vmax.f32 %v474_v58, 0.0  ;;  %v752_v45 = vmul.f32 %v9608_v37, %v9608_v37 }
 0x262   :  { %v858_v18 = vadd.f32 %v857_v10, %v856_v49  ;;  %v863_v10 = vsel %vm564_vm2, %v749_v16, 0.0  ;;  %v667_v60 = vadd.f32 %v666_v36, %v665_v12  ;;  %v9631_v48 = vmax.f32 %v477_v17, 0.0 }
 0x263   :  { %v483_v16 = vadd.f32 %v9101_v23, %v9526_v13  ;;  %v672_v36 = vsel %vm564_vm2, %v9608_v37, 0.0  ;;  %v869_v39 = vsel %vm564_vm2, %v752_v45, 0.0  ;;  %v674_v13 = vsel %vm564_vm2, %v9624_v57, 0.0 }
 0x264   :  { %v860_v2 = vadd.f32 %v859_v1, %v858_v18  ;;  %v865_v1 = vsel %vm564_vm2, %v750_v32, 0.0  ;;  %v669_v44 = vadd.f32 %v668_v0, %v667_v60  ;;  %v753_v32 = vmul.f32 %v9624_v57, %v9624_v57 }
 0x265   :  { %v754_v20 = vmul.f32 %v9631_v48, %v9631_v48  ;;  %v755_v60 = vmul.f32 %v9635_v25, %v9635_v25  ;;  %v676_v45 = vsel %vm564_vm2, %v9631_v48, 0.0 }
 0x266   :  { %v862_v49 = vadd.f32 %v861_v33, %v860_v2  ;;  %v867_v33 = vsel %vm564_vm2, %v751_v5, 0.0  ;;  %v486_v2 = vadd.f32 %v9101_v23, %v485_v42  ;;  %v671_v12 = vadd.f32 %v670_v27, %v669_v44 }
 0x267   :  { %v871_v42 = vsel %vm564_vm2, %v753_v32, 0.0 }
 0x268   :  { %v488_v19 = vpop.f32.mrf.mxu0  ;;  %v864_v18 = vadd.f32 %v863_v10, %v862_v49  ;;  %v9648_v10 = vmax.f32 %v483_v16, 0.0  ;;  %v673_v49 = vadd.f32 %v672_v36, %v671_v12  ;;  %v873_v16 = vsel %vm564_vm2, %v754_v20, 0.0 }
 0x269   :  { %v489_v0 = vadd.f32 %v9101_v23, %v488_v19  ;;  %v678_v19 = vsel %vm564_vm2, %v9635_v25, 0.0  ;;  %v875_v12 = vsel %vm564_vm2, %v755_v60, 0.0 }
 0x26a   :  { %v866_v17 = vadd.f32 %v865_v1, %v864_v18  ;;  %v9656_v1 = vmax.f32 %v486_v2, 0.0  ;;  %v675_v44 = vadd.f32 %v674_v13, %v673_v49 }
 0x26b   :  { %v9664_v36 = vmax.f32 %v489_v0, 0.0 }
 0x26c   :  { %v868_v5 = vadd.f32 %v867_v33, %v866_v17  ;;  %v756_v33 = vmul.f32 %v9648_v10, %v9648_v10  ;;  %v677_v17 = vadd.f32 %v676_v45, %v675_v44 }
 0x26d   :  { %v758_v60 = vmul.f32 %v9664_v36, %v9664_v36 }
 0x26e   :  { %v870_v18 = vadd.f32 %v869_v39, %v868_v5  ;;  %v757_v39 = vmul.f32 %v9656_v1, %v9656_v1  ;;  %v679_v49 = vadd.f32 %v678_v19, %v677_v17  ;;  %v877_v0 = vsel %vm564_vm2, %v756_v33, 0.0 }
 0x270   :  { %v491_v58 = vpop.f32.mrf.mxu0  ;;  %v872_v32 = vadd.f32 %v871_v42, %v870_v18  ;;  %v682_v42 = vsel %vm564_vm2, %v9656_v1, 0.0  ;;  %v879_v53 = vsel %vm564_vm2, %v757_v39, 0.0 }
 0x271   :  { %v492_v27 = vadd.f32 %v9101_v23, %v491_v58  ;;  %v680_v58 = vsel %vm564_vm2, %v9648_v10, 0.0 }
 0x272   :  { %v874_v5 = vadd.f32 %v873_v16, %v872_v32  ;;  %v681_v44 = vadd.f32 %v680_v58, %v679_v49  ;;  %v881_v32 = vsel %vm564_vm2, %v758_v60, 0.0 }
 0x273   :  { %v9671_v13 = vmax.f32 %v492_v27, 0.0  ;;  %v684_v27 = vsel %vm564_vm2, %v9664_v36, 0.0 }
 0x274   :  { %v876_v18 = vadd.f32 %v875_v12, %v874_v5  ;;  %v683_v33 = vadd.f32 %v682_v42, %v681_v44 }
 0x275   :  { %v759_v16 = vmul.f32 %v9671_v13, %v9671_v13  ;;  %v686_v17 = vsel %vm564_vm2, %v9671_v13, 0.0 }
 0x276   :  { %v878_v19 = vadd.f32 %v877_v0, %v876_v18  ;;  %v685_v58 = vadd.f32 %v684_v27, %v683_v33 }
 0x277   :  { %v883_v39 = vsel %vm564_vm2, %v759_v16, 0.0 }
 0x278   :  { %v494_v2 = vpop.f32.mrf.mxu0  ;;  %v880_v12 = vadd.f32 %v879_v53, %v878_v19  ;;  %v687_v42 = vadd.f32 %v686_v17, %v685_v58 }
 0x279   :  { %v495_v20 = vadd.f32 %v9101_v23, %v494_v2 }
 0x27a   :  { %v882_v0 = vadd.f32 %v881_v32, %v880_v12 }
 0x27b   :  { %v9679_v45 = vmax.f32 %v495_v20, 0.0 }
 0x27c   :  { %v884_v44 = vadd.f32 %v883_v39, %v882_v0 }
 0x27d   :  { %v760_v2 = vmul.f32 %v9679_v45, %v9679_v45  ;;  %v688_v5 = vsel %vm564_vm2, %v9679_v45, 0.0 }
 0x27e   :  { %v689_v61 = vadd.f32 %v688_v5, %v687_v42 }
 0x27f   :  { %v885_v60 = vsel %vm564_vm2, %v760_v2, 0.0 }
 0x280   :  { %v497_v20 = vpop.f32.mrf.mxu0  ;;  %v886_v53 = vadd.f32 %v885_v60, %v884_v44 }
 0x281   :  { %v498_v49 = vadd.f32 %v9101_v23, %v497_v20 }
 0x283   :  { %v563_v18 = vmax.f32 %v498_v49, 0.0 }
 0x285   :  { %v690_v41 = vsel %vm564_vm2, %v563_v18, 0.0  ;;  %v761_v24 = vmul.f32 %v563_v18, %v563_v18 }
 0x286   :  { %v691_v27 = vadd.f32 %v690_v41, %v689_v61 }
 0x287   :  { %v887_v19 = vsel %vm564_vm2, %v761_v24, 0.0 }
 0x288   :  { %v692_v16 = vrot.slane %v691_v27, 4  ;;  %v888_v33 = vadd.f32 %v887_v19, %v886_v53 }
 0x28a   :  { %v693_v6 = vadd.f32 %v692_v16, %v691_v27  ;;  %v889_v3 = vrot.slane %v888_v33, 4  ;;  %v91_v27 = vld [vmem:[%s13975_s4 + $0x1] sm:$0x1] }
 0x28c   :  { %v694_v21 = vrot.slane %v693_v6, 2  ;;  %v890_v23 = vadd.f32 %v889_v3, %v888_v33 }
 0x28e   :  { %v695_v32 = vadd.f32 %v694_v21, %v693_v6  ;;  %v891_v17 = vrot.slane %v890_v23, 2 }
 0x290   :  { %v696_v12 = vrot.slane %v695_v32, 1  ;;  %v892_v2 = vadd.f32 %v891_v17, %v890_v23  ;;  %v14086_v17 = vld [vmem:[#allocation7_spill] sm:$0xff] }
 0x292   :  { %v697_v58 = vadd.f32 %v696_v12, %v695_v32  ;;  %v893_v20 = vrot.slane %v892_v2, 1 }
 0x294   :  { %v894_v39 = vadd.f32 %v893_v20, %v892_v2  ;;  %v9698_v5 = vmul.f32 0.001953125, %v697_v58  ;;  %v14087_v2 = vld [vmem:[#allocation6_spill] sm:$0xff]  ;;  %v14088_v20 = vld [vmem:[#allocation8_spill] sm:$0xff] }
 0x296   :  { %v896_v49 = vmul.f32 0.001953125, %v894_v39  ;;  %v897_v41 = vmul.f32 %v9698_v5, %v9698_v5  ;;  %v959_v21 = vsub.f32 %v9664_v36, %v9698_v5  ;;  %v960_v6 = vsub.f32 %v9671_v13, %v9698_v5  ;;  %v9714_v36 = vld [vmem:[%s13975_s4 + $0x2] ss:$0 sm:$0xff] }
 0x297   :  { %v961_v44 = vsub.f32 %v9679_v45, %v9698_v5  ;;  %v962_v13 = vsub.f32 %v563_v18, %v9698_v5  ;;  %v899_v12 = vsub.f32 %v14086_v17, %v9698_v5  ;;  %v900_v58 = vsub.f32 %v14087_v2, %v9698_v5 }
 0x298   :  { %v898_v24 = vsub.f32 %v896_v49, %v897_v41  ;;  %v901_v39 = vsub.f32 %v14088_v20, %v9698_v5  ;;  %v14089_v49 = vld [vmem:[#allocation9_spill] sm:$0xff]  ;;  %v14090_v41 = vld [vmem:[#allocation10_spill] sm:$0xff] }
 0x299   :  { %v902_v18 = vsub.f32 %v14089_v49, %v9698_v5 }
 0x29a   :  { %v963_v61 = vadd.f32 1e-05, %v898_v24  ;;  %v903_v24 = vsub.f32 %v14090_v41, %v9698_v5 }
 0x29c   :  { %8455 = vrsqrt.f32 %v963_v61  ;;  %vm970_vm4 = vweird.f32 %v963_v61 }
 0x2a2   :  { %v8456_v0 = vpop.eup %8455 }
 0x2a3   :  { %v965_v42 = vmul.f32 %v8456_v0, %v963_v61  ;;  %vm971_vm3 = vweird.f32 %v8456_v0  ;;  %v904_v61 = vsub.f32 %v9151_v31, %v9698_v5  ;;  %v951_v31 = vsub.f32 %v9597_v50, %v9698_v5 }
 0x2a4   :  { %vm972_vm5 = vmor %vm970_vm4, %vm971_vm3  ;;  %v958_v50 = vsub.f32 %v9656_v1, %v9698_v5 }
 0x2a5   :  { %v966_v60 = vmul.f32 %v8456_v0, %v965_v42  ;;  %v906_v42 = vsub.f32 %v9172_v30, %v9698_v5  ;;  %v953_v30 = vsub.f32 %v9608_v37, %v9698_v5 }
 0x2a7   :  { %v967_v3 = vmul.f32 0.5, %v966_v60  ;;  %v14091_v60 = vld [vmem:[#allocation11_spill] sm:$0xff] }
 0x2a9   :  { %v968_v53 = vsub.f32 1.5, %v967_v3  ;;  %v907_v3 = vsub.f32 %v14091_v60, %v9698_v5 }
 0x2ab   :  { %v969_v19 = vmul.f32 %v8456_v0, %v968_v53  ;;  %v948_v53 = vsub.f32 %v9563_v34, %v9698_v5  ;;  %v955_v34 = vsub.f32 %v9631_v48, %v9698_v5 }
 0x2ad   :  { %v973_v16 = vsel %vm972_vm5, %v8456_v0, %v969_v19  ;;  %v905_v0 = vsub.f32 %v9156_v22, %v9698_v5  ;;  %v950_v19 = vsub.f32 %v9586_v35, %v9698_v5  ;;  %v952_v22 = vsub.f32 %v9604_v43, %v9698_v5 }
 0x2ae   :  { %v974_v33 = vmul.f32 %v973_v16, %v91_v27  ;;  %v949_v27 = vsub.f32 %v9577_v9, %v9698_v5  ;;  %v954_v16 = vsub.f32 %v9624_v57, %v9698_v5  ;;  %v956_v9 = vsub.f32 %v9635_v25, %v9698_v5 }
 0x2af   :  { %v957_v35 = vsub.f32 %v9648_v10, %v9698_v5 }
 0x2b0   :  { %v9717_v23 = vperm.slane %v974_v33, 0 }
 0x2b2   :  { %v1039_v45 = vmul.f32 %v9717_v23, %v962_v13  ;;  %v976_v43 = vmul.f32 %v9717_v23, %v899_v12  ;;  %v977_v33 = vmul.f32 %v9717_v23, %v900_v58  ;;  %v978_v37 = vmul.f32 %v9717_v23, %v901_v39 }
 0x2b3   :  { %v979_v57 = vmul.f32 %v9717_v23, %v902_v18  ;;  %v980_v13 = vmul.f32 %v9717_v23, %v903_v24  ;;  %v981_v48 = vmul.f32 %v9717_v23, %v904_v61  ;;  %v982_v25 = vmul.f32 %v9717_v23, %v905_v0 }
 0x2b4   :  { %v1104_v32 = vadd.f32 %v9714_v36, %v1039_v45  ;;  %v9770_v45 = vmul.f32 %v9717_v23, %v948_v53  ;;  %v9773_v10 = vmul.f32 %v9717_v23, %v949_v27  ;;  %v9776_v1 = vmul.f32 %v9717_v23, %v950_v19 }
 0x2b5   :  { %v9782_v17 = vmul.f32 %v9717_v23, %v952_v22  ;;  %v9785_v12 = vmul.f32 %v9717_v23, %v953_v30  ;;  %v9788_v2 = vmul.f32 %v9717_v23, %v954_v16  ;;  %v9791_v58 = vmul.f32 %v9717_v23, %v955_v34  ;;  %v14092_v22 = vld [vmem:[#allocation12_spill] sm:$0xff] }
 0x2b6   :  { %1314 = vst.msk [vmem:[#allocation2 + $0x450] sm:$0xff] %vm564_vm2, %v1104_v32  ;;  %v9779_v32 = vmul.f32 %v9717_v23, %v951_v31  ;;  %v9794_v20 = vmul.f32 %v9717_v23, %v956_v9  ;;  %v9797_v39 = vmul.f32 %v9717_v23, %v957_v35  ;;  %v9800_v49 = vmul.f32 %v9717_v23, %v958_v50 }
 0x2b7   :  { %v9803_v18 = vmul.f32 %v9717_v23, %v959_v21  ;;  %v9806_v41 = vmul.f32 %v9717_v23, %v960_v6  ;;  %v9809_v24 = vmul.f32 %v9717_v23, %v961_v44  ;;  %v1041_v61 = vadd.f32 %v9714_v36, %v976_v43 }
 0x2b8   :  { %v1042_v0 = vadd.f32 %v9714_v36, %v977_v33  ;;  %v1043_v60 = vadd.f32 %v9714_v36, %v978_v37  ;;  %v908_v53 = vsub.f32 %v9183_v11, %v9698_v5  ;;  %v983_v27 = vmul.f32 %v9717_v23, %v906_v42 }
 0x2b9   :  { %v1044_v21 = vadd.f32 %v9714_v36, %v979_v57  ;;  %v909_v6 = vsub.f32 %v9199_v28, %v9698_v5  ;;  %v910_v44 = vsub.f32 %v9208_v40, %v9698_v5  ;;  %v984_v19 = vmul.f32 %v9717_v23, %v907_v3  ;;  %1251 = vst.msk [vmem:[#allocation2 + $0x28] sm:$0xff] %vm564_vm2, %v1041_v61 }
 0x2ba   :  { %v1045_v31 = vadd.f32 %v9714_v36, %v980_v13  ;;  %v911_v30 = vsub.f32 %v14092_v22, %v9698_v5  ;;  %v912_v11 = vsub.f32 %v9228_v59, %v9698_v5  ;;  %v985_v42 = vmul.f32 %v9717_v23, %v908_v53  ;;  %1252 = vst.msk [vmem:[#allocation2 + $0x30] sm:$0xff] %vm564_vm2, %v1042_v0  ;;  %v14093_v59 = vld [vmem:[#allocation13_spill] sm:$0xff] }
 0x2bb   :  { %v1046_v16 = vadd.f32 %v9714_v36, %v981_v48  ;;  %v913_v28 = vsub.f32 %v9232_v15, %v9698_v5  ;;  %v914_v40 = vsub.f32 %v9248_v55, %v9698_v5  ;;  %v986_v3 = vmul.f32 %v9717_v23, %v909_v6  ;;  %1253 = vst.msk [vmem:[#allocation2 + $0x48] sm:$0xff] %vm564_vm2, %v1043_v60 }
 0x2bc   :  { %v1047_v34 = vadd.f32 %v9714_v36, %v982_v25  ;;  %v915_v9 = vsub.f32 %v14093_v59, %v9698_v5  ;;  %v916_v35 = vsub.f32 %v9259_v26, %v9698_v5  ;;  %v987_v50 = vmul.f32 %v9717_v23, %v910_v44  ;;  %1254 = vst.msk [vmem:[#allocation2 + $0x50] sm:$0xff] %vm564_vm2, %v1044_v21 }
 0x2bd   :  { %v1048_v43 = vadd.f32 %v9714_v36, %v983_v27  ;;  %v917_v15 = vsub.f32 %v9275_v46, %v9698_v5  ;;  %v918_v55 = vsub.f32 %v9284_v56, %v9698_v5  ;;  %v988_v33 = vmul.f32 %v9717_v23, %v911_v30  ;;  %1255 = vst.msk [vmem:[#allocation2 + $0x68] sm:$0xff] %vm564_vm2, %v1045_v31  ;;  %v14094_v46 = vld [vmem:[#allocation14_spill] sm:$0xff] }
 0x2be   :  { %v1049_v37 = vadd.f32 %v9714_v36, %v984_v19  ;;  %v989_v26 = vmul.f32 %v9717_v23, %v912_v11  ;;  %v990_v57 = vmul.f32 %v9717_v23, %v913_v28  ;;  %v991_v13 = vmul.f32 %v9717_v23, %v914_v40  ;;  %1256 = vst.msk [vmem:[#allocation2 + $0x70] sm:$0xff] %vm564_vm2, %v1046_v16 }
 0x2bf   :  { %v1050_v48 = vadd.f32 %v9714_v36, %v985_v42  ;;  %v919_v25 = vsub.f32 %v14094_v46, %v9698_v5  ;;  %v992_v56 = vmul.f32 %v9717_v23, %v915_v9  ;;  %v993_v61 = vmul.f32 %v9717_v23, %v916_v35  ;;  %1257 = vst.msk [vmem:[#allocation2 + $0x88] sm:$0xff] %vm564_vm2, %v1047_v34 }
 0x2c0   :  { %v1051_v0 = vadd.f32 %v9714_v36, %v986_v3  ;;  %v920_v60 = vsub.f32 %v9304_v52, %v9698_v5  ;;  %v921_v53 = vsub.f32 %v9308_v63, %v9698_v5  ;;  %v922_v27 = vsub.f32 %v9324_v38, %v9698_v5  ;;  %1258 = vst.msk [vmem:[#allocation2 + $0x90] sm:$0xff] %vm564_vm2, %v1048_v43 }
 0x2c1   :  { %v1052_v21 = vadd.f32 %v9714_v36, %v987_v50  ;;  %v994_v6 = vmul.f32 %v9717_v23, %v917_v15  ;;  %v995_v44 = vmul.f32 %v9717_v23, %v918_v55  ;;  %v996_v19 = vmul.f32 %v9717_v23, %v919_v25  ;;  %1259 = vst.msk [vmem:[#allocation2 + $0xa8] sm:$0xff] %vm564_vm2, %v1049_v37 }
 0x2c2   :  { %v1053_v31 = vadd.f32 %v9714_v36, %v988_v33  ;;  %v997_v52 = vmul.f32 %v9717_v23, %v920_v60  ;;  %v1054_v63 = vadd.f32 %v9714_v36, %v989_v26  ;;  %v1055_v38 = vadd.f32 %v9714_v36, %v990_v57  ;;  %1260 = vst.msk [vmem:[#allocation2 + $0xb0] sm:$0xff] %vm564_vm2, %v1050_v48 }
 0x2c3   :  { %v1056_v22 = vadd.f32 %v9714_v36, %v991_v13  ;;  %v1057_v30 = vadd.f32 %v9714_v36, %v992_v56  ;;  %v1058_v11 = vadd.f32 %v9714_v36, %v993_v61  ;;  %v9886_v42 = vadd.f32 %v9714_v36, %v9770_v45  ;;  %1261 = vst.msk [vmem:[#allocation2 + $0xc8] sm:$0xff] %vm564_vm2, %v1051_v0 }
 0x2c4   :  { %v9890_v16 = vadd.f32 %v9714_v36, %v9773_v10  ;;  %v9895_v28 = vadd.f32 %v9714_v36, %v9776_v1  ;;  %v9899_v40 = vadd.f32 %v9714_v36, %v9779_v32  ;;  %v9903_v3 = vadd.f32 %v9714_v36, %v9782_v17  ;;  %1262 = vst.msk [vmem:[#allocation2 + $0xd0] sm:$0xff] %vm564_vm2, %v1052_v21 }
 0x2c5   :  { %v9907_v45 = vadd.f32 %v9714_v36, %v9785_v12  ;;  %v9912_v10 = vadd.f32 %v9714_v36, %v9788_v2  ;;  %v9916_v1 = vadd.f32 %v9714_v36, %v9791_v58  ;;  %v9920_v32 = vadd.f32 %v9714_v36, %v9794_v20  ;;  %1263 = vst.msk [vmem:[#allocation2 + $0xe8] sm:$0xff] %vm564_vm2, %v1053_v31 }
 0x2c6   :  { %v9924_v17 = vadd.f32 %v9714_v36, %v9797_v39  ;;  %v9929_v12 = vadd.f32 %v9714_v36, %v9800_v49  ;;  %v9933_v2 = vadd.f32 %v9714_v36, %v9803_v18  ;;  %v9937_v58 = vadd.f32 %v9714_v36, %v9806_v41  ;;  %1264 = vst.msk [vmem:[#allocation2 + $0xf0] sm:$0xff] %vm564_vm2, %v1054_v63  ;;  %v14095_v39 = vld [vmem:[#allocation15_spill] sm:$0xff]  ;;  %v7764_v18 = vld [vmem:[%s13973_s2 + $0x38] sm:$0xff] }
 0x2c7   :  { %v9941_v20 = vadd.f32 %v9714_v36, %v9809_v24  ;;  %v923_v34 = vsub.f32 %v14095_v39, %v9698_v5  ;;  %v998_v49 = vmul.f32 %v9717_v23, %v921_v53  ;;  %v1059_v59 = vadd.f32 %v9714_v36, %v994_v6  ;;  %1265 = vst.msk [vmem:[#allocation2 + $0x108] sm:$0xff] %vm564_vm2, %v1055_v38 }
 0x2c8   :  { %v924_v41 = vsub.f32 %v9335_v47, %v9698_v5  ;;  %v999_v24 = vmul.f32 %v9717_v23, %v922_v27  ;;  %v1060_v9 = vadd.f32 %v9714_v36, %v995_v44  ;;  %1266 = vst.msk [vmem:[#allocation2 + $0x110] sm:$0xff] %vm564_vm2, %v1056_v22  ;;  %1656 = vmatpush.msrb.mxu0 %v7764_v18  ;;  %v7763_v47 = vld [vmem:[%s13973_s2 + $0x30] sm:$0xff]  ;;  %v14097_v27 = vld [vmem:[#allocation17_spill] sm:$0xff] }
 0x2c9   :  { %8433 = vmatpush.msra.mxu1 %v7764_v18  ;;  %v925_v35 = vsub.f32 %v9351_v62, %v9698_v5  ;;  %v1000_v50 = vmul.f32 %v9717_v23, %v923_v34  ;;  %v1061_v43 = vadd.f32 %v9714_v36, %v996_v19  ;;  %1267 = vst.msk [vmem:[#allocation2 + $0x128] sm:$0xff] %vm564_vm2, %v1057_v30  ;;  %v14096_v62 = vld [vmem:[#allocation16_spill] sm:$0xff] }
 0x2ca   :  { %v926_v15 = vsub.f32 %v9360_v8, %v9698_v5  ;;  %v1001_v55 = vmul.f32 %v9717_v23, %v924_v41  ;;  %v1062_v33 = vadd.f32 %v9714_v36, %v997_v52  ;;  %1268 = vst.msk [vmem:[#allocation2 + $0x130] sm:$0xff] %vm564_vm2, %v1058_v11  ;;  %1657 = vmatpush.msrb.mxu0 %v7763_v47  ;;  %v7762_v8 = vld [vmem:[%s13973_s2 + $0x28] sm:$0xff]  ;;  %v14098_v11 = vld [vmem:[#allocation18_spill] sm:$0xff]  ;;  %v14100_v41 = vld [vmem:[#allocation20_spill] sm:$0xff] }
 0x2cb   :  { %8434 = vmatpush.msra.mxu1 %v7763_v47  ;;  %v927_v37 = vsub.f32 %v14096_v62, %v9698_v5  ;;  %v1002_v26 = vmul.f32 %v9717_v23, %v925_v35  ;;  %v1063_v57 = vadd.f32 %v9714_v36, %v998_v49  ;;  %1269 = vst.msk [vmem:[#allocation2 + $0x148] sm:$0xff] %vm564_vm2, %v1059_v59  ;;  %v14099_v49 = vld [vmem:[#allocation19_spill] sm:$0xff] }
 0x2cc   :  { %v928_v13 = vsub.f32 %v9380_v4, %v9698_v5  ;;  %v1003_v48 = vmul.f32 %v9717_v23, %v926_v15  ;;  %v1064_v46 = vadd.f32 %v9714_v36, %v999_v24  ;;  %1270 = vst.msk [vmem:[#allocation2 + $0x150] sm:$0xff] %vm564_vm2, %v1060_v9  ;;  %1658 = vmatpush.msrb.mxu0 %v7762_v8  ;;  %v7761_v4 = vld [vmem:[%s13973_s2 + $0x20] sm:$0xff] }
 0x2cd   :  { %8435 = vmatpush.msra.mxu1 %v7762_v8  ;;  %v929_v25 = vsub.f32 %v9384_v51, %v9698_v5  ;;  %v1004_v56 = vmul.f32 %v9717_v23, %v927_v37  ;;  %v1065_v61 = vadd.f32 %v9714_v36, %v1000_v50  ;;  %1271 = vst.msk [vmem:[#allocation2 + $0x168] sm:$0xff] %vm564_vm2, %v1061_v43  ;;  %v1383_v51 = vld [vmem:[#allocation2 + $0x8] sm:$0xff]  ;;  %v14101_v50 = vld [vmem:[#allocation21_spill] sm:$0xff] }
 0x2ce   :  { %v930_v0 = vsub.f32 %v9400_v54, %v9698_v5  ;;  %v1005_v60 = vmul.f32 %v9717_v23, %v928_v13  ;;  %v1066_v53 = vadd.f32 %v9714_v36, %v1001_v55  ;;  %1272 = vst.msk [vmem:[#allocation2 + $0x170] sm:$0xff] %vm564_vm2, %v1062_v33  ;;  %1659 = vmatpush.msrb.mxu0 %v7761_v4  ;;  %v1384_v55 = vld [vmem:[#allocation2 + $0x10] sm:$0xff]  ;;  %v14102_v33 = vld [vmem:[#allocation22_spill] sm:$0xff]  ;;  %v10049_v8 = vld [vmem:[%s13973_s2 + $0x58] sm:$0xff] }
 0x2cf   :  { %8436 = vmatpush.msra.mxu1 %v7761_v4  ;;  %v931_v21 = vsub.f32 %v14097_v27, %v9698_v5  ;;  %v1006_v6 = vmul.f32 %v9717_v23, %v929_v25  ;;  %v1067_v44 = vadd.f32 %v9714_v36, %v1002_v26  ;;  %1273 = vst.msk [vmem:[#allocation2 + $0x188] sm:$0xff] %vm564_vm2, %v1063_v57  ;;  %v1382_v57 = vld [vmem:[%s13973_s2 + $0x18] sm:$0xff]  ;;  %v1381_v13 = vld [vmem:[%s13973_s2 + $0x10] sm:$0xff]  ;;  %v10076_v27 = vld [vmem:[%s13973_s2 + $0x48] sm:$0xff] }
 0x2d0   :  { %7765 = vmatmul.msk.f32.vlgmr.msrb.gmra.mxu0 %vm564_vm2, %v1383_v51  ;;  %v932_v54 = vsub.f32 %v9411_v7, %v9698_v5  ;;  %v1007_v19 = vmul.f32 %v9717_v23, %v930_v0  ;;  %v1068_v31 = vadd.f32 %v9714_v36, %v1003_v48  ;;  %1274 = vst.msk [vmem:[#allocation2 + $0x190] sm:$0xff] %vm564_vm2, %v1064_v46  ;;  %v14103_v48 = vld [vmem:[#allocation23_spill] sm:$0xff]  ;;  %v14104_v4 = vld [vmem:[#allocation24_spill] sm:$0xff] }
 0x2d1   :  { %v933_v52 = vsub.f32 %v9427_v14, %v9698_v5  ;;  %v1008_v63 = vmul.f32 %v9717_v23, %v931_v21  ;;  %v1069_v38 = vadd.f32 %v9714_v36, %v1004_v56  ;;  %1275 = vst.msk [vmem:[#allocation2 + $0x1a8] sm:$0xff] %vm564_vm2, %v1065_v61  ;;  %v934_v22 = vsub.f32 %v9436_v29, %v9698_v5  ;;  %v10063_v61 = vld [vmem:[%s13973_s2 + $0x50] sm:$0xff]  ;;  %v1380_v51 = vld [vmem:[%s13973_s2 + $0x8] sm:$0xff]  ;;  %v14105_v21 = vld [vmem:[#allocation25_spill] sm:$0xff] }
 0x2d2   :  { %v1009_v7 = vmul.f32 %v9717_v23, %v932_v54  ;;  %v1070_v30 = vadd.f32 %v9714_v36, %v1005_v60  ;;  %1276 = vst.msk [vmem:[#allocation2 + $0x1b0] sm:$0xff] %vm564_vm2, %v1066_v53  ;;  %v935_v39 = vsub.f32 %v14098_v11, %v9698_v5  ;;  %v1071_v34 = vadd.f32 %v9714_v36, %v1006_v6  ;;  %v14107_v11 = vld [vmem:[#allocation27_spill] sm:$0xff] }
 0x2d3   :  { %v1010_v14 = vmul.f32 %v9717_v23, %v933_v52  ;;  %1277 = vst.msk [vmem:[#allocation2 + $0x1c8] sm:$0xff] %vm564_vm2, %v1067_v44  ;;  %v936_v59 = vsub.f32 %v14099_v49, %v9698_v5  ;;  %v1011_v29 = vmul.f32 %v9717_v23, %v934_v22  ;;  %v1072_v18 = vadd.f32 %v9714_v36, %v1007_v19  ;;  %v1399_v19 = vld [vmem:[#allocation2 + $0x108] sm:$0xff]  ;;  %v1379_v22 = vld [vmem:[%s13973_s2] sm:$0xff] }
 0x2d4   :  { %1278 = vst.msk [vmem:[#allocation2 + $0x1d0] sm:$0xff] %vm564_vm2, %v1068_v31  ;;  %v937_v24 = vsub.f32 %v14100_v41, %v9698_v5  ;;  %v1012_v9 = vmul.f32 %v9717_v23, %v935_v39  ;;  %v1073_v35 = vadd.f32 %v9714_v36, %v1008_v63  ;;  %v938_v43 = vsub.f32 %v14101_v50, %v9698_v5  ;;  %v14106_v31 = vld [vmem:[#allocation26_spill] sm:$0xff]  ;;  %v1385_v49 = vld [vmem:[#allocation2 + $0x28] sm:$0xff]  ;;  %v14109_v50 = vld [vmem:[#allocation29_spill] sm:$0xff] }
 0x2d5   :  { %1279 = vst.msk [vmem:[#allocation2 + $0x1e8] sm:$0xff] %vm564_vm2, %v1069_v38  ;;  %v1013_v47 = vmul.f32 %v9717_v23, %v936_v59  ;;  %v1074_v15 = vadd.f32 %v9714_v36, %v1009_v7  ;;  %v939_v62 = vsub.f32 %v14102_v33, %v9698_v5  ;;  %v1075_v26 = vadd.f32 %v9714_v36, %v1010_v14  ;;  %v7893_v7 = vld [vmem:[%s13973_s2 + $0x40] sm:$0xff] }
 0x2d6   :  { %1280 = vst.msk [vmem:[#allocation2 + $0x1f0] sm:$0xff] %vm564_vm2, %v1070_v30  ;;  %v1014_v37 = vmul.f32 %v9717_v23, %v937_v24  ;;  %v940_v46 = vsub.f32 %v14103_v48, %v9698_v5  ;;  %v1015_v25 = vmul.f32 %v9717_v23, %v938_v43  ;;  %v1076_v56 = vadd.f32 %v9714_v36, %v1011_v29  ;;  %v7964_v30 = vld [vmem:[%s13973_s2 + $0x78] sm:$0xff]  ;;  %v1331_v59 = vld [vmem:[#allocation2 + $0x107] sm:$0xff]  ;;  %v14108_v29 = vld [vmem:[#allocation28_spill] sm:$0xff] }
 0x2d7   :  { %1281 = vst.msk [vmem:[#allocation2 + $0x208] sm:$0xff] %vm564_vm2, %v1071_v34  ;;  %8437 = vmatpush.msra.mxu2 %v1382_v57  ;;  %8441 = vmatpush.msra.mxu3 %v10049_v8  ;;  %v941_v0 = vsub.f32 %v14104_v4, %v9698_v5  ;;  %v1016_v60 = vmul.f32 %v9717_v23, %v939_v62  ;;  %v1386_v4 = vld [vmem:[#allocation2 + $0x30] sm:$0xff] }
 0x2d8   :  { %7766 = vmatmul.msk.f32.gmra.mxu0 %vm564_vm2, %v1384_v55  ;;  %1282 = vst.msk [vmem:[#allocation2 + $0x210] sm:$0xff] %vm564_vm2, %v1072_v18  ;;  %v1077_v53 = vadd.f32 %v9714_v36, %v1012_v9  ;;  %v942_v6 = vsub.f32 %v14105_v21, %v9698_v5  ;;  %v1017_v44 = vmul.f32 %v9717_v23, %v940_v46  ;;  %v2270_v9 = vld [vmem:[#allocation2 + $0x109] sm:$0xff]  ;;  %v14110_v55 = vld [vmem:[#allocation30_spill] sm:$0xff] }
 0x2d9   :  { %1283 = vst.msk [vmem:[#allocation2 + $0x268] sm:$0xff] %vm564_vm2, %v1073_v35  ;;  %2057 = vmatpush.msra.mxu0 %v1382_v57  ;;  %v1078_v54 = vadd.f32 %v9714_v36, %v1013_v47  ;;  %8438 = vmatpush.msra.mxu2 %v1381_v13  ;;  %v943_v52 = vsub.f32 %v14106_v31, %v9698_v5  ;;  %v8032_v35 = vld [vmem:[%s13973_s2 + $0x98] sm:$0xff]  ;;  %v1400_v46 = vld [vmem:[#allocation2 + $0x110] sm:$0xff]  ;;  %v1407_v31 = vld [vmem:[#allocation2 + $0x188] sm:$0xff] }
 0x2da   :  { %1284 = vst.msk [vmem:[#allocation2 + $0x270] sm:$0xff] %vm564_vm2, %v1074_v15  ;;  %8442 = vmatpush.msra.mxu3 %v10063_v61  ;;  %v1018_v63 = vmul.f32 %v9717_v23, %v941_v0  ;;  %v1079_v38 = vadd.f32 %v9714_v36, %v1014_v37  ;;  %7781 = vmatmul.msk.f32.vlgmr.msra.gmra.mxu1 %vm564_vm2, %v1399_v19  ;;  %v2274_v0 = vld [vmem:[#allocation2 + $0x149] sm:$0xff] }
 0x2db   :  { %1285 = vst.msk [vmem:[#allocation2 + $0x288] sm:$0xff] %vm564_vm2, %v1075_v26  ;;  %2058 = vmatpush.msra.mxu0 %v1381_v13  ;;  %v944_v39 = vsub.f32 %v14107_v11, %v9698_v5  ;;  %v1019_v14 = vmul.f32 %v9717_v23, %v942_v6  ;;  %v1080_v34 = vadd.f32 %v9714_v36, %v1015_v25  ;;  %v1392_v21 = vld [vmem:[#allocation2 + $0x90] sm:$0xff]  ;;  %v1393_v19 = vld [vmem:[#allocation2 + $0xa8] sm:$0xff] }
 0x2dc   :  { %1286 = vst.msk [vmem:[#allocation2 + $0x290] sm:$0xff] %vm564_vm2, %v1076_v56  ;;  %8439 = vmatpush.msra.mxu2 %v1380_v51  ;;  %8443 = vmatpush.msra.mxu3 %v10076_v27  ;;  %v945_v18 = vsub.f32 %v14108_v29, %v9698_v5  ;;  %v1020_v41 = vmul.f32 %v9717_v23, %v943_v52  ;;  %v1406_v6 = vld [vmem:[#allocation2 + $0x170] sm:$0xff]  ;;  %v1339_v52 = vld [vmem:[#allocation2 + $0x187] sm:$0xff] }
 0x2dd   :  { %v1081_v24 = vadd.f32 %v9714_v36, %v1016_v60  ;;  %1287 = vst.msk [vmem:[#allocation2 + $0x2a8] sm:$0xff] %vm564_vm2, %v1077_v53  ;;  %3061 = vmatpush.msrb.mxu1 %v7964_v30  ;;  %2059 = vmatpush.msra.mxu0 %v1380_v51  ;;  %v946_v43 = vsub.f32 %v14109_v50, %v9698_v5  ;;  %v1391_v60 = vld [vmem:[#allocation2 + $0x88] sm:$0xff]  ;;  %v8031_v11 = vld [vmem:[%s13973_s2 + $0x90] sm:$0xff] }
 0x2de   :  { %v1021_v47 = vmul.f32 %v9717_v23, %v944_v39  ;;  %v1082_v15 = vadd.f32 %v9714_v36, %v1017_v44  ;;  %1288 = vst.msk [vmem:[#allocation2 + $0x2b0] sm:$0xff] %vm564_vm2, %v1078_v54  ;;  %8440 = vmatpush.msra.mxu2 %v1379_v22  ;;  %8444 = vmatpush.msra.mxu3 %v7893_v7  ;;  %v1405_v53 = vld [vmem:[#allocation2 + $0x168] sm:$0xff]  ;;  %v7963_v39 = vld [vmem:[%s13973_s2 + $0x70] sm:$0xff] }
 0x2df   :  { %v947_v33 = vsub.f32 %v14110_v55, %v9698_v5  ;;  %v1022_v62 = vmul.f32 %v9717_v23, %v945_v18  ;;  %v1083_v37 = vadd.f32 %v9714_v36, %v1018_v63  ;;  %1289 = vst.msk [vmem:[#allocation2 + $0x2c8] sm:$0xff] %vm564_vm2, %v1079_v38  ;;  %7845 = vmatmul.msk.f32.vlgmr.msra.gmra.mxu2 %vm564_vm2, %v1331_v59  ;;  %v1337_v51 = vld [vmem:[#allocation2 + $0x167] sm:$0xff]  ;;  %v1338_v44 = vld [vmem:[#allocation2 + $0x16f] sm:$0xff] }
 0x2e0   :  { %7767 = vmatmul.msk.f32.gmra.mxu0 %vm564_vm2, %v1385_v49  ;;  %v1023_v26 = vmul.f32 %v9717_v23, %v946_v43  ;;  %v1084_v57 = vadd.f32 %v9714_v36, %v1019_v14  ;;  %1290 = vst.msk [vmem:[#allocation2 + $0x2d0] sm:$0xff] %vm564_vm2, %v1080_v34  ;;  %7913 = vmatmul.msk.f32.vlgmr.msra.gmra.mxu3 %vm564_vm2, %v2270_v9  ;;  %v2276_v54 = vld [vmem:[#allocation2 + $0x169] sm:$0xff] }
 0x2e1   :  { %3595 = vmatpush.msrb.mxu2 %v8032_v35  ;;  %v1024_v5 = vmul.f32 %v9717_v23, %v947_v33  ;;  %v1085_v13 = vadd.f32 %v9714_v36, %v1020_v41  ;;  %1291 = vst.msk [vmem:[#allocation2 + $0x2e8] sm:$0xff] %vm564_vm2, %v1081_v24  ;;  %2060 = vmatpush.msra.mxu0 %v1379_v22  ;;  %v1394_v38 = vld [vmem:[#allocation2 + $0xb0] sm:$0xff]  ;;  %v1395_v14 = vld [vmem:[#allocation2 + $0xc8] sm:$0xff] }
 0x2e2   :  { %v1086_v48 = vadd.f32 %v9714_v36, %v1021_v47  ;;  %1292 = vst.msk [vmem:[#allocation2 + $0x2f0] sm:$0xff] %vm564_vm2, %v1082_v15  ;;  %v1087_v25 = vadd.f32 %v9714_v36, %v1022_v62  ;;  %7782 = vmatmul.msk.f32.gmra.mxu1 %vm564_vm2, %v1400_v46  ;;  %v1088_v23 = vadd.f32 %v9714_v36, %v1023_v26  ;;  %v1408_v22 = vld [vmem:[#allocation2 + $0x190] sm:$0xff]  ;;  %v1409_v34 = vld [vmem:[#allocation2 + $0x1a8] sm:$0xff] }
 0x2e3   :  { %2527 = vmatpush.msrb.mxu0 %v10049_v8  ;;  %1293 = vst.msk [vmem:[#allocation2 + $0x308] sm:$0xff] %vm564_vm2, %v1083_v37  ;;  %v1089_v56 = vadd.f32 %v9714_v36, %v1024_v5  ;;  %v1332_v8 = vld [vmem:[#allocation2 + $0x10f] sm:$0xff]  ;;  %v14111_v36 = vmov 0.0   ;;  %3596 = vmatpush.msrb.mxu2 %v8031_v11  ;;  %v1341_v49 = vld [vmem:[#allocation2 + $0x1a7] sm:$0xff] }
 0x2e4   :  { %1294 = vst.msk [vmem:[#allocation2 + $0x310] sm:$0xff] %vm564_vm2, %v1084_v57  ;;  %v2278_v30 = vld [vmem:[#allocation2 + $0x189] sm:$0xff]  ;;  %3062 = vmatpush.msrb.mxu1 %v7963_v39 }
 0x2e5   :  { %2528 = vmatpush.msrb.mxu0 %v10063_v61  ;;  %1295 = vst.msk [vmem:[#allocation2 + $0x328] sm:$0xff] %vm564_vm2, %v1085_v13  ;;  %v1336_v61 = vld [vmem:[#allocation2 + $0x14f] sm:$0xff]  ;;  %v1343_v50 = vld [vmem:[#allocation2 + $0x1c7] sm:$0xff] }
 0x2e6   :  { %1296 = vst.msk [vmem:[#allocation2 + $0x330] sm:$0xff] %vm564_vm2, %v1086_v48  ;;  %v1396_v29 = vld [vmem:[#allocation2 + $0xd0] sm:$0xff]  ;;  %v1397_v9 = vld [vmem:[#allocation2 + $0xe8] sm:$0xff] }
 0x2e7   :  { %2529 = vmatpush.msrb.mxu0 %v10076_v27  ;;  %1297 = vst.msk [vmem:[#allocation2 + $0x348] sm:$0xff] %vm564_vm2, %v1087_v25  ;;  %7846 = vmatmul.msk.f32.gmra.mxu2 %vm564_vm2, %v1332_v8  ;;  %v1410_v18 = vld [vmem:[#allocation2 + $0x1b0] sm:$0xff]  ;;  %v1411_v35 = vld [vmem:[#allocation2 + $0x1c8] sm:$0xff] }
 0x2e8   :  { %7768 = vmatmul.msk.f32.gmra.mxu0 %vm564_vm2, %v1386_v4  ;;  %1298 = vst.msk [vmem:[#allocation2 + $0x350] sm:$0xff] %vm564_vm2, %v1088_v23  ;;  %v1342_v41 = vld [vmem:[#allocation2 + $0x1af] sm:$0xff]  ;;  %v1315_v37 = vld [vmem:[#allocation2 + $0x7] sm:$0xff] }
 0x2e9   :  { %2530 = vmatpush.msrb.mxu0 %v7893_v7  ;;  %1299 = vst.msk [vmem:[#allocation2 + $0x368] sm:$0xff] %vm564_vm2, %v1089_v56  ;;  %v1340_v7 = vld [vmem:[#allocation2 + $0x18f] sm:$0xff]  ;;  %v1345_v5 = vld [vmem:[#allocation2 + $0x1e7] sm:$0xff] }
 0x2ea   :  { %1300 = vst.msk [vmem:[#allocation2 + $0x370] sm:$0xff] %vm564_vm2, %v9886_v42  ;;  %v1387_v42 = vld [vmem:[#allocation2 + $0x48] sm:$0xff]  ;;  %v1398_v15 = vld [vmem:[#allocation2 + $0xf0] sm:$0xff] }
 0x2eb   :  { %1301 = vst.msk [vmem:[#allocation2 + $0x388] sm:$0xff] %vm564_vm2, %v9890_v16  ;;  %v1401_v16 = vld [vmem:[#allocation2 + $0x128] sm:$0xff]  ;;  %v1412_v55 = vld [vmem:[#allocation2 + $0x1d0] sm:$0xff] }
 0x2ec   :  { %1302 = vst.msk [vmem:[#allocation2 + $0x390] sm:$0xff] %vm564_vm2, %v9895_v28  ;;  %7783 = vmatmul.msk.f32.gmra.mxu1 %vm564_vm2, %v1401_v16  ;;  %v1333_v28 = vld [vmem:[#allocation2 + $0x127] sm:$0xff]  ;;  %v1344_v33 = vld [vmem:[#allocation2 + $0x1cf] sm:$0xff] }
 0x2ed   :  { %1303 = vst.msk [vmem:[#allocation2 + $0x3a8] sm:$0xff] %vm564_vm2, %v9899_v40  ;;  %v2280_v24 = vld [vmem:[#allocation2 + $0x1a9] sm:$0xff] }
 0x2ee   :  { %1304 = vst.msk [vmem:[#allocation2 + $0x3b0] sm:$0xff] %vm564_vm2, %v9903_v3  ;;  %v1388_v3 = vld [vmem:[#allocation2 + $0x50] sm:$0xff]  ;;  %v1413_v26 = vld [vmem:[#allocation2 + $0x1e8] sm:$0xff] }
 0x2ef   :  { %1305 = vst.msk [vmem:[#allocation2 + $0x3c8] sm:$0xff] %vm564_vm2, %v9907_v45  ;;  %7847 = vmatmul.msk.f32.gmra.mxu2 %vm564_vm2, %v1333_v28  ;;  %v1402_v45 = vld [vmem:[#allocation2 + $0x130] sm:$0xff]  ;;  %v1415_v8 = vld [vmem:[#allocation2 + $0x248] sm:$0xff] }
 0x2f0   :  { %1306 = vst.msk [vmem:[#allocation2 + $0x3d0] sm:$0xff] %vm564_vm2, %v9912_v10  ;;  %7769 = vmatmul.msk.f32.gmra.mxu0 %vm564_vm2, %v1387_v42  ;;  %v1334_v10 = vld [vmem:[#allocation2 + $0x12f] sm:$0xff]  ;;  %v10320_v42 = vld [vmem:[#allocation2 + $0x27] sm:$0xff] }
 0x2f1   :  { %1307 = vst.msk [vmem:[#allocation2 + $0x3e8] sm:$0xff] %vm564_vm2, %v9916_v1  ;;  %v2272_v1 = vld [vmem:[#allocation2 + $0x129] sm:$0xff] }
 0x2f2   :  { %1308 = vst.msk [vmem:[#allocation2 + $0x3f0] sm:$0xff] %vm564_vm2, %v9920_v32  ;;  %v1389_v32 = vld [vmem:[#allocation2 + $0x68] sm:$0xff]  ;;  %v1414_v46 = vld [vmem:[#allocation2 + $0x1f0] sm:$0xff] }
 0x2f3   :  { %1309 = vst.msk [vmem:[#allocation2 + $0x408] sm:$0xff] %vm564_vm2, %v9924_v17  ;;  %v1403_v17 = vld [vmem:[#allocation2 + $0x148] sm:$0xff] }
 0x2f4   :  { %1310 = vst.msk [vmem:[#allocation2 + $0x410] sm:$0xff] %vm564_vm2, %v9929_v12  ;;  %7784 = vmatmul.msk.f32.gmra.mxu1 %vm564_vm2, %v1402_v45  ;;  %v1335_v12 = vld [vmem:[#allocation2 + $0x147] sm:$0xff]  ;;  %v1316_v48 = vld [vmem:[#allocation2 + $0xf] sm:$0xff] }
 0x2f5   :  { %1311 = vst.msk [vmem:[#allocation2 + $0x428] sm:$0xff] %vm564_vm2, %v9933_v2  ;;  %v2282_v62 = vld [vmem:[#allocation2 + $0x1c9] sm:$0xff] }
 0x2f6   :  { %1312 = vst.msk [vmem:[#allocation2 + $0x430] sm:$0xff] %vm564_vm2, %v9937_v58  ;;  %v1390_v58 = vld [vmem:[#allocation2 + $0x70] sm:$0xff]  ;;  %v10366_v11 = vld [vmem:[#allocation2 + $0x67] sm:$0xff] }
 0x2f7   :  { %1313 = vst.msk [vmem:[#allocation2 + $0x448] sm:$0xff] %vm564_vm2, %v9941_v20  ;;  %7848 = vmatmul.msk.f32.gmra.mxu2 %vm564_vm2, %v1334_v10  ;;  %v1404_v20 = vld [vmem:[#allocation2 + $0x150] sm:$0xff] }
 0x2f8   :  { %1141 = vst.msk [vmem:[#allocation2 + $0x118] sm:$0x1] %vm1108_vm6, %v14111_v36  ;;  %7770 = vmatmul.msk.f32.gmra.mxu0 %vm564_vm2, %v1388_v3  ;;  %v1346_v25 = vld [vmem:[#allocation2 + $0x1ef] sm:$0xff] }
 0x2f9   :  { %1109 = vst.msk [vmem:[#allocation2 + $0x18] sm:$0x1] %vm1108_vm6, %v14111_v36  ;;  %v2284_v4 = vld [vmem:[#allocation2 + $0x1e9] sm:$0xff] }
 0x2fa   :  { %1113 = vst.msk [vmem:[#allocation2 + $0x38] sm:$0x1] %vm1108_vm6, %v14111_v36  ;;  %v1416_v45 = vld [vmem:[#allocation2 + $0x250] sm:$0xff] }
 0x2fb   :  { %1117 = vst.msk [vmem:[#allocation2 + $0x58] sm:$0x1] %vm1108_vm6, %v14111_v36  ;;  %v1348_v10 = vld [vmem:[#allocation2 + $0x24f] sm:$0xff] }
 0x2fc   :  { %1121 = vst.msk [vmem:[#allocation2 + $0x78] sm:$0x1] %vm1108_vm6, %v14111_v36  ;;  %7785 = vmatmul.msk.f32.gmra.mxu1 %vm564_vm2, %v1403_v17 }
 0x2fd   :  { %1125 = vst.msk [vmem:[#allocation2 + $0x98] sm:$0x1] %vm1108_vm6, %v14111_v36 }
 0x2fe   :  { %1129 = vst.msk [vmem:[#allocation2 + $0xb8] sm:$0x1] %vm1108_vm6, %v14111_v36 }
 0x2ff   :  { %v2271_v40 = vld [vmem:[#allocation2 + $0x111] sm:$0xff]  ;;  %1133 = vst.msk [vmem:[#allocation2 + $0xd8] sm:$0x1] %vm1108_vm6, %v14111_v36  ;;  %7849 = vmatmul.msk.f32.gmra.mxu2 %vm564_vm2, %v1335_v12 }
 0x300   :  { %7914 = vmatmul.msk.f32.gmra.mxu3 %vm564_vm2, %v2271_v40  ;;  %1137 = vst.msk [vmem:[#allocation2 + $0xf8] sm:$0x1] %vm1108_vm6, %v14111_v36  ;;  %7771 = vmatmul.msk.f32.gmra.mxu0 %vm564_vm2, %v1389_v32  ;;  %v2286_v32 = vld [vmem:[#allocation2 + $0x249] sm:$0xff] }
 0x301   :  { %1145 = vst.msk [vmem:[#allocation2 + $0x138] sm:$0x1] %vm1108_vm6, %v14111_v36 }
 0x302   :  { %1149 = vst.msk [vmem:[#allocation2 + $0x158] sm:$0x1] %vm1108_vm6, %v14111_v36 }
 0x303   :  { %1153 = vst.msk [vmem:[#allocation2 + $0x178] sm:$0x1] %vm1108_vm6, %v14111_v36 }
 0x304   :  { %1157 = vst.msk [vmem:[#allocation2 + $0x198] sm:$0x1] %vm1108_vm6, %v14111_v36  ;;  %7786 = vmatmul.msk.f32.gmra.mxu1 %vm564_vm2, %v1404_v20  ;;  %v1417_v20 = vld [vmem:[#allocation2 + $0x268] sm:$0xff] }
 0x305   :  { %1161 = vst.msk [vmem:[#allocation2 + $0x1b8] sm:$0x1] %vm1108_vm6, %v14111_v36 }
 0x306   :  { %1165 = vst.msk [vmem:[#allocation2 + $0x1d8] sm:$0x1] %vm1108_vm6, %v14111_v36 }
 0x307   :  { %1169 = vst.msk [vmem:[#allocation2 + $0x1f8] sm:$0x1] %vm1108_vm6, %v14111_v36  ;;  %7850 = vmatmul.msk.f32.gmra.mxu2 %vm564_vm2, %v1336_v61  ;;  %v10346_v61 = vld [vmem:[#allocation2 + $0x47] sm:$0xff] }
 0x308   :  { %1173 = vst.msk [vmem:[#allocation2 + $0x218] sm:$0x1] %vm1108_vm6, %v14111_v36  ;;  %7915 = vmatmul.msk.f32.gmra.mxu3 %vm564_vm2, %v2272_v1  ;;  %v2273_v2 = vld [vmem:[#allocation2 + $0x131] sm:$0xff]  ;;  %7772 = vmatmul.msk.f32.gmra.mxu0 %vm564_vm2, %v1390_v58 }
 0x309   :  { %1177 = vst.msk [vmem:[#allocation2 + $0x238] sm:$0x1] %vm1108_vm6, %v14111_v36  ;;  %v2275_v27 = vld [vmem:[#allocation2 + $0x151] sm:$0xff] }
 0x30a   :  { %1181 = vst.msk [vmem:[#allocation2 + $0x258] sm:$0x1] %vm1108_vm6, %v14111_v36  ;;  %v2277_v63 = vld [vmem:[#allocation2 + $0x171] sm:$0xff] }
 0x30b   :  { %1185 = vst.msk [vmem:[#allocation2 + $0x278] sm:$0x1] %vm1108_vm6, %v14111_v36  ;;  %v2279_v59 = vld [vmem:[#allocation2 + $0x191] sm:$0xff] }
 0x30c   :  { %1189 = vst.msk [vmem:[#allocation2 + $0x298] sm:$0x1] %vm1108_vm6, %v14111_v36  ;;  %7787 = vmatmul.msk.f32.gmra.mxu1 %vm564_vm2, %v1405_v53  ;;  %v2281_v43 = vld [vmem:[#allocation2 + $0x1b1] sm:$0xff] }
 0x30d   :  { %1193 = vst.msk [vmem:[#allocation2 + $0x2b8] sm:$0x1] %vm1108_vm6, %v14111_v36  ;;  %v2283_v13 = vld [vmem:[#allocation2 + $0x1d1] sm:$0xff] }
 0x30e   :  { %1197 = vst.msk [vmem:[#allocation2 + $0x2d8] sm:$0x1] %vm1108_vm6, %v14111_v36  ;;  %v2285_v28 = vld [vmem:[#allocation2 + $0x1f1] sm:$0xff] }
 0x30f   :  { %1201 = vst.msk [vmem:[#allocation2 + $0x2f8] sm:$0x1] %vm1108_vm6, %v14111_v36  ;;  %7851 = vmatmul.msk.f32.gmra.mxu2 %vm564_vm2, %v1337_v51  ;;  %v10333_v1 = vld [vmem:[#allocation2 + $0x2f] sm:$0xff] }
 0x310   :  { %1205 = vst.msk [vmem:[#allocation2 + $0x318] sm:$0x1] %vm1108_vm6, %v14111_v36  ;;  %7916 = vmatmul.msk.f32.gmra.mxu3 %vm564_vm2, %v2273_v2  ;;  %7773 = vmatmul.msk.f32.gmra.mxu0 %vm564_vm2, %v1391_v60 }
 0x311   :  { %1209 = vst.msk [vmem:[#allocation2 + $0x338] sm:$0x1] %vm1108_vm6, %v14111_v36  ;;  %v2287_v60 = vld [vmem:[#allocation2 + $0x251] sm:$0xff] }
 0x312   :  { %1213 = vst.msk [vmem:[#allocation2 + $0x358] sm:$0x1] %vm1108_vm6, %v14111_v36 }
 0x313   :  { %1217 = vst.msk [vmem:[#allocation2 + $0x378] sm:$0x1] %vm1108_vm6, %v14111_v36 }
 0x314   :  { %1221 = vst.msk [vmem:[#allocation2 + $0x398] sm:$0x1] %vm1108_vm6, %v14111_v36  ;;  %7788 = vmatmul.msk.f32.gmra.mxu1 %vm564_vm2, %v1406_v6 }
 0x315   :  { %1225 = vst.msk [vmem:[#allocation2 + $0x3b8] sm:$0x1] %vm1108_vm6, %v14111_v36 }
 0x316   :  { %1229 = vst.msk [vmem:[#allocation2 + $0x3d8] sm:$0x1] %vm1108_vm6, %v14111_v36 }
 0x317   :  { %1233 = vst.msk [vmem:[#allocation2 + $0x3f8] sm:$0x1] %vm1108_vm6, %v14111_v36  ;;  %7852 = vmatmul.msk.f32.gmra.mxu2 %vm564_vm2, %v1338_v44  ;;  %v1418_v44 = vld [vmem:[#allocation2 + $0x270] sm:$0xff] }
 0x318   :  { %1237 = vst.msk [vmem:[#allocation2 + $0x418] sm:$0x1] %vm1108_vm6, %v14111_v36  ;;  %7917 = vmatmul.msk.f32.gmra.mxu3 %vm564_vm2, %v2274_v0  ;;  %7774 = vmatmul.msk.f32.gmra.mxu0 %vm564_vm2, %v1392_v21  ;;  %v1349_v0 = vld [vmem:[#allocation2 + $0x267] sm:$0xff] }
 0x319   :  { %1241 = vst.msk [vmem:[#allocation2 + $0x438] sm:$0x1] %vm1108_vm6, %v14111_v36 }
 0x31a   :  { %1245 = vst.msk [vmem:[#allocation2 + $0x458] sm:$0x1] %vm1108_vm6, %v14111_v36 }
 0x31b   :  { %1249 = vst.msk [vmem:[#allocation2 + $0x478] sm:$0x1] %vm1108_vm6, %v14111_v36  ;;  %v1347_v36 = vld [vmem:[#allocation2 + $0x247] sm:$0xff] }
 0x31c   :  { %7789 = vmatmul.msk.f32.gmra.mxu1 %vm564_vm2, %v1407_v31  ;;  %v2288_v31 = vld [vmem:[#allocation2 + $0x269] sm:$0xff] }
 0x31f   :  { %7853 = vmatmul.msk.f32.gmra.mxu2 %vm564_vm2, %v1339_v52 }
 0x320   :  { %7918 = vmatmul.msk.f32.gmra.mxu3 %vm564_vm2, %v2275_v27  ;;  %7775 = vmatmul.msk.f32.gmra.mxu0 %vm564_vm2, %v1393_v19  ;;  %v1350_v19 = vld [vmem:[#allocation2 + $0x26f] sm:$0xff] }
 0x324   :  { %7790 = vmatmul.msk.f32.gmra.mxu1 %vm564_vm2, %v1408_v22 }
 0x327   :  { %7854 = vmatmul.msk.f32.gmra.mxu2 %vm564_vm2, %v1340_v7 }
 0x328   :  { %7919 = vmatmul.msk.f32.gmra.mxu3 %vm564_vm2, %v2276_v54  ;;  %7776 = vmatmul.msk.f32.gmra.mxu0 %vm564_vm2, %v1394_v38  ;;  %v10357_v54 = vld [vmem:[#allocation2 + $0x4f] sm:$0xff] }
 0x32c   :  { %7791 = vmatmul.msk.f32.gmra.mxu1 %vm564_vm2, %v1409_v34  ;;  %v2289_v34 = vld [vmem:[#allocation2 + $0x271] sm:$0xff] }
 0x32f   :  { %7855 = vmatmul.msk.f32.gmra.mxu2 %vm564_vm2, %v1341_v49 }
 0x330   :  { %7920 = vmatmul.msk.f32.gmra.mxu3 %vm564_vm2, %v2277_v63  ;;  %7777 = vmatmul.msk.f32.gmra.mxu0 %vm564_vm2, %v1395_v14  ;;  %v1351_v14 = vld [vmem:[#allocation2 + $0x287] sm:$0xff] }
 0x334   :  { %7792 = vmatmul.msk.f32.gmra.mxu1 %vm564_vm2, %v1410_v18 }
 0x337   :  { %7856 = vmatmul.msk.f32.gmra.mxu2 %vm564_vm2, %v1342_v41 }
 0x338   :  { %7921 = vmatmul.msk.f32.gmra.mxu3 %vm564_vm2, %v2278_v30  ;;  %7778 = vmatmul.msk.f32.gmra.mxu0 %vm564_vm2, %v1396_v29  ;;  %v1419_v30 = vld [vmem:[#allocation2 + $0x288] sm:$0xff] }
 0x33c   :  { %7793 = vmatmul.msk.f32.gmra.mxu1 %vm564_vm2, %v1411_v35 }
 0x33f   :  { %7857 = vmatmul.msk.f32.gmra.mxu2 %vm564_vm2, %v1343_v50  ;;  %v1352_v50 = vld [vmem:[#allocation2 + $0x28f] sm:$0xff] }
 0x340   :  { %7922 = vmatmul.msk.f32.gmra.mxu3 %vm564_vm2, %v2279_v59  ;;  %7779 = vmatmul.msk.f32.gmra.mxu0 %vm564_vm2, %v1397_v9  ;;  %v10377_v9 = vld [vmem:[#allocation2 + $0x6f] sm:$0xff] }
 0x344   :  { %7794 = vmatmul.msk.f32.gmra.mxu1 %vm564_vm2, %v1412_v55  ;;  %v8030_v55 = vld [vmem:[%s13973_s2 + $0x88] sm:$0xff] }
 0x345   :  { %3597 = vmatpush.msrb.mxu2 %v8030_v55 }
 0x347   :  { %7858 = vmatmul.msk.f32.gmra.mxu2 %vm564_vm2, %v1344_v33 }
 0x348   :  { %7923 = vmatmul.msk.f32.gmra.mxu3 %vm564_vm2, %v2280_v24  ;;  %7780 = vmatmul.msk.f32.gmra.mxu0 %vm564_vm2, %v1398_v15  ;;  %v1420_v24 = vld [vmem:[#allocation2 + $0x290] sm:$0xff] }
 0x34c   :  { %7795 = vmatmul.msk.f32.gmra.mxu1 %vm564_vm2, %v1413_v26 }
 0x34d   :  { %v10300_v47 = vpop.f32.mrf.mxu0 }
 0x34f   :  { %7859 = vmatmul.msk.f32.gmra.mxu2 %vm564_vm2, %v1345_v5  ;;  %v1421_v5 = vld [vmem:[#allocation2 + $0x2a8] sm:$0xff] }
 0x350   :  { %7924 = vmatmul.msk.f32.gmra.mxu3 %vm564_vm2, %v2281_v43  ;;  %7829 = vmatmul.msk.f32.vlgmr.msra.gmra.mxu0 %vm564_vm2, %v1315_v37  ;;  %v2290_v43 = vld [vmem:[#allocation2 + $0x289] sm:$0xff] }
 0x354   :  { %7796 = vmatmul.msk.f32.gmra.mxu1 %vm564_vm2, %v1414_v46  ;;  %v1353_v46 = vld [vmem:[#allocation2 + $0x2a7] sm:$0xff] }
 0x355   :  { %v10306_v57 = vpop.f32.mrf.mxu0 }
 0x357   :  { %7860 = vmatmul.msk.f32.gmra.mxu2 %vm564_vm2, %v1346_v25  ;;  %v10317_v56 = vpop.f32.mrf.mxu1  ;;  %v7962_v25 = vld [vmem:[%s13973_s2 + $0x68] sm:$0xff] }
 0x358   :  { %7925 = vmatmul.msk.f32.gmra.mxu3 %vm564_vm2, %v2282_v62  ;;  %7830 = vmatmul.msk.f32.gmra.mxu0 %vm564_vm2, %v1316_v48  ;;  %14112 = vst [vmem:[#allocation7_spill] sm:$0xff] %v10317_v56  ;;  %v1440_v56 = vld [vmem:[#allocation2 + $0x3d0] sm:$0xff] }
 0x359   :  { %3063 = vmatpush.msrb.mxu1 %v7962_v25 }
 0x35c   :  { %7797 = vmatmul.msk.f32.gmra.mxu1 %vm564_vm2, %v1415_v8 }
 0x35d   :  { %v10315_v23 = vpop.f32.mrf.mxu0 }
 0x35f   :  { %7861 = vmatmul.msk.f32.gmra.mxu2 %vm564_vm2, %v1347_v36  ;;  %v10330_v3 = vpop.f32.mrf.mxu1 }
 0x360   :  { %7926 = vmatmul.msk.f32.gmra.mxu3 %vm564_vm2, %v2283_v13  ;;  %7831 = vmatmul.msk.f32.gmra.mxu0 %vm564_vm2, %v10320_v42  ;;  %14114 = vst [vmem:[#allocation8_spill] sm:$0xff] %v10330_v3  ;;  %v10391_v13 = vld [vmem:[#allocation2 + $0x87] sm:$0xff] }
 0x361   :  { %v1439_v3 = vld [vmem:[#allocation2 + $0x3c8] sm:$0xff] }
 0x362   :  { %v10325_v16 = vpop.f32.mrf.mxu2 }
 0x363   :  { %14113 = vst [vmem:[#allocation6_spill] sm:$0xff] %v10325_v16  ;;  %v10342_v12 = vpop.f32.mrf.mxu3 }
 0x364   :  { %7798 = vmatmul.msk.f32.gmra.mxu1 %vm564_vm2, %v1416_v45  ;;  %14116 = vst [vmem:[#allocation10_spill] sm:$0xff] %v10342_v12  ;;  %v1438_v12 = vld [vmem:[#allocation2 + $0x3b0] sm:$0xff] }
 0x365   :  { %v10328_v40 = vpop.f32.mrf.mxu0 }
 0x367   :  { %7862 = vmatmul.msk.f32.gmra.mxu2 %vm564_vm2, %v1348_v10 }
 0x368   :  { %7927 = vmatmul.msk.f32.gmra.mxu3 %vm564_vm2, %v2284_v4  ;;  %7832 = vmatmul.msk.f32.gmra.mxu0 %vm564_vm2, %v10333_v1  ;;  %v2291_v4 = vld [vmem:[#allocation2 + $0x291] sm:$0xff] }
 0x369   :  { %v1715_v58 = vpop.f32.mrf.mxu1 }
 0x36a   :  { %v10339_v17 = vpop.f32.mrf.mxu2 }
 0x36b   :  { %14115 = vst [vmem:[#allocation9_spill] sm:$0xff] %v10339_v17 }
 0x36c   :  { %7799 = vmatmul.msk.f32.gmra.mxu1 %vm564_vm2, %v1417_v20 }
 0x36d   :  { %v10344_v2 = vpop.f32.mrf.mxu0 }
 0x36f   :  { %7863 = vmatmul.msk.f32.gmra.mxu2 %vm564_vm2, %v1349_v0  ;;  %v1354_v0 = vld [vmem:[#allocation2 + $0x2af] sm:$0xff] }
 0x370   :  { %7928 = vmatmul.msk.f32.gmra.mxu3 %vm564_vm2, %v2285_v28  ;;  %7833 = vmatmul.msk.f32.gmra.mxu0 %vm564_vm2, %v10346_v61 }
 0x371   :  { %v1718_v21 = vpop.f32.mrf.mxu1 }
 0x372   :  { %v2116_v53 = vpop.f32.mrf.mxu2 }
 0x373   :  { %v2117_v51 = vadd.f32 %v2116_v53, %v1715_v58  ;;  %v10405_v58 = vld [vmem:[#allocation2 + $0x8f] sm:$0xff] }
 0x374   :  { %7800 = vmatmul.msk.f32.gmra.mxu1 %vm564_vm2, %v1418_v44 }
 0x375   :  { %v10353_v27 = vpop.f32.mrf.mxu0 }
 0x377   :  { %7864 = vmatmul.msk.f32.gmra.mxu2 %vm564_vm2, %v1350_v19 }
 0x378   :  { %7929 = vmatmul.msk.f32.gmra.mxu3 %vm564_vm2, %v2286_v32  ;;  %7834 = vmatmul.msk.f32.gmra.mxu0 %vm564_vm2, %v10357_v54  ;;  %v1422_v32 = vld [vmem:[#allocation2 + $0x2b0] sm:$0xff] }
 0x379   :  { %v1721_v22 = vpop.f32.mrf.mxu1 }
 0x37a   :  { %v2119_v52 = vpop.f32.mrf.mxu2 }
 0x37b   :  { %v2120_v63 = vadd.f32 %v2119_v52, %v1718_v21  ;;  %v10416_v52 = vld [vmem:[#allocation2 + $0xa7] sm:$0xff] }
 0x37c   :  { %7801 = vmatmul.msk.f32.gmra.mxu1 %vm564_vm2, %v1419_v30 }
 0x37d   :  { %v10364_v38 = vpop.f32.mrf.mxu0 }
 0x37f   :  { %7865 = vmatmul.msk.f32.gmra.mxu2 %vm564_vm2, %v1351_v14 }
 0x380   :  { %7930 = vmatmul.msk.f32.gmra.mxu3 %vm564_vm2, %v2287_v60  ;;  %7835 = vmatmul.msk.f32.gmra.mxu0 %vm564_vm2, %v10366_v11  ;;  %v2292_v60 = vld [vmem:[#allocation2 + $0x2a9] sm:$0xff] }
 0x381   :  { %v1724_v18 = vpop.f32.mrf.mxu1 }
 0x382   :  { %v2122_v49 = vpop.f32.mrf.mxu2 }
 0x383   :  { %v10355_v6 = vpop.f32.mrf.mxu3  ;;  %v2123_v59 = vadd.f32 %v2122_v49, %v1721_v22  ;;  %v1355_v22 = vld [vmem:[#allocation2 + $0x2c7] sm:$0xff] }
 0x384   :  { %14117 = vst [vmem:[#allocation11_spill] sm:$0xff] %v10355_v6  ;;  %7802 = vmatmul.msk.f32.gmra.mxu1 %vm564_vm2, %v1420_v24 }
 0x385   :  { %v10375_v29 = vpop.f32.mrf.mxu0 }
 0x387   :  { %7866 = vmatmul.msk.f32.gmra.mxu2 %vm564_vm2, %v1352_v50  ;;  %v1356_v50 = vld [vmem:[#allocation2 + $0x2cf] sm:$0xff] }
 0x388   :  { %7931 = vmatmul.msk.f32.gmra.mxu3 %vm564_vm2, %v2288_v31  ;;  %7836 = vmatmul.msk.f32.gmra.mxu0 %vm564_vm2, %v10377_v9  ;;  %v1423_v31 = vld [vmem:[#allocation2 + $0x2c8] sm:$0xff] }
 0x389   :  { %v1727_v37 = vpop.f32.mrf.mxu1 }
 0x38a   :  { %v2125_v15 = vpop.f32.mrf.mxu2 }
 0x38b   :  { %v2586_v7 = vpop.f32.mrf.mxu3  ;;  %v2126_v33 = vadd.f32 %v2125_v15, %v1724_v18  ;;  %v1424_v18 = vld [vmem:[#allocation2 + $0x2d0] sm:$0xff] }
 0x38c   :  { %v10368_v39 = vadd.f32 %v2586_v7, %v2117_v51  ;;  %7803 = vmatmul.msk.f32.gmra.mxu1 %vm564_vm2, %v1421_v5  ;;  %v2293_v7 = vld [vmem:[#allocation2 + $0x2b1] sm:$0xff]  ;;  %v1425_v5 = vld [vmem:[#allocation2 + $0x2e8] sm:$0xff] }
 0x38d   :  { %v10389_v62 = vpop.f32.mrf.mxu0 }
 0x38e   :  { %14118 = vst [vmem:[#allocation12_spill] sm:$0xff] %v10368_v39  ;;  %v1437_v39 = vld [vmem:[#allocation2 + $0x3a8] sm:$0xff] }
 0x38f   :  { %7867 = vmatmul.msk.f32.gmra.mxu2 %vm564_vm2, %v1353_v46  ;;  %v10438_v46 = vld [vmem:[#allocation2 + $0xc7] sm:$0xff] }
 0x390   :  { %7932 = vmatmul.msk.f32.gmra.mxu3 %vm564_vm2, %v2289_v34  ;;  %7837 = vmatmul.msk.f32.gmra.mxu0 %vm564_vm2, %v10391_v13 }
 0x391   :  { %v1730_v45 = vpop.f32.mrf.mxu1 }
 0x392   :  { %v2128_v8 = vpop.f32.mrf.mxu2 }
 0x393   :  { %v2589_v41 = vpop.f32.mrf.mxu3  ;;  %v2129_v36 = vadd.f32 %v2128_v8, %v1727_v37  ;;  %v2295_v8 = vld [vmem:[#allocation2 + $0x2d1] sm:$0xff] }
 0x394   :  { %v10379_v35 = vadd.f32 %v2589_v41, %v2120_v63  ;;  %7804 = vmatmul.msk.f32.gmra.mxu1 %vm564_vm2, %v1422_v32  ;;  %v10427_v41 = vld [vmem:[#allocation2 + $0xaf] sm:$0xff] }
 0x395   :  { %v10403_v28 = vpop.f32.mrf.mxu0 }
 0x396   :  { %14119 = vst [vmem:[#allocation13_spill] sm:$0xff] %v10379_v35 }
 0x397   :  { %7868 = vmatmul.msk.f32.gmra.mxu2 %vm564_vm2, %v1354_v0 }
 0x398   :  { %7933 = vmatmul.msk.f32.gmra.mxu3 %vm564_vm2, %v2290_v43  ;;  %7838 = vmatmul.msk.f32.gmra.mxu0 %vm564_vm2, %v10405_v58  ;;  %v2294_v43 = vld [vmem:[#allocation2 + $0x2c9] sm:$0xff] }
 0x399   :  { %v1733_v44 = vpop.f32.mrf.mxu1 }
 0x39a   :  { %v2131_v53 = vpop.f32.mrf.mxu2 }
 0x39b   :  { %v2592_v26 = vpop.f32.mrf.mxu3  ;;  %v2132_v51 = vadd.f32 %v2131_v53, %v1730_v45  ;;  %v10449_v53 = vld [vmem:[#allocation2 + $0xcf] sm:$0xff] }
 0x39c   :  { %v10393_v48 = vadd.f32 %v2592_v26, %v2123_v59  ;;  %7805 = vmatmul.msk.f32.gmra.mxu1 %vm564_vm2, %v1423_v31 }
 0x39d   :  { %v10414_v21 = vpop.f32.mrf.mxu0 }
 0x39e   :  { %14120 = vst [vmem:[#allocation14_spill] sm:$0xff] %v10393_v48  ;;  %v1436_v48 = vld [vmem:[#allocation2 + $0x390] sm:$0xff] }
 0x39f   :  { %14122 = vst [vmem:[#allocation16_spill] sm:$0xff] %v10414_v21  ;;  %7869 = vmatmul.msk.f32.gmra.mxu2 %vm564_vm2, %v1355_v22 }
 0x3a0   :  { %7934 = vmatmul.msk.f32.gmra.mxu3 %vm564_vm2, %v2291_v4  ;;  %7839 = vmatmul.msk.f32.gmra.mxu0 %vm564_vm2, %v10416_v52  ;;  %v1357_v4 = vld [vmem:[#allocation2 + $0x2e7] sm:$0xff] }
 0x3a1   :  { %v1736_v49 = vpop.f32.mrf.mxu1 }
 0x3a2   :  { %v2134_v30 = vpop.f32.mrf.mxu2 }
 0x3a3   :  { %v2595_v10 = vpop.f32.mrf.mxu3  ;;  %v2135_v14 = vadd.f32 %v2134_v30, %v1733_v44  ;;  %v1358_v44 = vld [vmem:[#allocation2 + $0x2ef] sm:$0xff] }
 0x3a4   :  { %v10407_v20 = vadd.f32 %v2595_v10, %v2126_v33  ;;  %7806 = vmatmul.msk.f32.gmra.mxu1 %vm564_vm2, %v1424_v18 }
 0x3a5   :  { %v10425_v34 = vpop.f32.mrf.mxu0 }
 0x3a6   :  { %14121 = vst [vmem:[#allocation15_spill] sm:$0xff] %v10407_v20 }
 0x3a7   :  { %14124 = vst [vmem:[#allocation18_spill] sm:$0xff] %v10425_v34  ;;  %7870 = vmatmul.msk.f32.gmra.mxu2 %vm564_vm2, %v1356_v50  ;;  %v1359_v50 = vld [vmem:[#allocation2 + $0x307] sm:$0xff]  ;;  %v1378_v34 = vld [vmem:[#allocation2 + $0x42f] sm:$0xff] }
 0x3a8   :  { %7935 = vmatmul.msk.f32.gmra.mxu3 %vm564_vm2, %v2292_v60  ;;  %7840 = vmatmul.msk.f32.gmra.mxu0 %vm564_vm2, %v10427_v41  ;;  %v1426_v60 = vld [vmem:[#allocation2 + $0x2f0] sm:$0xff] }
 0x3a9   :  { %v1739_v37 = vpop.f32.mrf.mxu1 }
 0x3aa   :  { %v2137_v15 = vpop.f32.mrf.mxu2 }
 0x3ab   :  { %v2598_v19 = vpop.f32.mrf.mxu3  ;;  %v2138_v55 = vadd.f32 %v2137_v15, %v1736_v49  ;;  %v1427_v49 = vld [vmem:[#allocation2 + $0x308] sm:$0xff] }
 0x3ac   :  { %v10418_v63 = vadd.f32 %v2598_v19, %v2129_v36  ;;  %7807 = vmatmul.msk.f32.gmra.mxu1 %vm564_vm2, %v1425_v5  ;;  %v2296_v19 = vld [vmem:[#allocation2 + $0x2e9] sm:$0xff] }
 0x3ad   :  { %v10436_v33 = vpop.f32.mrf.mxu0 }
 0x3ae   :  { %14123 = vst [vmem:[#allocation17_spill] sm:$0xff] %v10418_v63  ;;  %v1435_v63 = vld [vmem:[#allocation2 + $0x388] sm:$0xff] }
 0x3af   :  { %14126 = vst [vmem:[#allocation20_spill] sm:$0xff] %v10436_v33  ;;  %7871 = vmatmul.msk.f32.gmra.mxu2 %vm564_vm2, %v1357_v4  ;;  %v1428_v4 = vld [vmem:[#allocation2 + $0x310] sm:$0xff] }
 0x3b0   :  { %7936 = vmatmul.msk.f32.gmra.mxu3 %vm564_vm2, %v2293_v7  ;;  %7841 = vmatmul.msk.f32.gmra.mxu0 %vm564_vm2, %v10438_v46  ;;  %v10648_v33 = vld [vmem:[#allocation2 + $0xe9] sm:$0xff] }
 0x3b1   :  { %v1742_v32 = vpop.f32.mrf.mxu1 }
 0x3b2   :  { %v2140_v36 = vpop.f32.mrf.mxu2 }
 0x3b3   :  { %v2601_v59 = vpop.f32.mrf.mxu3  ;;  %v2141_v45 = vadd.f32 %v2140_v36, %v1739_v37 }
 0x3b4   :  { %v10429_v24 = vadd.f32 %v2601_v59, %v2132_v51  ;;  %7808 = vmatmul.msk.f32.gmra.mxu1 %vm564_vm2, %v1426_v60  ;;  %v10460_v59 = vld [vmem:[#allocation2 + $0xe7] sm:$0xff] }
 0x3b5   :  { %v10447_v10 = vpop.f32.mrf.mxu0 }
 0x3b6   :  { %14125 = vst [vmem:[#allocation19_spill] sm:$0xff] %v10429_v24 }
 0x3b7   :  { %14128 = vst [vmem:[#allocation22_spill] sm:$0xff] %v10447_v10  ;;  %7872 = vmatmul.msk.f32.gmra.mxu2 %vm564_vm2, %v1358_v44 }
 0x3b8   :  { %7937 = vmatmul.msk.f32.gmra.mxu3 %vm564_vm2, %v2294_v43  ;;  %7842 = vmatmul.msk.f32.gmra.mxu0 %vm564_vm2, %v10449_v53  ;;  %v2297_v43 = vld [vmem:[#allocation2 + $0x2f1] sm:$0xff] }
 0x3b9   :  { %v1745_v30 = vpop.f32.mrf.mxu1 }
 0x3ba   :  { %v2143_v31 = vpop.f32.mrf.mxu2 }
 0x3bb   :  { %v2604_v26 = vpop.f32.mrf.mxu3  ;;  %v2144_v22 = vadd.f32 %v2143_v31, %v1742_v32  ;;  %v2298_v32 = vld [vmem:[#allocation2 + $0x309] sm:$0xff] }
 0x3bc   :  { %v10440_v25 = vadd.f32 %v2604_v26, %v2135_v14  ;;  %7809 = vmatmul.msk.f32.gmra.mxu1 %vm564_vm2, %v1427_v49  ;;  %v2254_v31 = vld [vmem:[#allocation2 + $0x9] sm:$0xff] }
 0x3bd   :  { %v10458_v7 = vpop.f32.mrf.mxu0  ;;  %v1361_v49 = vld [vmem:[#allocation2 + $0x327] sm:$0xff] }
 0x3be   :  { %14127 = vst [vmem:[#allocation21_spill] sm:$0xff] %v10440_v25  ;;  %v1366_v25 = vld [vmem:[#allocation2 + $0x36f] sm:$0xff] }
 0x3bf   :  { %14130 = vst [vmem:[#allocation24_spill] sm:$0xff] %v10458_v7  ;;  %7873 = vmatmul.msk.f32.gmra.mxu2 %vm564_vm2, %v1359_v50  ;;  %v2299_v50 = vld [vmem:[#allocation2 + $0x311] sm:$0xff]  ;;  %v1441_v7 = vld [vmem:[#allocation2 + $0x3e8] sm:$0xff] }
 0x3c0   :  { %7938 = vmatmul.msk.f32.gmra.mxu3 %vm564_vm2, %v2295_v8  ;;  %7843 = vmatmul.msk.f32.gmra.mxu0 %vm564_vm2, %v10460_v59  ;;  %v10471_v8 = vld [vmem:[#allocation2 + $0xef] sm:$0xff] }
 0x3c1   :  { %v1748_v26 = vpop.f32.mrf.mxu1 }
 0x3c2   :  { %v2146_v15 = vpop.f32.mrf.mxu2 }
 0x3c3   :  { %v2607_v0 = vpop.f32.mrf.mxu3 }
 0x3c4   :  { %v10451_v51 = vadd.f32 %v2607_v0, %v2138_v55  ;;  %v2147_v55 = vadd.f32 %v2146_v15, %v1745_v30  ;;  %7810 = vmatmul.msk.f32.gmra.mxu1 %vm564_vm2, %v1428_v4  ;;  %v2255_v4 = vld [vmem:[#allocation2 + $0x11] sm:$0xff] }
 0x3c5   :  { %v10469_v37 = vpop.f32.mrf.mxu0 }
 0x3c6   :  { %14129 = vst [vmem:[#allocation23_spill] sm:$0xff] %v10451_v51 }
 0x3c7   :  { %14132 = vst [vmem:[#allocation26_spill] sm:$0xff] %v10469_v37 }
 0x3c8   :  { %7939 = vmatmul.msk.f32.gmra.mxu3 %vm564_vm2, %v2296_v19  ;;  %7844 = vmatmul.msk.f32.gmra.mxu0 %vm564_vm2, %v10471_v8 }
 0x3c9   :  { %v1751_v44 = vpop.f32.mrf.mxu1 }
 0x3ca   :  { %v2149_v0 = vpop.f32.mrf.mxu2 }
 0x3cb   :  { %v2610_v14 = vpop.f32.mrf.mxu3  ;;  %v2150_v60 = vadd.f32 %v2149_v0, %v1748_v26  ;;  %v1362_v0 = vld [vmem:[#allocation2 + $0x32f] sm:$0xff] }
 0x3cc   :  { %v10462_v18 = vadd.f32 %v2610_v14, %v2141_v45  ;;  %v1360_v45 = vld [vmem:[#allocation2 + $0x30f] sm:$0xff] }
 0x3cd   :  { %7874 = vmatmul.msk.f32.gmra.mxu2 %vm564_vm2, %v1360_v45  ;;  %v10480_v19 = vpop.f32.mrf.mxu0 }
 0x3ce   :  { %14131 = vst [vmem:[#allocation25_spill] sm:$0xff] %v10462_v18  ;;  %v10537_v18 = vld [vmem:[#allocation2 + $0x51] sm:$0xff] }
 0x3d0   :  { %7940 = vmatmul.msk.f32.gmra.mxu3 %vm564_vm2, %v2297_v43  ;;  %7897 = vmatmul.msk.f32.vlgmr.msrb.gmra.mxu0 %vm564_vm2, %v2254_v31  ;;  %v2300_v31 = vld [vmem:[#allocation2 + $0x329] sm:$0xff] }
 0x3d1   :  { %v1754_v26 = vpop.f32.mrf.mxu1 }
 0x3d2   :  { %v2152_v43 = vpop.f32.mrf.mxu2 }
 0x3d3   :  { %v2613_v5 = vpop.f32.mrf.mxu3  ;;  %v2153_v15 = vadd.f32 %v2152_v43, %v1751_v44  ;;  %v1431_v43 = vld [vmem:[#allocation2 + $0x348] sm:$0xff] }
 0x3d4   :  { %v10473_v36 = vadd.f32 %v2613_v5, %v2144_v22  ;;  %v1429_v22 = vld [vmem:[#allocation2 + $0x328] sm:$0xff] }
 0x3d5   :  { %7811 = vmatmul.msk.f32.gmra.mxu1 %vm564_vm2, %v1429_v22  ;;  %7875 = vmatmul.msk.f32.gmra.mxu2 %vm564_vm2, %v1361_v49  ;;  %v10488_v5 = vpop.f32.mrf.mxu0 }
 0x3d6   :  { %14133 = vst [vmem:[#allocation27_spill] sm:$0xff] %v10473_v36 }
 0x3d8   :  { %7941 = vmatmul.msk.f32.gmra.mxu3 %vm564_vm2, %v2298_v32  ;;  %v1430_v32 = vld [vmem:[#allocation2 + $0x330] sm:$0xff]  ;;  %7898 = vmatmul.msk.f32.gmra.mxu0 %vm564_vm2, %v2255_v4 }
 0x3d9   :  { %v1757_v22 = vpop.f32.mrf.mxu1  ;;  %v2301_v4 = vld [vmem:[#allocation2 + $0x331] sm:$0xff] }
 0x3db   :  { %v2616_v30 = vpop.f32.mrf.mxu3 }
 0x3dc   :  { %v10482_v14 = vadd.f32 %v2616_v30, %v2147_v55  ;;  %v2155_v30 = vpop.f32.mrf.mxu2 }
 0x3dd   :  { %7812 = vmatmul.msk.f32.gmra.mxu1 %vm564_vm2, %v1430_v32  ;;  %7876 = vmatmul.msk.f32.gmra.mxu2 %vm564_vm2, %v1362_v0  ;;  %v2156_v44 = vadd.f32 %v2155_v30, %v1754_v26  ;;  %v10496_v49 = vpop.f32.mrf.mxu0 }
 0x3de   :  { %14134 = vst [vmem:[#allocation28_spill] sm:$0xff] %v10482_v14  ;;  %v10498_v14 = vld [vmem:[#allocation2 + $0x29] sm:$0xff] }
 0x3e0   :  { %7942 = vmatmul.msk.f32.gmra.mxu3 %vm564_vm2, %v2299_v50  ;;  %7899 = vmatmul.msk.f32.gmra.mxu0 %vm564_vm2, %v10498_v14 }
 0x3e1   :  { %v1760_v0 = vpop.f32.mrf.mxu1 }
 0x3e3   :  { %v2619_v45 = vpop.f32.mrf.mxu3 }
 0x3e4   :  { %v10490_v55 = vadd.f32 %v2619_v45, %v2150_v60  ;;  %v1363_v45 = vld [vmem:[#allocation2 + $0x347] sm:$0xff]  ;;  %v2158_v26 = vpop.f32.mrf.mxu2 }
 0x3e5   :  { %7813 = vmatmul.msk.f32.gmra.mxu1 %vm564_vm2, %v1431_v43  ;;  %7877 = vmatmul.msk.f32.gmra.mxu2 %vm564_vm2, %v1363_v45  ;;  %v2159_v32 = vadd.f32 %v2158_v26, %v1757_v22  ;;  %v1364_v43 = vld [vmem:[#allocation2 + $0x34f] sm:$0xff] }
 0x3e6   :  { %14135 = vst [vmem:[#allocation29_spill] sm:$0xff] %v10490_v55  ;;  %v1432_v55 = vld [vmem:[#allocation2 + $0x350] sm:$0xff] }
 0x3e7   :  { %v2302_v45 = vld [vmem:[#allocation2 + $0x349] sm:$0xff] }
 0x3e8   :  { %7943 = vmatmul.msk.f32.gmra.mxu3 %vm564_vm2, %v2300_v31  ;;  %v10507_v31 = vpop.f32.mrf.mxu0 }
 0x3eb   :  { %v2622_v50 = vpop.f32.mrf.mxu3 }
 0x3ec   :  { %v10500_v60 = vadd.f32 %v2622_v50, %v2153_v15  ;;  %v10509_v15 = vld [vmem:[#allocation2 + $0x31] sm:$0xff]  ;;  %v2161_v22 = vpop.f32.mrf.mxu2 }
 0x3ed   :  { %7814 = vmatmul.msk.f32.gmra.mxu1 %vm564_vm2, %v1432_v55  ;;  %7900 = vmatmul.msk.f32.gmra.mxu0 %vm564_vm2, %v10509_v15  ;;  %v2162_v26 = vadd.f32 %v2161_v22, %v1760_v0  ;;  %v7961_v0 = vld [vmem:[%s13973_s2 + $0x60] sm:$0xff] }
 0x3ee   :  { %14136 = vst [vmem:[#allocation30_spill] sm:$0xff] %v10500_v60  ;;  %7878 = vmatmul.msk.f32.gmra.mxu2 %vm564_vm2, %v1364_v43  ;;  %v1763_v60 = vpop.f32.mrf.mxu1  ;;  %v1365_v43 = vld [vmem:[#allocation2 + $0x367] sm:$0xff]  ;;  %3064 = vmatpush.msrb.mxu1 %v7961_v0 }
 0x3f0   :  { %7944 = vmatmul.msk.f32.gmra.mxu3 %vm564_vm2, %v2301_v4  ;;  %v8029_v4 = vld [vmem:[%s13973_s2 + $0x80] sm:$0xff] }
 0x3f1   :  { %3598 = vmatpush.msrb.mxu2 %v8029_v4 }
 0x3f3   :  { %v2625_v30 = vpop.f32.mrf.mxu3 }
 0x3f4   :  { %v10511_v50 = vadd.f32 %v2625_v30, %v2156_v44  ;;  %v10521_v44 = vpop.f32.mrf.mxu0  ;;  %v1433_v30 = vld [vmem:[#allocation2 + $0x368] sm:$0xff]  ;;  %v2164_v22 = vpop.f32.mrf.mxu2 }
 0x3f5   :  { %7815 = vmatmul.msk.f32.gmra.mxu1 %vm564_vm2, %v1433_v30  ;;  %v2165_v4 = vadd.f32 %v2164_v22, %v1763_v60 }
 0x3f6   :  { %14137 = vst [vmem:[#allocation31_spill] sm:$0xff] %v10511_v50  ;;  %v10523_v50 = vld [vmem:[#allocation2 + $0x49] sm:$0xff]  ;;  %7879 = vmatmul.msk.f32.gmra.mxu2 %vm564_vm2, %v1365_v43 }
 0x3f7   :  { %7901 = vmatmul.msk.f32.gmra.mxu0 %vm564_vm2, %v10523_v50  ;;  %v2304_v43 = vld [vmem:[#allocation2 + $0x369] sm:$0xff] }
 0x3f8   :  { %7945 = vmatmul.msk.f32.gmra.mxu3 %vm564_vm2, %v2302_v45  ;;  %v2303_v45 = vld [vmem:[#allocation2 + $0x351] sm:$0xff] }
 0x3fb   :  { %v2628_v55 = vpop.f32.mrf.mxu3 }
 0x3fc   :  { %v10525_v36 = vadd.f32 %v2628_v55, %v2159_v32  ;;  %v1766_v32 = vpop.f32.mrf.mxu1  ;;  %v10535_v55 = vpop.f32.mrf.mxu0 }
 0x3fd   :  { %v2167_v60 = vpop.f32.mrf.mxu2 }
 0x3fe   :  { %14138 = vst [vmem:[#allocation32_spill] sm:$0xff] %v10525_v36  ;;  %v1434_v36 = vld [vmem:[#allocation2 + $0x370] sm:$0xff]  ;;  %7880 = vmatmul.msk.f32.gmra.mxu2 %vm564_vm2, %v1366_v25  ;;  %v2168_v0 = vadd.f32 %v2167_v60, %v1766_v32 }
 0x3ff   :  { %7816 = vmatmul.msk.f32.gmra.mxu1 %vm564_vm2, %v1434_v36  ;;  %7902 = vmatmul.msk.f32.gmra.mxu0 %vm564_vm2, %v10537_v18  ;;  %v1367_v36 = vld [vmem:[#allocation2 + $0x387] sm:$0xff]  ;;  %v2305_v25 = vld [vmem:[#allocation2 + $0x371] sm:$0xff] }
 0x400   :  { %7946 = vmatmul.msk.f32.gmra.mxu3 %vm564_vm2, %v2303_v45 }
 0x403   :  { %v2631_v30 = vpop.f32.mrf.mxu3 }
 0x404   :  { %v10539_v51 = vadd.f32 %v2631_v30, %v2162_v26  ;;  %v1769_v45 = vpop.f32.mrf.mxu1  ;;  %v10546_v22 = vpop.f32.mrf.mxu0  ;;  %v10548_v26 = vld [vmem:[#allocation2 + $0x69] sm:$0xff] }
 0x405   :  { %v2170_v32 = vpop.f32.mrf.mxu2 }
 0x406   :  { %14139 = vst [vmem:[#allocation33_spill] sm:$0xff] %v10539_v51  ;;  %7881 = vmatmul.msk.f32.gmra.mxu2 %vm564_vm2, %v1367_v36  ;;  %v2306_v36 = vld [vmem:[#allocation2 + $0x389] sm:$0xff] }
 0x407   :  { %7817 = vmatmul.msk.f32.gmra.mxu1 %vm564_vm2, %v1435_v63  ;;  %7903 = vmatmul.msk.f32.gmra.mxu0 %vm564_vm2, %v10548_v26  ;;  %v1368_v63 = vld [vmem:[#allocation2 + $0x38f] sm:$0xff] }
 0x408   :  { %7947 = vmatmul.msk.f32.gmra.mxu3 %vm564_vm2, %v2304_v43  ;;  %v2171_v43 = vadd.f32 %v2170_v32, %v1769_v45 }
 0x40b   :  { %v2634_v24 = vpop.f32.mrf.mxu3 }
 0x40c   :  { %v10550_v30 = vadd.f32 %v2634_v24, %v2165_v4  ;;  %v1772_v60 = vpop.f32.mrf.mxu1  ;;  %v10557_v51 = vpop.f32.mrf.mxu0  ;;  %v10559_v24 = vld [vmem:[#allocation2 + $0x71] sm:$0xff] }
 0x40d   :  { %v2173_v45 = vpop.f32.mrf.mxu2 }
 0x40e   :  { %14140 = vst [vmem:[#allocation34_spill] sm:$0xff] %v10550_v30  ;;  %7882 = vmatmul.msk.f32.gmra.mxu2 %vm564_vm2, %v1368_v63  ;;  %v2307_v63 = vld [vmem:[#allocation2 + $0x391] sm:$0xff] }
 0x40f   :  { %7818 = vmatmul.msk.f32.gmra.mxu1 %vm564_vm2, %v1436_v48  ;;  %7904 = vmatmul.msk.f32.gmra.mxu0 %vm564_vm2, %v10559_v24  ;;  %v1369_v48 = vld [vmem:[#allocation2 + $0x3a7] sm:$0xff] }
 0x410   :  { %7948 = vmatmul.msk.f32.gmra.mxu3 %vm564_vm2, %v2305_v25  ;;  %v2174_v25 = vadd.f32 %v2173_v45, %v1772_v60 }
 0x413   :  { %v2637_v20 = vpop.f32.mrf.mxu3 }
 0x414   :  { %v10561_v4 = vadd.f32 %v2637_v20, %v2168_v0  ;;  %v1775_v32 = vpop.f32.mrf.mxu1  ;;  %v10568_v30 = vpop.f32.mrf.mxu0  ;;  %v10570_v20 = vld [vmem:[#allocation2 + $0x89] sm:$0xff] }
 0x415   :  { %v2176_v60 = vpop.f32.mrf.mxu2 }
 0x416   :  { %14141 = vst [vmem:[#allocation35_spill] sm:$0xff] %v10561_v4  ;;  %7883 = vmatmul.msk.f32.gmra.mxu2 %vm564_vm2, %v1369_v48  ;;  %v2308_v48 = vld [vmem:[#allocation2 + $0x3a9] sm:$0xff] }
 0x417   :  { %7819 = vmatmul.msk.f32.gmra.mxu1 %vm564_vm2, %v1437_v39  ;;  %7905 = vmatmul.msk.f32.gmra.mxu0 %vm564_vm2, %v10570_v20  ;;  %v1370_v39 = vld [vmem:[#allocation2 + $0x3af] sm:$0xff] }
 0x418   :  { %7949 = vmatmul.msk.f32.gmra.mxu3 %vm564_vm2, %v2306_v36  ;;  %v2177_v36 = vadd.f32 %v2176_v60, %v1775_v32 }
 0x41b   :  { %v2640_v35 = vpop.f32.mrf.mxu3 }
 0x41c   :  { %v10572_v0 = vadd.f32 %v2640_v35, %v2171_v43  ;;  %v1778_v45 = vpop.f32.mrf.mxu1  ;;  %v10579_v4 = vpop.f32.mrf.mxu0  ;;  %v10581_v35 = vld [vmem:[#allocation2 + $0x91] sm:$0xff] }
 0x41d   :  { %v2179_v32 = vpop.f32.mrf.mxu2 }
 0x41e   :  { %14142 = vst [vmem:[#allocation36_spill] sm:$0xff] %v10572_v0  ;;  %7884 = vmatmul.msk.f32.gmra.mxu2 %vm564_vm2, %v1370_v39  ;;  %v2309_v39 = vld [vmem:[#allocation2 + $0x3b1] sm:$0xff] }
 0x41f   :  { %7820 = vmatmul.msk.f32.gmra.mxu1 %vm564_vm2, %v1438_v12  ;;  %7906 = vmatmul.msk.f32.gmra.mxu0 %vm564_vm2, %v10581_v35  ;;  %v1371_v12 = vld [vmem:[#allocation2 + $0x3c7] sm:$0xff] }
 0x420   :  { %7950 = vmatmul.msk.f32.gmra.mxu3 %vm564_vm2, %v2307_v63  ;;  %v2180_v63 = vadd.f32 %v2179_v32, %v1778_v45 }
 0x423   :  { %v2643_v6 = vpop.f32.mrf.mxu3 }
 0x424   :  { %v10583_v43 = vadd.f32 %v2643_v6, %v2174_v25  ;;  %v1781_v60 = vpop.f32.mrf.mxu1  ;;  %v10590_v0 = vpop.f32.mrf.mxu0  ;;  %v10592_v6 = vld [vmem:[#allocation2 + $0xa9] sm:$0xff] }
 0x425   :  { %14144 = vst [vmem:[#allocation38_spill] sm:$0xff] %v10590_v0  ;;  %v2182_v45 = vpop.f32.mrf.mxu2 }
 0x426   :  { %14143 = vst [vmem:[#allocation37_spill] sm:$0xff] %v10583_v43  ;;  %7885 = vmatmul.msk.f32.gmra.mxu2 %vm564_vm2, %v1371_v12  ;;  %v2310_v12 = vld [vmem:[#allocation2 + $0x3c9] sm:$0xff] }
 0x427   :  { %7821 = vmatmul.msk.f32.gmra.mxu1 %vm564_vm2, %v1439_v3  ;;  %7907 = vmatmul.msk.f32.gmra.mxu0 %vm564_vm2, %v10592_v6  ;;  %v1372_v3 = vld [vmem:[#allocation2 + $0x3cf] sm:$0xff] }
 0x428   :  { %7951 = vmatmul.msk.f32.gmra.mxu3 %vm564_vm2, %v2308_v48  ;;  %v2183_v48 = vadd.f32 %v2182_v45, %v1781_v60 }
 0x42b   :  { %v2646_v17 = vpop.f32.mrf.mxu3 }
 0x42c   :  { %v10594_v25 = vadd.f32 %v2646_v17, %v2177_v36  ;;  %v1784_v32 = vpop.f32.mrf.mxu1  ;;  %v10601_v43 = vpop.f32.mrf.mxu0  ;;  %v10603_v17 = vld [vmem:[#allocation2 + $0xb1] sm:$0xff] }
 0x42d   :  { %14146 = vst [vmem:[#allocation40_spill] sm:$0xff] %v10601_v43  ;;  %v2185_v60 = vpop.f32.mrf.mxu2 }
 0x42e   :  { %14145 = vst [vmem:[#allocation39_spill] sm:$0xff] %v10594_v25  ;;  %7886 = vmatmul.msk.f32.gmra.mxu2 %vm564_vm2, %v1372_v3  ;;  %v2311_v3 = vld [vmem:[#allocation2 + $0x3d1] sm:$0xff] }
 0x42f   :  { %7822 = vmatmul.msk.f32.gmra.mxu1 %vm564_vm2, %v1440_v56  ;;  %7908 = vmatmul.msk.f32.gmra.mxu0 %vm564_vm2, %v10603_v17  ;;  %v1373_v56 = vld [vmem:[#allocation2 + $0x3e7] sm:$0xff] }
 0x430   :  { %7952 = vmatmul.msk.f32.gmra.mxu3 %vm564_vm2, %v2309_v39  ;;  %v2186_v39 = vadd.f32 %v2185_v60, %v1784_v32 }
 0x433   :  { %v2649_v16 = vpop.f32.mrf.mxu3 }
 0x434   :  { %v10605_v36 = vadd.f32 %v2649_v16, %v2180_v63  ;;  %v1787_v45 = vpop.f32.mrf.mxu1  ;;  %v10612_v25 = vpop.f32.mrf.mxu0  ;;  %v10614_v16 = vld [vmem:[#allocation2 + $0xc9] sm:$0xff] }
 0x435   :  { %14148 = vst [vmem:[#allocation42_spill] sm:$0xff] %v10612_v25  ;;  %v2188_v32 = vpop.f32.mrf.mxu2  ;;  %v1443_v25 = vld [vmem:[#allocation2 + $0x408] sm:$0xff] }
 0x436   :  { %14147 = vst [vmem:[#allocation41_spill] sm:$0xff] %v10605_v36  ;;  %7887 = vmatmul.msk.f32.gmra.mxu2 %vm564_vm2, %v1373_v56  ;;  %v2189_v60 = vadd.f32 %v2188_v32, %v1787_v45  ;;  %v1374_v56 = vld [vmem:[#allocation2 + $0x3ef] sm:$0xff] }
 0x437   :  { %7823 = vmatmul.msk.f32.gmra.mxu1 %vm564_vm2, %v1441_v7  ;;  %7909 = vmatmul.msk.f32.gmra.mxu0 %vm564_vm2, %v10614_v16  ;;  %v8167_v45 = vld [vmem:[%s13973_s2 + $0xd0] sm:$0xff] }
 0x438   :  { %7953 = vmatmul.msk.f32.gmra.mxu3 %vm564_vm2, %v2310_v12  ;;  %v8168_v12 = vld [vmem:[%s13973_s2 + $0xd8] sm:$0xff]  ;;  %v2312_v32 = vld [vmem:[#allocation2 + $0x3e9] sm:$0xff] }
 0x439   :  { %4664 = vmatpush.msra.mxu0 %v8168_v12 }
 0x43b   :  { %v2652_v37 = vpop.f32.mrf.mxu3  ;;  %4665 = vmatpush.msra.mxu0 %v8167_v45  ;;  %v1375_v45 = vld [vmem:[#allocation2 + $0x407] sm:$0xff] }
 0x43c   :  { %v10616_v63 = vadd.f32 %v2652_v37, %v2183_v48  ;;  %v1790_v36 = vpop.f32.mrf.mxu1  ;;  %v10626_v37 = vpop.f32.mrf.mxu0  ;;  %v1442_v48 = vld [vmem:[#allocation2 + $0x3f0] sm:$0xff] }
 0x43d   :  { %14150 = vst [vmem:[#allocation44_spill] sm:$0xff] %v10626_v37  ;;  %v2191_v12 = vpop.f32.mrf.mxu2 }
 0x43e   :  { %14149 = vst [vmem:[#allocation43_spill] sm:$0xff] %v10616_v63  ;;  %v10628_v63 = vld [vmem:[#allocation2 + $0xd1] sm:$0xff]  ;;  %7888 = vmatmul.msk.f32.gmra.mxu2 %vm564_vm2, %v1374_v56 }
 0x43f   :  { %7824 = vmatmul.msk.f32.gmra.mxu1 %vm564_vm2, %v1442_v48  ;;  %7910 = vmatmul.msk.f32.gmra.mxu0 %vm564_vm2, %v10628_v63 }
 0x440   :  { %7954 = vmatmul.msk.f32.gmra.mxu3 %vm564_vm2, %v2311_v3  ;;  %v8166_v3 = vld [vmem:[%s13973_s2 + $0xc8] sm:$0xff] }
 0x441   :  { %4666 = vmatpush.msra.mxu0 %v8166_v3  ;;  %v2313_v3 = vld [vmem:[#allocation2 + $0x3f1] sm:$0xff] }
 0x443   :  { %v2655_v7 = vpop.f32.mrf.mxu3 }
 0x444   :  { %v10630_v10 = vadd.f32 %v2655_v7, %v2186_v39  ;;  %v8165_v39 = vld [vmem:[%s13973_s2 + $0xc0] sm:$0xff]  ;;  %v2192_v7 = vadd.f32 %v2191_v12, %v1790_v36  ;;  %v1793_v48 = vpop.f32.mrf.mxu1 }
 0x445   :  { %4667 = vmatpush.msra.mxu0 %v8165_v39  ;;  %v2194_v36 = vpop.f32.mrf.mxu2  ;;  %v8100_v39 = vld [vmem:[%s13973_s2 + $0xb8] sm:$0xff] }
 0x446   :  { %14151 = vst [vmem:[#allocation45_spill] sm:$0xff] %v10630_v10  ;;  %v10646_v10 = vpop.f32.mrf.mxu0  ;;  %7889 = vmatmul.msk.f32.gmra.mxu2 %vm564_vm2, %v1375_v45  ;;  %4129 = vmatpush.msrb.mxu3 %v8100_v39  ;;  %v1376_v45 = vld [vmem:[#allocation2 + $0x40f] sm:$0xff] }
 0x447   :  { %14152 = vst [vmem:[#allocation46_spill] sm:$0xff] %v10646_v10  ;;  %7825 = vmatmul.msk.f32.gmra.mxu1 %vm564_vm2, %v1443_v25  ;;  %7911 = vmatmul.msk.f32.gmra.mxu0 %vm564_vm2, %v10648_v33 }
 0x448   :  { %7955 = vmatmul.msk.f32.gmra.mxu3 %vm564_vm2, %v2312_v32  ;;  %v2195_v32 = vadd.f32 %v2194_v36, %v1793_v48  ;;  %v8099_v48 = vld [vmem:[%s13973_s2 + $0xb0] sm:$0xff] }
 0x449   :  { %4130 = vmatpush.msrb.mxu3 %v8099_v48  ;;  %v2314_v36 = vld [vmem:[#allocation2 + $0x409] sm:$0xff] }
 0x44a   :  { %v1445_v48 = vld [vmem:[#allocation2 + $0x428] sm:$0xff] }
 0x44b   :  { %v2658_v37 = vpop.f32.mrf.mxu3 }
 0x44c   :  { %v10650_v56 = vadd.f32 %v2658_v37, %v2189_v60  ;;  %v1796_v12 = vpop.f32.mrf.mxu1  ;;  %v1444_v37 = vld [vmem:[#allocation2 + $0x410] sm:$0xff] }
 0x44e   :  { %14153 = vst [vmem:[#allocation47_spill] sm:$0xff] %v10650_v56  ;;  %v10660_v60 = vpop.f32.mrf.mxu0  ;;  %v10662_v56 = vld [vmem:[#allocation2 + $0xf1] sm:$0xff]  ;;  %7890 = vmatmul.msk.f32.gmra.mxu2 %vm564_vm2, %v1376_v45 }
 0x44f   :  { %14154 = vst [vmem:[#allocation48_spill] sm:$0xff] %v10660_v60  ;;  %7826 = vmatmul.msk.f32.gmra.mxu1 %vm564_vm2, %v1444_v37  ;;  %7912 = vmatmul.msk.f32.gmra.mxu0 %vm564_vm2, %v10662_v56 }
 0x450   :  { %7956 = vmatmul.msk.f32.gmra.mxu3 %vm564_vm2, %v2313_v3  ;;  %v8098_v3 = vld [vmem:[%s13973_s2 + $0xa8] sm:$0xff]  ;;  %v2197_v39 = vpop.f32.mrf.mxu2 }
 0x451   :  { %4131 = vmatpush.msrb.mxu3 %v8098_v3  ;;  %v2198_v37 = vadd.f32 %v2197_v39, %v1796_v12  ;;  %v1377_v3 = vld [vmem:[#allocation2 + $0x427] sm:$0xff]  ;;  %v2315_v12 = vld [vmem:[#allocation2 + $0x411] sm:$0xff] }
 0x453   :  { %v2661_v25 = vpop.f32.mrf.mxu3 }
 0x454   :  { %v10664_v10 = vadd.f32 %v2661_v25, %v2192_v7  ;;  %v8097_v7 = vld [vmem:[%s13973_s2 + $0xa0] sm:$0xff]  ;;  %v8304_v25 = vld [vmem:[%s13973_s2 + $0x118] sm:$0xff] }
 0x455   :  { %4132 = vmatpush.msrb.mxu3 %v8097_v7  ;;  %5732 = vmatpush.msra.mxu2 %v8304_v25 }
 0x456   :  { %14155 = vst [vmem:[#allocation49_spill] sm:$0xff] %v10664_v10  ;;  %v1799_v10 = vpop.f32.mrf.mxu1  ;;  %v10683_v60 = vpop.f32.mrf.mxu0  ;;  %7891 = vmatmul.msk.f32.gmra.mxu2 %vm564_vm2, %v1377_v3  ;;  %v2316_v3 = vld [vmem:[#allocation2 + $0x429] sm:$0xff] }
 0x457   :  { %7827 = vmatmul.msk.f32.gmra.mxu1 %vm564_vm2, %v1445_v48  ;;  %8169 = vmatmul.msk.f32.vlgmr.msra.gmra.mxu0 %vm564_vm2, %v10346_v61  ;;  %v1446_v48 = vld [vmem:[#allocation2 + $0x430] sm:$0xff] }
 0x458   :  { %7957 = vmatmul.msk.f32.gmra.mxu3 %vm564_vm2, %v2314_v36  ;;  %v8236_v36 = vld [vmem:[%s13973_s2 + $0xf8] sm:$0xff]  ;;  %v2200_v7 = vpop.f32.mrf.mxu2 }
 0x459   :  { %5198 = vmatpush.msra.mxu1 %v8236_v36  ;;  %v2201_v39 = vadd.f32 %v2200_v7, %v1799_v10 }
 0x45b   :  { %v2664_v45 = vpop.f32.mrf.mxu3 }
 0x45c   :  { %v10685_v43 = vadd.f32 %v2664_v45, %v2195_v32 }
 0x45e   :  { %14156 = vst [vmem:[#allocation50_spill] sm:$0xff] %v10685_v43  ;;  %v1802_v32 = vpop.f32.mrf.mxu1  ;;  %v10695_v25 = vpop.f32.mrf.mxu0  ;;  %7892 = vmatmul.msk.f32.gmra.mxu2 %vm564_vm2, %v1378_v34  ;;  %v2317_v34 = vld [vmem:[#allocation2 + $0x431] sm:$0xff] }
 0x45f   :  { %7828 = vmatmul.msk.f32.gmra.mxu1 %vm564_vm2, %v1446_v48  ;;  %8170 = vmatmul.msk.f32.gmra.mxu0 %vm564_vm2, %v10357_v54 }
 0x460   :  { %7958 = vmatmul.msk.f32.gmra.mxu3 %vm564_vm2, %v2315_v12  ;;  %v2203_v36 = vpop.f32.mrf.mxu2 }
 0x461   :  { %v2204_v10 = vadd.f32 %v2203_v36, %v1802_v32 }
 0x463   :  { %v2667_v45 = vpop.f32.mrf.mxu3 }
 0x464   :  { %v10697_v43 = vadd.f32 %v2667_v45, %v2198_v37  ;;  %v3322_v37 = vld [vmem:[#allocation2 + $0x28] sm:$0xff] }
 0x466   :  { %v1805_v12 = vpop.f32.mrf.mxu1  ;;  %v10704_v7 = vpop.f32.mrf.mxu0  ;;  %8033 = vmatmul.msk.f32.vlgmr.msrb.gmra.mxu2 %vm564_vm2, %v3322_v37 }
 0x467   :  { %7965 = vmatmul.msk.f32.vlgmr.msrb.gmra.mxu1 %vm564_vm2, %v10320_v42  ;;  %8171 = vmatmul.msk.f32.gmra.mxu0 %vm564_vm2, %v10366_v11  ;;  %v3323_v42 = vld [vmem:[#allocation2 + $0x30] sm:$0xff] }
 0x468   :  { %7959 = vmatmul.msk.f32.gmra.mxu3 %vm564_vm2, %v2316_v3  ;;  %v2206_v45 = vpop.f32.mrf.mxu2 }
 0x469   :  { %v2207_v32 = vadd.f32 %v2206_v45, %v1805_v12 }
 0x46b   :  { %v2670_v0 = vpop.f32.mrf.mxu3 }
 0x46c   :  { %v10706_v21 = vadd.f32 %v2670_v0, %v2201_v39 }
 0x46e   :  { %v1808_v48 = vpop.f32.mrf.mxu1  ;;  %v10714_v3 = vpop.f32.mrf.mxu0  ;;  %8034 = vmatmul.msk.f32.gmra.mxu2 %vm564_vm2, %v3323_v42 }
 0x46f   :  { %7966 = vmatmul.msk.f32.gmra.mxu1 %vm564_vm2, %v10333_v1  ;;  %8172 = vmatmul.msk.f32.gmra.mxu0 %vm564_vm2, %v10377_v9  ;;  %v3324_v1 = vld [vmem:[#allocation2 + $0x48] sm:$0xff] }
 0x470   :  { %7960 = vmatmul.msk.f32.gmra.mxu3 %vm564_vm2, %v2317_v34 }
 0x471   :  { %v2209_v39 = vpop.f32.mrf.mxu2 }
 0x472   :  { %v2210_v12 = vadd.f32 %v2209_v39, %v1808_v48 }
 0x473   :  { %v2673_v36 = vpop.f32.mrf.mxu3 }
 0x474   :  { %v10716_v0 = vadd.f32 %v2673_v36, %v2204_v10 }
 0x476   :  { %v1811_v37 = vpop.f32.mrf.mxu1  ;;  %v10725_v34 = vpop.f32.mrf.mxu0  ;;  %8035 = vmatmul.msk.f32.gmra.mxu2 %vm564_vm2, %v3324_v1 }
 0x477   :  { %7967 = vmatmul.msk.f32.gmra.mxu1 %vm564_vm2, %v10346_v61  ;;  %8173 = vmatmul.msk.f32.gmra.mxu0 %vm564_vm2, %v10391_v13  ;;  %v3325_v61 = vld [vmem:[#allocation2 + $0x50] sm:$0xff] }
 0x478   :  { %8101 = vmatmul.msk.f32.vlgmr.msrb.gmra.mxu3 %vm564_vm2, %v10498_v14 }
 0x479   :  { %v2212_v14 = vpop.f32.mrf.mxu2 }
 0x47a   :  { %v2213_v48 = vadd.f32 %v2212_v14, %v1811_v37 }
 0x47b   :  { %v2676_v45 = vpop.f32.mrf.mxu3 }
 0x47c   :  { %v10727_v10 = vadd.f32 %v2676_v45, %v2207_v32 }
 0x47e   :  { %v1814_v36 = vpop.f32.mrf.mxu1  ;;  %v10736_v42 = vpop.f32.mrf.mxu0  ;;  %8036 = vmatmul.msk.f32.gmra.mxu2 %vm564_vm2, %v3325_v61 }
 0x47f   :  { %7968 = vmatmul.msk.f32.gmra.mxu1 %vm564_vm2, %v10357_v54  ;;  %8174 = vmatmul.msk.f32.gmra.mxu0 %vm564_vm2, %v10405_v58  ;;  %v3326_v54 = vld [vmem:[#allocation2 + $0x68] sm:$0xff] }
 0x480   :  { %8102 = vmatmul.msk.f32.gmra.mxu3 %vm564_vm2, %v10509_v15 }
 0x481   :  { %v2215_v15 = vpop.f32.mrf.mxu2 }
 0x482   :  { %v2216_v37 = vadd.f32 %v2215_v15, %v1814_v36 }
 0x483   :  { %v2679_v39 = vpop.f32.mrf.mxu3 }
 0x484   :  { %v10738_v32 = vadd.f32 %v2679_v39, %v2210_v12 }
 0x486   :  { %v1817_v45 = vpop.f32.mrf.mxu1  ;;  %v10747_v1 = vpop.f32.mrf.mxu0  ;;  %8037 = vmatmul.msk.f32.gmra.mxu2 %vm564_vm2, %v3326_v54 }
 0x487   :  { %7969 = vmatmul.msk.f32.gmra.mxu1 %vm564_vm2, %v10366_v11  ;;  %8175 = vmatmul.msk.f32.gmra.mxu0 %vm564_vm2, %v10416_v52  ;;  %v3327_v11 = vld [vmem:[#allocation2 + $0x70] sm:$0xff] }
 0x488   :  { %8103 = vmatmul.msk.f32.gmra.mxu3 %vm564_vm2, %v10523_v50 }
 0x489   :  { %v2218_v50 = vpop.f32.mrf.mxu2 }
 0x48a   :  { %v2219_v36 = vadd.f32 %v2218_v50, %v1817_v45 }
 0x48b   :  { %v2682_v14 = vpop.f32.mrf.mxu3 }
 0x48c   :  { %v10749_v12 = vadd.f32 %v2682_v14, %v2213_v48 }
 0x48e   :  { %v1820_v39 = vpop.f32.mrf.mxu1  ;;  %v10758_v61 = vpop.f32.mrf.mxu0  ;;  %8038 = vmatmul.msk.f32.gmra.mxu2 %vm564_vm2, %v3327_v11 }
 0x48f   :  { %7970 = vmatmul.msk.f32.gmra.mxu1 %vm564_vm2, %v10377_v9  ;;  %8176 = vmatmul.msk.f32.gmra.mxu0 %vm564_vm2, %v10427_v41  ;;  %v3328_v9 = vld [vmem:[#allocation2 + $0x88] sm:$0xff] }
 0x490   :  { %8104 = vmatmul.msk.f32.gmra.mxu3 %vm564_vm2, %v10537_v18 }
 0x491   :  { %v2221_v18 = vpop.f32.mrf.mxu2 }
 0x492   :  { %v2222_v45 = vadd.f32 %v2221_v18, %v1820_v39 }
 0x493   :  { %v2685_v15 = vpop.f32.mrf.mxu3 }
 0x494   :  { %v10760_v48 = vadd.f32 %v2685_v15, %v2216_v37 }
 0x496   :  { %v1823_v14 = vpop.f32.mrf.mxu1  ;;  %v10769_v54 = vpop.f32.mrf.mxu0  ;;  %8039 = vmatmul.msk.f32.gmra.mxu2 %vm564_vm2, %v3328_v9 }
 0x497   :  { %7971 = vmatmul.msk.f32.gmra.mxu1 %vm564_vm2, %v10391_v13  ;;  %8177 = vmatmul.msk.f32.gmra.mxu0 %vm564_vm2, %v10438_v46  ;;  %v3329_v13 = vld [vmem:[#allocation2 + $0x90] sm:$0xff] }
 0x498   :  { %8105 = vmatmul.msk.f32.gmra.mxu3 %vm564_vm2, %v10548_v26 }
 0x499   :  { %v2224_v26 = vpop.f32.mrf.mxu2 }
 0x49a   :  { %v2225_v39 = vadd.f32 %v2224_v26, %v1823_v14 }
 0x49b   :  { %v2688_v50 = vpop.f32.mrf.mxu3 }
 0x49c   :  { %v10771_v37 = vadd.f32 %v2688_v50, %v2219_v36 }
 0x49e   :  { %v1826_v15 = vpop.f32.mrf.mxu1  ;;  %v10780_v11 = vpop.f32.mrf.mxu0  ;;  %8040 = vmatmul.msk.f32.gmra.mxu2 %vm564_vm2, %v3329_v13 }
 0x49f   :  { %7972 = vmatmul.msk.f32.gmra.mxu1 %vm564_vm2, %v10405_v58  ;;  %8178 = vmatmul.msk.f32.gmra.mxu0 %vm564_vm2, %v10449_v53  ;;  %v3330_v58 = vld [vmem:[#allocation2 + $0xa8] sm:$0xff] }
 0x4a0   :  { %8106 = vmatmul.msk.f32.gmra.mxu3 %vm564_vm2, %v10559_v24 }
 0x4a1   :  { %v2227_v24 = vpop.f32.mrf.mxu2 }
 0x4a2   :  { %v2228_v14 = vadd.f32 %v2227_v24, %v1826_v15 }
 0x4a3   :  { %v2691_v18 = vpop.f32.mrf.mxu3 }
 0x4a4   :  { %v10782_v36 = vadd.f32 %v2691_v18, %v2222_v45 }
 0x4a6   :  { %v1829_v50 = vpop.f32.mrf.mxu1  ;;  %v10791_v9 = vpop.f32.mrf.mxu0  ;;  %8041 = vmatmul.msk.f32.gmra.mxu2 %vm564_vm2, %v3330_v58 }
 0x4a7   :  { %7973 = vmatmul.msk.f32.gmra.mxu1 %vm564_vm2, %v10416_v52  ;;  %8179 = vmatmul.msk.f32.gmra.mxu0 %vm564_vm2, %v10460_v59  ;;  %v3331_v52 = vld [vmem:[#allocation2 + $0xb0] sm:$0xff] }
 0x4a8   :  { %8107 = vmatmul.msk.f32.gmra.mxu3 %vm564_vm2, %v10570_v20 }
 0x4a9   :  { %v2230_v20 = vpop.f32.mrf.mxu2 }
 0x4aa   :  { %v2231_v15 = vadd.f32 %v2230_v20, %v1829_v50 }
 0x4ab   :  { %v2694_v26 = vpop.f32.mrf.mxu3 }
 0x4ac   :  { %v10793_v45 = vadd.f32 %v2694_v26, %v2225_v39 }
 0x4ae   :  { %14157 = vst [vmem:[#allocation51_spill] sm:$0xff] %v10793_v45  ;;  %v1832_v18 = vpop.f32.mrf.mxu1  ;;  %v10802_v13 = vpop.f32.mrf.mxu0  ;;  %8042 = vmatmul.msk.f32.gmra.mxu2 %vm564_vm2, %v3331_v52  ;;  %v4404_v45 = vld [vmem:[#allocation2 + $0x10f] sm:$0xff] }
 0x4af   :  { %7974 = vmatmul.msk.f32.gmra.mxu1 %vm564_vm2, %v10427_v41  ;;  %8180 = vmatmul.msk.f32.gmra.mxu0 %vm564_vm2, %v10471_v8  ;;  %v3332_v41 = vld [vmem:[#allocation2 + $0xc8] sm:$0xff] }
 0x4b0   :  { %8108 = vmatmul.msk.f32.gmra.mxu3 %vm564_vm2, %v10581_v35 }
 0x4b1   :  { %v2233_v35 = vpop.f32.mrf.mxu2 }
 0x4b2   :  { %v2234_v50 = vadd.f32 %v2233_v35, %v1832_v18 }
 0x4b3   :  { %v2697_v24 = vpop.f32.mrf.mxu3 }
 0x4b4   :  { %v10804_v39 = vadd.f32 %v2697_v24, %v2228_v14  ;;  %v4403_v14 = vld [vmem:[#allocation2 + $0x107] sm:$0xff] }
 0x4b6   :  { %14158 = vst [vmem:[#allocation52_spill] sm:$0xff] %v10804_v39  ;;  %v1835_v26 = vpop.f32.mrf.mxu1  ;;  %v10813_v58 = vpop.f32.mrf.mxu0  ;;  %8043 = vmatmul.msk.f32.gmra.mxu2 %vm564_vm2, %v3332_v41 }
 0x4b7   :  { %7975 = vmatmul.msk.f32.gmra.mxu1 %vm564_vm2, %v10438_v46  ;;  %8181 = vmatmul.msk.f32.gmra.mxu0 %vm564_vm2, %v4403_v14  ;;  %v3333_v46 = vld [vmem:[#allocation2 + $0xd0] sm:$0xff] }
 0x4b8   :  { %8109 = vmatmul.msk.f32.gmra.mxu3 %vm564_vm2, %v10592_v6 }
 0x4b9   :  { %v2236_v6 = vpop.f32.mrf.mxu2 }
 0x4ba   :  { %v2237_v18 = vadd.f32 %v2236_v6, %v1835_v26 }
 0x4bb   :  { %v2700_v20 = vpop.f32.mrf.mxu3 }
 0x4bc   :  { %v10815_v24 = vadd.f32 %v2700_v20, %v2231_v15 }
 0x4be   :  { %14159 = vst [vmem:[#allocation53_spill] sm:$0xff] %v10815_v24  ;;  %v1838_v52 = vpop.f32.mrf.mxu1  ;;  %v10823_v35 = vpop.f32.mrf.mxu0  ;;  %8044 = vmatmul.msk.f32.gmra.mxu2 %vm564_vm2, %v3333_v46  ;;  %v4405_v24 = vld [vmem:[#allocation2 + $0x127] sm:$0xff] }
 0x4bf   :  { %7976 = vmatmul.msk.f32.gmra.mxu1 %vm564_vm2, %v10449_v53  ;;  %8182 = vmatmul.msk.f32.gmra.mxu0 %vm564_vm2, %v4404_v45  ;;  %v3334_v53 = vld [vmem:[#allocation2 + $0xe8] sm:$0xff] }
 0x4c0   :  { %8110 = vmatmul.msk.f32.gmra.mxu3 %vm564_vm2, %v10603_v17 }
 0x4c1   :  { %v2239_v17 = vpop.f32.mrf.mxu2 }
 0x4c2   :  { %v2240_v26 = vadd.f32 %v2239_v17, %v1838_v52 }
 0x4c3   :  { %v2703_v39 = vpop.f32.mrf.mxu3 }
 0x4c4   :  { %v10825_v15 = vadd.f32 %v2703_v39, %v2234_v50 }
 0x4c6   :  { %14160 = vst [vmem:[#allocation54_spill] sm:$0xff] %v10825_v15  ;;  %v1841_v20 = vpop.f32.mrf.mxu1  ;;  %v10833_v41 = vpop.f32.mrf.mxu0  ;;  %8045 = vmatmul.msk.f32.gmra.mxu2 %vm564_vm2, %v3334_v53  ;;  %v4406_v15 = vld [vmem:[#allocation2 + $0x12f] sm:$0xff] }
 0x4c7   :  { %7977 = vmatmul.msk.f32.gmra.mxu1 %vm564_vm2, %v10460_v59  ;;  %8183 = vmatmul.msk.f32.gmra.mxu0 %vm564_vm2, %v4405_v24  ;;  %v3335_v59 = vld [vmem:[#allocation2 + $0xf0] sm:$0xff] }
 0x4c8   :  { %8111 = vmatmul.msk.f32.gmra.mxu3 %vm564_vm2, %v10614_v16 }
 0x4c9   :  { %v2242_v16 = vpop.f32.mrf.mxu2 }
 0x4ca   :  { %v2243_v50 = vadd.f32 %v2242_v16, %v1841_v20  ;;  %v8303_v20 = vld [vmem:[%s13973_s2 + $0x110] sm:$0xff] }
 0x4cb   :  { %v2706_v6 = vpop.f32.mrf.mxu3  ;;  %5733 = vmatpush.msra.mxu2 %v8303_v20 }
 0x4cc   :  { %v10835_v39 = vadd.f32 %v2706_v6, %v2237_v18 }
 0x4ce   :  { %v1844_v52 = vpop.f32.mrf.mxu1  ;;  %v10843_v46 = vpop.f32.mrf.mxu0  ;;  %8046 = vmatmul.msk.f32.gmra.mxu2 %vm564_vm2, %v3335_v59  ;;  %v3336_v59 = vld [vmem:[#allocation2 + $0x108] sm:$0xff] }
 0x4cf   :  { %7978 = vmatmul.msk.f32.gmra.mxu1 %vm564_vm2, %v10471_v8  ;;  %8184 = vmatmul.msk.f32.gmra.mxu0 %vm564_vm2, %v4406_v15  ;;  %v4407_v8 = vld [vmem:[#allocation2 + $0x147] sm:$0xff] }
 0x4d0   :  { %8112 = vmatmul.msk.f32.gmra.mxu3 %vm564_vm2, %v10628_v63 }
 0x4d1   :  { %v2245_v63 = vpop.f32.mrf.mxu2 }
 0x4d2   :  { %v2246_v6 = vadd.f32 %v2245_v63, %v1844_v52 }
 0x4d3   :  { %v2709_v17 = vpop.f32.mrf.mxu3 }
 0x4d4   :  { %v10845_v18 = vadd.f32 %v2709_v17, %v2240_v26 }
 0x4d6   :  { %14161 = vst [vmem:[#allocation55_spill] sm:$0xff] %v10845_v18  ;;  %v1847_v53 = vpop.f32.mrf.mxu1  ;;  %v10856_v26 = vpop.f32.mrf.mxu0  ;;  %8047 = vmatmul.msk.f32.gmra.mxu2 %vm564_vm2, %v3336_v59  ;;  %v3870_v59 = vld [vmem:[#allocation2 + $0x109] sm:$0xff] }
 0x4d7   :  { %14162 = vst [vmem:[#allocation56_spill] sm:$0xff] %v10856_v26  ;;  %7979 = vmatmul.msk.f32.gmra.mxu1 %vm564_vm2, %v4403_v14  ;;  %8185 = vmatmul.msk.f32.gmra.mxu0 %vm564_vm2, %v4407_v8  ;;  %v4408_v14 = vld [vmem:[#allocation2 + $0x14f] sm:$0xff]  ;;  %v10878_v18 = vld [vmem:[#allocation2 + $0x167] sm:$0xff] }
 0x4d8   :  { %8113 = vmatmul.msk.f32.gmra.mxu3 %vm564_vm2, %v10648_v33  ;;  %v8235_v33 = vld [vmem:[%s13973_s2 + $0xf0] sm:$0xff] }
 0x4d9   :  { %5199 = vmatpush.msra.mxu1 %v8235_v33  ;;  %v2248_v52 = vpop.f32.mrf.mxu2 }
 0x4da   :  { %v2249_v63 = vadd.f32 %v2248_v52, %v1847_v53 }
 0x4db   :  { %v2712_v16 = vpop.f32.mrf.mxu3 }
 0x4dc   :  { %v10858_v17 = vadd.f32 %v2712_v16, %v2243_v50 }
 0x4de   :  { %14163 = vst [vmem:[#allocation57_spill] sm:$0xff] %v10858_v17  ;;  %v1850_v20 = vpop.f32.mrf.mxu1  ;;  %v10868_v50 = vpop.f32.mrf.mxu0  ;;  %v3337_v17 = vld [vmem:[#allocation2 + $0x110] sm:$0xff] }
 0x4df   :  { %14164 = vst [vmem:[#allocation58_spill] sm:$0xff] %v10868_v50  ;;  %7980 = vmatmul.msk.f32.gmra.mxu1 %vm564_vm2, %v4404_v45  ;;  %8186 = vmatmul.msk.f32.gmra.mxu0 %vm564_vm2, %v4408_v14  ;;  %v3338_v45 = vld [vmem:[#allocation2 + $0x128] sm:$0xff] }
 0x4e0   :  { %8114 = vmatmul.msk.f32.gmra.mxu3 %vm564_vm2, %v10662_v56  ;;  %8048 = vmatmul.msk.f32.gmra.mxu2 %vm564_vm2, %v3337_v17  ;;  %v2063_v17 = vadd.f32 %v10480_v19, %v10300_v47  ;;  %v2066_v47 = vadd.f32 %v10488_v5, %v10306_v57  ;;  %v3873_v5 = vld [vmem:[#allocation2 + $0x131] sm:$0xff] }
 0x4e1   :  { %v2251_v56 = vpop.f32.mrf.mxu2 }
 0x4e2   :  { %v2252_v33 = vadd.f32 %v2251_v56, %v1850_v20  ;;  %v3871_v20 = vld [vmem:[#allocation2 + $0x111] sm:$0xff] }
 0x4e3   :  { %v2715_v16 = vpop.f32.mrf.mxu3 }
 0x4e4   :  { %v10870_v26 = vadd.f32 %v2715_v16, %v2246_v6 }
 0x4e6   :  { %v3066_v53 = vpop.f32.mrf.mxu1  ;;  %v10876_v52 = vpop.f32.mrf.mxu0 }
 0x4e7   :  { %14165 = vst [vmem:[#allocation59_spill] sm:$0xff] %v10876_v52  ;;  %7981 = vmatmul.msk.f32.gmra.mxu1 %vm564_vm2, %v4405_v24  ;;  %8187 = vmatmul.msk.f32.gmra.mxu0 %vm564_vm2, %v10878_v18  ;;  %v10892_v24 = vld [vmem:[#allocation2 + $0x16f] sm:$0xff] }
 0x4e8   :  { %8115 = vmatmul.msk.f32.gmra.mxu3 %vm564_vm2, %v3870_v59  ;;  %8049 = vmatmul.msk.f32.gmra.mxu2 %vm564_vm2, %v3338_v45  ;;  %v3339_v45 = vld [vmem:[#allocation2 + $0x130] sm:$0xff] }
 0x4e9   :  { %v3600_v16 = vpop.f32.mrf.mxu2 }
 0x4eb   :  { %v2718_v50 = vpop.f32.mrf.mxu3 }
 0x4ec   :  { %v10880_v6 = vadd.f32 %v2718_v50, %v2249_v63  ;;  %v2724_v63 = vadd.f32 %v10683_v60, %v2063_v17 }
 0x4ee   :  { %14166 = vst [vmem:[#allocation60_spill] sm:$0xff] %v10880_v6  ;;  %v3069_v59 = vpop.f32.mrf.mxu1  ;;  %v10889_v56 = vpop.f32.mrf.mxu0  ;;  %v3258_v19 = vadd.f32 %v3066_v53, %v2724_v63  ;;  %v2069_v63 = vadd.f32 %v10496_v49, %v10315_v23 }
 0x4ef   :  { %14167 = vst [vmem:[#allocation61_spill] sm:$0xff] %v10889_v56  ;;  %7982 = vmatmul.msk.f32.gmra.mxu1 %vm564_vm2, %v4406_v15  ;;  %8188 = vmatmul.msk.f32.gmra.mxu0 %vm564_vm2, %v10892_v24 }
 0x4f0   :  { %8116 = vmatmul.msk.f32.gmra.mxu3 %vm564_vm2, %v3871_v20  ;;  %8050 = vmatmul.msk.f32.gmra.mxu2 %vm564_vm2, %v3339_v45  ;;  %v3872_v20 = vld [vmem:[#allocation2 + $0x129] sm:$0xff]  ;;  %v3792_v60 = vadd.f32 %v3600_v16, %v3258_v19 }
 0x4f1   :  { %v3603_v17 = vpop.f32.mrf.mxu2  ;;  %v3340_v45 = vld [vmem:[#allocation2 + $0x148] sm:$0xff] }
 0x4f2   :  { %v10917_v19 = vld [vmem:[#allocation2 + $0x18f] sm:$0xff] }
 0x4f3   :  { %v2721_v50 = vpop.f32.mrf.mxu3 }
 0x4f4   :  { %v10894_v52 = vadd.f32 %v2721_v50, %v2252_v33  ;;  %v2725_v33 = vadd.f32 %v10695_v25, %v2066_v47 }
 0x4f6   :  { %14168 = vst [vmem:[#allocation62_spill] sm:$0xff] %v10894_v52  ;;  %v3072_v56 = vpop.f32.mrf.mxu1  ;;  %v10904_v50 = vpop.f32.mrf.mxu0  ;;  %v10906_v52 = vld [vmem:[#allocation2 + $0x187] sm:$0xff]  ;;  %v3259_v57 = vadd.f32 %v3069_v59, %v2725_v33  ;;  %v3341_v59 = vld [vmem:[#allocation2 + $0x150] sm:$0xff] }
 0x4f7   :  { %7983 = vmatmul.msk.f32.gmra.mxu1 %vm564_vm2, %v4407_v8  ;;  %8189 = vmatmul.msk.f32.gmra.mxu0 %vm564_vm2, %v10906_v52  ;;  %v2726_v8 = vadd.f32 %v10704_v7, %v2069_v63  ;;  %v3874_v33 = vld [vmem:[#allocation2 + $0x149] sm:$0xff]  ;;  %v2072_v7 = vadd.f32 %v10507_v31, %v10328_v40  ;;  %v3875_v40 = vld [vmem:[#allocation2 + $0x151] sm:$0xff] }
 0x4f8   :  { %8117 = vmatmul.msk.f32.gmra.mxu3 %vm564_vm2, %v3872_v20  ;;  %8051 = vmatmul.msk.f32.gmra.mxu2 %vm564_vm2, %v3340_v45  ;;  %v3793_v25 = vadd.f32 %v3603_v17, %v3259_v57  ;;  %v10931_v57 = vld [vmem:[#allocation2 + $0x1a7] sm:$0xff] }
 0x4f9   :  { %v3606_v53 = vpop.f32.mrf.mxu2  ;;  %v3260_v17 = vadd.f32 %v3072_v56, %v2726_v8  ;;  %v3342_v56 = vld [vmem:[#allocation2 + $0x168] sm:$0xff] }
 0x4fb   :  { %v4134_v15 = vpop.f32.mrf.mxu3  ;;  %v3794_v23 = vadd.f32 %v3606_v53, %v3260_v17 }
 0x4fc   :  { %v10908_v6 = vadd.f32 %v4134_v15, %v3792_v60 }
 0x4fe   :  { %v3075_v16 = vpop.f32.mrf.mxu1  ;;  %v10922_v60 = vpop.f32.mrf.mxu0 }
 0x4ff   :  { %7984 = vmatmul.msk.f32.gmra.mxu1 %vm564_vm2, %v4408_v14  ;;  %8190 = vmatmul.msk.f32.gmra.mxu0 %vm564_vm2, %v10917_v19  ;;  %v2727_v14 = vadd.f32 %v10714_v3, %v2072_v7  ;;  %v2078_v7 = vadd.f32 %v10535_v55, %v10353_v27 }
 0x500   :  { %8118 = vmatmul.msk.f32.gmra.mxu3 %vm564_vm2, %v3873_v5  ;;  %8052 = vmatmul.msk.f32.gmra.mxu2 %vm564_vm2, %v3341_v59 }
 0x501   :  { %v3609_v49 = vpop.f32.mrf.mxu2 }
 0x503   :  { %v4137_v47 = vpop.f32.mrf.mxu3 }
 0x504   :  { %v10920_v20 = vadd.f32 %v4137_v47, %v3793_v25  ;;  %v3261_v25 = vadd.f32 %v3075_v16, %v2727_v14  ;;  %v2075_v47 = vadd.f32 %v10521_v44, %v10344_v2  ;;  %v3343_v16 = vld [vmem:[#allocation2 + $0x170] sm:$0xff]  ;;  %v2729_v14 = vadd.f32 %v10736_v42, %v2078_v7 }
 0x505   :  { %v2081_v42 = vadd.f32 %v10546_v22, %v10364_v38  ;;  %v3878_v38 = vld [vmem:[#allocation2 + $0x189] sm:$0xff] }
 0x506   :  { %v3078_v15 = vpop.f32.mrf.mxu1  ;;  %v10941_v53 = vpop.f32.mrf.mxu0  ;;  %v3795_v31 = vadd.f32 %v3609_v49, %v3261_v25  ;;  %v2728_v59 = vadd.f32 %v10725_v34, %v2075_v47 }
 0x507   :  { %7985 = vmatmul.msk.f32.gmra.mxu1 %vm564_vm2, %v10878_v18  ;;  %8191 = vmatmul.msk.f32.gmra.mxu0 %vm564_vm2, %v10931_v57  ;;  %v10946_v18 = vld [vmem:[#allocation2 + $0x1af] sm:$0xff] }
 0x508   :  { %8119 = vmatmul.msk.f32.gmra.mxu3 %vm564_vm2, %v3874_v33  ;;  %8053 = vmatmul.msk.f32.gmra.mxu2 %vm564_vm2, %v3342_v56  ;;  %v3262_v33 = vadd.f32 %v3078_v15, %v2728_v59  ;;  %v3344_v15 = vld [vmem:[#allocation2 + $0x188] sm:$0xff] }
 0x509   :  { %v3612_v63 = vpop.f32.mrf.mxu2 }
 0x50a   :  { %v3796_v2 = vadd.f32 %v3612_v63, %v3262_v33 }
 0x50b   :  { %v4140_v45 = vpop.f32.mrf.mxu3 }
 0x50c   :  { %v10934_v5 = vadd.f32 %v4140_v45, %v3794_v23  ;;  %v3876_v23 = vld [vmem:[#allocation2 + $0x169] sm:$0xff] }
 0x50e   :  { %v3081_v3 = vpop.f32.mrf.mxu1  ;;  %v10957_v44 = vpop.f32.mrf.mxu0 }
 0x50f   :  { %7986 = vmatmul.msk.f32.gmra.mxu1 %vm564_vm2, %v10892_v24  ;;  %8192 = vmatmul.msk.f32.gmra.mxu0 %vm564_vm2, %v10946_v18  ;;  %v10961_v24 = vld [vmem:[#allocation2 + $0x1c7] sm:$0xff]  ;;  %v3263_v25 = vadd.f32 %v3081_v3, %v2729_v14  ;;  %v3345_v3 = vld [vmem:[#allocation2 + $0x190] sm:$0xff] }
 0x510   :  { %8120 = vmatmul.msk.f32.gmra.mxu3 %vm564_vm2, %v3875_v40  ;;  %8054 = vmatmul.msk.f32.gmra.mxu2 %vm564_vm2, %v3343_v16  ;;  %v3877_v40 = vld [vmem:[#allocation2 + $0x171] sm:$0xff] }
 0x511   :  { %v3615_v49 = vpop.f32.mrf.mxu2 }
 0x512   :  { %v3797_v27 = vadd.f32 %v3615_v49, %v3263_v25  ;;  %v10989_v49 = vld [vmem:[#allocation2 + $0x1e7] sm:$0xff]  ;;  %v2087_v25 = vadd.f32 %v10568_v30, %v10389_v62 }
 0x513   :  { %v4143_v8 = vpop.f32.mrf.mxu3  ;;  %v3880_v62 = vld [vmem:[#allocation2 + $0x1a9] sm:$0xff] }
 0x514   :  { %v10949_v17 = vadd.f32 %v4143_v8, %v3795_v31  ;;  %v2730_v8 = vadd.f32 %v10747_v1, %v2081_v42  ;;  %v2084_v1 = vadd.f32 %v10557_v51, %v10375_v29  ;;  %v3879_v29 = vld [vmem:[#allocation2 + $0x191] sm:$0xff] }
 0x516   :  { %v3084_v34 = vpop.f32.mrf.mxu1  ;;  %v10974_v63 = vpop.f32.mrf.mxu0 }
 0x517   :  { %7987 = vmatmul.msk.f32.gmra.mxu1 %vm564_vm2, %v10906_v52  ;;  %8193 = vmatmul.msk.f32.gmra.mxu0 %vm564_vm2, %v10961_v24  ;;  %v10976_v52 = vld [vmem:[#allocation2 + $0x1cf] sm:$0xff]  ;;  %v3264_v16 = vadd.f32 %v3084_v34, %v2730_v8 }
 0x518   :  { %8121 = vmatmul.msk.f32.gmra.mxu3 %vm564_vm2, %v3876_v23  ;;  %8055 = vmatmul.msk.f32.gmra.mxu2 %vm564_vm2, %v3344_v15  ;;  %v3346_v34 = vld [vmem:[#allocation2 + $0x1a8] sm:$0xff] }
 0x519   :  { %v3618_v55 = vpop.f32.mrf.mxu2 }
 0x51a   :  { %v3798_v22 = vadd.f32 %v3618_v55, %v3264_v16 }
 0x51b   :  { %v4146_v45 = vpop.f32.mrf.mxu3 }
 0x51c   :  { %v10964_v56 = vadd.f32 %v4146_v45, %v3796_v2 }
 0x51e   :  { %v3087_v31 = vpop.f32.mrf.mxu1  ;;  %v10994_v45 = vpop.f32.mrf.mxu0 }
 0x51f   :  { %7988 = vmatmul.msk.f32.gmra.mxu1 %vm564_vm2, %v10917_v19  ;;  %8194 = vmatmul.msk.f32.gmra.mxu0 %vm564_vm2, %v10976_v52  ;;  %v2731_v19 = vadd.f32 %v10758_v61, %v2084_v1  ;;  %v3881_v1 = vld [vmem:[#allocation2 + $0x1b1] sm:$0xff] }
 0x520   :  { %8122 = vmatmul.msk.f32.gmra.mxu3 %vm564_vm2, %v3877_v40  ;;  %8056 = vmatmul.msk.f32.gmra.mxu2 %vm564_vm2, %v3345_v3  ;;  %v2090_v3 = vadd.f32 %v10579_v4, %v10403_v28 }
 0x521   :  { %v3621_v33 = vpop.f32.mrf.mxu2  ;;  %v3265_v14 = vadd.f32 %v3087_v31, %v2731_v19  ;;  %v3347_v31 = vld [vmem:[#allocation2 + $0x1b0] sm:$0xff] }
 0x522   :  { %v14169_v19 = vld [vmem:[#allocation16_spill] sm:$0xff] }
 0x523   :  { %v4149_v47 = vpop.f32.mrf.mxu3  ;;  %v3799_v51 = vadd.f32 %v3621_v33, %v3265_v14  ;;  %v3348_v33 = vld [vmem:[#allocation2 + $0x1c8] sm:$0xff] }
 0x524   :  { %v10979_v59 = vadd.f32 %v4149_v47, %v3797_v27  ;;  %v11004_v27 = vld [vmem:[#allocation2 + $0x1ef] sm:$0xff] }
 0x526   :  { %v3090_v23 = vpop.f32.mrf.mxu1  ;;  %v11014_v47 = vpop.f32.mrf.mxu0 }
 0x527   :  { %7989 = vmatmul.msk.f32.gmra.mxu1 %vm564_vm2, %v10931_v57  ;;  %8195 = vmatmul.msk.f32.gmra.mxu0 %vm564_vm2, %v10989_v49  ;;  %v2732_v57 = vadd.f32 %v10769_v54, %v2087_v25 }
 0x528   :  { %8123 = vmatmul.msk.f32.gmra.mxu3 %vm564_vm2, %v3878_v38  ;;  %8057 = vmatmul.msk.f32.gmra.mxu2 %vm564_vm2, %v3346_v34  ;;  %v2733_v38 = vadd.f32 %v10780_v11, %v2090_v3  ;;  %v14170_v34 = vld [vmem:[#allocation38_spill] sm:$0xff] }
 0x529   :  { %v3624_v15 = vpop.f32.mrf.mxu2  ;;  %v3266_v42 = vadd.f32 %v3090_v23, %v2732_v57  ;;  %v2093_v14 = vadd.f32 %v14170_v34, %v14169_v19  ;;  %v4422_v19 = vld [vmem:[#allocation2 + $0x22f] sm:$0xff] }
 0x52a   :  { %v14173_v34 = vld [vmem:[#allocation20_spill] sm:$0xff] }
 0x52b   :  { %v4152_v2 = vpop.f32.mrf.mxu3  ;;  %v3800_v30 = vadd.f32 %v3624_v15, %v3266_v42 }
 0x52c   :  { %v10992_v7 = vadd.f32 %v4152_v2, %v3798_v22 }
 0x52e   :  { %v3093_v61 = vpop.f32.mrf.mxu1  ;;  %v11029_v2 = vpop.f32.mrf.mxu0 }
 0x52f   :  { %7990 = vmatmul.msk.f32.gmra.mxu1 %vm564_vm2, %v10946_v18  ;;  %8196 = vmatmul.msk.f32.gmra.mxu0 %vm564_vm2, %v11004_v27  ;;  %v11019_v18 = vld [vmem:[#allocation2 + $0x207] sm:$0xff]  ;;  %v3267_v23 = vadd.f32 %v3093_v61, %v2733_v38  ;;  %v3349_v61 = vld [vmem:[#allocation2 + $0x1d0] sm:$0xff] }
 0x530   :  { %8124 = vmatmul.msk.f32.gmra.mxu3 %vm564_vm2, %v3879_v29  ;;  %8058 = vmatmul.msk.f32.gmra.mxu2 %vm564_vm2, %v3347_v31 }
 0x531   :  { %v3627_v8 = vpop.f32.mrf.mxu2 }
 0x532   :  { %v3801_v28 = vadd.f32 %v3627_v8, %v3267_v23  ;;  %v3883_v23 = vld [vmem:[#allocation2 + $0x1d1] sm:$0xff] }
 0x533   :  { %v4155_v40 = vpop.f32.mrf.mxu3 }
 0x534   :  { %v11007_v55 = vadd.f32 %v4155_v40, %v3799_v51  ;;  %v2734_v51 = vadd.f32 %v10791_v9, %v2093_v14  ;;  %v3882_v40 = vld [vmem:[#allocation2 + $0x1c9] sm:$0xff]  ;;  %v14171_v9 = vld [vmem:[#allocation18_spill] sm:$0xff] }
 0x536   :  { %v3096_v54 = vpop.f32.mrf.mxu1  ;;  %v11047_v3 = vpop.f32.mrf.mxu0 }
 0x537   :  { %7991 = vmatmul.msk.f32.gmra.mxu1 %vm564_vm2, %v10961_v24  ;;  %8197 = vmatmul.msk.f32.gmra.mxu0 %vm564_vm2, %v11019_v18  ;;  %v11034_v24 = vld [vmem:[#allocation2 + $0x20f] sm:$0xff]  ;;  %v3268_v25 = vadd.f32 %v3096_v54, %v2734_v51 }
 0x538   :  { %8125 = vmatmul.msk.f32.gmra.mxu3 %vm564_vm2, %v3880_v62  ;;  %8059 = vmatmul.msk.f32.gmra.mxu2 %vm564_vm2, %v3348_v33  ;;  %v4421_v62 = vld [vmem:[#allocation2 + $0x227] sm:$0xff] }
 0x539   :  { %v3630_v4 = vpop.f32.mrf.mxu2  ;;  %v3350_v54 = vld [vmem:[#allocation2 + $0x1e8] sm:$0xff] }
 0x53a   :  { %v3802_v57 = vadd.f32 %v3630_v4, %v3268_v25 }
 0x53b   :  { %v4158_v16 = vpop.f32.mrf.mxu3 }
 0x53c   :  { %v11022_v22 = vadd.f32 %v4158_v16, %v3800_v30  ;;  %v14172_v30 = vld [vmem:[#allocation40_spill] sm:$0xff] }
 0x53d   :  { %v2096_v8 = vadd.f32 %v14172_v30, %v14171_v9  ;;  %v14175_v9 = vld [vmem:[#allocation22_spill] sm:$0xff]  ;;  %v14176_v30 = vld [vmem:[#allocation44_spill] sm:$0xff] }
 0x53e   :  { %v3099_v11 = vpop.f32.mrf.mxu1 }
 0x53f   :  { %7992 = vmatmul.msk.f32.gmra.mxu1 %vm564_vm2, %v10976_v52  ;;  %8198 = vmatmul.msk.f32.gmra.mxu0 %vm564_vm2, %v11034_v24  ;;  %v2735_v16 = vadd.f32 %v10802_v13, %v2096_v8  ;;  %v14174_v13 = vld [vmem:[#allocation42_spill] sm:$0xff] }
 0x540   :  { %8126 = vmatmul.msk.f32.gmra.mxu3 %vm564_vm2, %v3881_v1  ;;  %8060 = vmatmul.msk.f32.gmra.mxu2 %vm564_vm2, %v3349_v61  ;;  %v2099_v14 = vadd.f32 %v14174_v13, %v14173_v34  ;;  %v14177_v34 = vld [vmem:[#allocation24_spill] sm:$0xff]  ;;  %v14178_v13 = vld [vmem:[#allocation46_spill] sm:$0xff] }
 0x541   :  { %v3633_v31 = vpop.f32.mrf.mxu2  ;;  %v3269_v33 = vadd.f32 %v3099_v11, %v2735_v16  ;;  %v3351_v11 = vld [vmem:[#allocation2 + $0x1f0] sm:$0xff] }
 0x542   :  { %v2736_v51 = vadd.f32 %v10813_v58, %v2099_v14  ;;  %v8302_v58 = vld [vmem:[%s13973_s2 + $0x108] sm:$0xff]  ;;  %v2105_v14 = vadd.f32 %v14178_v13, %v14177_v34  ;;  %v14182_v34 = vld [vmem:[#allocation6_spill] sm:$0xff] }
 0x543   :  { %v4161_v29 = vpop.f32.mrf.mxu3  ;;  %v3803_v1 = vadd.f32 %v3633_v31, %v3269_v33  ;;  %5734 = vmatpush.msra.mxu2 %v8302_v58  ;;  %v8234_v33 = vld [vmem:[%s13973_s2 + $0xe8] sm:$0xff] }
 0x544   :  { %v11037_v15 = vadd.f32 %v4161_v29, %v3801_v28  ;;  %5200 = vmatpush.msra.mxu1 %v8234_v33 }
 0x546   :  { %v3102_v42 = vpop.f32.mrf.mxu1 }
 0x547   :  { %7993 = vmatmul.msk.f32.gmra.mxu1 %vm564_vm2, %v10989_v49  ;;  %8199 = vmatmul.msk.f32.gmra.mxu0 %vm564_vm2, %v4421_v62  ;;  %v11060_v49 = vpop.f32.mrf.mxu0  ;;  %v3270_v25 = vadd.f32 %v3102_v42, %v2736_v51  ;;  %v11092_v51 = vld [vmem:[#allocation2 + $0x28f] sm:$0xff] }
 0x548   :  { %8127 = vmatmul.msk.f32.gmra.mxu3 %vm564_vm2, %v3882_v40  ;;  %8061 = vmatmul.msk.f32.gmra.mxu2 %vm564_vm2, %v3350_v54  ;;  %v3884_v40 = vld [vmem:[#allocation2 + $0x1e9] sm:$0xff] }
 0x549   :  { %v3636_v28 = vpop.f32.mrf.mxu2  ;;  %v3352_v54 = vld [vmem:[#allocation2 + $0x208] sm:$0xff] }
 0x54b   :  { %v4164_v52 = vpop.f32.mrf.mxu3 }
 0x54c   :  { %v11050_v38 = vadd.f32 %v4164_v52, %v3802_v57  ;;  %v3804_v57 = vadd.f32 %v3636_v28, %v3270_v25  ;;  %v11074_v52 = vld [vmem:[#allocation2 + $0x287] sm:$0xff] }
 0x54e   :  { %v3105_v4 = vpop.f32.mrf.mxu1 }
 0x54f   :  { %7994 = vmatmul.msk.f32.gmra.mxu1 %vm564_vm2, %v11004_v27  ;;  %8200 = vmatmul.msk.f32.gmra.mxu0 %vm564_vm2, %v4422_v19  ;;  %v2102_v27 = vadd.f32 %v14176_v30, %v14175_v9  ;;  %v14179_v30 = vld [vmem:[#allocation26_spill] sm:$0xff] }
 0x550   :  { %8128 = vmatmul.msk.f32.gmra.mxu3 %vm564_vm2, %v3883_v23  ;;  %8062 = vmatmul.msk.f32.gmra.mxu2 %vm564_vm2, %v3351_v11  ;;  %v11087_v23 = vpop.f32.mrf.mxu0  ;;  %v2738_v11 = vadd.f32 %v10833_v41, %v2105_v14 }
 0x551   :  { %v3639_v31 = vpop.f32.mrf.mxu2  ;;  %v2737_v16 = vadd.f32 %v10823_v35, %v2102_v27  ;;  %v3885_v35 = vld [vmem:[#allocation2 + $0x1f1] sm:$0xff] }
 0x552   :  { %v14180_v27 = vld [vmem:[#allocation48_spill] sm:$0xff] }
 0x553   :  { %v4167_v29 = vpop.f32.mrf.mxu3 }
 0x554   :  { %v11062_v61 = vadd.f32 %v4167_v29, %v3803_v1  ;;  %v3271_v1 = vadd.f32 %v3105_v4, %v2737_v16  ;;  %v3353_v4 = vld [vmem:[#allocation2 + $0x210] sm:$0xff] }
 0x556   :  { %v3108_v62 = vpop.f32.mrf.mxu1  ;;  %v3805_v28 = vadd.f32 %v3639_v31, %v3271_v1 }
 0x557   :  { %7995 = vmatmul.msk.f32.gmra.mxu1 %vm564_vm2, %v11019_v18  ;;  %8201 = vmatmul.msk.f32.gmra.mxu0 %vm564_vm2, %v11074_v52 }
 0x558   :  { %8129 = vmatmul.msk.f32.gmra.mxu3 %vm564_vm2, %v3884_v40  ;;  %8063 = vmatmul.msk.f32.gmra.mxu2 %vm564_vm2, %v3352_v54  ;;  %v3272_v40 = vadd.f32 %v3108_v62, %v2738_v11  ;;  %v11102_v31 = vpop.f32.mrf.mxu0  ;;  %v11107_v54 = vld [vmem:[#allocation2 + $0x2a7] sm:$0xff]  ;;  %v14184_v11 = vld [vmem:[#allocation9_spill] sm:$0xff] }
 0x559   :  { %v3642_v19 = vpop.f32.mrf.mxu2  ;;  %v3354_v62 = vld [vmem:[#allocation2 + $0x268] sm:$0xff] }
 0x55a   :  { %v3806_v58 = vadd.f32 %v3642_v19, %v3272_v40  ;;  %v14181_v19 = vld [vmem:[#allocation7_spill] sm:$0xff] }
 0x55b   :  { %v4170_v8 = vpop.f32.mrf.mxu3  ;;  %v2111_v13 = vadd.f32 %v14182_v34, %v14181_v19 }
 0x55c   :  { %v11077_v42 = vadd.f32 %v4170_v8, %v3804_v57  ;;  %v3886_v57 = vld [vmem:[#allocation2 + $0x209] sm:$0xff]  ;;  %v2108_v8 = vadd.f32 %v14180_v27, %v14179_v30 }
 0x55d   :  { %v2821_v30 = vld [vmem:[#allocation2 + $0x26f] sm:$0xff] }
 0x55e   :  { %v3111_v18 = vpop.f32.mrf.mxu1  ;;  %v2739_v33 = vadd.f32 %v10843_v46, %v2108_v8  ;;  %v14183_v46 = vld [vmem:[#allocation8_spill] sm:$0xff]  ;;  %v14185_v8 = vld [vmem:[#allocation10_spill] sm:$0xff] }
 0x55f   :  { %7996 = vmatmul.msk.f32.gmra.mxu1 %vm564_vm2, %v11034_v24  ;;  %8202 = vmatmul.msk.f32.gmra.mxu0 %vm564_vm2, %v11092_v51  ;;  %v2820_v24 = vld [vmem:[#allocation2 + $0x267] sm:$0xff]  ;;  %v4426_v27 = vld [vmem:[#allocation2 + $0x2af] sm:$0xff] }
 0x560   :  { %8130 = vmatmul.msk.f32.gmra.mxu3 %vm564_vm2, %v3885_v35  ;;  %8064 = vmatmul.msk.f32.gmra.mxu2 %vm564_vm2, %v3353_v4  ;;  %v3273_v35 = vadd.f32 %v3111_v18, %v2739_v33  ;;  %v2114_v4 = vadd.f32 %v14184_v11, %v14183_v46  ;;  %v4427_v11 = vld [vmem:[#allocation2 + $0x2c7] sm:$0xff] }
 0x563   :  { %v4173_v29 = vpop.f32.mrf.mxu3  ;;  %v3645_v9 = vpop.f32.mrf.mxu2 }
 0x564   :  { %v11095_v25 = vadd.f32 %v4173_v29, %v3805_v28  ;;  %v3887_v28 = vld [vmem:[#allocation2 + $0x211] sm:$0xff]  ;;  %v3807_v14 = vadd.f32 %v3645_v9, %v3273_v35  ;;  %v14186_v9 = vld [vmem:[#allocation11_spill] sm:$0xff] }
 0x565   :  { %v2741_v33 = vadd.f32 %v14186_v9, %v2114_v4  ;;  %v3888_v35 = vld [vmem:[#allocation2 + $0x269] sm:$0xff] }
 0x566   :  { %v3114_v41 = vpop.f32.mrf.mxu1  ;;  %v3356_v4 = vld [vmem:[#allocation2 + $0x288] sm:$0xff] }
 0x567   :  { %7997 = vmatmul.msk.f32.gmra.mxu1 %vm564_vm2, %v2820_v24  ;;  %8203 = vmatmul.msk.f32.gmra.mxu0 %vm564_vm2, %v11107_v54  ;;  %v3355_v24 = vld [vmem:[#allocation2 + $0x270] sm:$0xff] }
 0x568   :  { %8131 = vmatmul.msk.f32.gmra.mxu3 %vm564_vm2, %v3886_v57  ;;  %8065 = vmatmul.msk.f32.gmra.mxu2 %vm564_vm2, %v3354_v62  ;;  %v11121_v57 = vpop.f32.mrf.mxu0 }
 0x56b   :  { %v4176_v16 = vpop.f32.mrf.mxu3  ;;  %v3648_v29 = vpop.f32.mrf.mxu2 }
 0x56c   :  { %v11110_v1 = vadd.f32 %v4176_v16, %v3806_v58  ;;  %v2740_v16 = vadd.f32 %v14185_v8, %v2111_v13 }
 0x56e   :  { %v3117_v40 = vpop.f32.mrf.mxu1  ;;  %v3274_v62 = vadd.f32 %v3114_v41, %v2740_v16  ;;  %v3889_v41 = vld [vmem:[#allocation2 + $0x271] sm:$0xff] }
 0x56f   :  { %7998 = vmatmul.msk.f32.gmra.mxu1 %vm564_vm2, %v2821_v30  ;;  %8204 = vmatmul.msk.f32.gmra.mxu0 %vm564_vm2, %v4426_v27 }
 0x570   :  { %8132 = vmatmul.msk.f32.gmra.mxu3 %vm564_vm2, %v3887_v28  ;;  %8066 = vmatmul.msk.f32.gmra.mxu2 %vm564_vm2, %v3355_v24  ;;  %v3275_v28 = vadd.f32 %v3117_v40, %v2741_v33  ;;  %v3808_v19 = vadd.f32 %v3648_v29, %v3274_v62  ;;  %v14187_v40 = vld [vmem:[#allocation12_spill] sm:$0xff] }
 0x571   :  { %v4428_v33 = vld [vmem:[#allocation2 + $0x2cf] sm:$0xff] }
 0x573   :  { %v4179_v58 = vpop.f32.mrf.mxu3  ;;  %v3651_v34 = vpop.f32.mrf.mxu2 }
 0x574   :  { %v11124_v18 = vadd.f32 %v4179_v58, %v3807_v14  ;;  %v3809_v46 = vadd.f32 %v3651_v34, %v3275_v28  ;;  %v11131_v58 = vpop.f32.mrf.mxu0  ;;  %v3890_v28 = vld [vmem:[#allocation2 + $0x289] sm:$0xff] }
 0x576   :  { %v3120_v13 = vpop.f32.mrf.mxu1 }
 0x577   :  { %7999 = vmatmul.msk.f32.gmra.mxu1 %vm564_vm2, %v11074_v52  ;;  %8205 = vmatmul.msk.f32.gmra.mxu0 %vm564_vm2, %v4427_v11  ;;  %v3276_v29 = vadd.f32 %v3120_v13, %v14187_v40  ;;  %v3357_v52 = vld [vmem:[#allocation2 + $0x290] sm:$0xff] }
 0x578   :  { %8133 = vmatmul.msk.f32.gmra.mxu3 %vm564_vm2, %v3888_v35  ;;  %8067 = vmatmul.msk.f32.gmra.mxu2 %vm564_vm2, %v3356_v4 }
 0x57b   :  { %v4182_v14 = vpop.f32.mrf.mxu3  ;;  %v3654_v8 = vpop.f32.mrf.mxu2 }
 0x57c   :  { %v11133_v30 = vadd.f32 %v4182_v14, %v3808_v19  ;;  %v3810_v16 = vadd.f32 %v3654_v8, %v3276_v29  ;;  %v11147_v35 = vpop.f32.mrf.mxu0  ;;  %v14189_v19 = vld [vmem:[#allocation13_spill] sm:$0xff]  ;;  %v14190_v8 = vld [vmem:[#allocation14_spill] sm:$0xff] }
 0x57d   :  { %14188 = vst [vmem:[#allocation16_spill] sm:$0xff] %v11147_v35  ;;  %v3891_v29 = vld [vmem:[#allocation2 + $0x291] sm:$0xff] }
 0x57e   :  { %v3123_v24 = vpop.f32.mrf.mxu1 }
 0x57f   :  { %8000 = vmatmul.msk.f32.gmra.mxu1 %vm564_vm2, %v11092_v51  ;;  %8206 = vmatmul.msk.f32.gmra.mxu0 %vm564_vm2, %v4428_v33  ;;  %v3277_v34 = vadd.f32 %v3123_v24, %v14189_v19  ;;  %v3358_v51 = vld [vmem:[#allocation2 + $0x2a8] sm:$0xff] }
 0x580   :  { %8134 = vmatmul.msk.f32.gmra.mxu3 %vm564_vm2, %v3889_v41  ;;  %8068 = vmatmul.msk.f32.gmra.mxu2 %vm564_vm2, %v3357_v52  ;;  %v4429_v41 = vld [vmem:[#allocation2 + $0x2e7] sm:$0xff] }
 0x583   :  { %v4185_v9 = vpop.f32.mrf.mxu3  ;;  %v3657_v13 = vpop.f32.mrf.mxu2 }
 0x584   :  { %v11141_v62 = vadd.f32 %v4185_v9, %v3809_v46  ;;  %v3811_v14 = vadd.f32 %v3657_v13, %v3277_v34  ;;  %v11158_v9 = vpop.f32.mrf.mxu0  ;;  %v4430_v34 = vld [vmem:[#allocation2 + $0x2ef] sm:$0xff] }
 0x585   :  { %14191 = vst [vmem:[#allocation38_spill] sm:$0xff] %v11158_v9 }
 0x586   :  { %v3126_v4 = vpop.f32.mrf.mxu1 }
 0x587   :  { %8001 = vmatmul.msk.f32.gmra.mxu1 %vm564_vm2, %v11107_v54  ;;  %8207 = vmatmul.msk.f32.gmra.mxu0 %vm564_vm2, %v4429_v41  ;;  %v3278_v24 = vadd.f32 %v3126_v4, %v14190_v8  ;;  %v3359_v54 = vld [vmem:[#allocation2 + $0x2b0] sm:$0xff]  ;;  %v14193_v4 = vld [vmem:[#allocation15_spill] sm:$0xff] }
 0x588   :  { %8135 = vmatmul.msk.f32.gmra.mxu3 %vm564_vm2, %v3890_v28  ;;  %8069 = vmatmul.msk.f32.gmra.mxu2 %vm564_vm2, %v3358_v51 }
 0x58b   :  { %v4188_v46 = vpop.f32.mrf.mxu3  ;;  %v3660_v52 = vpop.f32.mrf.mxu2 }
 0x58c   :  { %v11151_v40 = vadd.f32 %v4188_v46, %v3810_v16  ;;  %v3812_v28 = vadd.f32 %v3660_v52, %v3278_v24  ;;  %v3892_v46 = vld [vmem:[#allocation2 + $0x2a9] sm:$0xff]  ;;  %v11168_v52 = vpop.f32.mrf.mxu0 }
 0x58d   :  { %14194 = vst [vmem:[#allocation40_spill] sm:$0xff] %v11168_v52 }
 0x58e   :  { %v3129_v19 = vpop.f32.mrf.mxu1 }
 0x58f   :  { %8002 = vmatmul.msk.f32.gmra.mxu1 %vm564_vm2, %v4426_v27  ;;  %8208 = vmatmul.msk.f32.gmra.mxu0 %vm564_vm2, %v4430_v34  ;;  %v3279_v51 = vadd.f32 %v3129_v19, %v14193_v4  ;;  %v3360_v27 = vld [vmem:[#allocation2 + $0x2c8] sm:$0xff]  ;;  %v14196_v19 = vld [vmem:[#allocation17_spill] sm:$0xff] }
 0x590   :  { %8136 = vmatmul.msk.f32.gmra.mxu3 %vm564_vm2, %v3891_v29  ;;  %8070 = vmatmul.msk.f32.gmra.mxu2 %vm564_vm2, %v3359_v54  ;;  %v3893_v54 = vld [vmem:[#allocation2 + $0x2b1] sm:$0xff] }
 0x593   :  { %v4191_v16 = vpop.f32.mrf.mxu3  ;;  %v3663_v29 = vpop.f32.mrf.mxu2 }
 0x594   :  { %v11161_v13 = vadd.f32 %v4191_v16, %v3811_v14  ;;  %v3813_v8 = vadd.f32 %v3663_v29, %v3279_v51  ;;  %v4431_v14 = vld [vmem:[#allocation2 + $0x307] sm:$0xff]  ;;  %v11177_v35 = vpop.f32.mrf.mxu0 }
 0x595   :  { %14197 = vst [vmem:[#allocation42_spill] sm:$0xff] %v11177_v35 }
 0x596   :  { %14192 = vst [vmem:[#allocation18_spill] sm:$0xff] %v11161_v13  ;;  %v3132_v24 = vpop.f32.mrf.mxu1  ;;  %v4432_v13 = vld [vmem:[#allocation2 + $0x30f] sm:$0xff] }
 0x597   :  { %8003 = vmatmul.msk.f32.gmra.mxu1 %vm564_vm2, %v4427_v11  ;;  %8209 = vmatmul.msk.f32.gmra.mxu0 %vm564_vm2, %v4431_v14  ;;  %v3280_v4 = vadd.f32 %v3132_v24, %v14196_v19  ;;  %v3361_v11 = vld [vmem:[#allocation2 + $0x2d0] sm:$0xff]  ;;  %v14199_v24 = vld [vmem:[#allocation19_spill] sm:$0xff] }
 0x598   :  { %8137 = vmatmul.msk.f32.gmra.mxu3 %vm564_vm2, %v3892_v46  ;;  %8071 = vmatmul.msk.f32.gmra.mxu2 %vm564_vm2, %v3360_v27 }
 0x59b   :  { %v4194_v9 = vpop.f32.mrf.mxu3  ;;  %v3666_v46 = vpop.f32.mrf.mxu2 }
 0x59c   :  { %v11170_v16 = vadd.f32 %v4194_v9, %v3812_v28  ;;  %v3814_v51 = vadd.f32 %v3666_v46, %v3280_v4  ;;  %v3894_v28 = vld [vmem:[#allocation2 + $0x2c9] sm:$0xff] }
 0x59e   :  { %14195 = vst [vmem:[#allocation20_spill] sm:$0xff] %v11170_v16  ;;  %v3135_v29 = vpop.f32.mrf.mxu1  ;;  %v4433_v16 = vld [vmem:[#allocation2 + $0x327] sm:$0xff] }
 0x59f   :  { %8004 = vmatmul.msk.f32.gmra.mxu1 %vm564_vm2, %v4428_v33  ;;  %8210 = vmatmul.msk.f32.gmra.mxu0 %vm564_vm2, %v4432_v13  ;;  %v3281_v27 = vadd.f32 %v3135_v29, %v14199_v24  ;;  %v3362_v33 = vld [vmem:[#allocation2 + $0x2e8] sm:$0xff]  ;;  %v14202_v29 = vld [vmem:[#allocation21_spill] sm:$0xff] }
 0x5a0   :  { %8138 = vmatmul.msk.f32.gmra.mxu3 %vm564_vm2, %v3893_v54  ;;  %8072 = vmatmul.msk.f32.gmra.mxu2 %vm564_vm2, %v3361_v11 }
 0x5a3   :  { %v4197_v52 = vpop.f32.mrf.mxu3  ;;  %v3669_v54 = vpop.f32.mrf.mxu2 }
 0x5a4   :  { %v11179_v9 = vadd.f32 %v4197_v52, %v3813_v8  ;;  %v3815_v19 = vadd.f32 %v3669_v54, %v3281_v27  ;;  %v11191_v8 = vpop.f32.mrf.mxu0  ;;  %v3895_v52 = vld [vmem:[#allocation2 + $0x2d1] sm:$0xff] }
 0x5a5   :  { %14201 = vst [vmem:[#allocation24_spill] sm:$0xff] %v11191_v8  ;;  %v14204_v8 = vld [vmem:[#allocation23_spill] sm:$0xff] }
 0x5a6   :  { %14198 = vst [vmem:[#allocation22_spill] sm:$0xff] %v11179_v9  ;;  %v3138_v4 = vpop.f32.mrf.mxu1 }
 0x5a7   :  { %8005 = vmatmul.msk.f32.gmra.mxu1 %vm564_vm2, %v4429_v41  ;;  %8211 = vmatmul.msk.f32.gmra.mxu0 %vm564_vm2, %v4433_v16  ;;  %v3282_v11 = vadd.f32 %v3138_v4, %v14202_v29  ;;  %v3363_v41 = vld [vmem:[#allocation2 + $0x2f0] sm:$0xff] }
 0x5a8   :  { %8139 = vmatmul.msk.f32.gmra.mxu3 %vm564_vm2, %v3894_v28  ;;  %8073 = vmatmul.msk.f32.gmra.mxu2 %vm564_vm2, %v3362_v33  ;;  %v3896_v33 = vld [vmem:[#allocation2 + $0x2e9] sm:$0xff] }
 0x5ab   :  { %v4200_v46 = vpop.f32.mrf.mxu3  ;;  %v3672_v28 = vpop.f32.mrf.mxu2 }
 0x5ac   :  { %v11186_v35 = vadd.f32 %v4200_v46, %v3814_v51  ;;  %v3816_v24 = vadd.f32 %v3672_v28, %v3282_v11  ;;  %v4434_v51 = vld [vmem:[#allocation2 + $0x32f] sm:$0xff]  ;;  %v11201_v4 = vpop.f32.mrf.mxu0 }
 0x5ad   :  { %14205 = vst [vmem:[#allocation26_spill] sm:$0xff] %v11201_v4 }
 0x5ae   :  { %14200 = vst [vmem:[#allocation44_spill] sm:$0xff] %v11186_v35  ;;  %v3141_v27 = vpop.f32.mrf.mxu1 }
 0x5af   :  { %8006 = vmatmul.msk.f32.gmra.mxu1 %vm564_vm2, %v4430_v34  ;;  %8212 = vmatmul.msk.f32.gmra.mxu0 %vm564_vm2, %v4434_v51  ;;  %v3283_v35 = vadd.f32 %v3141_v27, %v14204_v8  ;;  %v3364_v34 = vld [vmem:[#allocation2 + $0x308] sm:$0xff]  ;;  %v14207_v8 = vld [vmem:[#allocation25_spill] sm:$0xff] }
 0x5b0   :  { %8140 = vmatmul.msk.f32.gmra.mxu3 %vm564_vm2, %v3895_v52  ;;  %8074 = vmatmul.msk.f32.gmra.mxu2 %vm564_vm2, %v3363_v41  ;;  %v3897_v41 = vld [vmem:[#allocation2 + $0x2f1] sm:$0xff] }
 0x5b3   :  { %v4203_v54 = vpop.f32.mrf.mxu3  ;;  %v3675_v52 = vpop.f32.mrf.mxu2 }
 0x5b4   :  { %v11195_v46 = vadd.f32 %v4203_v54, %v3815_v19  ;;  %v3817_v29 = vadd.f32 %v3675_v52, %v3283_v35  ;;  %v4435_v19 = vld [vmem:[#allocation2 + $0x347] sm:$0xff]  ;;  %v11211_v52 = vpop.f32.mrf.mxu0 }
 0x5b5   :  { %14208 = vst [vmem:[#allocation7_spill] sm:$0xff] %v11211_v52 }
 0x5b6   :  { %14203 = vst [vmem:[#allocation46_spill] sm:$0xff] %v11195_v46  ;;  %v3144_v11 = vpop.f32.mrf.mxu1 }
 0x5b7   :  { %8007 = vmatmul.msk.f32.gmra.mxu1 %vm564_vm2, %v4431_v14  ;;  %8213 = vmatmul.msk.f32.gmra.mxu0 %vm564_vm2, %v4435_v19  ;;  %v3284_v27 = vadd.f32 %v3144_v11, %v14207_v8  ;;  %v3365_v14 = vld [vmem:[#allocation2 + $0x310] sm:$0xff]  ;;  %v14210_v11 = vld [vmem:[#allocation27_spill] sm:$0xff] }
 0x5b8   :  { %8141 = vmatmul.msk.f32.gmra.mxu3 %vm564_vm2, %v3896_v33  ;;  %8075 = vmatmul.msk.f32.gmra.mxu2 %vm564_vm2, %v3364_v34  ;;  %v3898_v34 = vld [vmem:[#allocation2 + $0x309] sm:$0xff] }
 0x5bb   :  { %v4206_v28 = vpop.f32.mrf.mxu3  ;;  %v3678_v33 = vpop.f32.mrf.mxu2 }
 0x5bc   :  { %v11204_v54 = vadd.f32 %v4206_v28, %v3816_v24  ;;  %v3818_v4 = vadd.f32 %v3678_v33, %v3284_v27  ;;  %v4436_v24 = vld [vmem:[#allocation2 + $0x34f] sm:$0xff]  ;;  %v11220_v9 = vpop.f32.mrf.mxu0 }
 0x5bd   :  { %14211 = vst [vmem:[#allocation8_spill] sm:$0xff] %v11220_v9 }
 0x5be   :  { %14206 = vst [vmem:[#allocation48_spill] sm:$0xff] %v11204_v54  ;;  %v3147_v35 = vpop.f32.mrf.mxu1  ;;  %v4437_v54 = vld [vmem:[#allocation2 + $0x367] sm:$0xff] }
 0x5bf   :  { %8008 = vmatmul.msk.f32.gmra.mxu1 %vm564_vm2, %v4432_v13  ;;  %8214 = vmatmul.msk.f32.gmra.mxu0 %vm564_vm2, %v4436_v24  ;;  %v3285_v8 = vadd.f32 %v3147_v35, %v14210_v11  ;;  %v3366_v13 = vld [vmem:[#allocation2 + $0x328] sm:$0xff]  ;;  %v14213_v35 = vld [vmem:[#allocation28_spill] sm:$0xff] }
 0x5c0   :  { %8142 = vmatmul.msk.f32.gmra.mxu3 %vm564_vm2, %v3897_v41  ;;  %8076 = vmatmul.msk.f32.gmra.mxu2 %vm564_vm2, %v3365_v14 }
 0x5c3   :  { %v4209_v46 = vpop.f32.mrf.mxu3  ;;  %v3681_v41 = vpop.f32.mrf.mxu2 }
 0x5c4   :  { %v11213_v28 = vadd.f32 %v4209_v46, %v3817_v29  ;;  %v3819_v27 = vadd.f32 %v3681_v41, %v3285_v8  ;;  %v3899_v29 = vld [vmem:[#allocation2 + $0x311] sm:$0xff] }
 0x5c6   :  { %14209 = vst [vmem:[#allocation6_spill] sm:$0xff] %v11213_v28  ;;  %v3150_v33 = vpop.f32.mrf.mxu1  ;;  %v4438_v28 = vld [vmem:[#allocation2 + $0x36f] sm:$0xff] }
 0x5c7   :  { %8009 = vmatmul.msk.f32.gmra.mxu1 %vm564_vm2, %v4433_v16  ;;  %8215 = vmatmul.msk.f32.gmra.mxu0 %vm564_vm2, %v4437_v54  ;;  %v3286_v14 = vadd.f32 %v3150_v33, %v14213_v35  ;;  %v3367_v16 = vld [vmem:[#allocation2 + $0x330] sm:$0xff]  ;;  %v14216_v33 = vld [vmem:[#allocation29_spill] sm:$0xff] }
 0x5c8   :  { %8143 = vmatmul.msk.f32.gmra.mxu3 %vm564_vm2, %v3898_v34  ;;  %8077 = vmatmul.msk.f32.gmra.mxu2 %vm564_vm2, %v3366_v13 }
 0x5cb   :  { %v4212_v52 = vpop.f32.mrf.mxu3  ;;  %v3684_v34 = vpop.f32.mrf.mxu2 }
 0x5cc   :  { %v11222_v46 = vadd.f32 %v4212_v52, %v3818_v4  ;;  %v3820_v11 = vadd.f32 %v3684_v34, %v3286_v14  ;;  %v11234_v4 = vpop.f32.mrf.mxu0  ;;  %v3900_v52 = vld [vmem:[#allocation2 + $0x329] sm:$0xff] }
 0x5cd   :  { %14215 = vst [vmem:[#allocation11_spill] sm:$0xff] %v11234_v4  ;;  %v4439_v34 = vld [vmem:[#allocation2 + $0x387] sm:$0xff]  ;;  %v3369_v4 = vld [vmem:[#allocation2 + $0x350] sm:$0xff] }
 0x5ce   :  { %14212 = vst [vmem:[#allocation9_spill] sm:$0xff] %v11222_v46  ;;  %v3153_v8 = vpop.f32.mrf.mxu1 }
 0x5cf   :  { %8010 = vmatmul.msk.f32.gmra.mxu1 %vm564_vm2, %v4434_v51  ;;  %8216 = vmatmul.msk.f32.gmra.mxu0 %vm564_vm2, %v4438_v28  ;;  %v3287_v13 = vadd.f32 %v3153_v8, %v14216_v33  ;;  %v8233_v8 = vld [vmem:[%s13973_s2 + $0xe0] sm:$0xff] }
 0x5d0   :  { %8144 = vmatmul.msk.f32.gmra.mxu3 %vm564_vm2, %v3899_v29  ;;  %8078 = vmatmul.msk.f32.gmra.mxu2 %vm564_vm2, %v3367_v16  ;;  %v3368_v16 = vld [vmem:[#allocation2 + $0x348] sm:$0xff]  ;;  %v14218_v33 = vld [vmem:[#allocation30_spill] sm:$0xff] }
 0x5d1   :  { %5201 = vmatpush.msra.mxu1 %v8233_v8 }
 0x5d3   :  { %v4215_v41 = vpop.f32.mrf.mxu3  ;;  %v3687_v29 = vpop.f32.mrf.mxu2 }
 0x5d4   :  { %v11229_v9 = vadd.f32 %v4215_v41, %v3819_v27  ;;  %v8301_v27 = vld [vmem:[%s13973_s2 + $0x100] sm:$0xff]  ;;  %v3821_v35 = vadd.f32 %v3687_v29, %v3287_v13  ;;  %v11250_v29 = vpop.f32.mrf.mxu0 }
 0x5d5   :  { %5735 = vmatpush.msra.mxu2 %v8301_v27  ;;  %14219 = vst [vmem:[#allocation13_spill] sm:$0xff] %v11250_v29 }
 0x5d6   :  { %14214 = vst [vmem:[#allocation10_spill] sm:$0xff] %v11229_v9  ;;  %v3156_v14 = vpop.f32.mrf.mxu1 }
 0x5d7   :  { %8011 = vmatmul.msk.f32.gmra.mxu1 %vm564_vm2, %v4435_v19  ;;  %8217 = vmatmul.msk.f32.gmra.mxu0 %vm564_vm2, %v4439_v34  ;;  %v3288_v13 = vadd.f32 %v3156_v14, %v14218_v33  ;;  %v14221_v14 = vld [vmem:[#allocation31_spill] sm:$0xff] }
 0x5d8   :  { %8145 = vmatmul.msk.f32.gmra.mxu3 %vm564_vm2, %v3900_v52  ;;  %8079 = vmatmul.msk.f32.gmra.mxu2 %vm564_vm2, %v3368_v16  ;;  %v3901_v52 = vld [vmem:[#allocation2 + $0x331] sm:$0xff]  ;;  %v3902_v16 = vld [vmem:[#allocation2 + $0x349] sm:$0xff] }
 0x5db   :  { %v4218_v51 = vpop.f32.mrf.mxu3 }
 0x5dc   :  { %v11241_v41 = vadd.f32 %v4218_v51, %v3820_v11  ;;  %v3690_v11 = vpop.f32.mrf.mxu2 }
 0x5dd   :  { %v3822_v27 = vadd.f32 %v3690_v11, %v3288_v13  ;;  %v11260_v11 = vpop.f32.mrf.mxu0 }
 0x5de   :  { %14217 = vst [vmem:[#allocation12_spill] sm:$0xff] %v11241_v41  ;;  %v3159_v19 = vpop.f32.mrf.mxu1  ;;  %v4440_v41 = vld [vmem:[#allocation2 + $0x38f] sm:$0xff] }
 0x5df   :  { %8012 = vmatmul.msk.f32.gmra.mxu1 %vm564_vm2, %v4436_v24  ;;  %8218 = vmatmul.msk.f32.gmra.mxu0 %vm564_vm2, %v4440_v41  ;;  %v3289_v8 = vadd.f32 %v3159_v19, %v14221_v14  ;;  %14222 = vst [vmem:[#allocation15_spill] sm:$0xff] %v11260_v11  ;;  %v3370_v24 = vld [vmem:[#allocation2 + $0x368] sm:$0xff]  ;;  %v14224_v19 = vld [vmem:[#allocation32_spill] sm:$0xff] }
 0x5e0   :  { %8146 = vmatmul.msk.f32.gmra.mxu3 %vm564_vm2, %v3901_v52  ;;  %8080 = vmatmul.msk.f32.gmra.mxu2 %vm564_vm2, %v3369_v4  ;;  %v3903_v4 = vld [vmem:[#allocation2 + $0x351] sm:$0xff] }
 0x5e1   :  { %v4442_v11 = vld [vmem:[#allocation2 + $0x3af] sm:$0xff] }
 0x5e3   :  { %v4221_v51 = vpop.f32.mrf.mxu3 }
 0x5e4   :  { %v11253_v9 = vadd.f32 %v4221_v51, %v3821_v35  ;;  %v3693_v52 = vpop.f32.mrf.mxu2  ;;  %v4441_v35 = vld [vmem:[#allocation2 + $0x3a7] sm:$0xff] }
 0x5e5   :  { %v3823_v33 = vadd.f32 %v3693_v52, %v3289_v8  ;;  %v11269_v46 = vpop.f32.mrf.mxu0 }
 0x5e6   :  { %14220 = vst [vmem:[#allocation14_spill] sm:$0xff] %v11253_v9  ;;  %v3162_v13 = vpop.f32.mrf.mxu1 }
 0x5e7   :  { %8013 = vmatmul.msk.f32.gmra.mxu1 %vm564_vm2, %v4437_v54  ;;  %8219 = vmatmul.msk.f32.gmra.mxu0 %vm564_vm2, %v4441_v35  ;;  %v3290_v14 = vadd.f32 %v3162_v13, %v14224_v19  ;;  %14225 = vst [vmem:[#allocation19_spill] sm:$0xff] %v11269_v46  ;;  %v3371_v54 = vld [vmem:[#allocation2 + $0x370] sm:$0xff]  ;;  %v14227_v13 = vld [vmem:[#allocation33_spill] sm:$0xff] }
 0x5e8   :  { %8147 = vmatmul.msk.f32.gmra.mxu3 %vm564_vm2, %v3902_v16  ;;  %8081 = vmatmul.msk.f32.gmra.mxu2 %vm564_vm2, %v3370_v24 }
 0x5eb   :  { %v4224_v29 = vpop.f32.mrf.mxu3 }
 0x5ec   :  { %v11262_v51 = vadd.f32 %v4224_v29, %v3822_v27  ;;  %v3696_v16 = vpop.f32.mrf.mxu2  ;;  %v3904_v27 = vld [vmem:[#allocation2 + $0x369] sm:$0xff] }
 0x5ed   :  { %v3824_v8 = vadd.f32 %v3696_v16, %v3290_v14 }
 0x5ee   :  { %14223 = vst [vmem:[#allocation17_spill] sm:$0xff] %v11262_v51  ;;  %v3165_v52 = vpop.f32.mrf.mxu1  ;;  %v4443_v51 = vld [vmem:[#allocation2 + $0x3c7] sm:$0xff] }
 0x5ef   :  { %8014 = vmatmul.msk.f32.gmra.mxu1 %vm564_vm2, %v4438_v28  ;;  %8220 = vmatmul.msk.f32.gmra.mxu0 %vm564_vm2, %v4442_v11  ;;  %v3291_v24 = vadd.f32 %v3165_v52, %v14227_v13  ;;  %v11283_v28 = vpop.f32.mrf.mxu0  ;;  %v14230_v52 = vld [vmem:[#allocation34_spill] sm:$0xff] }
 0x5f0   :  { %8148 = vmatmul.msk.f32.gmra.mxu3 %vm564_vm2, %v3903_v4  ;;  %8082 = vmatmul.msk.f32.gmra.mxu2 %vm564_vm2, %v3371_v54  ;;  %14229 = vst [vmem:[#allocation25_spill] sm:$0xff] %v11283_v28 }
 0x5f3   :  { %v4227_v9 = vpop.f32.mrf.mxu3 }
 0x5f4   :  { %v11271_v29 = vadd.f32 %v4227_v9, %v3823_v33  ;;  %v3699_v4 = vpop.f32.mrf.mxu2  ;;  %v3372_v9 = vld [vmem:[#allocation2 + $0x388] sm:$0xff]  ;;  %v3905_v33 = vld [vmem:[#allocation2 + $0x371] sm:$0xff] }
 0x5f5   :  { %v3825_v19 = vadd.f32 %v3699_v4, %v3291_v24 }
 0x5f6   :  { %14226 = vst [vmem:[#allocation21_spill] sm:$0xff] %v11271_v29  ;;  %v3168_v14 = vpop.f32.mrf.mxu1 }
 0x5f7   :  { %8015 = vmatmul.msk.f32.gmra.mxu1 %vm564_vm2, %v4439_v34  ;;  %8221 = vmatmul.msk.f32.gmra.mxu0 %vm564_vm2, %v4443_v51  ;;  %v3292_v54 = vadd.f32 %v3168_v14, %v14230_v52  ;;  %v3373_v34 = vld [vmem:[#allocation2 + $0x390] sm:$0xff]  ;;  %v11293_v14 = vpop.f32.mrf.mxu0 }
 0x5f8   :  { %8149 = vmatmul.msk.f32.gmra.mxu3 %vm564_vm2, %v3904_v27  ;;  %8083 = vmatmul.msk.f32.gmra.mxu2 %vm564_vm2, %v3372_v9  ;;  %v3906_v9 = vld [vmem:[#allocation2 + $0x389] sm:$0xff]  ;;  %14233 = vst [vmem:[#allocation28_spill] sm:$0xff] %v11293_v14 }
 0x5fb   :  { %v4230_v16 = vpop.f32.mrf.mxu3 }
 0x5fc   :  { %v11278_v46 = vadd.f32 %v4230_v16, %v3824_v8  ;;  %v3702_v27 = vpop.f32.mrf.mxu2  ;;  %v4444_v8 = vld [vmem:[#allocation2 + $0x3cf] sm:$0xff] }
 0x5fd   :  { %v3826_v13 = vadd.f32 %v3702_v27, %v3292_v54 }
 0x5fe   :  { %14228 = vst [vmem:[#allocation23_spill] sm:$0xff] %v11278_v46  ;;  %v3171_v24 = vpop.f32.mrf.mxu1  ;;  %v14232_v46 = vld [vmem:[#allocation35_spill] sm:$0xff] }
 0x5ff   :  { %8016 = vmatmul.msk.f32.gmra.mxu1 %vm564_vm2, %v4440_v41  ;;  %8222 = vmatmul.msk.f32.gmra.mxu0 %vm564_vm2, %v4444_v8  ;;  %v3293_v29 = vadd.f32 %v3171_v24, %v14232_v46  ;;  %v3374_v41 = vld [vmem:[#allocation2 + $0x3a8] sm:$0xff]  ;;  %v14235_v46 = vld [vmem:[#allocation36_spill] sm:$0xff] }
 0x600   :  { %8150 = vmatmul.msk.f32.gmra.mxu3 %vm564_vm2, %v3905_v33  ;;  %8084 = vmatmul.msk.f32.gmra.mxu2 %vm564_vm2, %v3373_v34  ;;  %v3907_v34 = vld [vmem:[#allocation2 + $0x391] sm:$0xff] }
 0x603   :  { %v4233_v4 = vpop.f32.mrf.mxu3 }
 0x604   :  { %v11287_v16 = vadd.f32 %v4233_v4, %v3825_v19  ;;  %v3705_v33 = vpop.f32.mrf.mxu2  ;;  %v4445_v19 = vld [vmem:[#allocation2 + $0x3e7] sm:$0xff] }
 0x605   :  { %v3827_v52 = vadd.f32 %v3705_v33, %v3293_v29  ;;  %v11303_v33 = vpop.f32.mrf.mxu0 }
 0x606   :  { %14231 = vst [vmem:[#allocation27_spill] sm:$0xff] %v11287_v16  ;;  %v3174_v54 = vpop.f32.mrf.mxu1 }
 0x607   :  { %8017 = vmatmul.msk.f32.gmra.mxu1 %vm564_vm2, %v4441_v35  ;;  %8223 = vmatmul.msk.f32.gmra.mxu0 %vm564_vm2, %v4445_v19  ;;  %v3294_v24 = vadd.f32 %v3174_v54, %v14235_v46  ;;  %14236 = vst [vmem:[#allocation30_spill] sm:$0xff] %v11303_v33  ;;  %v3375_v35 = vld [vmem:[#allocation2 + $0x3b0] sm:$0xff]  ;;  %v14238_v54 = vld [vmem:[#allocation37_spill] sm:$0xff]  ;;  %v4447_v33 = vld [vmem:[#allocation2 + $0x407] sm:$0xff] }
 0x608   :  { %8151 = vmatmul.msk.f32.gmra.mxu3 %vm564_vm2, %v3906_v9  ;;  %8085 = vmatmul.msk.f32.gmra.mxu2 %vm564_vm2, %v3374_v41  ;;  %v3908_v41 = vld [vmem:[#allocation2 + $0x3a9] sm:$0xff] }
 0x60b   :  { %v4236_v27 = vpop.f32.mrf.mxu3 }
 0x60c   :  { %v11296_v4 = vadd.f32 %v4236_v27, %v3826_v13  ;;  %v3708_v9 = vpop.f32.mrf.mxu2  ;;  %v4446_v13 = vld [vmem:[#allocation2 + $0x3ef] sm:$0xff] }
 0x60d   :  { %v3828_v16 = vadd.f32 %v3708_v9, %v3294_v24  ;;  %v11312_v28 = vpop.f32.mrf.mxu0 }
 0x60e   :  { %14234 = vst [vmem:[#allocation29_spill] sm:$0xff] %v11296_v4  ;;  %v3177_v29 = vpop.f32.mrf.mxu1 }
 0x60f   :  { %8018 = vmatmul.msk.f32.gmra.mxu1 %vm564_vm2, %v4442_v11  ;;  %8224 = vmatmul.msk.f32.gmra.mxu0 %vm564_vm2, %v4446_v13  ;;  %v3295_v46 = vadd.f32 %v3177_v29, %v14238_v54  ;;  %14239 = vst [vmem:[#allocation32_spill] sm:$0xff] %v11312_v28  ;;  %v3376_v11 = vld [vmem:[#allocation2 + $0x3c8] sm:$0xff] }
 0x610   :  { %8152 = vmatmul.msk.f32.gmra.mxu3 %vm564_vm2, %v3907_v34  ;;  %8086 = vmatmul.msk.f32.gmra.mxu2 %vm564_vm2, %v3375_v35  ;;  %v14241_v29 = vld [vmem:[#allocation39_spill] sm:$0xff] }
 0x613   :  { %v4239_v14 = vpop.f32.mrf.mxu3 }
 0x614   :  { %v11305_v27 = vadd.f32 %v4239_v14, %v3827_v52  ;;  %v3711_v34 = vpop.f32.mrf.mxu2  ;;  %v3909_v52 = vld [vmem:[#allocation2 + $0x3b1] sm:$0xff] }
 0x615   :  { %v3829_v24 = vadd.f32 %v3711_v34, %v3295_v46 }
 0x616   :  { %14237 = vst [vmem:[#allocation31_spill] sm:$0xff] %v11305_v27  ;;  %v3180_v9 = vpop.f32.mrf.mxu1  ;;  %v4448_v27 = vld [vmem:[#allocation2 + $0x40f] sm:$0xff] }
 0x617   :  { %8019 = vmatmul.msk.f32.gmra.mxu1 %vm564_vm2, %v4443_v51  ;;  %8225 = vmatmul.msk.f32.gmra.mxu0 %vm564_vm2, %v4447_v33  ;;  %v3296_v35 = vadd.f32 %v3180_v9, %v14241_v29  ;;  %v3377_v51 = vld [vmem:[#allocation2 + $0x3d0] sm:$0xff]  ;;  %v14243_v9 = vld [vmem:[#allocation41_spill] sm:$0xff] }
 0x618   :  { %8153 = vmatmul.msk.f32.gmra.mxu3 %vm564_vm2, %v3908_v41  ;;  %8087 = vmatmul.msk.f32.gmra.mxu2 %vm564_vm2, %v3376_v11 }
 0x61b   :  { %v4242_v4 = vpop.f32.mrf.mxu3 }
 0x61c   :  { %v11314_v14 = vadd.f32 %v4242_v4, %v3828_v16  ;;  %v3714_v41 = vpop.f32.mrf.mxu2  ;;  %v11326_v16 = vpop.f32.mrf.mxu0  ;;  %v3910_v4 = vld [vmem:[#allocation2 + $0x3c9] sm:$0xff] }
 0x61d   :  { %v3830_v54 = vadd.f32 %v3714_v41, %v3296_v35 }
 0x61e   :  { %14240 = vst [vmem:[#allocation33_spill] sm:$0xff] %v11314_v14  ;;  %v3183_v46 = vpop.f32.mrf.mxu1 }
 0x61f   :  { %8020 = vmatmul.msk.f32.gmra.mxu1 %vm564_vm2, %v4444_v8  ;;  %8226 = vmatmul.msk.f32.gmra.mxu0 %vm564_vm2, %v4448_v27  ;;  %v3297_v11 = vadd.f32 %v3183_v46, %v14243_v9  ;;  %v3378_v8 = vld [vmem:[#allocation2 + $0x3e8] sm:$0xff] }
 0x620   :  { %8154 = vmatmul.msk.f32.gmra.mxu3 %vm564_vm2, %v3909_v52  ;;  %8088 = vmatmul.msk.f32.gmra.mxu2 %vm564_vm2, %v3377_v51  ;;  %v3911_v51 = vld [vmem:[#allocation2 + $0x3d1] sm:$0xff] }
 0x623   :  { %v4245_v34 = vpop.f32.mrf.mxu3 }
 0x624   :  { %v11321_v28 = vadd.f32 %v4245_v34, %v3829_v24  ;;  %v3717_v52 = vpop.f32.mrf.mxu2  ;;  %v4449_v24 = vld [vmem:[#allocation2 + $0x427] sm:$0xff]  ;;  %v11336_v46 = vpop.f32.mrf.mxu0 }
 0x625   :  { %v3831_v29 = vadd.f32 %v3717_v52, %v3297_v11  ;;  %v4450_v52 = vld [vmem:[#allocation2 + $0x42f] sm:$0xff] }
 0x626   :  { %14242 = vst [vmem:[#allocation34_spill] sm:$0xff] %v11321_v28  ;;  %v3186_v35 = vpop.f32.mrf.mxu1  ;;  %v14245_v28 = vld [vmem:[#allocation43_spill] sm:$0xff] }
 0x627   :  { %8021 = vmatmul.msk.f32.gmra.mxu1 %vm564_vm2, %v4445_v19  ;;  %8227 = vmatmul.msk.f32.gmra.mxu0 %vm564_vm2, %v4449_v24  ;;  %v3298_v14 = vadd.f32 %v3186_v35, %v14245_v28  ;;  %v3379_v19 = vld [vmem:[#allocation2 + $0x3f0] sm:$0xff]  ;;  %v14248_v35 = vld [vmem:[#allocation45_spill] sm:$0xff] }
 0x628   :  { %8155 = vmatmul.msk.f32.gmra.mxu3 %vm564_vm2, %v3910_v4  ;;  %8089 = vmatmul.msk.f32.gmra.mxu2 %vm564_vm2, %v3378_v8  ;;  %v3912_v28 = vld [vmem:[#allocation2 + $0x3e9] sm:$0xff] }
 0x62b   :  { %v4248_v41 = vpop.f32.mrf.mxu3 }
 0x62c   :  { %v11330_v34 = vadd.f32 %v4248_v41, %v3830_v54  ;;  %v3720_v4 = vpop.f32.mrf.mxu2 }
 0x62d   :  { %v11339_v9 = vadd.f32 %v3720_v4, %v3298_v14 }
 0x62e   :  { %14244 = vst [vmem:[#allocation35_spill] sm:$0xff] %v11330_v34  ;;  %v3189_v11 = vpop.f32.mrf.mxu1 }
 0x62f   :  { %14246 = vst [vmem:[#allocation36_spill] sm:$0xff] %v11339_v9  ;;  %8022 = vmatmul.msk.f32.gmra.mxu1 %vm564_vm2, %v4446_v13  ;;  %8228 = vmatmul.msk.f32.gmra.mxu0 %vm564_vm2, %v4450_v52  ;;  %v3299_v8 = vadd.f32 %v3189_v11, %v14248_v35  ;;  %v11350_v9 = vpop.f32.mrf.mxu0  ;;  %v3380_v13 = vld [vmem:[#allocation2 + $0x408] sm:$0xff] }
 0x630   :  { %8156 = vmatmul.msk.f32.gmra.mxu3 %vm564_vm2, %v3911_v51  ;;  %8090 = vmatmul.msk.f32.gmra.mxu2 %vm564_vm2, %v3379_v19  ;;  %v14250_v19 = vld [vmem:[#allocation47_spill] sm:$0xff] }
 0x633   :  { %v4251_v54 = vpop.f32.mrf.mxu3 }
 0x634   :  { %v11341_v41 = vadd.f32 %v4251_v54, %v3831_v29  ;;  %v3723_v51 = vpop.f32.mrf.mxu2  ;;  %v4451_v29 = vld [vmem:[#allocation2 + $0x447] sm:$0xff]  ;;  %v3913_v54 = vld [vmem:[#allocation2 + $0x3f1] sm:$0xff] }
 0x635   :  { %v11348_v14 = vadd.f32 %v3723_v51, %v3299_v8  ;;  %v4452_v8 = vld [vmem:[#allocation2 + $0x44f] sm:$0xff] }
 0x636   :  { %14247 = vst [vmem:[#allocation37_spill] sm:$0xff] %v11341_v41  ;;  %v3192_v4 = vpop.f32.mrf.mxu1 }
 0x637   :  { %14249 = vst [vmem:[#allocation39_spill] sm:$0xff] %v11348_v14  ;;  %8023 = vmatmul.msk.f32.gmra.mxu1 %vm564_vm2, %v4447_v33  ;;  %8229 = vmatmul.msk.f32.gmra.mxu0 %vm564_vm2, %v4451_v29  ;;  %v3300_v41 = vadd.f32 %v3192_v4, %v14250_v19  ;;  %v11359_v51 = vpop.f32.mrf.mxu0  ;;  %v3381_v33 = vld [vmem:[#allocation2 + $0x410] sm:$0xff]  ;;  %v14253_v14 = vld [vmem:[#allocation49_spill] sm:$0xff]  ;;  %v3382_v19 = vld [vmem:[#allocation2 + $0x428] sm:$0xff] }
 0x638   :  { %8157 = vmatmul.msk.f32.gmra.mxu3 %vm564_vm2, %v3912_v28  ;;  %8091 = vmatmul.msk.f32.gmra.mxu2 %vm564_vm2, %v3380_v13  ;;  %14252 = vst [vmem:[#allocation43_spill] sm:$0xff] %v11359_v51  ;;  %v3914_v13 = vld [vmem:[#allocation2 + $0x409] sm:$0xff] }
 0x63c   :  { %v3726_v11 = vpop.f32.mrf.mxu2 }
 0x63d   :  { %v11357_v28 = vadd.f32 %v3726_v11, %v3300_v41  ;;  %v3915_v11 = vld [vmem:[#allocation2 + $0x411] sm:$0xff] }
 0x63e   :  { %v3195_v35 = vpop.f32.mrf.mxu1 }
 0x63f   :  { %14251 = vst [vmem:[#allocation41_spill] sm:$0xff] %v11357_v28  ;;  %8024 = vmatmul.msk.f32.gmra.mxu1 %vm564_vm2, %v4448_v27  ;;  %8230 = vmatmul.msk.f32.gmra.mxu0 %vm564_vm2, %v4452_v8  ;;  %v3301_v34 = vadd.f32 %v3195_v35, %v14253_v14  ;;  %v11370_v27 = vpop.f32.mrf.mxu0  ;;  %v14254_v28 = vld [vmem:[#allocation50_spill] sm:$0xff] }
 0x640   :  { %8158 = vmatmul.msk.f32.gmra.mxu3 %vm564_vm2, %v3913_v54  ;;  %8092 = vmatmul.msk.f32.gmra.mxu2 %vm564_vm2, %v3381_v33  ;;  %v4453_v14 = vld [vmem:[#allocation2 + $0x467] sm:$0xff] }
 0x644   :  { %v3729_v4 = vpop.f32.mrf.mxu2 }
 0x645   :  { %v11366_v54 = vadd.f32 %v3729_v4, %v3301_v34  ;;  %v4454_v34 = vld [vmem:[#allocation2 + $0x46f] sm:$0xff] }
 0x646   :  { %v3198_v41 = vpop.f32.mrf.mxu1  ;;  %v3916_v4 = vld [vmem:[#allocation2 + $0x429] sm:$0xff] }
 0x647   :  { %8025 = vmatmul.msk.f32.gmra.mxu1 %vm564_vm2, %v4449_v24  ;;  %v3302_v51 = vadd.f32 %v3198_v41, %v14254_v28  ;;  %8231 = vmatmul.msk.f32.gmra.mxu0 %vm564_vm2, %v4453_v14  ;;  %v3383_v24 = vld [vmem:[#allocation2 + $0x430] sm:$0xff]  ;;  %v11381_v41 = vpop.f32.mrf.mxu0 }
 0x648   :  { %8159 = vmatmul.msk.f32.gmra.mxu3 %vm564_vm2, %v3914_v13  ;;  %8093 = vmatmul.msk.f32.gmra.mxu2 %vm564_vm2, %v3382_v19 }
 0x64c   :  { %v3732_v33 = vpop.f32.mrf.mxu2 }
 0x64d   :  { %v11374_v35 = vadd.f32 %v3732_v33, %v3302_v51  ;;  %v3917_v33 = vld [vmem:[#allocation2 + $0x431] sm:$0xff] }
 0x64e   :  { %v3201_v13 = vpop.f32.mrf.mxu1 }
 0x64f   :  { %8026 = vmatmul.msk.f32.gmra.mxu1 %vm564_vm2, %v4450_v52  ;;  %v3303_v19 = vadd.f32 %v3201_v13, %v10697_v43  ;;  %8232 = vmatmul.msk.f32.gmra.mxu0 %vm564_vm2, %v4454_v34  ;;  %v3384_v52 = vld [vmem:[#allocation2 + $0x448] sm:$0xff] }
 0x650   :  { %8160 = vmatmul.msk.f32.gmra.mxu3 %vm564_vm2, %v3915_v11  ;;  %8094 = vmatmul.msk.f32.gmra.mxu2 %vm564_vm2, %v3383_v24  ;;  %v3918_v34 = vld [vmem:[#allocation2 + $0x449] sm:$0xff] }
 0x654   :  { %v3735_v28 = vpop.f32.mrf.mxu2 }
 0x655   :  { %v11383_v11 = vadd.f32 %v3735_v28, %v3303_v19 }
 0x656   :  { %v3204_v51 = vpop.f32.mrf.mxu1 }
 0x657   :  { %14255 = vst [vmem:[#allocation45_spill] sm:$0xff] %v11383_v11  ;;  %8027 = vmatmul.msk.f32.gmra.mxu1 %vm564_vm2, %v4451_v29  ;;  %v3304_v14 = vadd.f32 %v3204_v51, %v10706_v21  ;;  %v4925_v51 = vld [vmem:[#allocation2 + $0x48] sm:$0xff] }
 0x658   :  { %8161 = vmatmul.msk.f32.gmra.mxu3 %vm564_vm2, %v3916_v4  ;;  %8095 = vmatmul.msk.f32.gmra.mxu2 %vm564_vm2, %v3384_v52  ;;  %v3385_v4 = vld [vmem:[#allocation2 + $0x450] sm:$0xff] }
 0x659   :  { %v5459_v52 = vld [vmem:[#allocation2 + $0x49] sm:$0xff] }
 0x65c   :  { %v3738_v43 = vpop.f32.mrf.mxu2 }
 0x65d   :  { %v11390_v13 = vadd.f32 %v3738_v43, %v3304_v14 }
 0x65e   :  { %v3207_v24 = vpop.f32.mrf.mxu1 }
 0x65f   :  { %14256 = vst [vmem:[#allocation47_spill] sm:$0xff] %v11390_v13  ;;  %8028 = vmatmul.msk.f32.gmra.mxu1 %vm564_vm2, %v4452_v8  ;;  %v3305_v29 = vadd.f32 %v3207_v24, %v10716_v0  ;;  %v4926_v24 = vld [vmem:[#allocation2 + $0x50] sm:$0xff]  ;;  %v4937_v13 = vld [vmem:[#allocation2 + $0x108] sm:$0xff] }
 0x660   :  { %8162 = vmatmul.msk.f32.gmra.mxu3 %vm564_vm2, %v3917_v33  ;;  %8096 = vmatmul.msk.f32.gmra.mxu2 %vm564_vm2, %v3385_v4  ;;  %v3919_v33 = vld [vmem:[#allocation2 + $0x451] sm:$0xff] }
 0x661   :  { %v5460_v4 = vld [vmem:[#allocation2 + $0x51] sm:$0xff] }
 0x664   :  { %v3741_v19 = vpop.f32.mrf.mxu2 }
 0x665   :  { %v11396_v28 = vadd.f32 %v3741_v19, %v3305_v29 }
 0x666   :  { %v3210_v21 = vpop.f32.mrf.mxu1 }
 0x667   :  { %14257 = vst [vmem:[#allocation49_spill] sm:$0xff] %v11396_v28  ;;  %8237 = vmatmul.msk.f32.vlgmr.msra.gmra.mxu1 %vm564_vm2, %v4925_v51  ;;  %v3306_v8 = vadd.f32 %v3210_v21, %v10727_v10  ;;  %v5461_v10 = vld [vmem:[#allocation2 + $0x69] sm:$0xff] }
 0x668   :  { %8163 = vmatmul.msk.f32.gmra.mxu3 %vm564_vm2, %v3918_v34  ;;  %8305 = vmatmul.msk.f32.vlgmr.msra.gmra.mxu2 %vm564_vm2, %v5459_v52  ;;  %v4927_v52 = vld [vmem:[#allocation2 + $0x68] sm:$0xff] }
 0x66c   :  { %v3744_v14 = vpop.f32.mrf.mxu2 }
 0x66d   :  { %v11402_v43 = vadd.f32 %v3744_v14, %v3306_v8 }
 0x66e   :  { %v3213_v0 = vpop.f32.mrf.mxu1 }
 0x66f   :  { %14258 = vst [vmem:[#allocation50_spill] sm:$0xff] %v11402_v43  ;;  %8238 = vmatmul.msk.f32.gmra.mxu1 %vm564_vm2, %v4926_v24  ;;  %v3307_v34 = vadd.f32 %v3213_v0, %v10738_v32  ;;  %v4928_v24 = vld [vmem:[#allocation2 + $0x70] sm:$0xff]  ;;  %v4935_v43 = vld [vmem:[#allocation2 + $0xe8] sm:$0xff] }
 0x670   :  { %8164 = vmatmul.msk.f32.gmra.mxu3 %vm564_vm2, %v3919_v33  ;;  %8306 = vmatmul.msk.f32.gmra.mxu2 %vm564_vm2, %v5460_v4  ;;  %v5462_v32 = vld [vmem:[#allocation2 + $0x71] sm:$0xff] }
 0x674   :  { %v3747_v29 = vpop.f32.mrf.mxu2 }
 0x675   :  { %v11407_v19 = vadd.f32 %v3747_v29, %v3307_v34 }
 0x676   :  { %v3216_v51 = vpop.f32.mrf.mxu1 }
 0x677   :  { %14259 = vst [vmem:[#allocation63_spill] sm:$0xff] %v11407_v19  ;;  %8239 = vmatmul.msk.f32.gmra.mxu1 %vm564_vm2, %v4927_v52  ;;  %v3308_v21 = vadd.f32 %v3216_v51, %v10749_v12  ;;  %v4929_v52 = vld [vmem:[#allocation2 + $0x88] sm:$0xff] }
 0x678   :  { %8307 = vmatmul.msk.f32.gmra.mxu2 %vm564_vm2, %v5461_v10  ;;  %v5463_v12 = vld [vmem:[#allocation2 + $0x89] sm:$0xff] }
 0x67c   :  { %v3750_v33 = vpop.f32.mrf.mxu2 }
 0x67d   :  { %v11412_v8 = vadd.f32 %v3750_v33, %v3308_v21 }
 0x67e   :  { %v3219_v14 = vpop.f32.mrf.mxu1 }
 0x67f   :  { %14260 = vst [vmem:[#allocation64_spill] sm:$0xff] %v11412_v8  ;;  %8240 = vmatmul.msk.f32.gmra.mxu1 %vm564_vm2, %v4928_v24  ;;  %v3309_v0 = vadd.f32 %v3219_v14, %v10760_v48  ;;  %v4930_v24 = vld [vmem:[#allocation2 + $0x90] sm:$0xff] }
 0x680   :  { %8308 = vmatmul.msk.f32.gmra.mxu2 %vm564_vm2, %v5462_v32  ;;  %v5464_v48 = vld [vmem:[#allocation2 + $0x91] sm:$0xff] }
 0x684   :  { %v3753_v4 = vpop.f32.mrf.mxu2 }
 0x685   :  { %v11417_v34 = vadd.f32 %v3753_v4, %v3309_v0 }
 0x686   :  { %v3222_v29 = vpop.f32.mrf.mxu1 }
 0x687   :  { %14261 = vst [vmem:[#allocation65_spill] sm:$0xff] %v11417_v34  ;;  %8241 = vmatmul.msk.f32.gmra.mxu1 %vm564_vm2, %v4929_v52  ;;  %v3310_v51 = vadd.f32 %v3222_v29, %v10771_v37  ;;  %v4931_v52 = vld [vmem:[#allocation2 + $0xa8] sm:$0xff]  ;;  %v11434_v34 = vpop.f32.mrf.mxu3 }
 0x688   :  { %8309 = vmatmul.msk.f32.gmra.mxu2 %vm564_vm2, %v5463_v12  ;;  %v5465_v37 = vld [vmem:[#allocation2 + $0xa9] sm:$0xff] }
 0x689   :  { %v14263_v29 = vld [vmem:[#allocation51_spill] sm:$0xff] }
 0x68c   :  { %v3756_v10 = vpop.f32.mrf.mxu2 }
 0x68d   :  { %v11422_v21 = vadd.f32 %v3756_v10, %v3310_v51 }
 0x68e   :  { %v3225_v33 = vpop.f32.mrf.mxu1 }
 0x68f   :  { %8242 = vmatmul.msk.f32.gmra.mxu1 %vm564_vm2, %v4930_v24  ;;  %v3311_v14 = vadd.f32 %v3225_v33, %v10782_v36  ;;  %v5466_v36 = vld [vmem:[#allocation2 + $0xb1] sm:$0xff]  ;;  %v11438_v33 = vpop.f32.mrf.mxu0 }
 0x690   :  { %8310 = vmatmul.msk.f32.gmra.mxu2 %vm564_vm2, %v5464_v48  ;;  %v4932_v48 = vld [vmem:[#allocation2 + $0xb0] sm:$0xff] }
 0x694   :  { %v3759_v32 = vpop.f32.mrf.mxu2 }
 0x695   :  { %v11427_v0 = vadd.f32 %v3759_v32, %v3311_v14  ;;  %v14265_v14 = vld [vmem:[#allocation52_spill] sm:$0xff] }
 0x696   :  { %v3228_v4 = vpop.f32.mrf.mxu1 }
 0x697   :  { %14262 = vst [vmem:[#allocation66_spill] sm:$0xff] %v11427_v0  ;;  %8243 = vmatmul.msk.f32.gmra.mxu1 %vm564_vm2, %v4931_v52  ;;  %v3312_v12 = vadd.f32 %v3228_v4, %v14263_v29  ;;  %v4933_v29 = vld [vmem:[#allocation2 + $0xc8] sm:$0xff]  ;;  %v11448_v0 = vpop.f32.mrf.mxu0 }
 0x698   :  { %8311 = vmatmul.msk.f32.gmra.mxu2 %vm564_vm2, %v5465_v37 }
 0x69c   :  { %v3762_v51 = vpop.f32.mrf.mxu2 }
 0x69d   :  { %v11432_v10 = vadd.f32 %v3762_v51, %v3312_v12  ;;  %v11443_v12 = vpop.f32.mrf.mxu3  ;;  %v5467_v51 = vld [vmem:[#allocation2 + $0xc9] sm:$0xff] }
 0x69e   :  { %v3231_v24 = vpop.f32.mrf.mxu1 }
 0x69f   :  { %14264 = vst [vmem:[#allocation51_spill] sm:$0xff] %v11432_v10  ;;  %8244 = vmatmul.msk.f32.gmra.mxu1 %vm564_vm2, %v4932_v48  ;;  %v3313_v32 = vadd.f32 %v3231_v24, %v14265_v14  ;;  %v14267_v48 = vld [vmem:[#allocation53_spill] sm:$0xff]  ;;  %v4934_v14 = vld [vmem:[#allocation2 + $0xd0] sm:$0xff] }
 0x6a0   :  { %8312 = vmatmul.msk.f32.gmra.mxu2 %vm564_vm2, %v5466_v36 }
 0x6a4   :  { %v3765_v52 = vpop.f32.mrf.mxu2 }
 0x6a5   :  { %v11441_v37 = vadd.f32 %v3765_v52, %v3313_v32  ;;  %v5468_v32 = vld [vmem:[#allocation2 + $0xd1] sm:$0xff]  ;;  %v11454_v52 = vpop.f32.mrf.mxu3 }
 0x6a6   :  { %v3234_v4 = vpop.f32.mrf.mxu1 }
 0x6a7   :  { %14266 = vst [vmem:[#allocation52_spill] sm:$0xff] %v11441_v37  ;;  %8245 = vmatmul.msk.f32.gmra.mxu1 %vm564_vm2, %v4933_v29  ;;  %v3314_v10 = vadd.f32 %v3234_v4, %v14267_v48  ;;  %v14269_v29 = vld [vmem:[#allocation54_spill] sm:$0xff]  ;;  %v11459_v48 = vpop.f32.mrf.mxu0 }
 0x6a8   :  { %8313 = vmatmul.msk.f32.gmra.mxu2 %vm564_vm2, %v5467_v51 }
 0x6ac   :  { %v3768_v36 = vpop.f32.mrf.mxu2 }
 0x6ad   :  { %v11450_v8 = vadd.f32 %v3768_v36, %v3314_v10  ;;  %v5469_v10 = vld [vmem:[#allocation2 + $0xe9] sm:$0xff] }
 0x6ae   :  { %v3237_v24 = vpop.f32.mrf.mxu1 }
 0x6af   :  { %14268 = vst [vmem:[#allocation53_spill] sm:$0xff] %v11450_v8  ;;  %8246 = vmatmul.msk.f32.gmra.mxu1 %vm564_vm2, %v4934_v14  ;;  %v3315_v37 = vadd.f32 %v3237_v24, %v14269_v29  ;;  %v11464_v14 = vpop.f32.mrf.mxu3  ;;  %v4936_v29 = vld [vmem:[#allocation2 + $0xf0] sm:$0xff] }
 0x6b0   :  { %8314 = vmatmul.msk.f32.gmra.mxu2 %vm564_vm2, %v5468_v32 }
 0x6b4   :  { %v3771_v19 = vpop.f32.mrf.mxu2 }
 0x6b5   :  { %v11457_v51 = vadd.f32 %v3771_v19, %v3315_v37  ;;  %v11468_v19 = vpop.f32.mrf.mxu0  ;;  %v5470_v37 = vld [vmem:[#allocation2 + $0xf1] sm:$0xff] }
 0x6b6   :  { %v3240_v4 = vpop.f32.mrf.mxu1 }
 0x6b7   :  { %14270 = vst [vmem:[#allocation54_spill] sm:$0xff] %v11457_v51  ;;  %8247 = vmatmul.msk.f32.gmra.mxu1 %vm564_vm2, %v4935_v43  ;;  %v3316_v36 = vadd.f32 %v3240_v4, %v10835_v39  ;;  %v14272_v43 = vld [vmem:[#allocation55_spill] sm:$0xff]  ;;  %v11475_v4 = vpop.f32.mrf.mxu3 }
 0x6b8   :  { %8315 = vmatmul.msk.f32.gmra.mxu2 %vm564_vm2, %v5469_v10 }
 0x6bc   :  { %v3774_v32 = vpop.f32.mrf.mxu2 }
 0x6bd   :  { %v11466_v8 = vadd.f32 %v3774_v32, %v3316_v36  ;;  %v5471_v36 = vld [vmem:[#allocation2 + $0x109] sm:$0xff]  ;;  %v11479_v32 = vpop.f32.mrf.mxu0 }
 0x6be   :  { %v3243_v24 = vpop.f32.mrf.mxu1  ;;  %14274 = vst [vmem:[#allocation68_spill] sm:$0xff] %v11479_v32 }
 0x6bf   :  { %14271 = vst [vmem:[#allocation67_spill] sm:$0xff] %v11466_v8  ;;  %8248 = vmatmul.msk.f32.gmra.mxu1 %vm564_vm2, %v4936_v29  ;;  %v3317_v51 = vadd.f32 %v3243_v24, %v14272_v43  ;;  %v14275_v29 = vld [vmem:[#allocation57_spill] sm:$0xff]  ;;  %v4938_v43 = vld [vmem:[#allocation2 + $0x110] sm:$0xff] }
 0x6c0   :  { %8316 = vmatmul.msk.f32.gmra.mxu2 %vm564_vm2, %v5470_v37 }
 0x6c4   :  { %v3777_v28 = vpop.f32.mrf.mxu2 }
 0x6c5   :  { %v11473_v10 = vadd.f32 %v3777_v28, %v3317_v51  ;;  %v11484_v28 = vpop.f32.mrf.mxu3  ;;  %v5472_v51 = vld [vmem:[#allocation2 + $0x111] sm:$0xff] }
 0x6c6   :  { %v3246_v39 = vpop.f32.mrf.mxu1  ;;  %14277 = vst [vmem:[#allocation69_spill] sm:$0xff] %v11484_v28 }
 0x6c7   :  { %14273 = vst [vmem:[#allocation55_spill] sm:$0xff] %v11473_v10  ;;  %8249 = vmatmul.msk.f32.gmra.mxu1 %vm564_vm2, %v4937_v13  ;;  %v3318_v8 = vadd.f32 %v3246_v39, %v14275_v29  ;;  %v11489_v10 = vpop.f32.mrf.mxu0  ;;  %v4939_v29 = vld [vmem:[#allocation2 + $0x128] sm:$0xff] }
 0x6c8   :  { %8317 = vmatmul.msk.f32.gmra.mxu2 %vm564_vm2, %v5471_v36  ;;  %14278 = vst [vmem:[#allocation70_spill] sm:$0xff] %v11489_v10  ;;  %v4940_v10 = vld [vmem:[#allocation2 + $0x130] sm:$0xff] }
 0x6cc   :  { %v3780_v11 = vpop.f32.mrf.mxu2 }
 0x6cd   :  { %v11482_v37 = vadd.f32 %v3780_v11, %v3318_v8  ;;  %v5473_v11 = vld [vmem:[#allocation2 + $0x129] sm:$0xff]  ;;  %v11495_v8 = vpop.f32.mrf.mxu3 }
 0x6ce   :  { %v3249_v24 = vpop.f32.mrf.mxu1  ;;  %14280 = vst [vmem:[#allocation72_spill] sm:$0xff] %v11495_v8 }
 0x6cf   :  { %14276 = vst [vmem:[#allocation57_spill] sm:$0xff] %v11482_v37  ;;  %8250 = vmatmul.msk.f32.gmra.mxu1 %vm564_vm2, %v4938_v43  ;;  %v3319_v13 = vadd.f32 %v3249_v24, %v10870_v26  ;;  %v14281_v43 = vld [vmem:[#allocation60_spill] sm:$0xff]  ;;  %v11500_v24 = vpop.f32.mrf.mxu0 }
 0x6d0   :  { %8318 = vmatmul.msk.f32.gmra.mxu2 %vm564_vm2, %v5472_v51  ;;  %14283 = vst [vmem:[#allocation73_spill] sm:$0xff] %v11500_v24 }
 0x6d4   :  { %v3783_v36 = vpop.f32.mrf.mxu2 }
 0x6d5   :  { %v11491_v32 = vadd.f32 %v3783_v36, %v3319_v13  ;;  %v5474_v13 = vld [vmem:[#allocation2 + $0x131] sm:$0xff]  ;;  %v14284_v36 = vld [vmem:[#allocation62_spill] sm:$0xff] }
 0x6d6   :  { %v3252_v39 = vpop.f32.mrf.mxu1 }
 0x6d7   :  { %14279 = vst [vmem:[#allocation71_spill] sm:$0xff] %v11491_v32  ;;  %8251 = vmatmul.msk.f32.gmra.mxu1 %vm564_vm2, %v4939_v29  ;;  %v3320_v37 = vadd.f32 %v3252_v39, %v14281_v43  ;;  %v11505_v32 = vpop.f32.mrf.mxu3  ;;  %v4941_v43 = vld [vmem:[#allocation2 + $0x148] sm:$0xff] }
 0x6d8   :  { %8319 = vmatmul.msk.f32.gmra.mxu2 %vm564_vm2, %v5473_v11  ;;  %14285 = vst [vmem:[#allocation62_spill] sm:$0xff] %v11505_v32 }
 0x6dc   :  { %v3786_v28 = vpop.f32.mrf.mxu2 }
 0x6dd   :  { %v11498_v51 = vadd.f32 %v3786_v28, %v3320_v37  ;;  %v11509_v37 = vpop.f32.mrf.mxu0  ;;  %v5475_v28 = vld [vmem:[#allocation2 + $0x149] sm:$0xff] }
 0x6de   :  { %v3255_v26 = vpop.f32.mrf.mxu1  ;;  %14287 = vst [vmem:[#allocation75_spill] sm:$0xff] %v11509_v37 }
 0x6df   :  { %14282 = vst [vmem:[#allocation60_spill] sm:$0xff] %v11498_v51  ;;  %8252 = vmatmul.msk.f32.gmra.mxu1 %vm564_vm2, %v4940_v10  ;;  %v3321_v29 = vadd.f32 %v3255_v26, %v14284_v36  ;;  %v14288_v51 = vld [vmem:[#allocation56_spill] sm:$0xff]  ;;  %v11517_v32 = vpop.f32.mrf.mxu3 }
 0x6e0   :  { %8320 = vmatmul.msk.f32.gmra.mxu2 %vm564_vm2, %v5474_v13  ;;  %v4861_v10 = vadd.f32 %v14288_v51, %v10908_v6  ;;  %14289 = vst [vmem:[#allocation56_spill] sm:$0xff] %v11517_v32 }
 0x6e4   :  { %v3789_v11 = vpop.f32.mrf.mxu2 }
 0x6e5   :  { %v11507_v8 = vadd.f32 %v3789_v11, %v3321_v29  ;;  %v4942_v29 = vld [vmem:[#allocation2 + $0x150] sm:$0xff]  ;;  %v11523_v37 = vpop.f32.mrf.mxu0 }
 0x6e6   :  { %v5203_v39 = vpop.f32.mrf.mxu1  ;;  %v5476_v11 = vld [vmem:[#allocation2 + $0x151] sm:$0xff] }
 0x6e7   :  { %14286 = vst [vmem:[#allocation74_spill] sm:$0xff] %v11507_v8  ;;  %8253 = vmatmul.msk.f32.gmra.mxu1 %vm564_vm2, %v4941_v43  ;;  %v5395_v13 = vadd.f32 %v5203_v39, %v4861_v10  ;;  %v14290_v8 = vld [vmem:[#allocation58_spill] sm:$0xff]  ;;  %v11527_v10 = vpop.f32.mrf.mxu3 }
 0x6e8   :  { %8321 = vmatmul.msk.f32.gmra.mxu2 %vm564_vm2, %v5475_v28  ;;  %v4862_v43 = vadd.f32 %v14290_v8, %v10920_v20  ;;  %14291 = vst [vmem:[#allocation58_spill] sm:$0xff] %v11523_v37  ;;  %v4943_v28 = vld [vmem:[#allocation2 + $0x168] sm:$0xff] }
 0x6e9   :  { %14292 = vst [vmem:[#allocation76_spill] sm:$0xff] %v11527_v10  ;;  %v14294_v10 = vld [vmem:[#allocation61_spill] sm:$0xff] }
 0x6ec   :  { %v5737_v24 = vpop.f32.mrf.mxu2 }
 0x6ed   :  { %v11515_v26 = vadd.f32 %v5737_v24, %v5395_v13  ;;  %v5477_v13 = vld [vmem:[#allocation2 + $0x169] sm:$0xff]  ;;  %v11533_v8 = vpop.f32.mrf.mxu0 }
 0x6ee   :  { %v5206_v36 = vpop.f32.mrf.mxu1 }
 0x6ef   :  { %8254 = vmatmul.msk.f32.gmra.mxu1 %vm564_vm2, %v4942_v29  ;;  %v5396_v6 = vadd.f32 %v5206_v36, %v4862_v43  ;;  %v14293_v29 = vld [vmem:[#allocation59_spill] sm:$0xff]  ;;  %v11541_v37 = vpop.f32.mrf.mxu3 }
 0x6f0   :  { %8322 = vmatmul.msk.f32.gmra.mxu2 %vm564_vm2, %v5476_v11  ;;  %v4863_v32 = vadd.f32 %v14293_v29, %v10934_v5 }
 0x6f4   :  { %v5740_v51 = vpop.f32.mrf.mxu2 }
 0x6f5   :  { %v11525_v39 = vadd.f32 %v5740_v51, %v5396_v6  ;;  %v4944_v6 = vld [vmem:[#allocation2 + $0x170] sm:$0xff]  ;;  %v11545_v29 = vpop.f32.mrf.mxu0 }
 0x6f6   :  { %v5209_v24 = vpop.f32.mrf.mxu1  ;;  %v5478_v51 = vld [vmem:[#allocation2 + $0x171] sm:$0xff]  ;;  %14295 = vst [vmem:[#allocation59_spill] sm:$0xff] %v11545_v29 }
 0x6f7   :  { %8255 = vmatmul.msk.f32.gmra.mxu1 %vm564_vm2, %v4943_v28  ;;  %v5397_v20 = vadd.f32 %v5209_v24, %v4863_v32  ;;  %v4864_v28 = vadd.f32 %v14294_v10, %v10949_v17  ;;  %v5479_v17 = vld [vmem:[#allocation2 + $0x189] sm:$0xff]  ;;  %v4865_v10 = vadd.f32 %v10904_v50, %v10964_v56 }
 0x6f8   :  { %8323 = vmatmul.msk.f32.gmra.mxu2 %vm564_vm2, %v5477_v13 }
 0x6fc   :  { %v5743_v11 = vpop.f32.mrf.mxu2 }
 0x6fd   :  { %v11535_v36 = vadd.f32 %v5743_v11, %v5397_v20  ;;  %v6668_v20 = vld [vmem:[%s13974_s3 + $0x18] sm:$0xff]  ;;  %v4945_v11 = vld [vmem:[#allocation2 + $0x188] sm:$0xff]  ;;  %v11558_v29 = vpop.f32.mrf.mxu0 }
 0x6fe   :  { %v5212_v43 = vpop.f32.mrf.mxu1  ;;  %6877 = vmatpush.msra.mxu3 %v6668_v20  ;;  %14296 = vst [vmem:[#allocation61_spill] sm:$0xff] %v11558_v29  ;;  %v5480_v20 = vld [vmem:[#allocation2 + $0x191] sm:$0xff]  ;;  %v5481_v29 = vld [vmem:[#allocation2 + $0x1a9] sm:$0xff] }
 0x6ff   :  { %8256 = vmatmul.msk.f32.gmra.mxu1 %vm564_vm2, %v4944_v6  ;;  %v5398_v5 = vadd.f32 %v5212_v43, %v4864_v28  ;;  %v11554_v6 = vpop.f32.mrf.mxu3 }
 0x700   :  { %8324 = vmatmul.msk.f32.gmra.mxu2 %vm564_vm2, %v5478_v51 }
 0x704   :  { %v5746_v13 = vpop.f32.mrf.mxu2 }
 0x705   :  { %v11543_v32 = vadd.f32 %v5746_v13, %v5398_v5  ;;  %v4946_v13 = vld [vmem:[#allocation2 + $0x190] sm:$0xff] }
 0x706   :  { %v5215_v24 = vpop.f32.mrf.mxu1 }
 0x707   :  { %8257 = vmatmul.msk.f32.gmra.mxu1 %vm564_vm2, %v4945_v11  ;;  %v5399_v43 = vadd.f32 %v5215_v24, %v4865_v10  ;;  %v4866_v11 = vadd.f32 %v10922_v60, %v10979_v59  ;;  %v4290_v10 = vpop.f32.mrf.mxu3  ;;  %v4825_v60 = vpop.f32.mrf.mxu0 }
 0x708   :  { %8325 = vmatmul.msk.f32.gmra.mxu2 %vm564_vm2, %v5479_v17 }
 0x70c   :  { %v5749_v51 = vpop.f32.mrf.mxu2 }
 0x70d   :  { %v11556_v28 = vadd.f32 %v5749_v51, %v5399_v43  ;;  %v4378_v43 = vadd.f32 %v4290_v10, %v11422_v21  ;;  %v4947_v51 = vld [vmem:[#allocation2 + $0x1a8] sm:$0xff]  ;;  %v5482_v21 = vld [vmem:[#allocation2 + $0x1b1] sm:$0xff]  ;;  %v4868_v10 = vadd.f32 %v10957_v44, %v11007_v55 }
 0x70e   :  { %v5218_v5 = vpop.f32.mrf.mxu1  ;;  %v4950_v55 = vld [vmem:[#allocation2 + $0x1d0] sm:$0xff] }
 0x70f   :  { %8258 = vmatmul.msk.f32.gmra.mxu1 %vm564_vm2, %v4946_v13  ;;  %v5400_v50 = vadd.f32 %v5218_v5, %v4866_v11  ;;  %v4867_v13 = vadd.f32 %v10941_v53, %v10992_v7 }
 0x710   :  { %8326 = vmatmul.msk.f32.gmra.mxu2 %vm564_vm2, %v5480_v20  ;;  %v11571_v20 = vadd.f32 %v4825_v60, %v4378_v43  ;;  %v4949_v43 = vld [vmem:[#allocation2 + $0x1c8] sm:$0xff] }
 0x714   :  { %v5752_v56 = vpop.f32.mrf.mxu2 }
 0x715   :  { %v11564_v24 = vadd.f32 %v5752_v56, %v5400_v50  ;;  %v4948_v56 = vld [vmem:[#allocation2 + $0x1b0] sm:$0xff] }
 0x716   :  { %v5221_v17 = vpop.f32.mrf.mxu1 }
 0x717   :  { %8259 = vmatmul.msk.f32.gmra.mxu1 %vm564_vm2, %v4947_v51  ;;  %v5401_v59 = vadd.f32 %v5221_v17, %v4867_v13  ;;  %v5483_v51 = vld [vmem:[#allocation2 + $0x1c9] sm:$0xff]  ;;  %v4869_v13 = vadd.f32 %v10974_v63, %v11022_v22 }
 0x718   :  { %8327 = vmatmul.msk.f32.gmra.mxu2 %vm564_vm2, %v5481_v29  ;;  %v4951_v22 = vld [vmem:[#allocation2 + $0x1e8] sm:$0xff] }
 0x71c   :  { %v5755_v5 = vpop.f32.mrf.mxu2 }
 0x71d   :  { %v11573_v11 = vadd.f32 %v5755_v5, %v5401_v59 }
 0x71e   :  { %v5224_v50 = vpop.f32.mrf.mxu1 }
 0x71f   :  { %8260 = vmatmul.msk.f32.gmra.mxu1 %vm564_vm2, %v4948_v56  ;;  %v5402_v53 = vadd.f32 %v5224_v50, %v4868_v10  ;;  %v5484_v50 = vld [vmem:[#allocation2 + $0x1d1] sm:$0xff]  ;;  %v4870_v56 = vadd.f32 %v10994_v45, %v11037_v15 }
 0x720   :  { %8328 = vmatmul.msk.f32.gmra.mxu2 %vm564_vm2, %v5482_v21  ;;  %v4952_v15 = vld [vmem:[#allocation2 + $0x1f0] sm:$0xff] }
 0x724   :  { %v5758_v7 = vpop.f32.mrf.mxu2 }
 0x725   :  { %v11579_v29 = vadd.f32 %v5758_v7, %v5402_v53  ;;  %v5485_v7 = vld [vmem:[#allocation2 + $0x1e9] sm:$0xff] }
 0x726   :  { %v5227_v17 = vpop.f32.mrf.mxu1 }
 0x727   :  { %8261 = vmatmul.msk.f32.gmra.mxu1 %vm564_vm2, %v4949_v43  ;;  %v5403_v60 = vadd.f32 %v5227_v17, %v4869_v13  ;;  %v4871_v17 = vadd.f32 %v11014_v47, %v11050_v38  ;;  %v4953_v38 = vld [vmem:[#allocation2 + $0x208] sm:$0xff] }
 0x728   :  { %8329 = vmatmul.msk.f32.gmra.mxu2 %vm564_vm2, %v5483_v51 }
 0x72c   :  { %v5761_v59 = vpop.f32.mrf.mxu2 }
 0x72d   :  { %v11585_v5 = vadd.f32 %v5761_v59, %v5403_v60  ;;  %v5486_v60 = vld [vmem:[#allocation2 + $0x1f1] sm:$0xff]  ;;  %v4872_v59 = vadd.f32 %v11029_v2, %v11062_v61 }
 0x72e   :  { %v5230_v44 = vpop.f32.mrf.mxu1  ;;  %v4954_v61 = vld [vmem:[#allocation2 + $0x210] sm:$0xff] }
 0x72f   :  { %8262 = vmatmul.msk.f32.gmra.mxu1 %vm564_vm2, %v4950_v55  ;;  %v5404_v21 = vadd.f32 %v5230_v44, %v4870_v56  ;;  %v5487_v56 = vld [vmem:[#allocation2 + $0x209] sm:$0xff] }
 0x730   :  { %8330 = vmatmul.msk.f32.gmra.mxu2 %vm564_vm2, %v5484_v50 }
 0x734   :  { %v5764_v10 = vpop.f32.mrf.mxu2 }
 0x735   :  { %v11591_v53 = vadd.f32 %v5764_v10, %v5404_v21  ;;  %v4873_v21 = vadd.f32 %v11047_v3, %v11077_v42  ;;  %v4955_v42 = vld [vmem:[#allocation2 + $0x228] sm:$0xff] }
 0x736   :  { %v5233_v63 = vpop.f32.mrf.mxu1 }
 0x737   :  { %8263 = vmatmul.msk.f32.gmra.mxu1 %vm564_vm2, %v4951_v22  ;;  %v5405_v43 = vadd.f32 %v5233_v63, %v4871_v17  ;;  %v4874_v17 = vadd.f32 %v11060_v49, %v11095_v25  ;;  %v4956_v25 = vld [vmem:[#allocation2 + $0x230] sm:$0xff] }
 0x738   :  { %8331 = vmatmul.msk.f32.gmra.mxu2 %vm564_vm2, %v5485_v7  ;;  %v5488_v7 = vld [vmem:[#allocation2 + $0x211] sm:$0xff] }
 0x73c   :  { %v5767_v51 = vpop.f32.mrf.mxu2 }
 0x73d   :  { %v11597_v13 = vadd.f32 %v5767_v51, %v5405_v43 }
 0x73e   :  { %v5236_v45 = vpop.f32.mrf.mxu1 }
 0x73f   :  { %8264 = vmatmul.msk.f32.gmra.mxu1 %vm564_vm2, %v4952_v15  ;;  %v5406_v44 = vadd.f32 %v5236_v45, %v4872_v59  ;;  %v5489_v15 = vld [vmem:[#allocation2 + $0x229] sm:$0xff] }
 0x740   :  { %8332 = vmatmul.msk.f32.gmra.mxu2 %vm564_vm2, %v5486_v60  ;;  %v4875_v60 = vadd.f32 %v11087_v23, %v11110_v1  ;;  %v4957_v1 = vld [vmem:[#allocation2 + $0x288] sm:$0xff] }
 0x744   :  { %v5770_v55 = vpop.f32.mrf.mxu2 }
 0x745   :  { %v11603_v50 = vadd.f32 %v5770_v55, %v5406_v44 }
 0x746   :  { %v5239_v47 = vpop.f32.mrf.mxu1 }
 0x747   :  { %8265 = vmatmul.msk.f32.gmra.mxu1 %vm564_vm2, %v4953_v38  ;;  %v5407_v10 = vadd.f32 %v5239_v47, %v4873_v21  ;;  %v5490_v47 = vld [vmem:[#allocation2 + $0x231] sm:$0xff]  ;;  %v4876_v38 = vadd.f32 %v11102_v31, %v11124_v18 }
 0x748   :  { %8333 = vmatmul.msk.f32.gmra.mxu2 %vm564_vm2, %v5487_v56  ;;  %v4958_v18 = vld [vmem:[#allocation2 + $0x290] sm:$0xff] }
 0x74c   :  { %v5773_v63 = vpop.f32.mrf.mxu2 }
 0x74d   :  { %v11609_v22 = vadd.f32 %v5773_v63, %v5407_v10  ;;  %v5491_v63 = vld [vmem:[#allocation2 + $0x289] sm:$0xff] }
 0x74e   :  { %v5242_v2 = vpop.f32.mrf.mxu1 }
 0x74f   :  { %8266 = vmatmul.msk.f32.gmra.mxu1 %vm564_vm2, %v4954_v61  ;;  %v5408_v43 = vadd.f32 %v5242_v2, %v4874_v17  ;;  %v4877_v2 = vadd.f32 %v11121_v57, %v11133_v30  ;;  %v4959_v30 = vld [vmem:[#allocation2 + $0x2a8] sm:$0xff] }
 0x750   :  { %8334 = vmatmul.msk.f32.gmra.mxu2 %vm564_vm2, %v5488_v7 }
 0x754   :  { %v5776_v51 = vpop.f32.mrf.mxu2 }
 0x755   :  { %v11615_v45 = vadd.f32 %v5776_v51, %v5408_v43  ;;  %v5492_v43 = vld [vmem:[#allocation2 + $0x291] sm:$0xff]  ;;  %v4878_v51 = vadd.f32 %v11131_v58, %v11141_v62 }
 0x756   :  { %v5245_v3 = vpop.f32.mrf.mxu1  ;;  %v4960_v62 = vld [vmem:[#allocation2 + $0x2b0] sm:$0xff] }
 0x757   :  { %8267 = vmatmul.msk.f32.gmra.mxu1 %vm564_vm2, %v4955_v42  ;;  %v5409_v59 = vadd.f32 %v5245_v3, %v4875_v60  ;;  %v5493_v60 = vld [vmem:[#allocation2 + $0x2a9] sm:$0xff] }
 0x758   :  { %8335 = vmatmul.msk.f32.gmra.mxu2 %vm564_vm2, %v5489_v15 }
 0x75c   :  { %v5779_v44 = vpop.f32.mrf.mxu2 }
 0x75d   :  { %v11621_v55 = vadd.f32 %v5779_v44, %v5409_v59  ;;  %v14297_v59 = vld [vmem:[#allocation16_spill] sm:$0xff] }
 0x75e   :  { %v5248_v49 = vpop.f32.mrf.mxu1  ;;  %v4879_v44 = vadd.f32 %v14297_v59, %v11151_v40  ;;  %v5496_v59 = vld [vmem:[#allocation2 + $0x2d1] sm:$0xff] }
 0x75f   :  { %8268 = vmatmul.msk.f32.gmra.mxu1 %vm564_vm2, %v4956_v25  ;;  %v5410_v56 = vadd.f32 %v5248_v49, %v4876_v38  ;;  %v5494_v38 = vld [vmem:[#allocation2 + $0x2b1] sm:$0xff] }
 0x760   :  { %8336 = vmatmul.msk.f32.gmra.mxu2 %vm564_vm2, %v5490_v47 }
 0x764   :  { %v5782_v21 = vpop.f32.mrf.mxu2 }
 0x765   :  { %v11627_v10 = vadd.f32 %v5782_v21, %v5410_v56  ;;  %v14298_v56 = vld [vmem:[#allocation18_spill] sm:$0xff] }
 0x766   :  { %v5251_v23 = vpop.f32.mrf.mxu1  ;;  %v14299_v21 = vld [vmem:[#allocation38_spill] sm:$0xff] }
 0x767   :  { %8269 = vmatmul.msk.f32.gmra.mxu1 %vm564_vm2, %v4957_v1  ;;  %v5411_v61 = vadd.f32 %v5251_v23, %v4877_v2  ;;  %v4880_v23 = vadd.f32 %v14299_v21, %v14298_v56  ;;  %v4963_v21 = vld [vmem:[#allocation2 + $0x2e8] sm:$0xff] }
 0x768   :  { %8337 = vmatmul.msk.f32.gmra.mxu2 %vm564_vm2, %v5491_v63 }
 0x76c   :  { %v5785_v7 = vpop.f32.mrf.mxu2 }
 0x76d   :  { %v11633_v17 = vadd.f32 %v5785_v7, %v5411_v61  ;;  %v6667_v61 = vld [vmem:[%s13974_s3 + $0x10] sm:$0xff]  ;;  %v4961_v7 = vld [vmem:[#allocation2 + $0x2c8] sm:$0xff] }
 0x76e   :  { %v5254_v31 = vpop.f32.mrf.mxu1  ;;  %6878 = vmatpush.msra.mxu3 %v6667_v61 }
 0x76f   :  { %8270 = vmatmul.msk.f32.gmra.mxu1 %vm564_vm2, %v4958_v18  ;;  %v5412_v3 = vadd.f32 %v5254_v31, %v4878_v51  ;;  %v5495_v31 = vld [vmem:[#allocation2 + $0x2c9] sm:$0xff] }
 0x770   :  { %8338 = vmatmul.msk.f32.gmra.mxu2 %vm564_vm2, %v5492_v43  ;;  %v14300_v18 = vld [vmem:[#allocation20_spill] sm:$0xff] }
 0x771   :  { %v14301_v43 = vld [vmem:[#allocation40_spill] sm:$0xff] }
 0x772   :  { %v4881_v51 = vadd.f32 %v14301_v43, %v14300_v18  ;;  %v4964_v43 = vld [vmem:[#allocation2 + $0x2f0] sm:$0xff] }
 0x774   :  { %v5788_v42 = vpop.f32.mrf.mxu2 }
 0x775   :  { %v11639_v15 = vadd.f32 %v5788_v42, %v5412_v3 }
 0x776   :  { %v5257_v57 = vpop.f32.mrf.mxu1 }
 0x777   :  { %8271 = vmatmul.msk.f32.gmra.mxu1 %vm564_vm2, %v4959_v30  ;;  %v5413_v49 = vadd.f32 %v5257_v57, %v4879_v44  ;;  %v14302_v44 = vld [vmem:[#allocation22_spill] sm:$0xff] }
 0x778   :  { %8339 = vmatmul.msk.f32.gmra.mxu2 %vm564_vm2, %v5493_v60  ;;  %v4962_v60 = vld [vmem:[#allocation2 + $0x2d0] sm:$0xff] }
 0x77c   :  { %v5791_v25 = vpop.f32.mrf.mxu2 }
 0x77d   :  { %v11645_v47 = vadd.f32 %v5791_v25, %v5413_v49  ;;  %v14303_v49 = vld [vmem:[#allocation42_spill] sm:$0xff] }
 0x77e   :  { %v5260_v58 = vpop.f32.mrf.mxu1  ;;  %v4882_v25 = vadd.f32 %v14303_v49, %v14302_v44 }
 0x77f   :  { %8272 = vmatmul.msk.f32.gmra.mxu1 %vm564_vm2, %v4960_v62  ;;  %v5414_v1 = vadd.f32 %v5260_v58, %v4880_v23  ;;  %v5497_v23 = vld [vmem:[#allocation2 + $0x2e9] sm:$0xff] }
 0x780   :  { %8340 = vmatmul.msk.f32.gmra.mxu2 %vm564_vm2, %v5494_v38 }
 0x784   :  { %v5794_v63 = vpop.f32.mrf.mxu2 }
 0x785   :  { %v11651_v2 = vadd.f32 %v5794_v63, %v5414_v1  ;;  %v14304_v1 = vld [vmem:[#allocation44_spill] sm:$0xff] }
 0x786   :  { %v5263_v40 = vpop.f32.mrf.mxu1  ;;  %v14305_v63 = vld [vmem:[#allocation24_spill] sm:$0xff] }
 0x787   :  { %8273 = vmatmul.msk.f32.gmra.mxu1 %vm564_vm2, %v4961_v7  ;;  %v5415_v3 = vadd.f32 %v5263_v40, %v4881_v51  ;;  %v4883_v40 = vadd.f32 %v14305_v63, %v14304_v1  ;;  %v5498_v51 = vld [vmem:[#allocation2 + $0x2f1] sm:$0xff] }
 0x788   :  { %8341 = vmatmul.msk.f32.gmra.mxu2 %vm564_vm2, %v5495_v31 }
 0x78c   :  { %v5797_v42 = vpop.f32.mrf.mxu2 }
 0x78d   :  { %v11660_v57 = vadd.f32 %v5797_v42, %v5415_v3  ;;  %v14306_v3 = vld [vmem:[#allocation46_spill] sm:$0xff] }
 0x78e   :  { %v5266_v30 = vpop.f32.mrf.mxu1  ;;  %v14307_v42 = vld [vmem:[#allocation26_spill] sm:$0xff] }
 0x78f   :  { %8274 = vmatmul.msk.f32.gmra.mxu1 %vm564_vm2, %v4962_v60  ;;  %v5416_v58 = vadd.f32 %v5266_v30, %v4882_v25  ;;  %v4884_v30 = vadd.f32 %v14307_v42, %v14306_v3  ;;  %v4965_v25 = vld [vmem:[#allocation2 + $0x308] sm:$0xff] }
 0x790   :  { %8342 = vmatmul.msk.f32.gmra.mxu2 %vm564_vm2, %v5496_v59 }
 0x794   :  { %v5800_v62 = vpop.f32.mrf.mxu2 }
 0x795   :  { %v11666_v38 = vadd.f32 %v5800_v62, %v5416_v58  ;;  %v5499_v58 = vld [vmem:[#allocation2 + $0x309] sm:$0xff] }
 0x796   :  { %v5269_v56 = vpop.f32.mrf.mxu1  ;;  %v14308_v62 = vld [vmem:[#allocation48_spill] sm:$0xff] }
 0x797   :  { %8275 = vmatmul.msk.f32.gmra.mxu1 %vm564_vm2, %v4963_v21  ;;  %v5417_v61 = vadd.f32 %v5269_v56, %v4883_v40  ;;  %v14309_v56 = vld [vmem:[#allocation7_spill] sm:$0xff] }
 0x798   :  { %8343 = vmatmul.msk.f32.gmra.mxu2 %vm564_vm2, %v5497_v23  ;;  %v4885_v21 = vadd.f32 %v14309_v56, %v14308_v62 }
 0x79c   :  { %v5803_v7 = vpop.f32.mrf.mxu2 }
 0x79d   :  { %v11672_v31 = vadd.f32 %v5803_v7, %v5417_v61  ;;  %v4966_v61 = vld [vmem:[#allocation2 + $0x310] sm:$0xff] }
 0x79e   :  { %v5272_v18 = vpop.f32.mrf.mxu1  ;;  %v5500_v7 = vld [vmem:[#allocation2 + $0x311] sm:$0xff] }
 0x79f   :  { %8276 = vmatmul.msk.f32.gmra.mxu1 %vm564_vm2, %v4964_v43  ;;  %v5418_v60 = vadd.f32 %v5272_v18, %v4884_v30  ;;  %v14310_v18 = vld [vmem:[#allocation6_spill] sm:$0xff]  ;;  %v14311_v43 = vld [vmem:[#allocation8_spill] sm:$0xff] }
 0x7a0   :  { %8344 = vmatmul.msk.f32.gmra.mxu2 %vm564_vm2, %v5498_v51  ;;  %v4886_v51 = vadd.f32 %v14311_v43, %v14310_v18  ;;  %v14315_v18 = vld [vmem:[#allocation13_spill] sm:$0xff] }
 0x7a4   :  { %v5806_v59 = vpop.f32.mrf.mxu2 }
 0x7a5   :  { %v11678_v44 = vadd.f32 %v5806_v59, %v5418_v60  ;;  %v4967_v59 = vld [vmem:[#allocation2 + $0x328] sm:$0xff] }
 0x7a6   :  { %v5275_v49 = vpop.f32.mrf.mxu1 }
 0x7a7   :  { %8277 = vmatmul.msk.f32.gmra.mxu1 %vm564_vm2, %v4965_v25  ;;  %v5419_v23 = vadd.f32 %v5275_v49, %v4885_v21  ;;  %v5501_v49 = vld [vmem:[#allocation2 + $0x329] sm:$0xff]  ;;  %v14312_v25 = vld [vmem:[#allocation9_spill] sm:$0xff] }
 0x7a8   :  { %8345 = vmatmul.msk.f32.gmra.mxu2 %vm564_vm2, %v5499_v58  ;;  %v14313_v58 = vld [vmem:[#allocation11_spill] sm:$0xff] }
 0x7a9   :  { %v4887_v62 = vadd.f32 %v14313_v58, %v14312_v25  ;;  %v14317_v25 = vld [vmem:[#allocation12_spill] sm:$0xff]  ;;  %v14318_v58 = vld [vmem:[#allocation15_spill] sm:$0xff] }
 0x7ac   :  { %v5809_v1 = vpop.f32.mrf.mxu2 }
 0x7ad   :  { %v11684_v63 = vadd.f32 %v5809_v1, %v5419_v23 }
 0x7ae   :  { %v5278_v40 = vpop.f32.mrf.mxu1 }
 0x7af   :  { %8278 = vmatmul.msk.f32.gmra.mxu1 %vm564_vm2, %v4966_v61  ;;  %v5420_v3 = vadd.f32 %v5278_v40, %v4886_v51  ;;  %v4968_v61 = vld [vmem:[#allocation2 + $0x330] sm:$0xff] }
 0x7b0   :  { %8346 = vmatmul.msk.f32.gmra.mxu2 %vm564_vm2, %v5500_v7  ;;  %v5502_v40 = vld [vmem:[#allocation2 + $0x331] sm:$0xff]  ;;  %v14314_v7 = vld [vmem:[#allocation10_spill] sm:$0xff] }
 0x7b1   :  { %v4888_v43 = vadd.f32 %v14315_v18, %v14314_v7  ;;  %v14320_v18 = vld [vmem:[#allocation14_spill] sm:$0xff] }
 0x7b4   :  { %v5812_v42 = vpop.f32.mrf.mxu2 }
 0x7b5   :  { %v11690_v30 = vadd.f32 %v5812_v42, %v5420_v3 }
 0x7b6   :  { %v5281_v60 = vpop.f32.mrf.mxu1 }
 0x7b7   :  { %8279 = vmatmul.msk.f32.gmra.mxu1 %vm564_vm2, %v4967_v59  ;;  %v5421_v56 = vadd.f32 %v5281_v60, %v4887_v62  ;;  %v5503_v60 = vld [vmem:[#allocation2 + $0x349] sm:$0xff]  ;;  %v4889_v62 = vadd.f32 %v14318_v58, %v14317_v25  ;;  %v14323_v58 = vld [vmem:[#allocation17_spill] sm:$0xff] }
 0x7b8   :  { %8347 = vmatmul.msk.f32.gmra.mxu2 %vm564_vm2, %v5501_v49  ;;  %v4969_v49 = vld [vmem:[#allocation2 + $0x348] sm:$0xff] }
 0x7bc   :  { %v5815_v21 = vpop.f32.mrf.mxu2 }
 0x7bd   :  { %v11696_v23 = vadd.f32 %v5815_v21, %v5421_v56 }
 0x7be   :  { %v5284_v1 = vpop.f32.mrf.mxu1 }
 0x7bf   :  { %8280 = vmatmul.msk.f32.gmra.mxu1 %vm564_vm2, %v4968_v61  ;;  %v5422_v51 = vadd.f32 %v5284_v1, %v4888_v43  ;;  %v5504_v1 = vld [vmem:[#allocation2 + $0x351] sm:$0xff]  ;;  %v14321_v43 = vld [vmem:[#allocation19_spill] sm:$0xff] }
 0x7c0   :  { %8348 = vmatmul.msk.f32.gmra.mxu2 %vm564_vm2, %v5502_v40  ;;  %v4970_v40 = vld [vmem:[#allocation2 + $0x350] sm:$0xff] }
 0x7c4   :  { %v5818_v3 = vpop.f32.mrf.mxu2 }
 0x7c5   :  { %v11702_v42 = vadd.f32 %v5818_v3, %v5422_v51  ;;  %v4890_v51 = vadd.f32 %v14321_v43, %v14320_v18  ;;  %v14326_v43 = vld [vmem:[#allocation21_spill] sm:$0xff] }
 0x7c6   :  { %v5287_v59 = vpop.f32.mrf.mxu1 }
 0x7c7   :  { %14316 = vst [vmem:[#allocation16_spill] sm:$0xff] %v11702_v42  ;;  %8281 = vmatmul.msk.f32.gmra.mxu1 %vm564_vm2, %v4969_v49  ;;  %v5423_v56 = vadd.f32 %v5287_v59, %v4889_v62  ;;  %v5505_v59 = vld [vmem:[#allocation2 + $0x369] sm:$0xff]  ;;  %v14324_v62 = vld [vmem:[#allocation25_spill] sm:$0xff] }
 0x7c8   :  { %8349 = vmatmul.msk.f32.gmra.mxu2 %vm564_vm2, %v5503_v60  ;;  %v4971_v60 = vld [vmem:[#allocation2 + $0x368] sm:$0xff] }
 0x7cc   :  { %v5821_v21 = vpop.f32.mrf.mxu2 }
 0x7cd   :  { %v11708_v61 = vadd.f32 %v5821_v21, %v5423_v56  ;;  %v4891_v56 = vadd.f32 %v14324_v62, %v14323_v58  ;;  %v14329_v62 = vld [vmem:[#allocation23_spill] sm:$0xff] }
 0x7ce   :  { %v5290_v7 = vpop.f32.mrf.mxu1 }
 0x7cf   :  { %14319 = vst [vmem:[#allocation18_spill] sm:$0xff] %v11708_v61  ;;  %8282 = vmatmul.msk.f32.gmra.mxu1 %vm564_vm2, %v4970_v40  ;;  %v5424_v3 = vadd.f32 %v5290_v7, %v4890_v51  ;;  %v5506_v7 = vld [vmem:[#allocation2 + $0x371] sm:$0xff] }
 0x7d0   :  { %8350 = vmatmul.msk.f32.gmra.mxu2 %vm564_vm2, %v5504_v1  ;;  %v4972_v1 = vld [vmem:[#allocation2 + $0x370] sm:$0xff] }
 0x7d1   :  { %v14327_v51 = vld [vmem:[#allocation28_spill] sm:$0xff] }
 0x7d4   :  { %v5824_v49 = vpop.f32.mrf.mxu2 }
 0x7d5   :  { %v11714_v42 = vadd.f32 %v5824_v49, %v5424_v3  ;;  %v4892_v3 = vadd.f32 %v14327_v51, %v14326_v43  ;;  %v14331_v51 = vld [vmem:[#allocation27_spill] sm:$0xff] }
 0x7d6   :  { %v5293_v25 = vpop.f32.mrf.mxu1 }
 0x7d7   :  { %14322 = vst [vmem:[#allocation38_spill] sm:$0xff] %v11714_v42  ;;  %8283 = vmatmul.msk.f32.gmra.mxu1 %vm564_vm2, %v4971_v60  ;;  %v5425_v21 = vadd.f32 %v5293_v25, %v4891_v56  ;;  %v5507_v25 = vld [vmem:[#allocation2 + $0x389] sm:$0xff]  ;;  %v14330_v56 = vld [vmem:[#allocation30_spill] sm:$0xff] }
 0x7d8   :  { %8351 = vmatmul.msk.f32.gmra.mxu2 %vm564_vm2, %v5505_v59  ;;  %v4973_v59 = vld [vmem:[#allocation2 + $0x388] sm:$0xff] }
 0x7dc   :  { %v5827_v40 = vpop.f32.mrf.mxu2 }
 0x7dd   :  { %v11720_v61 = vadd.f32 %v5827_v40, %v5425_v21  ;;  %v4893_v21 = vadd.f32 %v14330_v56, %v14329_v62  ;;  %v14333_v56 = vld [vmem:[#allocation29_spill] sm:$0xff] }
 0x7de   :  { %v5296_v18 = vpop.f32.mrf.mxu1 }
 0x7df   :  { %14325 = vst [vmem:[#allocation20_spill] sm:$0xff] %v11720_v61  ;;  %8284 = vmatmul.msk.f32.gmra.mxu1 %vm564_vm2, %v4972_v1  ;;  %v5426_v49 = vadd.f32 %v5296_v18, %v4892_v3  ;;  %v5508_v18 = vld [vmem:[#allocation2 + $0x391] sm:$0xff] }
 0x7e0   :  { %8352 = vmatmul.msk.f32.gmra.mxu2 %vm564_vm2, %v5506_v7  ;;  %v4974_v7 = vld [vmem:[#allocation2 + $0x390] sm:$0xff] }
 0x7e1   :  { %v14332_v3 = vld [vmem:[#allocation32_spill] sm:$0xff] }
 0x7e4   :  { %v5830_v60 = vpop.f32.mrf.mxu2 }
 0x7e5   :  { %v11726_v42 = vadd.f32 %v5830_v60, %v5426_v49  ;;  %v4894_v49 = vadd.f32 %v14332_v3, %v14331_v51  ;;  %v14334_v3 = vld [vmem:[#allocation31_spill] sm:$0xff] }
 0x7e6   :  { %v5299_v58 = vpop.f32.mrf.mxu1 }
 0x7e7   :  { %14328 = vst [vmem:[#allocation40_spill] sm:$0xff] %v11726_v42  ;;  %8285 = vmatmul.msk.f32.gmra.mxu1 %vm564_vm2, %v4973_v59  ;;  %v5427_v40 = vadd.f32 %v5299_v58, %v4893_v21  ;;  %v5509_v58 = vld [vmem:[#allocation2 + $0x3a9] sm:$0xff]  ;;  %v4895_v21 = vadd.f32 %v11326_v16, %v14333_v56 }
 0x7e8   :  { %8353 = vmatmul.msk.f32.gmra.mxu2 %vm564_vm2, %v5507_v25  ;;  %v4975_v25 = vld [vmem:[#allocation2 + $0x3a8] sm:$0xff] }
 0x7e9   :  { %v5511_v56 = vld [vmem:[#allocation2 + $0x3c9] sm:$0xff] }
 0x7ec   :  { %v5833_v1 = vpop.f32.mrf.mxu2 }
 0x7ed   :  { %v11732_v61 = vadd.f32 %v5833_v1, %v5427_v40 }
 0x7ee   :  { %v5302_v43 = vpop.f32.mrf.mxu1 }
 0x7ef   :  { %8286 = vmatmul.msk.f32.gmra.mxu1 %vm564_vm2, %v4974_v7  ;;  %v5428_v60 = vadd.f32 %v5302_v43, %v4894_v49  ;;  %v5510_v43 = vld [vmem:[#allocation2 + $0x3b1] sm:$0xff]  ;;  %v4896_v49 = vadd.f32 %v11336_v46, %v14334_v3 }
 0x7f0   :  { %8354 = vmatmul.msk.f32.gmra.mxu2 %vm564_vm2, %v5508_v18  ;;  %v4976_v18 = vld [vmem:[#allocation2 + $0x3b0] sm:$0xff] }
 0x7f1   :  { %v5512_v3 = vld [vmem:[#allocation2 + $0x3d1] sm:$0xff] }
 0x7f4   :  { %v5836_v59 = vpop.f32.mrf.mxu2 }
 0x7f5   :  { %v11738_v42 = vadd.f32 %v5836_v59, %v5428_v60 }
 0x7f6   :  { %v5305_v62 = vpop.f32.mrf.mxu1 }
 0x7f7   :  { %8287 = vmatmul.msk.f32.gmra.mxu1 %vm564_vm2, %v4975_v25  ;;  %v5429_v40 = vadd.f32 %v5305_v62, %v4895_v21  ;;  %v6666_v62 = vld [vmem:[%s13974_s3 + $0x8] sm:$0xff]  ;;  %v14336_v21 = vld [vmem:[#allocation33_spill] sm:$0xff] }
 0x7f8   :  { %8355 = vmatmul.msk.f32.gmra.mxu2 %vm564_vm2, %v5509_v58  ;;  %v4977_v58 = vld [vmem:[#allocation2 + $0x3c8] sm:$0xff]  ;;  %6879 = vmatpush.msra.mxu3 %v6666_v62 }
 0x7fc   :  { %v5839_v1 = vpop.f32.mrf.mxu2 }
 0x7fd   :  { %v11744_v7 = vadd.f32 %v5839_v1, %v5429_v40  ;;  %v4897_v40 = vadd.f32 %v11350_v9, %v14336_v21  ;;  %v14339_v21 = vld [vmem:[#allocation35_spill] sm:$0xff] }
 0x7fe   :  { %v5308_v51 = vpop.f32.mrf.mxu1 }
 0x7ff   :  { %8288 = vmatmul.msk.f32.gmra.mxu1 %vm564_vm2, %v4976_v18  ;;  %v5430_v60 = vadd.f32 %v5308_v51, %v4896_v49  ;;  %v14337_v49 = vld [vmem:[#allocation34_spill] sm:$0xff] }
 0x800   :  { %8356 = vmatmul.msk.f32.gmra.mxu2 %vm564_vm2, %v5510_v43  ;;  %v4978_v43 = vld [vmem:[#allocation2 + $0x3d0] sm:$0xff] }
 0x804   :  { %v5842_v59 = vpop.f32.mrf.mxu2 }
 0x805   :  { %v11750_v25 = vadd.f32 %v5842_v59, %v5430_v60  ;;  %v14338_v60 = vld [vmem:[#allocation43_spill] sm:$0xff] }
 0x806   :  { %v5311_v16 = vpop.f32.mrf.mxu1  ;;  %v4898_v59 = vadd.f32 %v14338_v60, %v14337_v49 }
 0x807   :  { %14335 = vst [vmem:[#allocation22_spill] sm:$0xff] %v11750_v25  ;;  %8289 = vmatmul.msk.f32.gmra.mxu1 %vm564_vm2, %v4977_v58  ;;  %v5431_v46 = vadd.f32 %v5311_v16, %v4897_v40  ;;  %v5513_v16 = vld [vmem:[#allocation2 + $0x3e9] sm:$0xff]  ;;  %v4899_v40 = vadd.f32 %v11370_v27, %v14339_v21 }
 0x808   :  { %8357 = vmatmul.msk.f32.gmra.mxu2 %vm564_vm2, %v5511_v56  ;;  %v4979_v56 = vld [vmem:[#allocation2 + $0x3e8] sm:$0xff] }
 0x80c   :  { %v5845_v1 = vpop.f32.mrf.mxu2 }
 0x80d   :  { %v11759_v51 = vadd.f32 %v5845_v1, %v5431_v46 }
 0x80e   :  { %v5314_v18 = vpop.f32.mrf.mxu1 }
 0x80f   :  { %8290 = vmatmul.msk.f32.gmra.mxu1 %vm564_vm2, %v4978_v43  ;;  %v5432_v62 = vadd.f32 %v5314_v18, %v4898_v59  ;;  %v14340_v18 = vld [vmem:[#allocation36_spill] sm:$0xff] }
 0x810   :  { %8358 = vmatmul.msk.f32.gmra.mxu2 %vm564_vm2, %v5512_v3  ;;  %v4980_v3 = vld [vmem:[#allocation2 + $0x3f0] sm:$0xff]  ;;  %v4366_v60 = vadd.f32 %v11434_v34, %v14340_v18 }
 0x811   :  { %v5514_v59 = vld [vmem:[#allocation2 + $0x3f1] sm:$0xff] }
 0x814   :  { %v5848_v58 = vpop.f32.mrf.mxu2 }
 0x815   :  { %v11765_v25 = vadd.f32 %v5848_v58, %v5432_v62  ;;  %v14341_v62 = vld [vmem:[#allocation37_spill] sm:$0xff] }
 0x816   :  { %v5317_v9 = vpop.f32.mrf.mxu1  ;;  %v4900_v58 = vadd.f32 %v11381_v41, %v14341_v62  ;;  %v14343_v62 = vld [vmem:[#allocation41_spill] sm:$0xff] }
 0x817   :  { %8291 = vmatmul.msk.f32.gmra.mxu1 %vm564_vm2, %v4979_v56  ;;  %v5433_v46 = vadd.f32 %v5317_v9, %v4899_v40  ;;  %v4901_v9 = vadd.f32 %v11438_v33, %v4366_v60  ;;  %v4982_v60 = vld [vmem:[#allocation2 + $0x410] sm:$0xff] }
 0x818   :  { %8359 = vmatmul.msk.f32.gmra.mxu2 %vm564_vm2, %v5513_v16 }
 0x81c   :  { %v5851_v1 = vpop.f32.mrf.mxu2 }
 0x81d   :  { %v11771_v43 = vadd.f32 %v5851_v1, %v5433_v46  ;;  %v4981_v46 = vld [vmem:[#allocation2 + $0x408] sm:$0xff] }
 0x81e   :  { %v5320_v49 = vpop.f32.mrf.mxu1  ;;  %v14342_v1 = vld [vmem:[#allocation39_spill] sm:$0xff] }
 0x81f   :  { %8292 = vmatmul.msk.f32.gmra.mxu1 %vm564_vm2, %v4980_v3  ;;  %v5434_v27 = vadd.f32 %v5320_v49, %v4900_v58  ;;  %v4367_v34 = vadd.f32 %v11443_v12, %v14342_v1  ;;  %v5515_v3 = vld [vmem:[#allocation2 + $0x409] sm:$0xff]  ;;  %v4368_v58 = vadd.f32 %v11454_v52, %v14343_v62 }
 0x820   :  { %8360 = vmatmul.msk.f32.gmra.mxu2 %vm564_vm2, %v5514_v59  ;;  %v5517_v1 = vld [vmem:[#allocation2 + $0x429] sm:$0xff] }
 0x821   :  { %v4902_v18 = vadd.f32 %v11448_v0, %v4367_v34 }
 0x824   :  { %v5854_v56 = vpop.f32.mrf.mxu2 }
 0x825   :  { %v11780_v16 = vadd.f32 %v5854_v56, %v5434_v27  ;;  %v5516_v27 = vld [vmem:[#allocation2 + $0x411] sm:$0xff]  ;;  %v4903_v56 = vadd.f32 %v11459_v48, %v4368_v58 }
 0x826   :  { %v5323_v21 = vpop.f32.mrf.mxu1 }
 0x827   :  { %v5435_v40 = vadd.f32 %v5323_v21, %v4901_v9  ;;  %8293 = vmatmul.msk.f32.gmra.mxu1 %vm564_vm2, %v4981_v46  ;;  %v4369_v46 = vadd.f32 %v11464_v14, %v11366_v54  ;;  %v14344_v14 = vld [vmem:[#allocation68_spill] sm:$0xff] }
 0x828   :  { %8361 = vmatmul.msk.f32.gmra.mxu2 %vm564_vm2, %v5515_v3 }
 0x829   :  { %v4904_v34 = vadd.f32 %v11468_v19, %v4369_v46  ;;  %v11818_v46 = vld [vmem:[%s13975_s4 + $0x3] ss:$0 sm:$0xff] }
 0x82c   :  { %v5857_v41 = vpop.f32.mrf.mxu2 }
 0x82d   :  { %v11787_v49 = vadd.f32 %v5857_v41, %v5435_v40  ;;  %v4983_v40 = vld [vmem:[#allocation2 + $0x428] sm:$0xff] }
 0x82e   :  { %v5326_v59 = vpop.f32.mrf.mxu1 }
 0x82f   :  { %v5436_v33 = vadd.f32 %v5326_v59, %v4902_v18  ;;  %8294 = vmatmul.msk.f32.gmra.mxu1 %vm564_vm2, %v4982_v60  ;;  %v4984_v18 = vld [vmem:[#allocation2 + $0x430] sm:$0xff]  ;;  %v4370_v59 = vadd.f32 %v11475_v4, %v11374_v35  ;;  %v14347_v4 = vld [vmem:[#allocation70_spill] sm:$0xff] }
 0x830   :  { %8362 = vmatmul.msk.f32.gmra.mxu2 %vm564_vm2, %v5516_v27  ;;  %v4985_v27 = vld [vmem:[#allocation2 + $0x448] sm:$0xff] }
 0x831   :  { %v4905_v60 = vadd.f32 %v14344_v14, %v4370_v59  ;;  %v5997_v14 = vadd.f32 %v11818_v46, %v11515_v26 }
 0x834   :  { %v5860_v12 = vpop.f32.mrf.mxu2 }
 0x835   :  { %v11794_v9 = vadd.f32 %v5860_v12, %v5436_v33  ;;  %v5518_v33 = vld [vmem:[#allocation2 + $0x431] sm:$0xff] }
 0x836   :  { %v5329_v21 = vpop.f32.mrf.mxu1  ;;  %v14345_v12 = vld [vmem:[#allocation45_spill] sm:$0xff] }
 0x837   :  { %v5437_v0 = vadd.f32 %v5329_v21, %v4903_v56  ;;  %8295 = vmatmul.msk.f32.gmra.mxu1 %vm564_vm2, %v4983_v40  ;;  %v14346_v56 = vld [vmem:[#allocation69_spill] sm:$0xff] }
 0x838   :  { %8363 = vmatmul.msk.f32.gmra.mxu2 %vm564_vm2, %v5517_v1  ;;  %v4371_v21 = vadd.f32 %v14346_v56, %v14345_v12  ;;  %v14352_v12 = vld [vmem:[#allocation73_spill] sm:$0xff] }
 0x83a   :  { %v4906_v40 = vadd.f32 %v14347_v4, %v4371_v21 }
 0x83c   :  { %v5863_v52 = vpop.f32.mrf.mxu2 }
 0x83d   :  { %v11801_v3 = vadd.f32 %v5863_v52, %v5437_v0  ;;  %v5519_v0 = vld [vmem:[#allocation2 + $0x449] sm:$0xff] }
 0x83e   :  { %v5332_v41 = vpop.f32.mrf.mxu1 }
 0x83f   :  { %v5438_v48 = vadd.f32 %v5332_v41, %v4904_v34  ;;  %8296 = vmatmul.msk.f32.gmra.mxu1 %vm564_vm2, %v4984_v18  ;;  %v4986_v41 = vld [vmem:[#allocation2 + $0x450] sm:$0xff] }
 0x840   :  { %8364 = vmatmul.msk.f32.gmra.mxu2 %vm564_vm2, %v5518_v33  ;;  %v14350_v18 = vld [vmem:[#allocation72_spill] sm:$0xff]  ;;  %v5998_v33 = vadd.f32 %v11818_v46, %v11525_v39  ;;  %v11837_v39 = vmax.f32 %v5997_v14, 0.0  ;;  %v14357_v14 = vld [vmem:[#allocation75_spill] sm:$0xff] }
 0x842   :  { %14353 = vst [vmem:[#allocation24_spill] sm:$0xff] %v11837_v39 }
 0x844   :  { %v5866_v54 = vpop.f32.mrf.mxu2 }
 0x845   :  { %v11808_v62 = vadd.f32 %v5866_v54, %v5438_v48  ;;  %v14349_v48 = vld [vmem:[#allocation47_spill] sm:$0xff]  ;;  %v5520_v54 = vld [vmem:[#allocation2 + $0x451] sm:$0xff] }
 0x846   :  { %v5335_v58 = vpop.f32.mrf.mxu1  ;;  %v4372_v59 = vadd.f32 %v14350_v18, %v14349_v48  ;;  %v6001_v18 = vadd.f32 %v11818_v46, %v11556_v28 }
 0x847   :  { %v5439_v19 = vadd.f32 %v5335_v58, %v4905_v60  ;;  %8297 = vmatmul.msk.f32.gmra.mxu1 %vm564_vm2, %v4985_v27  ;;  %v5999_v60 = vadd.f32 %v11818_v46, %v11535_v36  ;;  %v11832_v58 = vmax.f32 %v5998_v33, 0.0  ;;  %v14356_v36 = vld [vmem:[#allocation62_spill] sm:$0xff] }
 0x848   :  { %8365 = vmatmul.msk.f32.gmra.mxu2 %vm564_vm2, %v5519_v0  ;;  %v4907_v56 = vadd.f32 %v14352_v12, %v4372_v59  ;;  %v6002_v59 = vadd.f32 %v11818_v46, %v11564_v24  ;;  %v11867_v12 = vmax.f32 %v6001_v18, 0.0 }
 0x849   :  { %14351 = vst [vmem:[#allocation44_spill] sm:$0xff] %v11832_v58  ;;  %v11841_v26 = vmax.f32 %v5999_v60, 0.0  ;;  %v6259_v48 = vmul.f32 %v11832_v58, %v11832_v58  ;;  %v6126_v28 = vsel %vm564_vm2, %v11832_v58, 0.0  ;;  %v14358_v58 = vld [vmem:[#allocation50_spill] sm:$0xff] }
 0x84b   :  { %v6260_v33 = vmul.f32 %v11841_v26, %v11841_v26 }
 0x84c   :  { %v5869_v35 = vpop.f32.mrf.mxu2 }
 0x84d   :  { %v11820_v1 = vadd.f32 %v5869_v35, %v5439_v19  ;;  %v6000_v19 = vadd.f32 %v11818_v46, %v11543_v32  ;;  %v4987_v35 = vld [vmem:[#allocation2 + $0x468] sm:$0xff] }
 0x84e   :  { %v5338_v52 = vpop.f32.mrf.mxu1 }
 0x84f   :  { %14348 = vst [vmem:[#allocation42_spill] sm:$0xff] %v11820_v1  ;;  %v5440_v34 = vadd.f32 %v5338_v52, %v4906_v40  ;;  %8298 = vmatmul.msk.f32.gmra.mxu1 %vm564_vm2, %v4986_v41  ;;  %v5521_v40 = vld [vmem:[#allocation2 + $0x469] sm:$0xff]  ;;  %v14355_v52 = vld [vmem:[#allocation49_spill] sm:$0xff]  ;;  %v11847_v32 = vmax.f32 %v6000_v19, 0.0  ;;  %v6323_v19 = vsel %vm564_vm2, %v6259_v48, 0.0  ;;  %v6004_v48 = vadd.f32 %v11818_v46, %v11579_v29 }
 0x850   :  { %8366 = vmatmul.msk.f32.gmra.mxu2 %vm564_vm2, %v5520_v54  ;;  %v4373_v41 = vadd.f32 %v14356_v36, %v14355_v52  ;;  %v6003_v54 = vadd.f32 %v11818_v46, %v11573_v11  ;;  %v4988_v52 = vld [vmem:[#allocation2 + $0x470] sm:$0xff]  ;;  %v6128_v36 = vsel %vm564_vm2, %v11841_v26, 0.0  ;;  %v6005_v29 = vadd.f32 %v11818_v46, %v11585_v5 }
 0x852   :  { %v4908_v60 = vadd.f32 %v14357_v14, %v4373_v41  ;;  %v6325_v41 = vsel %vm564_vm2, %v6260_v33, 0.0  ;;  %v5522_v14 = vld [vmem:[#allocation2 + $0x471] sm:$0xff]  ;;  %v11883_v1 = vmax.f32 %v6003_v54, 0.0  ;;  %v6262_v33 = vmul.f32 %v11867_v12, %v11867_v12 }
 0x853   :  { %v6132_v54 = vsel %vm564_vm2, %v11867_v12, 0.0 }
 0x854   :  { %v5872_v27 = vpop.f32.mrf.mxu2  ;;  %14360 = vst [vmem:[#allocation26_spill] sm:$0xff] %v11883_v1  ;;  %v6264_v5 = vmul.f32 %v11883_v1, %v11883_v1 }
 0x855   :  { %v11839_v21 = vadd.f32 %v5872_v27, %v5440_v34  ;;  %v6258_v34 = vmul.f32 %v11837_v39, %v11837_v39  ;;  %v6261_v27 = vmul.f32 %v11847_v32, %v11847_v32 }
 0x856   :  { %v5341_v0 = vpop.f32.mrf.mxu1 }
 0x857   :  { %14354 = vst [vmem:[#allocation46_spill] sm:$0xff] %v11839_v21  ;;  %v5441_v4 = vadd.f32 %v5341_v0, %v4907_v56  ;;  %8299 = vmatmul.msk.f32.gmra.mxu1 %vm564_vm2, %v4987_v35  ;;  %v6125_v56 = vsel %vm564_vm2, %v11837_v39, 0.0  ;;  %v6322_v0 = vsel %vm564_vm2, %v6258_v34, 0.0  ;;  %v11872_v35 = vmax.f32 %v6002_v59, 0.0  ;;  %v14359_v39 = vld [vmem:[#allocation56_spill] sm:$0xff] }
 0x858   :  { %8367 = vmatmul.msk.f32.gmra.mxu2 %vm564_vm2, %v5521_v40  ;;  %v4374_v21 = vadd.f32 %v14359_v39, %v14358_v58  ;;  %v6127_v34 = vadd.f32 %v6126_v28, %v6125_v56  ;;  %v6324_v59 = vadd.f32 %v6323_v19, %v6322_v0  ;;  %v6006_v39 = vadd.f32 %v11818_v46, %v11591_v53  ;;  %v14361_v56 = vld [vmem:[#allocation58_spill] sm:$0xff] }
 0x859   :  { %v6263_v58 = vmul.f32 %v11872_v35, %v11872_v35  ;;  %v11900_v28 = vmax.f32 %v6004_v48, 0.0  ;;  %v11908_v53 = vmax.f32 %v6005_v29, 0.0  ;;  %v6008_v29 = vadd.f32 %v11818_v46, %v11603_v50 }
 0x85a   :  { %v4909_v0 = vadd.f32 %v14361_v56, %v4374_v21  ;;  %v6136_v21 = vsel %vm564_vm2, %v11883_v1, 0.0  ;;  %v6009_v50 = vadd.f32 %v11818_v46, %v11609_v22 }
 0x85b   :  { %v6138_v56 = vsel %vm564_vm2, %v11900_v28, 0.0 }
 0x85c   :  { %v5875_v24 = vpop.f32.mrf.mxu2 }
 0x85d   :  { %v11874_v11 = vadd.f32 %v5875_v24, %v5441_v4  ;;  %v6130_v4 = vsel %vm564_vm2, %v11847_v32, 0.0  ;;  %v6327_v24 = vsel %vm564_vm2, %v6261_v27, 0.0 }
 0x85e   :  { %v5344_v40 = vpop.f32.mrf.mxu1 }
 0x85f   :  { %v5442_v18 = vadd.f32 %v5344_v40, %v4908_v60  ;;  %8300 = vmatmul.msk.f32.gmra.mxu1 %vm564_vm2, %v4988_v52  ;;  %v6129_v60 = vadd.f32 %v6128_v36, %v6127_v34  ;;  %v6326_v40 = vadd.f32 %v6325_v41, %v6324_v59  ;;  %v6329_v52 = vsel %vm564_vm2, %v6262_v33, 0.0 }
 0x860   :  { %8368 = vmatmul.msk.f32.gmra.mxu2 %vm564_vm2, %v5522_v14  ;;  %v6134_v36 = vsel %vm564_vm2, %v11872_v35, 0.0  ;;  %v6007_v41 = vadd.f32 %v11818_v46, %v11597_v13  ;;  %v6331_v34 = vsel %vm564_vm2, %v6263_v58, 0.0  ;;  %v11913_v59 = vmax.f32 %v6006_v39, 0.0  ;;  %v14362_v13 = vld [vmem:[#allocation63_spill] sm:$0xff] }
 0x861   :  { %v6131_v19 = vadd.f32 %v6130_v4, %v6129_v60  ;;  %v6328_v27 = vadd.f32 %v6327_v24, %v6326_v40  ;;  %v6265_v33 = vmul.f32 %v11900_v28, %v11900_v28  ;;  %v14363_v40 = vld [vmem:[#allocation76_spill] sm:$0xff]  ;;  %v6333_v39 = vsel %vm564_vm2, %v6264_v5, 0.0 }
 0x862   :  { %v11932_v1 = vmax.f32 %v6007_v41, 0.0  ;;  %v6140_v41 = vsel %vm564_vm2, %v11908_v53, 0.0 }
 0x863   :  { %v6133_v48 = vadd.f32 %v6132_v54, %v6131_v19  ;;  %v4375_v54 = vadd.f32 %v14363_v40, %v14362_v13  ;;  %v6330_v19 = vadd.f32 %v6329_v52, %v6328_v27  ;;  %v6267_v27 = vmul.f32 %v11913_v59, %v11913_v59 }
 0x864   :  { %v5878_v14 = vpop.f32.mrf.mxu2  ;;  %v6335_v5 = vsel %vm564_vm2, %v6265_v33, 0.0  ;;  %v11939_v52 = vmax.f32 %v6008_v29, 0.0  ;;  %v6011_v33 = vadd.f32 %v11818_v46, %v11621_v55  ;;  %v14366_v55 = vld [vmem:[#allocation64_spill] sm:$0xff] }
 0x865   :  { %v11915_v4 = vadd.f32 %v5878_v14, %v5442_v18  ;;  %v6135_v58 = vadd.f32 %v6134_v36, %v6133_v48  ;;  %v11926_v18 = vpop.f32.mrf.mxu3  ;;  %v6266_v14 = vmul.f32 %v11908_v53, %v11908_v53  ;;  %v6010_v36 = vadd.f32 %v11818_v46, %v11615_v45 }
 0x866   :  { %v5347_v24 = vpop.f32.mrf.mxu1  ;;  %14364 = vst [vmem:[#allocation48_spill] sm:$0xff] %v11939_v52  ;;  %v4910_v40 = vadd.f32 %v11533_v8, %v4375_v54  ;;  %v6142_v45 = vsel %vm564_vm2, %v11913_v59, 0.0  ;;  %v6269_v54 = vmul.f32 %v11939_v52, %v11939_v52 }
 0x867   :  { %v5443_v60 = vadd.f32 %v5347_v24, %v4909_v0  ;;  %v6332_v0 = vadd.f32 %v6331_v34, %v6330_v19  ;;  %v6137_v24 = vadd.f32 %v6136_v21, %v6135_v58  ;;  %v6337_v22 = vsel %vm564_vm2, %v6266_v14, 0.0 }
 0x868   :  { %v6268_v34 = vmul.f32 %v11932_v1, %v11932_v1  ;;  %v11949_v21 = vmax.f32 %v6009_v50, 0.0  ;;  %v6339_v58 = vsel %vm564_vm2, %v6267_v27, 0.0  ;;  %v6012_v14 = vadd.f32 %v11818_v46, %v11627_v10 }
 0x869   :  { %v6334_v48 = vadd.f32 %v6333_v39, %v6332_v0  ;;  %v6139_v13 = vadd.f32 %v6138_v56, %v6137_v24  ;;  %v11960_v56 = vmax.f32 %v6010_v36, 0.0  ;;  %v4376_v0 = vadd.f32 %v11541_v37, %v14366_v55 }
 0x86a   :  { %14365 = vst [vmem:[#allocation7_spill] sm:$0xff] %v11949_v21  ;;  %v6144_v27 = vsel %vm564_vm2, %v11932_v1, 0.0  ;;  %v6013_v36 = vadd.f32 %v11818_v46, %v11633_v17  ;;  %v6146_v37 = vsel %vm564_vm2, %v11939_v52, 0.0  ;;  %v6148_v17 = vsel %vm564_vm2, %v11949_v21, 0.0 }
 0x86b   :  { %v6336_v19 = vadd.f32 %v6335_v5, %v6334_v48  ;;  %v6141_v24 = vadd.f32 %v6140_v41, %v6139_v13  ;;  %v6270_v48 = vmul.f32 %v11949_v21, %v11949_v21  ;;  %v6343_v41 = vsel %vm564_vm2, %v6269_v54, 0.0 }
 0x86c   :  { %v5881_v29 = vpop.f32.mrf.mxu2 }
 0x86d   :  { %v11956_v39 = vadd.f32 %v5881_v29, %v5443_v60  ;;  %v6338_v5 = vadd.f32 %v6337_v22, %v6336_v19  ;;  %v6341_v60 = vsel %vm564_vm2, %v6268_v34, 0.0  ;;  %v11971_v29 = vmax.f32 %v6011_v33, 0.0  ;;  %v11977_v13 = vpop.f32.mrf.mxu3 }
 0x86e   :  { %v5350_v8 = vpop.f32.mrf.mxu1  ;;  %v6143_v10 = vadd.f32 %v6142_v45, %v6141_v24  ;;  %v6271_v22 = vmul.f32 %v11960_v56, %v11960_v56  ;;  %v11982_v34 = vmax.f32 %v6012_v14, 0.0  ;;  %v6014_v33 = vadd.f32 %v11818_v46, %v11639_v15  ;;  %v14369_v45 = vld [vmem:[#allocation59_spill] sm:$0xff] }
 0x86f   :  { %v5444_v50 = vadd.f32 %v5350_v8, %v4910_v40  ;;  %14367 = vst [vmem:[#allocation6_spill] sm:$0xff] %v11971_v29  ;;  %v6340_v40 = vadd.f32 %v6339_v58, %v6338_v5  ;;  %v4911_v58 = vadd.f32 %v14369_v45, %v4376_v0  ;;  %v6345_v55 = vsel %vm564_vm2, %v6270_v48, 0.0  ;;  %v14372_v45 = vld [vmem:[#allocation65_spill] sm:$0xff] }
 0x870   :  { %14368 = vst [vmem:[#allocation8_spill] sm:$0xff] %v11982_v34  ;;  %v6145_v19 = vadd.f32 %v6144_v27, %v6143_v10  ;;  %v6272_v54 = vmul.f32 %v11971_v29, %v11971_v29  ;;  %v11992_v24 = vmax.f32 %v6013_v36, 0.0  ;;  %v6015_v14 = vadd.f32 %v11818_v46, %v11645_v47 }
 0x871   :  { %v6342_v8 = vadd.f32 %v6341_v60, %v6340_v40  ;;  %v6150_v27 = vsel %vm564_vm2, %v11960_v56, 0.0  ;;  %v6347_v0 = vsel %vm564_vm2, %v6271_v22, 0.0  ;;  %v6273_v48 = vmul.f32 %v11982_v34, %v11982_v34 }
 0x872   :  { %14370 = vst [vmem:[#allocation9_spill] sm:$0xff] %v11992_v24  ;;  %v6147_v52 = vadd.f32 %v6146_v37, %v6145_v19  ;;  %v12003_v40 = vmax.f32 %v6014_v33, 0.0  ;;  %v4377_v47 = vadd.f32 %v11554_v6, %v14372_v45  ;;  %v6274_v19 = vmul.f32 %v11992_v24, %v11992_v24 }
 0x873   :  { %v6344_v15 = vadd.f32 %v6343_v41, %v6342_v8  ;;  %v6152_v41 = vsel %vm564_vm2, %v11971_v29, 0.0  ;;  %v12012_v22 = vmax.f32 %v6015_v14, 0.0  ;;  %v6016_v33 = vadd.f32 %v11818_v46, %v11651_v2 }
 0x874   :  { %v5884_v5 = vpop.f32.mrf.mxu2  ;;  %14371 = vst [vmem:[#allocation11_spill] sm:$0xff] %v12003_v40  ;;  %v6149_v21 = vadd.f32 %v6148_v17, %v6147_v52  ;;  %v6017_v6 = vadd.f32 %v11818_v46, %v11660_v57  ;;  %v6154_v52 = vsel %vm564_vm2, %v11982_v34, 0.0  ;;  %v6351_v17 = vsel %vm564_vm2, %v6273_v48, 0.0 }
 0x875   :  { %v11998_v60 = vadd.f32 %v5884_v5, %v5444_v50  ;;  %v6346_v37 = vadd.f32 %v6345_v55, %v6344_v15  ;;  %v6349_v50 = vsel %vm564_vm2, %v6272_v54, 0.0  ;;  %14373 = vst [vmem:[#allocation10_spill] sm:$0xff] %v12012_v22  ;;  %v6275_v55 = vmul.f32 %v12003_v40, %v12003_v40  ;;  %v12023_v54 = vpop.f32.mrf.mxu0 }
 0x876   :  { %v5353_v10 = vpop.f32.mrf.mxu1  ;;  %v6151_v8 = vadd.f32 %v6150_v27, %v6149_v21  ;;  %v6156_v2 = vsel %vm564_vm2, %v11992_v24, 0.0  ;;  %v14374_v21 = vld [vmem:[#allocation61_spill] sm:$0xff]  ;;  %v12028_v27 = vpop.f32.mrf.mxu3  ;;  %v6353_v57 = vsel %vm564_vm2, %v6274_v19, 0.0  ;;  %v6018_v48 = vadd.f32 %v11818_v46, %v11666_v38 }
 0x877   :  { %v5445_v36 = vadd.f32 %v5353_v10, %v4911_v58  ;;  %v6348_v58 = vadd.f32 %v6347_v0, %v6346_v37  ;;  %v4912_v15 = vadd.f32 %v14374_v21, %v4377_v47  ;;  %v6276_v10 = vmul.f32 %v12012_v22, %v12012_v22 }
 0x878   :  { %v6153_v14 = vadd.f32 %v6152_v41, %v6151_v8  ;;  %v12033_v0 = vmax.f32 %v6016_v33, 0.0  ;;  %v6355_v19 = vsel %vm564_vm2, %v6275_v55, 0.0  ;;  %v6019_v33 = vadd.f32 %v11818_v46, %v11672_v31 }
 0x879   :  { %v6350_v5 = vadd.f32 %v6349_v50, %v6348_v58  ;;  %v12037_v50 = vmax.f32 %v6017_v6, 0.0  ;;  %v6158_v58 = vsel %vm564_vm2, %v12003_v40, 0.0  ;;  %v6020_v38 = vadd.f32 %v11818_v46, %v11678_v44 }
 0x87a   :  { %14375 = vst [vmem:[#allocation13_spill] sm:$0xff] %v12033_v0  ;;  %v6155_v37 = vadd.f32 %v6154_v52, %v6153_v14  ;;  %v6160_v6 = vsel %vm564_vm2, %v12012_v22, 0.0  ;;  %v6277_v52 = vmul.f32 %v12033_v0, %v12033_v0  ;;  %v6162_v44 = vsel %vm564_vm2, %v12033_v0, 0.0 }
 0x87b   :  { %v6352_v41 = vadd.f32 %v6351_v17, %v6350_v5  ;;  %14376 = vst [vmem:[#allocation12_spill] sm:$0xff] %v12037_v50  ;;  %v12053_v17 = vmax.f32 %v6018_v48, 0.0  ;;  %v6278_v31 = vmul.f32 %v12037_v50, %v12037_v50  ;;  %v6021_v5 = vadd.f32 %v11818_v46, %v11684_v63 }
 0x87c   :  { %v5887_v45 = vpop.f32.mrf.mxu2  ;;  %v6157_v24 = vadd.f32 %v6156_v2, %v6155_v37  ;;  %v12061_v2 = vmax.f32 %v6019_v33, 0.0  ;;  %v6359_v48 = vsel %vm564_vm2, %v6277_v52, 0.0  ;;  %v6022_v63 = vadd.f32 %v11818_v46, %v11690_v30 }
 0x87d   :  { %v12039_v8 = vadd.f32 %v5887_v45, %v5445_v36  ;;  %v6354_v34 = vadd.f32 %v6353_v57, %v6352_v41  ;;  %v6357_v36 = vsel %vm564_vm2, %v6276_v10, 0.0  ;;  %14377 = vst [vmem:[#allocation15_spill] sm:$0xff] %v12053_v17  ;;  %v12063_v10 = vmax.f32 %v6020_v38, 0.0  ;;  %v12072_v37 = vpop.f32.mrf.mxu0 }
 0x87e   :  { %v5356_v47 = vpop.f32.mrf.mxu1  ;;  %v6159_v55 = vadd.f32 %v6158_v58, %v6157_v24  ;;  %14378 = vst [vmem:[#allocation14_spill] sm:$0xff] %v12061_v2  ;;  %v6279_v24 = vmul.f32 %v12053_v17, %v12053_v17  ;;  %v12075_v58 = vmax.f32 %v6021_v5, 0.0  ;;  %v12079_v38 = vpop.f32.mrf.mxu3  ;;  %v6023_v30 = vadd.f32 %v11818_v46, %v11696_v23  ;;  %v14382_v23 = vld [vmem:[#allocation16_spill] sm:$0xff] }
 0x87f   :  { %v5446_v21 = vadd.f32 %v5356_v47, %v4912_v15  ;;  %v6356_v14 = vadd.f32 %v6355_v19, %v6354_v34  ;;  %14379 = vst [vmem:[#allocation19_spill] sm:$0xff] %v12063_v10  ;;  %v6164_v34 = vsel %vm564_vm2, %v12037_v50, 0.0  ;;  %v6361_v47 = vsel %vm564_vm2, %v6278_v31, 0.0 }
 0x880   :  { %v6161_v15 = vadd.f32 %v6160_v6, %v6159_v55  ;;  %14380 = vst [vmem:[#allocation17_spill] sm:$0xff] %v12075_v58  ;;  %v6166_v6 = vsel %vm564_vm2, %v12053_v17, 0.0  ;;  %v6665_v55 = vld [vmem:[%s13974_s3] sm:$0xff]  ;;  %v6281_v31 = vmul.f32 %v12063_v10, %v12063_v10  ;;  %v6363_v5 = vsel %vm564_vm2, %v6279_v24, 0.0 }
 0x881   :  { %v6358_v57 = vadd.f32 %v6357_v36, %v6356_v14  ;;  %v6280_v36 = vmul.f32 %v12061_v2, %v12061_v2  ;;  %6880 = vmatpush.msra.mxu3 %v6665_v55  ;;  %v14384_v24 = vld [vmem:[#allocation18_spill] sm:$0xff] }
 0x882   :  { %v6163_v41 = vadd.f32 %v6162_v44, %v6161_v15  ;;  %v6168_v44 = vsel %vm564_vm2, %v12061_v2, 0.0  ;;  %v12096_v15 = vmax.f32 %v6022_v63, 0.0  ;;  %v6025_v55 = vadd.f32 %v11818_v46, %v14384_v24 }
 0x883   :  { %v6367_v17 = vsel %vm564_vm2, %v6281_v31, 0.0 }
 0x884   :  { %v5890_v45 = vpop.f32.mrf.mxu2  ;;  %v6165_v14 = vadd.f32 %v6164_v34, %v6163_v41  ;;  %14381 = vst [vmem:[#allocation25_spill] sm:$0xff] %v12096_v15  ;;  %v6170_v34 = vsel %vm564_vm2, %v12063_v10, 0.0  ;;  %v12105_v41 = vmax.f32 %v6023_v30, 0.0  ;;  %v6174_v31 = vsel %vm564_vm2, %v12096_v15, 0.0 }
 0x885   :  { %v12077_v19 = vadd.f32 %v5890_v45, %v5446_v21  ;;  %v6360_v21 = vadd.f32 %v6359_v48, %v6358_v57  ;;  %v6282_v57 = vmul.f32 %v12075_v58, %v12075_v58  ;;  %v6365_v48 = vsel %vm564_vm2, %v6280_v36, 0.0  ;;  %v14386_v36 = vld [vmem:[#allocation38_spill] sm:$0xff] }
 0x886   :  { %v5359_v33 = vpop.f32.mrf.mxu1  ;;  %14383 = vst [vmem:[#allocation21_spill] sm:$0xff] %v12105_v41 }
 0x887   :  { %v5447_v52 = vadd.f32 %v5359_v33, %v11571_v20  ;;  %v6024_v20 = vadd.f32 %v11818_v46, %v14382_v23  ;;  %v6362_v45 = vadd.f32 %v6361_v47, %v6360_v21  ;;  %v6167_v33 = vadd.f32 %v6166_v6, %v6165_v14 }
 0x888   :  { %v6172_v47 = vsel %vm564_vm2, %v12075_v58, 0.0  ;;  %v6283_v6 = vmul.f32 %v12096_v15, %v12096_v15  ;;  %v6026_v14 = vadd.f32 %v11818_v46, %v14386_v36  ;;  %v6369_v24 = vsel %vm564_vm2, %v6282_v57, 0.0  ;;  %v12131_v58 = vpop.f32.mrf.mxu0  ;;  %v14389_v57 = vld [vmem:[#allocation40_spill] sm:$0xff] }
 0x889   :  { %v6364_v63 = vadd.f32 %v6363_v5, %v6362_v45  ;;  %v6169_v2 = vadd.f32 %v6168_v44, %v6167_v33  ;;  %v12114_v21 = vmax.f32 %v6024_v20, 0.0  ;;  %v6284_v45 = vmul.f32 %v12105_v41, %v12105_v41  ;;  %v14388_v33 = vld [vmem:[#allocation20_spill] sm:$0xff] }
 0x88a   :  { %v12127_v20 = vmax.f32 %v6025_v55, 0.0  ;;  %v6027_v36 = vadd.f32 %v11818_v46, %v14388_v33  ;;  %v12142_v15 = vmax.f32 %v6026_v14, 0.0 }
 0x88b   :  { %14385 = vst [vmem:[#allocation28_spill] sm:$0xff] %v12114_v21  ;;  %v6366_v23 = vadd.f32 %v6365_v48, %v6364_v63  ;;  %v6171_v10 = vadd.f32 %v6170_v34, %v6169_v2  ;;  %v12135_v34 = vpop.f32.mrf.mxu3  ;;  %v6371_v63 = vsel %vm564_vm2, %v6283_v6, 0.0  ;;  %v6285_v55 = vmul.f32 %v12114_v21, %v12114_v21 }
 0x88c   :  { %v5893_v30 = vpop.f32.mrf.mxu2  ;;  %14387 = vst [vmem:[#allocation23_spill] sm:$0xff] %v12127_v20  ;;  %v6286_v6 = vmul.f32 %v12127_v20, %v12127_v20 }
 0x88d   :  { %v12119_v5 = vadd.f32 %v5893_v30, %v5447_v52  ;;  %v6368_v2 = vadd.f32 %v6367_v17, %v6366_v23  ;;  %v6173_v48 = vadd.f32 %v6172_v47, %v6171_v10  ;;  %v6028_v52 = vadd.f32 %v11818_v46, %v14389_v57  ;;  %14390 = vst [vmem:[#allocation30_spill] sm:$0xff] %v12142_v15 }
 0x88e   :  { %v12121_v44 = vpop.f32.mrf.mxu1  ;;  %v6176_v30 = vsel %vm564_vm2, %v12105_v41, 0.0  ;;  %v6029_v17 = vadd.f32 %v11818_v46, %v11732_v61  ;;  %v6373_v10 = vsel %vm564_vm2, %v6284_v45, 0.0  ;;  %v6178_v47 = vsel %vm564_vm2, %v12114_v21, 0.0 }
 0x88f   :  { %v6370_v33 = vadd.f32 %v6369_v24, %v6368_v2  ;;  %v6175_v50 = vadd.f32 %v6174_v31, %v6173_v48  ;;  %v12151_v23 = vmax.f32 %v6027_v36, 0.0  ;;  %v12153_v0 = vmax.f32 %v6028_v52, 0.0 }
 0x890   :  { %v6375_v14 = vsel %vm564_vm2, %v6285_v55, 0.0  ;;  %v6180_v24 = vsel %vm564_vm2, %v12127_v20, 0.0  ;;  %v6287_v61 = vmul.f32 %v12142_v15, %v12142_v15  ;;  %v6030_v31 = vadd.f32 %v11818_v46, %v11738_v42 }
 0x891   :  { %14391 = vst [vmem:[#allocation27_spill] sm:$0xff] %v12151_v23  ;;  %v6372_v57 = vadd.f32 %v6371_v63, %v6370_v33  ;;  %v6177_v41 = vadd.f32 %v6176_v30, %v6175_v50  ;;  %v12164_v48 = vmax.f32 %v6029_v17, 0.0  ;;  %v6377_v52 = vsel %vm564_vm2, %v6286_v6, 0.0  ;;  %v14395_v6 = vld [vmem:[#allocation22_spill] sm:$0xff] }
 0x892   :  { %14392 = vst [vmem:[#allocation32_spill] sm:$0xff] %v12153_v0  ;;  %v6182_v63 = vsel %vm564_vm2, %v12142_v15, 0.0  ;;  %v6288_v30 = vmul.f32 %v12151_v23, %v12151_v23  ;;  %v6031_v55 = vadd.f32 %v11818_v46, %v11744_v7  ;;  %v6379_v17 = vsel %vm564_vm2, %v6287_v61, 0.0  ;;  %v12184_v15 = vpop.f32.mrf.mxu0 }
 0x893   :  { %v6374_v2 = vadd.f32 %v6373_v10, %v6372_v57  ;;  %v6179_v36 = vadd.f32 %v6178_v47, %v6177_v41  ;;  %14393 = vst [vmem:[#allocation29_spill] sm:$0xff] %v12164_v48  ;;  %v6289_v41 = vmul.f32 %v12153_v0, %v12153_v0  ;;  %v6184_v10 = vsel %vm564_vm2, %v12151_v23, 0.0 }
 0x894   :  { %v12162_v45 = vpop.f32.mrf.mxu2  ;;  %v12180_v47 = vmax.f32 %v6030_v31, 0.0  ;;  %v6032_v57 = vadd.f32 %v11818_v46, %v14395_v6  ;;  %v6290_v7 = vmul.f32 %v12164_v48, %v12164_v48  ;;  %v6186_v61 = vsel %vm564_vm2, %v12153_v0, 0.0 }
 0x895   :  { %v6376_v42 = vadd.f32 %v6375_v14, %v6374_v2  ;;  %v6181_v33 = vadd.f32 %v6180_v24, %v6179_v36  ;;  %v12188_v14 = vpop.f32.mrf.mxu3  ;;  %v6381_v24 = vsel %vm564_vm2, %v6288_v30, 0.0  ;;  %v12193_v2 = vmax.f32 %v6031_v55, 0.0 }
 0x896   :  { %v12166_v50 = vpop.f32.mrf.mxu1  ;;  %14394 = vst [vmem:[#allocation31_spill] sm:$0xff] %v12180_v47  ;;  %v6033_v31 = vadd.f32 %v11818_v46, %v11759_v51  ;;  %v6034_v30 = vadd.f32 %v11818_v46, %v11765_v25  ;;  %v6385_v51 = vsel %vm564_vm2, %v6290_v7, 0.0 }
 0x897   :  { %v6378_v20 = vadd.f32 %v6377_v52, %v6376_v42  ;;  %v6183_v21 = vadd.f32 %v6182_v63, %v6181_v33  ;;  %14396 = vst [vmem:[#allocation33_spill] sm:$0xff] %v12193_v2  ;;  %v6383_v52 = vsel %vm564_vm2, %v6289_v41, 0.0  ;;  %v6188_v63 = vsel %vm564_vm2, %v12164_v48, 0.0  ;;  %v14405_v48 = vld [vmem:[#allocation52_spill] sm:$0xff] }
 0x898   :  { %v6291_v42 = vmul.f32 %v12180_v47, %v12180_v47  ;;  %v12202_v33 = vmax.f32 %v6032_v57, 0.0  ;;  %v6292_v41 = vmul.f32 %v12193_v2, %v12193_v2 }
 0x899   :  { %v6380_v36 = vadd.f32 %v6379_v17, %v6378_v20  ;;  %v6185_v6 = vadd.f32 %v6184_v10, %v6183_v21  ;;  %v6190_v20 = vsel %vm564_vm2, %v12180_v47, 0.0  ;;  %v12215_v17 = vmax.f32 %v6033_v31, 0.0 }
 0x89a   :  { %14397 = vst [vmem:[#allocation34_spill] sm:$0xff] %v12202_v33  ;;  %v6035_v10 = vadd.f32 %v11818_v46, %v11771_v43  ;;  %v6387_v7 = vsel %vm564_vm2, %v6291_v42, 0.0  ;;  %v6037_v43 = vadd.f32 %v11818_v46, %v11787_v49 }
 0x89b   :  { %v6382_v0 = vadd.f32 %v6381_v24, %v6380_v36  ;;  %v6187_v23 = vadd.f32 %v6186_v61, %v6185_v6  ;;  %14398 = vst [vmem:[#allocation43_spill] sm:$0xff] %v12215_v17  ;;  %v6036_v24 = vadd.f32 %v11818_v46, %v11780_v16  ;;  %v6192_v61 = vsel %vm564_vm2, %v12193_v2, 0.0 }
 0x89c   :  { %v12206_v55 = vpop.f32.mrf.mxu2  ;;  %v6293_v36 = vmul.f32 %v12202_v33, %v12202_v33  ;;  %v12226_v6 = vmax.f32 %v6034_v30, 0.0  ;;  %v6194_v16 = vsel %vm564_vm2, %v12202_v33, 0.0  ;;  %v12241_v30 = vpop.f32.mrf.mxu0  ;;  %v6038_v33 = vadd.f32 %v11818_v46, %v11794_v9 }
 0x89d   :  { %v6384_v25 = vadd.f32 %v6383_v52, %v6382_v0  ;;  %v6189_v57 = vadd.f32 %v6188_v63, %v6187_v23  ;;  %v6389_v0 = vsel %vm564_vm2, %v6292_v41, 0.0  ;;  %v6294_v23 = vmul.f32 %v12215_v17, %v12215_v17  ;;  %v14401_v63 = vld [vmem:[#allocation66_spill] sm:$0xff]  ;;  %v4311_v49 = vpop.f32.mrf.mxu3 }
 0x89e   :  { %v12209_v21 = vpop.f32.mrf.mxu1  ;;  %14399 = vst [vmem:[#allocation35_spill] sm:$0xff] %v12226_v6  ;;  %v12235_v52 = vmax.f32 %v6035_v10, 0.0  ;;  %v12239_v42 = vadd.f32 %v11926_v18, %v14401_v63  ;;  %v6391_v41 = vsel %vm564_vm2, %v6293_v36, 0.0  ;;  %v6295_v10 = vmul.f32 %v12226_v6, %v12226_v6  ;;  %v14403_v63 = vld [vmem:[#allocation51_spill] sm:$0xff] }
 0x89f   :  { %v6386_v31 = vadd.f32 %v6385_v51, %v6384_v25  ;;  %v6191_v47 = vadd.f32 %v6190_v20, %v6189_v57  ;;  %v12243_v25 = vmax.f32 %v6036_v24, 0.0  ;;  %v6196_v57 = vsel %vm564_vm2, %v12215_v17, 0.0 }
 0x8a0   :  { %14400 = vst [vmem:[#allocation36_spill] sm:$0xff] %v12235_v52  ;;  %v6198_v17 = vsel %vm564_vm2, %v12226_v6, 0.0  ;;  %v6296_v9 = vmul.f32 %v12235_v52, %v12235_v52  ;;  %v6039_v2 = vadd.f32 %v11818_v46, %v11801_v3  ;;  %v14407_v6 = vld [vmem:[#allocation53_spill] sm:$0xff] }
 0x8a1   :  { %v6388_v51 = vadd.f32 %v6387_v7, %v6386_v31  ;;  %v6193_v20 = vadd.f32 %v6192_v61, %v6191_v47  ;;  %14402 = vst [vmem:[#allocation37_spill] sm:$0xff] %v12243_v25  ;;  %v12256_v7 = vadd.f32 %v11977_v13, %v14403_v63  ;;  %v12258_v61 = vmax.f32 %v6037_v43, 0.0 }
 0x8a2   :  { %v6393_v31 = vsel %vm564_vm2, %v6294_v23, 0.0  ;;  %v4381_v13 = vadd.f32 %v12028_v27, %v14405_v48  ;;  %v6297_v43 = vmul.f32 %v12243_v25, %v12243_v25  ;;  %v6200_v23 = vsel %vm564_vm2, %v12235_v52, 0.0 }
 0x8a3   :  { %v6390_v47 = vadd.f32 %v6389_v0, %v6388_v51  ;;  %v6195_v24 = vadd.f32 %v6194_v16, %v6193_v20  ;;  %14404 = vst [vmem:[#allocation39_spill] sm:$0xff] %v12258_v61  ;;  %v6395_v51 = vsel %vm564_vm2, %v6295_v10, 0.0  ;;  %v12276_v20 = vmax.f32 %v6038_v33, 0.0  ;;  %v14408_v33 = vld [vmem:[#allocation42_spill] sm:$0xff] }
 0x8a4   :  { %v12252_v18 = vpop.f32.mrf.mxu2  ;;  %v6040_v63 = vadd.f32 %v11818_v46, %v11808_v62  ;;  %v4382_v3 = vadd.f32 %v12079_v38, %v14407_v6  ;;  %v6298_v48 = vmul.f32 %v12258_v61, %v12258_v61  ;;  %v12287_v10 = vmax.f32 %v6039_v2, 0.0  ;;  %v14410_v2 = vld [vmem:[#allocation46_spill] sm:$0xff] }
 0x8a5   :  { %v6392_v0 = vadd.f32 %v6391_v41, %v6390_v47  ;;  %v6197_v16 = vadd.f32 %v6196_v57, %v6195_v24  ;;  %14406 = vst [vmem:[#allocation41_spill] sm:$0xff] %v12276_v20  ;;  %v6397_v41 = vsel %vm564_vm2, %v6296_v9, 0.0  ;;  %v6202_v57 = vsel %vm564_vm2, %v12243_v25, 0.0  ;;  %v14409_v24 = vld [vmem:[#allocation54_spill] sm:$0xff] }
 0x8a6   :  { %v12260_v36 = vpop.f32.mrf.mxu1  ;;  %v6041_v47 = vadd.f32 %v11818_v46, %v14408_v33  ;;  %v4383_v62 = vadd.f32 %v12135_v34, %v14409_v24  ;;  %v6204_v6 = vsel %vm564_vm2, %v12258_v61, 0.0  ;;  %v12298_v9 = vmax.f32 %v6040_v63, 0.0  ;;  %v14411_v33 = vld [vmem:[#allocation67_spill] sm:$0xff]  ;;  %v4314_v24 = vpop.f32.mrf.mxu3 }
 0x8a7   :  { %v6394_v22 = vadd.f32 %v6393_v31, %v6392_v0  ;;  %v6199_v27 = vadd.f32 %v6198_v17, %v6197_v16  ;;  %v6399_v17 = vsel %vm564_vm2, %v6297_v43, 0.0  ;;  %v6299_v31 = vmul.f32 %v12276_v20, %v12276_v20 }
 0x8a8   :  { %v6042_v0 = vadd.f32 %v11818_v46, %v14410_v2  ;;  %v4384_v34 = vadd.f32 %v12188_v14, %v14411_v33  ;;  %v6401_v43 = vsel %vm564_vm2, %v6298_v48, 0.0  ;;  %v6206_v63 = vsel %vm564_vm2, %v12276_v20, 0.0  ;;  %v14412_v14 = vld [vmem:[#allocation55_spill] sm:$0xff] }
 0x8a9   :  { %v6396_v52 = vadd.f32 %v6395_v51, %v6394_v22  ;;  %v6201_v38 = vadd.f32 %v6200_v23, %v6199_v27  ;;  %v4843_v27 = vpop.f32.mrf.mxu0  ;;  %v6300_v61 = vmul.f32 %v12287_v10, %v12287_v10  ;;  %v12313_v2 = vmax.f32 %v6041_v47, 0.0 }
 0x8aa   :  { %v6043_v25 = vadd.f32 %v11818_v46, %v11874_v11  ;;  %v6403_v33 = vsel %vm564_vm2, %v6299_v31, 0.0  ;;  %v6208_v20 = vsel %vm564_vm2, %v12287_v10, 0.0  ;;  %v6301_v47 = vmul.f32 %v12298_v9, %v12298_v9 }
 0x8ab   :  { %v6398_v22 = vadd.f32 %v6397_v41, %v6396_v52  ;;  %v6203_v51 = vadd.f32 %v6202_v57, %v6201_v38  ;;  %v12318_v52 = vadd.f32 %v4311_v49, %v14412_v14  ;;  %v14413_v41 = vld [vmem:[#allocation57_spill] sm:$0xff]  ;;  %v12328_v40 = vmax.f32 %v6042_v0, 0.0 }
 0x8ac   :  { %v12302_v16 = vpop.f32.mrf.mxu2  ;;  %v12321_v48 = vadd.f32 %v4314_v24, %v14413_v41  ;;  %v6044_v49 = vadd.f32 %v11818_v46, %v11915_v4  ;;  %v4914_v24 = vadd.f32 %v12023_v54, %v12239_v42  ;;  %v6302_v31 = vmul.f32 %v12313_v2, %v12313_v2 }
 0x8ad   :  { %v6400_v57 = vadd.f32 %v6399_v17, %v6398_v22  ;;  %v6205_v38 = vadd.f32 %v6204_v6, %v6203_v51  ;;  %v6405_v17 = vsel %vm564_vm2, %v6300_v61, 0.0  ;;  %v6210_v6 = vsel %vm564_vm2, %v12298_v9, 0.0 }
 0x8ae   :  { %v12307_v23 = vpop.f32.mrf.mxu1  ;;  %v12339_v22 = vmax.f32 %v6043_v25, 0.0  ;;  %v4915_v4 = vadd.f32 %v12072_v37, %v12256_v7  ;;  %v6407_v54 = vsel %vm564_vm2, %v6301_v47, 0.0  ;;  %v6212_v42 = vsel %vm564_vm2, %v12313_v2, 0.0 }
 0x8af   :  { %v6402_v29 = vadd.f32 %v6401_v43, %v6400_v57  ;;  %v6207_v11 = vadd.f32 %v6206_v63, %v6205_v38  ;;  %v6045_v43 = vadd.f32 %v11818_v46, %v11956_v39  ;;  %v6303_v61 = vmul.f32 %v12328_v40, %v12328_v40 }
 0x8b0   :  { %v4916_v63 = vadd.f32 %v12131_v58, %v4381_v13  ;;  %v12353_v14 = vmax.f32 %v6044_v49, 0.0  ;;  %v4917_v39 = vadd.f32 %v12184_v15, %v4382_v3  ;;  %v6409_v37 = vsel %vm564_vm2, %v6302_v31, 0.0 }
 0x8b1   :  { %v6404_v0 = vadd.f32 %v6403_v33, %v6402_v29  ;;  %v6209_v51 = vadd.f32 %v6208_v20, %v6207_v11  ;;  %v6214_v7 = vsel %vm564_vm2, %v12328_v40, 0.0  ;;  %v6304_v57 = vmul.f32 %v12339_v22, %v12339_v22  ;;  %v4846_v11 = vpop.f32.mrf.mxu0 }
 0x8b2   :  { %v6046_v58 = vadd.f32 %v11818_v46, %v11998_v60  ;;  %v12363_v33 = vmax.f32 %v6045_v43, 0.0  ;;  %v4918_v47 = vadd.f32 %v12241_v30, %v4383_v62  ;;  %v6411_v15 = vsel %vm564_vm2, %v6303_v61, 0.0 }
 0x8b3   :  { %v6406_v29 = vadd.f32 %v6405_v17, %v6404_v0  ;;  %v6211_v20 = vadd.f32 %v6210_v6, %v6209_v51  ;;  %v6047_v3 = vadd.f32 %v11818_v46, %v12039_v8  ;;  %v5448_v49 = vadd.f32 %v12121_v44, %v4914_v24 }
 0x8b4   :  { %v12351_v25 = vpop.f32.mrf.mxu2  ;;  %v4919_v17 = vadd.f32 %v4843_v27, %v4384_v34  ;;  %v6216_v60 = vsel %vm564_vm2, %v12339_v22, 0.0  ;;  %v6305_v0 = vmul.f32 %v12353_v14, %v12353_v14  ;;  %v6413_v51 = vsel %vm564_vm2, %v6304_v57, 0.0 }
 0x8b5   :  { %v6408_v13 = vadd.f32 %v6407_v54, %v6406_v29  ;;  %v6213_v38 = vadd.f32 %v6212_v42, %v6211_v20  ;;  %v12375_v30 = vmax.f32 %v6046_v58, 0.0  ;;  %v5982_v62 = vadd.f32 %v12162_v45, %v5448_v49 }
 0x8b6   :  { %v5377_v41 = vpop.f32.mrf.mxu1  ;;  %v5449_v43 = vadd.f32 %v12166_v50, %v4915_v4  ;;  %v6218_v44 = vsel %vm564_vm2, %v12353_v14, 0.0  ;;  %v6306_v34 = vmul.f32 %v12363_v33, %v12363_v33  ;;  %v6048_v27 = vadd.f32 %v11818_v46, %v12077_v19 }
 0x8b7   :  { %v6410_v6 = vadd.f32 %v6409_v37, %v6408_v13  ;;  %v6215_v31 = vadd.f32 %v6214_v7, %v6213_v38  ;;  %v12385_v54 = vmax.f32 %v6047_v3, 0.0  ;;  %v5450_v61 = vadd.f32 %v12209_v21, %v4916_v63 }
 0x8b8   :  { %v5983_v42 = vadd.f32 %v12206_v55, %v5449_v43  ;;  %v6415_v50 = vsel %vm564_vm2, %v6305_v0, 0.0  ;;  %v6220_v4 = vsel %vm564_vm2, %v12363_v33, 0.0  ;;  %v6049_v20 = vadd.f32 %v11818_v46, %v12119_v5 }
 0x8b9   :  { %v6412_v8 = vadd.f32 %v6411_v15, %v6410_v6  ;;  %v6217_v24 = vadd.f32 %v6216_v60, %v6215_v31  ;;  %v6307_v19 = vmul.f32 %v12375_v30, %v12375_v30  ;;  %v6050_v57 = vadd.f32 %v11818_v46, %v5982_v62  ;;  %v4849_v60 = vpop.f32.mrf.mxu0 }
 0x8ba   :  { %v5984_v55 = vadd.f32 %v12252_v18, %v5450_v61  ;;  %v6417_v21 = vsel %vm564_vm2, %v6306_v34, 0.0  ;;  %v12399_v63 = vmax.f32 %v6048_v27, 0.0  ;;  %v5451_v58 = vadd.f32 %v12260_v36, %v4917_v39 }
 0x8bb   :  { %v6414_v29 = vadd.f32 %v6413_v51, %v6412_v8  ;;  %v6219_v7 = vadd.f32 %v6218_v44, %v6217_v24  ;;  %v4920_v13 = vadd.f32 %v4846_v11, %v12318_v52  ;;  %v6308_v5 = vmul.f32 %v12385_v54, %v12385_v54 }
 0x8bc   :  { %v5911_v45 = vpop.f32.mrf.mxu2  ;;  %v6051_v3 = vadd.f32 %v11818_v46, %v5983_v42  ;;  %v6222_v49 = vsel %vm564_vm2, %v12375_v30, 0.0  ;;  %v12408_v6 = vmax.f32 %v6049_v20, 0.0  ;;  %v5985_v18 = vadd.f32 %v12302_v16, %v5451_v58 }
 0x8bd   :  { %v6416_v38 = vadd.f32 %v6415_v50, %v6414_v29  ;;  %v6221_v15 = vadd.f32 %v6220_v4, %v6219_v7  ;;  %v5452_v31 = vadd.f32 %v12307_v23, %v4918_v47  ;;  %v6419_v52 = vsel %vm564_vm2, %v6307_v19, 0.0  ;;  %v4317_v19 = vpop.f32.mrf.mxu3 }
 0x8be   :  { %v5380_v37 = vpop.f32.mrf.mxu1  ;;  %v12413_v39 = vmax.f32 %v6050_v57, 0.0  ;;  %v6052_v11 = vadd.f32 %v11818_v46, %v5984_v55  ;;  %v6224_v0 = vsel %vm564_vm2, %v12385_v54, 0.0  ;;  %v6309_v51 = vmul.f32 %v12399_v63, %v12399_v63 }
 0x8bf   :  { %v6418_v36 = vadd.f32 %v6417_v21, %v6416_v38  ;;  %v5986_v62 = vadd.f32 %v12351_v25, %v5452_v31  ;;  %v5453_v43 = vadd.f32 %v5377_v41, %v4919_v17  ;;  %v6223_v16 = vadd.f32 %v6222_v49, %v6221_v15 }
 0x8c0   :  { %v6421_v23 = vsel %vm564_vm2, %v6308_v5, 0.0  ;;  %v6226_v47 = vsel %vm564_vm2, %v12399_v63, 0.0  ;;  %v12424_v8 = vmax.f32 %v6051_v3, 0.0  ;;  %v6310_v34 = vmul.f32 %v12408_v6, %v12408_v6 }
 0x8c1   :  { %v6053_v27 = vadd.f32 %v11818_v46, %v5985_v18  ;;  %v5987_v24 = vadd.f32 %v5911_v45, %v5453_v43  ;;  %v5454_v42 = vadd.f32 %v5380_v37, %v4920_v13  ;;  %v6420_v29 = vadd.f32 %v6419_v52, %v6418_v36  ;;  %v4852_v36 = vpop.f32.mrf.mxu0  ;;  %v14414_v52 = vld [vmem:[#allocation71_spill] sm:$0xff] }
 0x8c2   :  { %v6225_v25 = vadd.f32 %v6224_v0, %v6223_v16  ;;  %v6311_v41 = vmul.f32 %v12413_v39, %v12413_v39  ;;  %v12431_v17 = vmax.f32 %v6052_v11, 0.0  ;;  %v6423_v50 = vsel %vm564_vm2, %v6309_v51, 0.0 }
 0x8c3   :  { %v6228_v4 = vsel %vm564_vm2, %v12408_v6, 0.0  ;;  %v6054_v20 = vadd.f32 %v11818_v46, %v5986_v62  ;;  %v6422_v57 = vadd.f32 %v6421_v23, %v6420_v29  ;;  %v6312_v37 = vmul.f32 %v12424_v8, %v12424_v8 }
 0x8c4   :  { %v5914_v44 = vpop.f32.mrf.mxu2  ;;  %v6227_v45 = vadd.f32 %v6226_v47, %v6225_v25  ;;  %v4921_v55 = vadd.f32 %v4849_v60, %v12321_v48  ;;  %v6425_v21 = vsel %vm564_vm2, %v6310_v34, 0.0  ;;  %v6230_v58 = vsel %vm564_vm2, %v12413_v39, 0.0  ;;  %v8461_v25 = vld [vmem:[%s13975_s4 + $0x3] ss:$0 sm:$0xff] }
 0x8c5   :  { %v5988_v7 = vadd.f32 %v5914_v44, %v5454_v42  ;;  %v12443_v13 = vmax.f32 %v6053_v27, 0.0  ;;  %v6055_v38 = vadd.f32 %v11818_v46, %v5987_v24  ;;  %v6424_v15 = vadd.f32 %v6423_v50, %v6422_v57 }
 0x8c6   :  { %v5383_v61 = vpop.f32.mrf.mxu1  ;;  %v6229_v5 = vadd.f32 %v6228_v4, %v6227_v45  ;;  %v6427_v3 = vsel %vm564_vm2, %v6311_v41, 0.0  ;;  %v6313_v49 = vmul.f32 %v12431_v17, %v12431_v17  ;;  %v6232_v18 = vsel %vm564_vm2, %v12424_v8, 0.0 }
 0x8c7   :  { %v12451_v48 = vmax.f32 %v6054_v20, 0.0  ;;  %v6056_v31 = vadd.f32 %v11818_v46, %v5988_v7  ;;  %v5455_v60 = vadd.f32 %v5383_v61, %v4921_v55  ;;  %v4387_v11 = vadd.f32 %v4317_v19, %v14414_v52 }
 0x8c8   :  { %v6426_v0 = vadd.f32 %v6425_v21, %v6424_v15  ;;  %v6231_v51 = vadd.f32 %v6230_v58, %v6229_v5  ;;  %v6429_v62 = vsel %vm564_vm2, %v6312_v37, 0.0  ;;  %v6234_v16 = vsel %vm564_vm2, %v12431_v17, 0.0  ;;  %v4320_v37 = vpop.f32.mrf.mxu3 }
 0x8c9   :  { %v6314_v23 = vmul.f32 %v12443_v13, %v12443_v13  ;;  %v12460_v47 = vmax.f32 %v6055_v38, 0.0  ;;  %v6431_v24 = vsel %vm564_vm2, %v6313_v49, 0.0  ;;  %v6236_v42 = vsel %vm564_vm2, %v12443_v13, 0.0 }
 0x8ca   :  { %v6428_v46 = vadd.f32 %v6427_v3, %v6426_v0  ;;  %v6233_v27 = vadd.f32 %v6232_v18, %v6231_v51  ;;  %v6315_v61 = vmul.f32 %v12451_v48, %v12451_v48  ;;  %v12467_v29 = vmax.f32 %v6056_v31, 0.0  ;;  %v14415_v3 = vld [vmem:[#allocation60_spill] sm:$0xff]  ;;  %v4855_v18 = vpop.f32.mrf.mxu0 }
 0x8cb   :  { %v4922_v20 = vadd.f32 %v4852_v36, %v4387_v11  ;;  %v6433_v7 = vsel %vm564_vm2, %v6314_v23, 0.0  ;;  %v6238_v19 = vsel %vm564_vm2, %v12451_v48, 0.0  ;;  %v6316_v57 = vmul.f32 %v12460_v47, %v12460_v47 }
 0x8cc   :  { %v5917_v43 = vpop.f32.mrf.mxu2  ;;  %v6430_v50 = vadd.f32 %v6429_v62, %v6428_v46  ;;  %v6235_v4 = vadd.f32 %v6234_v16, %v6233_v27  ;;  %v6435_v58 = vsel %vm564_vm2, %v6315_v61, 0.0  ;;  %v6240_v38 = vsel %vm564_vm2, %v12460_v47, 0.0 }
 0x8cd   :  { %v5989_v44 = vadd.f32 %v5917_v43, %v5455_v60  ;;  %v6317_v15 = vmul.f32 %v12467_v29, %v12467_v29  ;;  %v4388_v49 = vadd.f32 %v4320_v37, %v14415_v3  ;;  %v6437_v52 = vsel %vm564_vm2, %v6316_v57, 0.0 }
 0x8ce   :  { %v5386_v34 = vpop.f32.mrf.mxu1  ;;  %v6432_v55 = vadd.f32 %v6431_v24, %v6430_v50  ;;  %v6237_v21 = vadd.f32 %v6236_v42, %v6235_v4  ;;  %v6242_v11 = vsel %vm564_vm2, %v12467_v29, 0.0 }
 0x8cf   :  { %v6057_v41 = vadd.f32 %v8461_v25, %v5989_v44  ;;  %v5456_v5 = vadd.f32 %v5386_v34, %v4922_v20  ;;  %v6439_v23 = vsel %vm564_vm2, %v6317_v15, 0.0  ;;  %v4923_v24 = vadd.f32 %v4855_v18, %v4388_v49 }
 0x8d0   :  { %v6434_v31 = vadd.f32 %v6433_v7, %v6432_v55  ;;  %v6239_v60 = vadd.f32 %v6238_v19, %v6237_v21  ;;  %v4323_v19 = vpop.f32.mrf.mxu3  ;;  %v14416_v21 = vld [vmem:[#allocation74_spill] sm:$0xff] }
 0x8d1   :  { %v12477_v45 = vmax.f32 %v6057_v41, 0.0 }
 0x8d2   :  { %v6436_v62 = vadd.f32 %v6435_v58, %v6434_v31  ;;  %v6241_v43 = vadd.f32 %v6240_v38, %v6239_v60  ;;  %v4389_v58 = vadd.f32 %v4323_v19, %v14416_v21 }
 0x8d3   :  { %v6318_v0 = vmul.f32 %v12477_v45, %v12477_v45  ;;  %v6244_v44 = vsel %vm564_vm2, %v12477_v45, 0.0 }
 0x8d4   :  { %v5920_v36 = vpop.f32.mrf.mxu2  ;;  %v6438_v46 = vadd.f32 %v6437_v52, %v6436_v62  ;;  %v6243_v27 = vadd.f32 %v6242_v11, %v6241_v43 }
 0x8d5   :  { %v5990_v51 = vadd.f32 %v5920_v36, %v5456_v5  ;;  %v6441_v42 = vsel %vm564_vm2, %v6318_v0, 0.0  ;;  %v4858_v5 = vpop.f32.mrf.mxu0 }
 0x8d6   :  { %v5389_v16 = vpop.f32.mrf.mxu1  ;;  %v6440_v41 = vadd.f32 %v6439_v23, %v6438_v46  ;;  %v6245_v50 = vadd.f32 %v6244_v44, %v6243_v27  ;;  %v4924_v31 = vadd.f32 %v4858_v5, %v4389_v58 }
 0x8d7   :  { %v6058_v34 = vadd.f32 %v8461_v25, %v5990_v51  ;;  %v5457_v7 = vadd.f32 %v5389_v16, %v4923_v24 }
 0x8d8   :  { %v6442_v57 = vadd.f32 %v6441_v42, %v6440_v41 }
 0x8d9   :  { %v12494_v61 = vmax.f32 %v6058_v34, 0.0 }
 0x8db   :  { %v6246_v4 = vsel %vm564_vm2, %v12494_v61, 0.0  ;;  %v6319_v20 = vmul.f32 %v12494_v61, %v12494_v61 }
 0x8dc   :  { %v6247_v37 = vadd.f32 %v6246_v4, %v6245_v50  ;;  %v5923_v55 = vpop.f32.mrf.mxu2 }
 0x8dd   :  { %v6443_v38 = vsel %vm564_vm2, %v6319_v20, 0.0  ;;  %v5991_v15 = vadd.f32 %v5923_v55, %v5457_v7 }
 0x8de   :  { %v6444_v3 = vadd.f32 %v6443_v38, %v6442_v57  ;;  %v5392_v18 = vpop.f32.mrf.mxu1 }
 0x8df   :  { %v6059_v49 = vadd.f32 %v8461_v25, %v5991_v15  ;;  %v5458_v11 = vadd.f32 %v5392_v18, %v4924_v31 }
 0x8e1   :  { %v12502_v60 = vmax.f32 %v6059_v49, 0.0 }
 0x8e3   :  { %v6248_v36 = vsel %vm564_vm2, %v12502_v60, 0.0  ;;  %v6320_v52 = vmul.f32 %v12502_v60, %v12502_v60 }
 0x8e4   :  { %v6249_v0 = vadd.f32 %v6248_v36, %v6247_v37  ;;  %v5926_v51 = vpop.f32.mrf.mxu2 }
 0x8e5   :  { %v6445_v62 = vsel %vm564_vm2, %v6320_v52, 0.0  ;;  %v5992_v43 = vadd.f32 %v5926_v51, %v5458_v11 }
 0x8e6   :  { %v6446_v16 = vadd.f32 %v6445_v62, %v6444_v3 }
 0x8e7   :  { %v6060_v23 = vadd.f32 %v8461_v25, %v5992_v43 }
 0x8e9   :  { %v12509_v44 = vmax.f32 %v6060_v23, 0.0 }
 0x8eb   :  { %v6250_v34 = vsel %vm564_vm2, %v12509_v44, 0.0  ;;  %v6321_v46 = vmul.f32 %v12509_v44, %v12509_v44 }
 0x8ec   :  { %v6251_v27 = vadd.f32 %v6250_v34, %v6249_v0 }
 0x8ed   :  { %v6447_v24 = vsel %vm564_vm2, %v6321_v46, 0.0 }
 0x8ee   :  { %v6252_v42 = vrot.slane %v6251_v27, 4  ;;  %v6448_v41 = vadd.f32 %v6447_v24, %v6446_v16  ;;  %v5994_v16 = vld [vmem:[%s13975_s4 + $0x4] sm:$0x1] }
 0x8f0   :  { %v6253_v50 = vadd.f32 %v6252_v42, %v6251_v27  ;;  %v6449_v4 = vrot.slane %v6448_v41, 4  ;;  %v12534_v27 = vld [vmem:[%s13975_s4 + $0x5] ss:$0 sm:$0xff]  ;;  %v14417_v42 = vld [vmem:[#allocation24_spill] sm:$0xff] }
 0x8f2   :  { %v6254_v20 = vrot.slane %v6253_v50, 2  ;;  %v6450_v7 = vadd.f32 %v6449_v4, %v6448_v41 }
 0x8f4   :  { %v6255_v19 = vadd.f32 %v6254_v20, %v6253_v50  ;;  %v6451_v57 = vrot.slane %v6450_v7, 2  ;;  %v14418_v20 = vld [vmem:[#allocation44_spill] sm:$0xff] }
 0x8f6   :  { %v6256_v25 = vrot.slane %v6255_v19, 1  ;;  %v6452_v37 = vadd.f32 %v6451_v57, %v6450_v7 }
 0x8f8   :  { %v6257_v55 = vadd.f32 %v6256_v25, %v6255_v19  ;;  %v6453_v21 = vrot.slane %v6452_v37, 1 }
 0x8fa   :  { %v6454_v58 = vadd.f32 %v6453_v21, %v6452_v37  ;;  %v12516_v38 = vmul.f32 0.001953125, %v6257_v55 }
 0x8fc   :  { %v6456_v15 = vmul.f32 0.001953125, %v6454_v58  ;;  %v6457_v5 = vmul.f32 %v12516_v38, %v12516_v38  ;;  %v6522_v3 = vsub.f32 %v12509_v44, %v12516_v38  ;;  %v6519_v0 = vsub.f32 %v12477_v45, %v12516_v38 }
 0x8fd   :  { %v6520_v51 = vsub.f32 %v12494_v61, %v12516_v38  ;;  %v6521_v62 = vsub.f32 %v12502_v60, %v12516_v38  ;;  %v6459_v41 = vsub.f32 %v14417_v42, %v12516_v38  ;;  %v6460_v7 = vsub.f32 %v14418_v20, %v12516_v38  ;;  %v14420_v20 = vld [vmem:[#allocation48_spill] sm:$0xff]  ;;  %v12958_v60 = vld [vmem:[%s13975_s4 + $0x6] ss:$0 sm:$0xff] }
 0x8fe   :  { %v6458_v49 = vsub.f32 %v6456_v15, %v6457_v5  ;;  %v6461_v25 = vsub.f32 %v11841_v26, %v12516_v38  ;;  %v6462_v21 = vsub.f32 %v11847_v32, %v12516_v38  ;;  %v6463_v5 = vsub.f32 %v11867_v12, %v12516_v38 }
 0x8ff   :  { %v6468_v42 = vsub.f32 %v11913_v59, %v12516_v38 }
 0x900   :  { %v6523_v18 = vadd.f32 1e-05, %v6458_v49 }
 0x902   :  { %8457 = vrsqrt.f32 %v6523_v18  ;;  %vm6530_vm8 = vweird.f32 %v6523_v18 }
 0x908   :  { %v8458_v31 = vpop.eup %8457 }
 0x909   :  { %v6525_v36 = vmul.f32 %v8458_v31, %v6523_v18  ;;  %vm6531_vm7 = vweird.f32 %v8458_v31  ;;  %v6464_v18 = vsub.f32 %v11872_v35, %v12516_v38 }
 0x90a   :  { %vm6532_vm9 = vmor %vm6530_vm8, %vm6531_vm7 }
 0x90b   :  { %v6526_v52 = vmul.f32 %v8458_v31, %v6525_v36  ;;  %v14419_v36 = vld [vmem:[#allocation26_spill] sm:$0xff] }
 0x90d   :  { %v6527_v11 = vmul.f32 0.5, %v6526_v52  ;;  %v6465_v52 = vsub.f32 %v14419_v36, %v12516_v38  ;;  %v14424_v36 = vld [vmem:[#allocation9_spill] sm:$0xff] }
 0x90f   :  { %v6528_v43 = vsub.f32 1.5, %v6527_v11 }
 0x911   :  { %v6529_v23 = vmul.f32 %v8458_v31, %v6528_v43  ;;  %v6466_v43 = vsub.f32 %v11900_v28, %v12516_v38 }
 0x913   :  { %v6533_v34 = vsel %vm6532_vm9, %v8458_v31, %v6529_v23  ;;  %v6467_v23 = vsub.f32 %v11908_v53, %v12516_v38 }
 0x914   :  { %v6534_v46 = vmul.f32 %v6533_v34, %v5994_v16 }
 0x916   :  { %v12536_v24 = vperm.slane %v6534_v46, 0 }
 0x918   :  { %v6536_v50 = vmul.f32 %v12536_v24, %v6459_v41  ;;  %v6537_v19 = vmul.f32 %v12536_v24, %v6460_v7  ;;  %v6538_v37 = vmul.f32 %v12536_v24, %v6461_v25  ;;  %v6539_v58 = vmul.f32 %v12536_v24, %v6462_v21 }
 0x919   :  { %v6540_v26 = vmul.f32 %v12536_v24, %v6463_v5  ;;  %v6541_v32 = vmul.f32 %v12536_v24, %v6464_v18  ;;  %v6542_v12 = vmul.f32 %v12536_v24, %v6465_v52  ;;  %v6543_v35 = vmul.f32 %v12536_v24, %v6466_v43  ;;  %v14423_v18 = vld [vmem:[#allocation8_spill] sm:$0xff]  ;;  %v14425_v43 = vld [vmem:[#allocation11_spill] sm:$0xff] }
 0x91a   :  { %v6601_v4 = vadd.f32 %v12534_v27, %v6536_v50  ;;  %v6602_v57 = vadd.f32 %v12534_v27, %v6537_v19  ;;  %v6603_v55 = vadd.f32 %v12534_v27, %v6538_v37  ;;  %v6604_v15 = vadd.f32 %v12534_v27, %v6539_v58 }
 0x91b   :  { %v6605_v49 = vadd.f32 %v12534_v27, %v6540_v26  ;;  %v6606_v31 = vadd.f32 %v12534_v27, %v6541_v32  ;;  %v6607_v11 = vadd.f32 %v12534_v27, %v6542_v12  ;;  %v6608_v16 = vadd.f32 %v12534_v27, %v6543_v35 }
 0x91c   :  { %8369 = vmatmul.msk.f32.vlgmr.msra.gmra.mxu3 %vm564_vm2, %v6601_v4  ;;  %v6544_v34 = vmul.f32 %v12536_v24, %v6467_v23  ;;  %v6545_v28 = vmul.f32 %v12536_v24, %v6468_v42  ;;  %v6469_v50 = vsub.f32 %v11932_v1, %v12516_v38  ;;  %v6470_v7 = vsub.f32 %v14420_v20, %v12516_v38 }
 0x91d   :  { %v6474_v32 = vsub.f32 %v14423_v18, %v12516_v38  ;;  %v6475_v52 = vsub.f32 %v14424_v36, %v12516_v38  ;;  %v6476_v35 = vsub.f32 %v14425_v43, %v12516_v38  ;;  %v14432_v43 = vld [vmem:[#allocation17_spill] sm:$0xff]  ;;  %v6598_v45 = vmul.f32 %v12536_v24, %v6521_v62 }
 0x91e   :  { %v6609_v46 = vadd.f32 %v12534_v27, %v6544_v34  ;;  %v6610_v41 = vadd.f32 %v12534_v27, %v6545_v28  ;;  %v6546_v53 = vmul.f32 %v12536_v24, %v6469_v50  ;;  %v6547_v59 = vmul.f32 %v12536_v24, %v6470_v7 }
 0x91f   :  { %v6552_v12 = vmul.f32 %v12536_v24, %v6475_v52  ;;  %v6599_v61 = vmul.f32 %v12536_v24, %v6522_v3 }
 0x920   :  { %v6611_v4 = vadd.f32 %v12534_v27, %v6546_v53  ;;  %v6612_v19 = vadd.f32 %v12534_v27, %v6547_v59  ;;  %v14427_v53 = vld [vmem:[#allocation13_spill] sm:$0xff] }
 0x924   :  { %8370 = vmatmul.msk.f32.gmra.mxu3 %vm564_vm2, %v6602_v57  ;;  %v14421_v57 = vld [vmem:[#allocation7_spill] sm:$0xff] }
 0x925   :  { %v6471_v25 = vsub.f32 %v14421_v57, %v12516_v38 }
 0x927   :  { %v6548_v1 = vmul.f32 %v12536_v24, %v6471_v25 }
 0x929   :  { %v6613_v37 = vadd.f32 %v12534_v27, %v6548_v1 }
 0x92c   :  { %8371 = vmatmul.msk.f32.gmra.mxu3 %vm564_vm2, %v6603_v55  ;;  %v6472_v55 = vsub.f32 %v11960_v56, %v12516_v38  ;;  %v6551_v56 = vmul.f32 %v12536_v24, %v6474_v32 }
 0x92e   :  { %v6549_v21 = vmul.f32 %v12536_v24, %v6472_v55  ;;  %v14429_v55 = vld [vmem:[#allocation15_spill] sm:$0xff] }
 0x930   :  { %v6614_v58 = vadd.f32 %v12534_v27, %v6549_v21  ;;  %v6480_v21 = vsub.f32 %v14429_v55, %v12516_v38 }
 0x934   :  { %8372 = vmatmul.msk.f32.gmra.mxu3 %vm564_vm2, %v6604_v15  ;;  %v14422_v15 = vld [vmem:[#allocation6_spill] sm:$0xff] }
 0x935   :  { %v6473_v5 = vsub.f32 %v14422_v15, %v12516_v38 }
 0x937   :  { %v6550_v26 = vmul.f32 %v12536_v24, %v6473_v5 }
 0x93c   :  { %8373 = vmatmul.msk.f32.gmra.mxu3 %vm564_vm2, %v6605_v49  ;;  %v6615_v49 = vadd.f32 %v12534_v27, %v6550_v26  ;;  %v14430_v26 = vld [vmem:[#allocation14_spill] sm:$0xff] }
 0x944   :  { %8374 = vmatmul.msk.f32.gmra.mxu3 %vm564_vm2, %v6606_v31  ;;  %v6616_v31 = vadd.f32 %v12534_v27, %v6551_v56 }
 0x94c   :  { %8375 = vmatmul.msk.f32.gmra.mxu3 %vm564_vm2, %v6607_v11  ;;  %v6617_v11 = vadd.f32 %v12534_v27, %v6552_v12 }
 0x954   :  { %8376 = vmatmul.msk.f32.gmra.mxu3 %vm564_vm2, %v6608_v16  ;;  %v6553_v16 = vmul.f32 %v12536_v24, %v6476_v35  ;;  %v6483_v35 = vsub.f32 %v14432_v43, %v12516_v38 }
 0x956   :  { %v6618_v34 = vadd.f32 %v12534_v27, %v6553_v16  ;;  %v6560_v16 = vmul.f32 %v12536_v24, %v6483_v35 }
 0x95c   :  { %8377 = vmatmul.msk.f32.gmra.mxu3 %vm564_vm2, %v6609_v46  ;;  %v14426_v46 = vld [vmem:[#allocation10_spill] sm:$0xff] }
 0x95d   :  { %v6477_v42 = vsub.f32 %v14426_v46, %v12516_v38  ;;  %v6625_v46 = vadd.f32 %v12534_v27, %v6560_v16  ;;  %v14438_v16 = vld [vmem:[#allocation27_spill] sm:$0xff] }
 0x95f   :  { %v6554_v28 = vmul.f32 %v12536_v24, %v6477_v42  ;;  %v14433_v42 = vld [vmem:[#allocation25_spill] sm:$0xff] }
 0x961   :  { %v6619_v50 = vadd.f32 %v12534_v27, %v6554_v28  ;;  %v6484_v28 = vsub.f32 %v14433_v42, %v12516_v38 }
 0x964   :  { %8378 = vmatmul.msk.f32.gmra.mxu3 %vm564_vm2, %v6610_v41 }
 0x96c   :  { %8379 = vmatmul.msk.f32.gmra.mxu3 %vm564_vm2, %v6611_v4  ;;  %v6478_v4 = vsub.f32 %v14427_v53, %v12516_v38 }
 0x96e   :  { %v6555_v20 = vmul.f32 %v12536_v24, %v6478_v4 }
 0x970   :  { %v6620_v59 = vadd.f32 %v12534_v27, %v6555_v20  ;;  %v14434_v20 = vld [vmem:[#allocation21_spill] sm:$0xff] }
 0x974   :  { %8380 = vmatmul.msk.f32.gmra.mxu3 %vm564_vm2, %v6612_v19  ;;  %v14428_v19 = vld [vmem:[#allocation12_spill] sm:$0xff] }
 0x975   :  { %v6479_v57 = vsub.f32 %v14428_v19, %v12516_v38 }
 0x977   :  { %v6556_v25 = vmul.f32 %v12536_v24, %v6479_v57 }
 0x97c   :  { %8381 = vmatmul.msk.f32.gmra.mxu3 %vm564_vm2, %v6613_v37  ;;  %v6621_v37 = vadd.f32 %v12534_v27, %v6556_v25 }
 0x984   :  { %8382 = vmatmul.msk.f32.gmra.mxu3 %vm564_vm2, %v6614_v58  ;;  %v6557_v58 = vmul.f32 %v12536_v24, %v6480_v21 }
 0x986   :  { %v6622_v5 = vadd.f32 %v12534_v27, %v6557_v58 }
 0x98c   :  { %8383 = vmatmul.msk.f32.gmra.mxu3 %vm564_vm2, %v6615_v49  ;;  %v6481_v49 = vsub.f32 %v14430_v26, %v12516_v38  ;;  %v14436_v26 = vld [vmem:[#allocation23_spill] sm:$0xff] }
 0x98e   :  { %v6558_v18 = vmul.f32 %v12536_v24, %v6481_v49  ;;  %v6487_v49 = vsub.f32 %v14436_v26, %v12516_v38 }
 0x990   :  { %v6623_v56 = vadd.f32 %v12534_v27, %v6558_v18  ;;  %v6564_v18 = vmul.f32 %v12536_v24, %v6487_v49  ;;  %v14441_v49 = vld [vmem:[#allocation31_spill] sm:$0xff] }
 0x994   :  { %8384 = vmatmul.msk.f32.gmra.mxu3 %vm564_vm2, %v6616_v31  ;;  %v14431_v31 = vld [vmem:[#allocation19_spill] sm:$0xff] }
 0x995   :  { %v6482_v36 = vsub.f32 %v14431_v31, %v12516_v38  ;;  %v6629_v31 = vadd.f32 %v12534_v27, %v6564_v18  ;;  %v6492_v18 = vsub.f32 %v14441_v49, %v12516_v38 }
 0x997   :  { %v6559_v52 = vmul.f32 %v12536_v24, %v6482_v36  ;;  %v14437_v36 = vld [vmem:[#allocation30_spill] sm:$0xff] }
 0x99c   :  { %8385 = vmatmul.msk.f32.gmra.mxu3 %vm564_vm2, %v6617_v11  ;;  %v6624_v11 = vadd.f32 %v12534_v27, %v6559_v52  ;;  %v6488_v52 = vsub.f32 %v14437_v36, %v12516_v38 }
 0x99f   :  { %v12626_v23 = vpop.f32.mrf.mxu3 }
 0x9a0   :  { %v12967_v44 = vadd.f32 %v12958_v60, %v12626_v23 }
 0x9a2   :  { %14451 = vst [vmem:[#allocation45_spill] sm:$0xff] %v12967_v44 }
 0x9a4   :  { %8386 = vmatmul.msk.f32.gmra.mxu3 %vm564_vm2, %v6618_v34 }
 0x9a7   :  { %v12633_v41 = vpop.f32.mrf.mxu3 }
 0x9a8   :  { %v12963_v62 = vadd.f32 %v12958_v60, %v12633_v41  ;;  %v7207_v41 = vmul.f32 %v12967_v44, %v12967_v44 }
 0x9aa   :  { %14450 = vst [vmem:[#allocation68_spill] sm:$0xff] %v12963_v62  ;;  %v7075_v23 = vsel %vm564_vm2, %v12963_v62, 0.0 }
 0x9ac   :  { %8387 = vmatmul.msk.f32.gmra.mxu3 %vm564_vm2, %v6619_v50  ;;  %v6561_v50 = vmul.f32 %v12536_v24, %v6484_v28 }
 0x9ae   :  { %v6626_v4 = vadd.f32 %v12534_v27, %v6561_v50 }
 0x9af   :  { %v12640_v7 = vpop.f32.mrf.mxu3 }
 0x9b0   :  { %v12973_v3 = vadd.f32 %v12958_v60, %v12640_v7 }
 0x9b2   :  { %14452 = vst [vmem:[#allocation69_spill] sm:$0xff] %v12973_v3 }
 0x9b4   :  { %8388 = vmatmul.msk.f32.gmra.mxu3 %vm564_vm2, %v6620_v59  ;;  %v6485_v59 = vsub.f32 %v14434_v20, %v12516_v38 }
 0x9b6   :  { %v6562_v19 = vmul.f32 %v12536_v24, %v6485_v59 }
 0x9b7   :  { %v12647_v1 = vpop.f32.mrf.mxu3 }
 0x9b8   :  { %v6627_v25 = vadd.f32 %v12534_v27, %v6562_v19 }
 0x9bc   :  { %8389 = vmatmul.msk.f32.gmra.mxu3 %vm564_vm2, %v6621_v37  ;;  %v14435_v37 = vld [vmem:[#allocation28_spill] sm:$0xff] }
 0x9bd   :  { %v6486_v55 = vsub.f32 %v14435_v37, %v12516_v38  ;;  %v14440_v37 = vld [vmem:[#allocation29_spill] sm:$0xff] }
 0x9bf   :  { %v12654_v15 = vpop.f32.mrf.mxu3  ;;  %v6563_v21 = vmul.f32 %v12536_v24, %v6486_v55  ;;  %v6491_v55 = vsub.f32 %v14440_v37, %v12516_v38  ;;  %v14444_v37 = vld [vmem:[#allocation43_spill] sm:$0xff] }
 0x9c0   :  { %v12989_v7 = vadd.f32 %v12958_v60, %v12654_v15 }
 0x9c4   :  { %8390 = vmatmul.msk.f32.gmra.mxu3 %vm564_vm2, %v6622_v5  ;;  %v6628_v5 = vadd.f32 %v12534_v27, %v6563_v21  ;;  %v6568_v21 = vmul.f32 %v12536_v24, %v6491_v55  ;;  %v6495_v55 = vsub.f32 %v14444_v37, %v12516_v38 }
 0x9c6   :  { %v6633_v26 = vadd.f32 %v12534_v27, %v6568_v21  ;;  %v6572_v21 = vmul.f32 %v12536_v24, %v6495_v55 }
 0x9c7   :  { %v12661_v32 = vpop.f32.mrf.mxu3 }
 0x9c8   :  { %v6637_v49 = vadd.f32 %v12534_v27, %v6572_v21 }
 0x9cc   :  { %8391 = vmatmul.msk.f32.gmra.mxu3 %vm564_vm2, %v6623_v56 }
 0x9cf   :  { %v12668_v12 = vpop.f32.mrf.mxu3 }
 0x9d4   :  { %8392 = vmatmul.msk.f32.gmra.mxu3 %vm564_vm2, %v6624_v11  ;;  %v6565_v11 = vmul.f32 %v12536_v24, %v6488_v52 }
 0x9d6   :  { %v6630_v35 = vadd.f32 %v12534_v27, %v6565_v11  ;;  %v14442_v11 = vld [vmem:[#allocation33_spill] sm:$0xff] }
 0x9d7   :  { %v12675_v34 = vpop.f32.mrf.mxu3 }
 0x9dc   :  { %8393 = vmatmul.msk.f32.gmra.mxu3 %vm564_vm2, %v6625_v46  ;;  %v6489_v46 = vsub.f32 %v14438_v16, %v12516_v38 }
 0x9de   :  { %v6566_v42 = vmul.f32 %v12536_v24, %v6489_v46 }
 0x9df   :  { %v12682_v53 = vpop.f32.mrf.mxu3 }
 0x9e0   :  { %v6631_v50 = vadd.f32 %v12534_v27, %v6566_v42 }
 0x9e4   :  { %8394 = vmatmul.msk.f32.gmra.mxu3 %vm564_vm2, %v6626_v4  ;;  %v14439_v4 = vld [vmem:[#allocation32_spill] sm:$0xff] }
 0x9e5   :  { %v6490_v20 = vsub.f32 %v14439_v4, %v12516_v38 }
 0x9e7   :  { %v12689_v57 = vpop.f32.mrf.mxu3  ;;  %v6567_v59 = vmul.f32 %v12536_v24, %v6490_v20 }
 0x9ec   :  { %8395 = vmatmul.msk.f32.gmra.mxu3 %vm564_vm2, %v6627_v25  ;;  %v6632_v25 = vadd.f32 %v12534_v27, %v6567_v59 }
 0x9ef   :  { %v12696_v58 = vpop.f32.mrf.mxu3 }
 0x9f4   :  { %8396 = vmatmul.msk.f32.gmra.mxu3 %vm564_vm2, %v6628_v5 }
 0x9f7   :  { %v12703_v56 = vpop.f32.mrf.mxu3 }
 0x9fc   :  { %8397 = vmatmul.msk.f32.gmra.mxu3 %vm564_vm2, %v6629_v31  ;;  %v6569_v31 = vmul.f32 %v12536_v24, %v6492_v18  ;;  %v14445_v18 = vld [vmem:[#allocation35_spill] sm:$0xff] }
 0x9fe   :  { %v6634_v52 = vadd.f32 %v12534_v27, %v6569_v31  ;;  %v6496_v31 = vsub.f32 %v14445_v18, %v12516_v38  ;;  %v14448_v18 = vld [vmem:[#allocation39_spill] sm:$0xff] }
 0x9ff   :  { %v12710_v43 = vpop.f32.mrf.mxu3 }
 0xa04   :  { %8398 = vmatmul.msk.f32.gmra.mxu3 %vm564_vm2, %v6630_v35  ;;  %v6493_v35 = vsub.f32 %v14442_v11, %v12516_v38 }
 0xa06   :  { %v6570_v16 = vmul.f32 %v12536_v24, %v6493_v35 }
 0xa07   :  { %v12717_v28 = vpop.f32.mrf.mxu3 }
 0xa08   :  { %v6635_v42 = vadd.f32 %v12534_v27, %v6570_v16  ;;  %v14446_v16 = vld [vmem:[#allocation36_spill] sm:$0xff] }
 0xa0c   :  { %8399 = vmatmul.msk.f32.gmra.mxu3 %vm564_vm2, %v6631_v50  ;;  %v14443_v50 = vld [vmem:[#allocation34_spill] sm:$0xff] }
 0xa0d   :  { %v6494_v4 = vsub.f32 %v14443_v50, %v12516_v38 }
 0xa0f   :  { %v12724_v19 = vpop.f32.mrf.mxu3  ;;  %v6571_v20 = vmul.f32 %v12536_v24, %v6494_v4 }
 0xa14   :  { %8400 = vmatmul.msk.f32.gmra.mxu3 %vm564_vm2, %v6632_v25  ;;  %v6636_v25 = vadd.f32 %v12534_v27, %v6571_v20 }
 0xa17   :  { %v12731_v5 = vpop.f32.mrf.mxu3 }
 0xa1c   :  { %8401 = vmatmul.msk.f32.gmra.mxu3 %vm564_vm2, %v6633_v26 }
 0xa1f   :  { %v12738_v36 = vpop.f32.mrf.mxu3 }
 0xa24   :  { %8402 = vmatmul.msk.f32.gmra.mxu3 %vm564_vm2, %v6634_v52  ;;  %v6573_v52 = vmul.f32 %v12536_v24, %v6496_v31  ;;  %v6499_v31 = vsub.f32 %v14448_v18, %v12516_v38 }
 0xa26   :  { %v6638_v35 = vadd.f32 %v12534_v27, %v6573_v52  ;;  %v6576_v52 = vmul.f32 %v12536_v24, %v6499_v31 }
 0xa27   :  { %v12745_v46 = vpop.f32.mrf.mxu3 }
 0xa2c   :  { %8403 = vmatmul.msk.f32.gmra.mxu3 %vm564_vm2, %v6635_v42  ;;  %v6497_v42 = vsub.f32 %v14446_v16, %v12516_v38  ;;  %v6641_v16 = vadd.f32 %v12534_v27, %v6576_v52  ;;  %v6502_v52 = vsub.f32 %v12298_v9, %v12516_v38  ;;  %v6504_v9 = vsub.f32 %v12328_v40, %v12516_v38 }
 0xa2d   :  { %v6506_v40 = vsub.f32 %v12353_v14, %v12516_v38  ;;  %v6508_v14 = vsub.f32 %v12375_v30, %v12516_v38  ;;  %v6510_v30 = vsub.f32 %v12399_v63, %v12516_v38  ;;  %v6512_v63 = vsub.f32 %v12413_v39, %v12516_v38 }
 0xa2e   :  { %v6574_v50 = vmul.f32 %v12536_v24, %v6497_v42  ;;  %v14449_v42 = vld [vmem:[#allocation41_spill] sm:$0xff]  ;;  %v6514_v39 = vsub.f32 %v12431_v17, %v12516_v38  ;;  %v6516_v17 = vsub.f32 %v12451_v48, %v12516_v38  ;;  %v6518_v48 = vsub.f32 %v12467_v29, %v12516_v38 }
 0xa2f   :  { %v12752_v59 = vpop.f32.mrf.mxu3  ;;  %v6597_v29 = vmul.f32 %v12536_v24, %v6520_v51 }
 0xa30   :  { %v6639_v20 = vadd.f32 %v12534_v27, %v6574_v50  ;;  %v6500_v50 = vsub.f32 %v14449_v42, %v12516_v38 }
 0xa34   :  { %8404 = vmatmul.msk.f32.gmra.mxu3 %vm564_vm2, %v6636_v25  ;;  %v14447_v25 = vld [vmem:[#allocation37_spill] sm:$0xff] }
 0xa35   :  { %v6498_v37 = vsub.f32 %v14447_v25, %v12516_v38 }
 0xa37   :  { %v12759_v26 = vpop.f32.mrf.mxu3  ;;  %v6575_v55 = vmul.f32 %v12536_v24, %v6498_v37 }
 0xa3c   :  { %8405 = vmatmul.msk.f32.gmra.mxu3 %vm564_vm2, %v6637_v49  ;;  %v6640_v49 = vadd.f32 %v12534_v27, %v6575_v55  ;;  %v6501_v55 = vsub.f32 %v12287_v10, %v12516_v38  ;;  %v6503_v10 = vsub.f32 %v12313_v2, %v12516_v38  ;;  %v6505_v2 = vsub.f32 %v12339_v22, %v12516_v38 }
 0xa3d   :  { %v6507_v22 = vsub.f32 %v12363_v33, %v12516_v38  ;;  %v6509_v33 = vsub.f32 %v12385_v54, %v12516_v38  ;;  %v6511_v54 = vsub.f32 %v12408_v6, %v12516_v38  ;;  %v6513_v6 = vsub.f32 %v12424_v8, %v12516_v38 }
 0xa3e   :  { %v6515_v8 = vsub.f32 %v12443_v13, %v12516_v38  ;;  %v6517_v13 = vsub.f32 %v12460_v47, %v12516_v38  ;;  %v6596_v47 = vmul.f32 %v12536_v24, %v6519_v0 }
 0xa3f   :  { %v12766_v11 = vpop.f32.mrf.mxu3 }
 0xa44   :  { %8406 = vmatmul.msk.f32.gmra.mxu3 %vm564_vm2, %v6638_v35 }
 0xa47   :  { %v12773_v4 = vpop.f32.mrf.mxu3 }
 0xa4c   :  { %8407 = vmatmul.msk.f32.gmra.mxu3 %vm564_vm2, %v6639_v20  ;;  %v6577_v20 = vmul.f32 %v12536_v24, %v6500_v50 }
 0xa4e   :  { %v6642_v37 = vadd.f32 %v12534_v27, %v6577_v20  ;;  %v6580_v20 = vmul.f32 %v12536_v24, %v6503_v10 }
 0xa4f   :  { %v12780_v21 = vpop.f32.mrf.mxu3 }
 0xa54   :  { %8408 = vmatmul.msk.f32.gmra.mxu3 %vm564_vm2, %v6640_v49  ;;  %v6578_v49 = vmul.f32 %v12536_v24, %v6501_v55  ;;  %v6645_v55 = vadd.f32 %v12534_v27, %v6580_v20  ;;  %v6583_v20 = vmul.f32 %v12536_v24, %v6506_v40 }
 0xa56   :  { %v6643_v31 = vadd.f32 %v12534_v27, %v6578_v49  ;;  %v6581_v49 = vmul.f32 %v12536_v24, %v6504_v9  ;;  %v6648_v9 = vadd.f32 %v12534_v27, %v6583_v20  ;;  %v6586_v20 = vmul.f32 %v12536_v24, %v6509_v33 }
 0xa57   :  { %v12787_v35 = vpop.f32.mrf.mxu3 }
 0xa5c   :  { %8409 = vmatmul.msk.f32.gmra.mxu3 %vm564_vm2, %v6641_v16  ;;  %v6579_v16 = vmul.f32 %v12536_v24, %v6502_v52  ;;  %v6646_v52 = vadd.f32 %v12534_v27, %v6581_v49  ;;  %v6584_v49 = vmul.f32 %v12536_v24, %v6507_v22  ;;  %v6651_v22 = vadd.f32 %v12534_v27, %v6586_v20 }
 0xa5d   :  { %v6589_v20 = vmul.f32 %v12536_v24, %v6512_v63 }
 0xa5e   :  { %v6644_v50 = vadd.f32 %v12534_v27, %v6579_v16  ;;  %v6582_v16 = vmul.f32 %v12536_v24, %v6505_v2  ;;  %v6649_v2 = vadd.f32 %v12534_v27, %v6584_v49  ;;  %v6587_v49 = vmul.f32 %v12536_v24, %v6510_v30 }
 0xa5f   :  { %v12794_v25 = vpop.f32.mrf.mxu3  ;;  %v6654_v30 = vadd.f32 %v12534_v27, %v6589_v20  ;;  %v6592_v20 = vmul.f32 %v12536_v24, %v6515_v8 }
 0xa60   :  { %v6647_v10 = vadd.f32 %v12534_v27, %v6582_v16  ;;  %v6585_v16 = vmul.f32 %v12536_v24, %v6508_v14  ;;  %v6652_v14 = vadd.f32 %v12534_v27, %v6587_v49  ;;  %v6590_v49 = vmul.f32 %v12536_v24, %v6513_v6 }
 0xa61   :  { %v6657_v6 = vadd.f32 %v12534_v27, %v6592_v20  ;;  %v6595_v20 = vmul.f32 %v12536_v24, %v6518_v48  ;;  %v6664_v48 = vadd.f32 %v12534_v27, %v6599_v61 }
 0xa62   :  { %v6650_v40 = vadd.f32 %v12534_v27, %v6585_v16  ;;  %v6588_v16 = vmul.f32 %v12536_v24, %v6511_v54  ;;  %v6655_v54 = vadd.f32 %v12534_v27, %v6590_v49  ;;  %v6593_v49 = vmul.f32 %v12536_v24, %v6516_v17 }
 0xa63   :  { %v6660_v17 = vadd.f32 %v12534_v27, %v6595_v20  ;;  %v7209_v20 = vmul.f32 %v12973_v3, %v12973_v3 }
 0xa64   :  { %8410 = vmatmul.msk.f32.gmra.mxu3 %vm564_vm2, %v6642_v37  ;;  %v6653_v33 = vadd.f32 %v12534_v27, %v6588_v16  ;;  %v6591_v16 = vmul.f32 %v12536_v24, %v6514_v39  ;;  %v6658_v39 = vadd.f32 %v12534_v27, %v6593_v49 }
 0xa66   :  { %v6656_v63 = vadd.f32 %v12534_v27, %v6591_v16  ;;  %v6594_v16 = vmul.f32 %v12536_v24, %v6517_v13  ;;  %v12979_v24 = vadd.f32 %v12958_v60, %v12647_v1  ;;  %v7077_v1 = vsel %vm564_vm2, %v12973_v3, 0.0 }
 0xa67   :  { %v12801_v18 = vpop.f32.mrf.mxu3 }
 0xa68   :  { %v6659_v8 = vadd.f32 %v12534_v27, %v6594_v16  ;;  %v6662_v16 = vadd.f32 %v12534_v27, %v6597_v29  ;;  %14453 = vst [vmem:[#allocation70_spill] sm:$0xff] %v12979_v24  ;;  %v13000_v29 = vadd.f32 %v12958_v60, %v12661_v32  ;;  %v7079_v61 = vsel %vm564_vm2, %v12979_v24, 0.0 }
 0xa6c   :  { %8411 = vmatmul.msk.f32.gmra.mxu3 %vm564_vm2, %v6643_v31 }
 0xa6f   :  { %v12808_v42 = vpop.f32.mrf.mxu3 }
 0xa74   :  { %8412 = vmatmul.msk.f32.gmra.mxu3 %vm564_vm2, %v6644_v50 }
 0xa77   :  { %v12815_v37 = vpop.f32.mrf.mxu3 }
 0xa7c   :  { %8413 = vmatmul.msk.f32.gmra.mxu3 %vm564_vm2, %v6645_v55 }
 0xa7f   :  { %v12822_v31 = vpop.f32.mrf.mxu3 }
 0xa84   :  { %8414 = vmatmul.msk.f32.gmra.mxu3 %vm564_vm2, %v6646_v52 }
 0xa87   :  { %v12829_v50 = vpop.f32.mrf.mxu3 }
 0xa8c   :  { %8415 = vmatmul.msk.f32.gmra.mxu3 %vm564_vm2, %v6647_v10 }
 0xa8f   :  { %v12836_v55 = vpop.f32.mrf.mxu3 }
 0xa94   :  { %8416 = vmatmul.msk.f32.gmra.mxu3 %vm564_vm2, %v6648_v9 }
 0xa97   :  { %v12843_v52 = vpop.f32.mrf.mxu3 }
 0xa9c   :  { %8417 = vmatmul.msk.f32.gmra.mxu3 %vm564_vm2, %v6649_v2 }
 0xa9f   :  { %v12850_v10 = vpop.f32.mrf.mxu3 }
 0xaa4   :  { %8418 = vmatmul.msk.f32.gmra.mxu3 %vm564_vm2, %v6650_v40 }
 0xaa7   :  { %v12857_v9 = vpop.f32.mrf.mxu3 }
 0xaac   :  { %8419 = vmatmul.msk.f32.gmra.mxu3 %vm564_vm2, %v6651_v22 }
 0xaaf   :  { %v12864_v2 = vpop.f32.mrf.mxu3 }
 0xab4   :  { %8420 = vmatmul.msk.f32.gmra.mxu3 %vm564_vm2, %v6652_v14 }
 0xab7   :  { %v12871_v40 = vpop.f32.mrf.mxu3 }
 0xabc   :  { %8421 = vmatmul.msk.f32.gmra.mxu3 %vm564_vm2, %v6653_v33 }
 0xabf   :  { %v12878_v22 = vpop.f32.mrf.mxu3 }
 0xac4   :  { %8422 = vmatmul.msk.f32.gmra.mxu3 %vm564_vm2, %v6654_v30 }
 0xac7   :  { %v12885_v14 = vpop.f32.mrf.mxu3 }
 0xacc   :  { %8423 = vmatmul.msk.f32.gmra.mxu3 %vm564_vm2, %v6655_v54 }
 0xacf   :  { %v12892_v33 = vpop.f32.mrf.mxu3 }
 0xad4   :  { %8424 = vmatmul.msk.f32.gmra.mxu3 %vm564_vm2, %v6656_v63 }
 0xad7   :  { %v12899_v30 = vpop.f32.mrf.mxu3 }
 0xadc   :  { %8425 = vmatmul.msk.f32.gmra.mxu3 %vm564_vm2, %v6657_v6 }
 0xadf   :  { %v12906_v54 = vpop.f32.mrf.mxu3 }
 0xae4   :  { %8426 = vmatmul.msk.f32.gmra.mxu3 %vm564_vm2, %v6658_v39  ;;  %v6661_v39 = vadd.f32 %v12534_v27, %v6596_v47 }
 0xae7   :  { %v12913_v63 = vpop.f32.mrf.mxu3 }
 0xaec   :  { %8427 = vmatmul.msk.f32.gmra.mxu3 %vm564_vm2, %v6659_v8  ;;  %v6663_v8 = vadd.f32 %v12534_v27, %v6598_v45  ;;  %v7208_v27 = vmul.f32 %v12963_v62, %v12963_v62 }
 0xaee   :  { %v7272_v47 = vsel %vm564_vm2, %v7208_v27, 0.0  ;;  %v13012_v27 = vadd.f32 %v12958_v60, %v12668_v12  ;;  %v7083_v12 = vsel %vm564_vm2, %v13000_v29, 0.0 }
 0xaef   :  { %v12920_v6 = vpop.f32.mrf.mxu3 }
 0xaf4   :  { %8428 = vmatmul.msk.f32.gmra.mxu3 %vm564_vm2, %v6660_v17  ;;  %v7074_v17 = vsel %vm564_vm2, %v12967_v44, 0.0 }
 0xaf5   :  { %v7076_v45 = vadd.f32 %v7075_v23, %v7074_v17  ;;  %v7212_v23 = vmul.f32 %v13000_v29, %v13000_v29 }
 0xaf7   :  { %v12928_v49 = vpop.f32.mrf.mxu3  ;;  %v7078_v32 = vadd.f32 %v7077_v1, %v7076_v45  ;;  %v13030_v1 = vadd.f32 %v12958_v60, %v12682_v53  ;;  %v7280_v45 = vsel %vm564_vm2, %v7212_v23, 0.0 }
 0xafc   :  { %8429 = vmatmul.msk.f32.gmra.mxu3 %vm564_vm2, %v6661_v39  ;;  %v7210_v39 = vmul.f32 %v12979_v24, %v12979_v24  ;;  %v7080_v24 = vadd.f32 %v7079_v61, %v7078_v32 }
 0xafe   :  { %v7276_v62 = vsel %vm564_vm2, %v7210_v39, 0.0 }
 0xaff   :  { %v12936_v13 = vpop.f32.mrf.mxu3 }
 0xb04   :  { %8430 = vmatmul.msk.f32.gmra.mxu3 %vm564_vm2, %v6662_v16  ;;  %v7271_v16 = vsel %vm564_vm2, %v7207_v41, 0.0  ;;  %v7081_v41 = vsel %vm564_vm2, %v12989_v7, 0.0 }
 0xb05   :  { %v7273_v3 = vadd.f32 %v7272_v47, %v7271_v16  ;;  %v7213_v47 = vmul.f32 %v13012_v27, %v13012_v27  ;;  %v7082_v16 = vadd.f32 %v7081_v41, %v7080_v24  ;;  %v7215_v24 = vmul.f32 %v13030_v1, %v13030_v1 }
 0xb06   :  { %v13050_v41 = vadd.f32 %v12958_v60, %v12696_v58 }
 0xb07   :  { %v12944_v0 = vpop.f32.mrf.mxu3  ;;  %v7282_v53 = vsel %vm564_vm2, %v7213_v47, 0.0  ;;  %v13059_v47 = vadd.f32 %v12958_v60, %v12703_v56 }
 0xb08   :  { %v7093_v56 = vsel %vm564_vm2, %v13050_v41, 0.0 }
 0xb09   :  { %14455 = vst [vmem:[#allocation72_spill] sm:$0xff] %v13059_v47 }
 0xb0c   :  { %8431 = vmatmul.msk.f32.gmra.mxu3 %vm564_vm2, %v6663_v8  ;;  %v7274_v8 = vsel %vm564_vm2, %v7209_v20, 0.0  ;;  %v13021_v20 = vadd.f32 %v12958_v60, %v12675_v34  ;;  %v7085_v34 = vsel %vm564_vm2, %v13012_v27, 0.0 }
 0xb0d   :  { %v7275_v17 = vadd.f32 %v7274_v8, %v7273_v3  ;;  %v13039_v8 = vadd.f32 %v12958_v60, %v12689_v57 }
 0xb0e   :  { %14454 = vst [vmem:[#allocation47_spill] sm:$0xff] %v13021_v20  ;;  %v7214_v3 = vmul.f32 %v13021_v20, %v13021_v20 }
 0xb0f   :  { %v12952_v51 = vpop.f32.mrf.mxu3  ;;  %v7277_v39 = vadd.f32 %v7276_v62, %v7275_v17  ;;  %v7087_v62 = vsel %vm564_vm2, %v13021_v20, 0.0  ;;  %v7286_v20 = vsel %vm564_vm2, %v7215_v24, 0.0  ;;  %v7091_v58 = vsel %vm564_vm2, %v13039_v8, 0.0 }
 0xb10   :  { %v7284_v57 = vsel %vm564_vm2, %v7214_v3, 0.0 }
 0xb14   :  { %8432 = vmatmul.msk.f32.gmra.mxu3 %vm564_vm2, %v6664_v48  ;;  %v7211_v48 = vmul.f32 %v12989_v7, %v12989_v7 }
 0xb16   :  { %v7278_v44 = vsel %vm564_vm2, %v7211_v48, 0.0  ;;  %v7084_v48 = vadd.f32 %v7083_v12, %v7082_v16  ;;  %v7216_v12 = vmul.f32 %v13039_v8, %v13039_v8 }
 0xb17   :  { %v12969_v38 = vpop.f32.mrf.mxu3  ;;  %v7279_v61 = vadd.f32 %v7278_v44, %v7277_v39  ;;  %v7089_v44 = vsel %vm564_vm2, %v13030_v1, 0.0 }
 0xb18   :  { %v7086_v17 = vadd.f32 %v7085_v34, %v7084_v48  ;;  %v13068_v34 = vadd.f32 %v12958_v60, %v12710_v43  ;;  %v7288_v48 = vsel %vm564_vm2, %v7216_v12, 0.0  ;;  %v13088_v12 = vadd.f32 %v12958_v60, %v12724_v19 }
 0xb19   :  { %v7281_v23 = vadd.f32 %v7280_v45, %v7279_v61  ;;  %v7217_v45 = vmul.f32 %v13050_v41, %v13050_v41 }
 0xb1a   :  { %v7088_v16 = vadd.f32 %v7087_v62, %v7086_v17  ;;  %v13077_v62 = vadd.f32 %v12958_v60, %v12717_v28 }
 0xb1b   :  { %v7283_v39 = vadd.f32 %v7282_v53, %v7281_v23  ;;  %v7218_v53 = vmul.f32 %v13059_v47, %v13059_v47  ;;  %v7290_v43 = vsel %vm564_vm2, %v7217_v45, 0.0  ;;  %v13097_v45 = vadd.f32 %v12958_v60, %v12731_v5 }
 0xb1c   :  { %v7090_v61 = vadd.f32 %v7089_v44, %v7088_v16  ;;  %v7219_v44 = vmul.f32 %v13068_v34, %v13068_v34  ;;  %v7099_v19 = vsel %vm564_vm2, %v13077_v62, 0.0  ;;  %v7101_v5 = vsel %vm564_vm2, %v13088_v12, 0.0 }
 0xb1d   :  { %v7285_v3 = vadd.f32 %v7284_v57, %v7283_v39  ;;  %v7095_v57 = vsel %vm564_vm2, %v13059_v47, 0.0  ;;  %v7292_v28 = vsel %vm564_vm2, %v7218_v53, 0.0  ;;  %14456 = vst [vmem:[#allocation73_spill] sm:$0xff] %v13097_v45 }
 0xb1e   :  { %v7092_v23 = vadd.f32 %v7091_v58, %v7090_v61  ;;  %v7220_v58 = vmul.f32 %v13077_v62, %v13077_v62  ;;  %v7294_v47 = vsel %vm564_vm2, %v7219_v44, 0.0 }
 0xb1f   :  { %v13003_v15 = vpop.f32.mrf.mxu3  ;;  %v7287_v24 = vadd.f32 %v7286_v20, %v7285_v3  ;;  %v7097_v20 = vsel %vm564_vm2, %v13068_v34, 0.0 }
 0xb20   :  { %v7094_v16 = vadd.f32 %v7093_v56, %v7092_v23  ;;  %v13106_v56 = vadd.f32 %v12958_v60, %v12738_v36  ;;  %v7296_v23 = vsel %vm564_vm2, %v7220_v58, 0.0  ;;  %v13126_v58 = vadd.f32 %v12958_v60, %v12752_v59 }
 0xb21   :  { %v7289_v39 = vadd.f32 %v7288_v48, %v7287_v24  ;;  %v7221_v48 = vmul.f32 %v13088_v12, %v13088_v12 }
 0xb22   :  { %v7096_v61 = vadd.f32 %v7095_v57, %v7094_v16  ;;  %v13115_v57 = vadd.f32 %v12958_v60, %v12745_v46 }
 0xb23   :  { %v7291_v3 = vadd.f32 %v7290_v43, %v7289_v39  ;;  %v7222_v43 = vmul.f32 %v13097_v45, %v13097_v45  ;;  %v7298_v36 = vsel %vm564_vm2, %v7221_v48, 0.0  ;;  %v13135_v48 = vadd.f32 %v12958_v60, %v12759_v26 }
 0xb24   :  { %v7098_v24 = vadd.f32 %v7097_v20, %v7096_v61  ;;  %v7223_v20 = vmul.f32 %v13106_v56, %v13106_v56  ;;  %v7107_v59 = vsel %vm564_vm2, %v13115_v57, 0.0  ;;  %v7109_v26 = vsel %vm564_vm2, %v13126_v58, 0.0 }
 0xb25   :  { %v7293_v53 = vadd.f32 %v7292_v28, %v7291_v3  ;;  %v7103_v28 = vsel %vm564_vm2, %v13097_v45, 0.0  ;;  %v7300_v46 = vsel %vm564_vm2, %v7222_v43, 0.0  ;;  %14457 = vst [vmem:[#allocation49_spill] sm:$0xff] %v13135_v48 }
 0xb26   :  { %v7100_v39 = vadd.f32 %v7099_v19, %v7098_v24  ;;  %v7224_v19 = vmul.f32 %v13115_v57, %v13115_v57  ;;  %v7302_v45 = vsel %vm564_vm2, %v7223_v20, 0.0 }
 0xb27   :  { %v13041_v32 = vpop.f32.mrf.mxu3  ;;  %v7295_v44 = vadd.f32 %v7294_v47, %v7293_v53  ;;  %v7105_v47 = vsel %vm564_vm2, %v13106_v56, 0.0 }
 0xb28   :  { %v7102_v61 = vadd.f32 %v7101_v5, %v7100_v39  ;;  %v13144_v5 = vadd.f32 %v12958_v60, %v12766_v11  ;;  %v7304_v39 = vsel %vm564_vm2, %v7224_v19, 0.0  ;;  %v13164_v19 = vadd.f32 %v12958_v60, %v12780_v21 }
 0xb29   :  { %v7297_v3 = vadd.f32 %v7296_v23, %v7295_v44  ;;  %v7225_v23 = vmul.f32 %v13126_v58, %v13126_v58 }
 0xb2a   :  { %v7104_v24 = vadd.f32 %v7103_v28, %v7102_v61  ;;  %v13153_v28 = vadd.f32 %v12958_v60, %v12773_v4 }
 0xb2b   :  { %v7299_v53 = vadd.f32 %v7298_v36, %v7297_v3  ;;  %v7226_v36 = vmul.f32 %v13135_v48, %v13135_v48  ;;  %v7306_v11 = vsel %vm564_vm2, %v7225_v23, 0.0  ;;  %v13173_v23 = vadd.f32 %v12958_v60, %v12787_v35 }
 0xb2c   :  { %v7106_v44 = vadd.f32 %v7105_v47, %v7104_v24  ;;  %v7227_v47 = vmul.f32 %v13144_v5, %v13144_v5  ;;  %v7115_v21 = vsel %vm564_vm2, %v13153_v28, 0.0  ;;  %v7117_v35 = vsel %vm564_vm2, %v13164_v19, 0.0 }
 0xb2d   :  { %v7301_v43 = vadd.f32 %v7300_v46, %v7299_v53  ;;  %v7111_v46 = vsel %vm564_vm2, %v13135_v48, 0.0  ;;  %v7308_v4 = vsel %vm564_vm2, %v7226_v36, 0.0  ;;  %14458 = vst [vmem:[#allocation62_spill] sm:$0xff] %v13173_v23 }
 0xb2e   :  { %v7108_v3 = vadd.f32 %v7107_v59, %v7106_v44  ;;  %v7228_v59 = vmul.f32 %v13153_v28, %v13153_v28  ;;  %v7310_v48 = vsel %vm564_vm2, %v7227_v47, 0.0 }
 0xb2f   :  { %v13079_v17 = vpop.f32.mrf.mxu3  ;;  %v7303_v20 = vadd.f32 %v7302_v45, %v7301_v43  ;;  %v7113_v45 = vsel %vm564_vm2, %v13144_v5, 0.0 }
 0xb30   :  { %v7110_v24 = vadd.f32 %v7109_v26, %v7108_v3  ;;  %v13182_v26 = vadd.f32 %v12958_v60, %v12794_v25  ;;  %v7312_v3 = vsel %vm564_vm2, %v7228_v59, 0.0  ;;  %v13202_v59 = vadd.f32 %v12958_v60, %v12808_v42 }
 0xb31   :  { %v7305_v53 = vadd.f32 %v7304_v39, %v7303_v20  ;;  %v7229_v39 = vmul.f32 %v13164_v19, %v13164_v19 }
 0xb32   :  { %v7112_v44 = vadd.f32 %v7111_v46, %v7110_v24  ;;  %v13191_v46 = vadd.f32 %v12958_v60, %v12801_v18 }
 0xb33   :  { %v7307_v43 = vadd.f32 %v7306_v11, %v7305_v53  ;;  %v7230_v11 = vmul.f32 %v13173_v23, %v13173_v23  ;;  %v7314_v25 = vsel %vm564_vm2, %v7229_v39, 0.0  ;;  %v13211_v39 = vadd.f32 %v12958_v60, %v12815_v37 }
 0xb34   :  { %v7114_v20 = vadd.f32 %v7113_v45, %v7112_v44  ;;  %v7231_v45 = vmul.f32 %v13182_v26, %v13182_v26  ;;  %v7123_v42 = vsel %vm564_vm2, %v13191_v46, 0.0  ;;  %v7125_v37 = vsel %vm564_vm2, %v13202_v59, 0.0 }
 0xb35   :  { %v7309_v36 = vadd.f32 %v7308_v4, %v7307_v43  ;;  %v7119_v4 = vsel %vm564_vm2, %v13173_v23, 0.0  ;;  %v7316_v18 = vsel %vm564_vm2, %v7230_v11, 0.0  ;;  %14459 = vst [vmem:[#allocation75_spill] sm:$0xff] %v13211_v39 }
 0xb36   :  { %v7116_v53 = vadd.f32 %v7115_v21, %v7114_v20  ;;  %v7232_v21 = vmul.f32 %v13191_v46, %v13191_v46  ;;  %v7318_v23 = vsel %vm564_vm2, %v7231_v45, 0.0 }
 0xb37   :  { %v13117_v16 = vpop.f32.mrf.mxu3  ;;  %v7311_v47 = vadd.f32 %v7310_v48, %v7309_v36  ;;  %v7121_v48 = vsel %vm564_vm2, %v13182_v26, 0.0 }
 0xb38   :  { %v7118_v44 = vadd.f32 %v7117_v35, %v7116_v53  ;;  %v13220_v35 = vadd.f32 %v12958_v60, %v12822_v31  ;;  %v7320_v53 = vsel %vm564_vm2, %v7232_v21, 0.0  ;;  %v13240_v21 = vadd.f32 %v12958_v60, %v12836_v55 }
 0xb39   :  { %v7313_v43 = vadd.f32 %v7312_v3, %v7311_v47  ;;  %v7233_v3 = vmul.f32 %v13202_v59, %v13202_v59 }
 0xb3a   :  { %v7120_v20 = vadd.f32 %v7119_v4, %v7118_v44  ;;  %v13229_v4 = vadd.f32 %v12958_v60, %v12829_v50 }
 0xb3b   :  { %v7315_v36 = vadd.f32 %v7314_v25, %v7313_v43  ;;  %v7234_v25 = vmul.f32 %v13211_v39, %v13211_v39  ;;  %v7322_v31 = vsel %vm564_vm2, %v7233_v3, 0.0  ;;  %v13249_v3 = vadd.f32 %v12958_v60, %v12843_v52 }
 0xb3c   :  { %v7122_v47 = vadd.f32 %v7121_v48, %v7120_v20  ;;  %v7235_v48 = vmul.f32 %v13220_v35, %v13220_v35  ;;  %v7131_v55 = vsel %vm564_vm2, %v13229_v4, 0.0  ;;  %v7133_v52 = vsel %vm564_vm2, %v13240_v21, 0.0 }
 0xb3d   :  { %v7317_v11 = vadd.f32 %v7316_v18, %v7315_v36  ;;  %v7127_v18 = vsel %vm564_vm2, %v13211_v39, 0.0  ;;  %v7324_v50 = vsel %vm564_vm2, %v7234_v25, 0.0  ;;  %14460 = vst [vmem:[#allocation50_spill] sm:$0xff] %v13249_v3 }
 0xb3e   :  { %v7124_v43 = vadd.f32 %v7123_v42, %v7122_v47  ;;  %v7236_v42 = vmul.f32 %v13229_v4, %v13229_v4  ;;  %v7326_v39 = vsel %vm564_vm2, %v7235_v48, 0.0 }
 0xb3f   :  { %v13155_v61 = vpop.f32.mrf.mxu3  ;;  %v7319_v45 = vadd.f32 %v7318_v23, %v7317_v11  ;;  %v7129_v23 = vsel %vm564_vm2, %v13220_v35, 0.0 }
 0xb40   :  { %v7126_v20 = vadd.f32 %v7125_v37, %v7124_v43  ;;  %v13258_v37 = vadd.f32 %v12958_v60, %v12850_v10  ;;  %v7328_v43 = vsel %vm564_vm2, %v7236_v42, 0.0  ;;  %v13278_v42 = vadd.f32 %v12958_v60, %v12864_v2 }
 0xb41   :  { %v7321_v36 = vadd.f32 %v7320_v53, %v7319_v45  ;;  %v7237_v53 = vmul.f32 %v13240_v21, %v13240_v21 }
 0xb42   :  { %v7128_v47 = vadd.f32 %v7127_v18, %v7126_v20  ;;  %v13267_v18 = vadd.f32 %v12958_v60, %v12857_v9 }
 0xb43   :  { %v7323_v11 = vadd.f32 %v7322_v31, %v7321_v36  ;;  %v7238_v31 = vmul.f32 %v13249_v3, %v13249_v3  ;;  %v7330_v10 = vsel %vm564_vm2, %v7237_v53, 0.0  ;;  %v13287_v53 = vadd.f32 %v12958_v60, %v12871_v40 }
 0xb44   :  { %v7130_v45 = vadd.f32 %v7129_v23, %v7128_v47  ;;  %v7239_v23 = vmul.f32 %v13258_v37, %v13258_v37  ;;  %v7139_v2 = vsel %vm564_vm2, %v13267_v18, 0.0  ;;  %v7141_v40 = vsel %vm564_vm2, %v13278_v42, 0.0 }
 0xb45   :  { %v7325_v25 = vadd.f32 %v7324_v50, %v7323_v11  ;;  %v7135_v50 = vsel %vm564_vm2, %v13249_v3, 0.0  ;;  %v7332_v9 = vsel %vm564_vm2, %v7238_v31, 0.0  ;;  %14461 = vst [vmem:[#allocation56_spill] sm:$0xff] %v13287_v53 }
 0xb46   :  { %v7132_v36 = vadd.f32 %v7131_v55, %v7130_v45  ;;  %v7240_v55 = vmul.f32 %v13267_v18, %v13267_v18  ;;  %v7334_v3 = vsel %vm564_vm2, %v7239_v23, 0.0 }
 0xb47   :  { %v13193_v24 = vpop.f32.mrf.mxu3  ;;  %v7327_v48 = vadd.f32 %v7326_v39, %v7325_v25  ;;  %v7137_v39 = vsel %vm564_vm2, %v13258_v37, 0.0 }
 0xb48   :  { %v7134_v47 = vadd.f32 %v7133_v52, %v7132_v36  ;;  %v13296_v52 = vadd.f32 %v12958_v60, %v12878_v22  ;;  %v7336_v36 = vsel %vm564_vm2, %v7240_v55, 0.0  ;;  %v13316_v55 = vadd.f32 %v12958_v60, %v12892_v33 }
 0xb49   :  { %v7329_v11 = vadd.f32 %v7328_v43, %v7327_v48  ;;  %v7241_v43 = vmul.f32 %v13278_v42, %v13278_v42 }
 0xb4a   :  { %v7136_v45 = vadd.f32 %v7135_v50, %v7134_v47  ;;  %v13305_v50 = vadd.f32 %v12958_v60, %v12885_v14  ;;  %14463 = vst [vmem:[#allocation63_spill] sm:$0xff] %v13316_v55 }
 0xb4b   :  { %v7331_v25 = vadd.f32 %v7330_v10, %v7329_v11  ;;  %v7242_v10 = vmul.f32 %v13287_v53, %v13287_v53  ;;  %v7338_v22 = vsel %vm564_vm2, %v7241_v43, 0.0  ;;  %v13325_v43 = vadd.f32 %v12958_v60, %v12899_v30 }
 0xb4c   :  { %v7138_v48 = vadd.f32 %v7137_v39, %v7136_v45  ;;  %14462 = vst [vmem:[#allocation58_spill] sm:$0xff] %v13305_v50  ;;  %v7243_v39 = vmul.f32 %v13296_v52, %v13296_v52  ;;  %v7147_v33 = vsel %vm564_vm2, %v13305_v50, 0.0  ;;  %v7149_v30 = vsel %vm564_vm2, %v13316_v55, 0.0 }
 0xb4d   :  { %v7333_v31 = vadd.f32 %v7332_v9, %v7331_v25  ;;  %v7143_v9 = vsel %vm564_vm2, %v13287_v53, 0.0  ;;  %v7340_v14 = vsel %vm564_vm2, %v7242_v10, 0.0  ;;  %14464 = vst [vmem:[#allocation76_spill] sm:$0xff] %v13325_v43 }
 0xb4e   :  { %v7140_v11 = vadd.f32 %v7139_v2, %v7138_v48  ;;  %v7244_v2 = vmul.f32 %v13305_v50, %v13305_v50  ;;  %v7342_v53 = vsel %vm564_vm2, %v7243_v39, 0.0 }
 0xb4f   :  { %v13231_v44 = vpop.f32.mrf.mxu3  ;;  %v7335_v23 = vadd.f32 %v7334_v3, %v7333_v31  ;;  %v7145_v3 = vsel %vm564_vm2, %v13296_v52, 0.0 }
 0xb50   :  { %v7142_v45 = vadd.f32 %v7141_v40, %v7140_v11  ;;  %v13334_v40 = vadd.f32 %v12958_v60, %v12906_v54  ;;  %v7344_v11 = vsel %vm564_vm2, %v7244_v2, 0.0  ;;  %v13354_v2 = vadd.f32 %v12958_v60, %v12920_v6 }
 0xb51   :  { %v7337_v25 = vadd.f32 %v7336_v36, %v7335_v23  ;;  %v7245_v36 = vmul.f32 %v13316_v55, %v13316_v55 }
 0xb52   :  { %v7144_v48 = vadd.f32 %v7143_v9, %v7142_v45  ;;  %14465 = vst [vmem:[#allocation64_spill] sm:$0xff] %v13334_v40  ;;  %v13343_v9 = vadd.f32 %v12958_v60, %v12913_v63 }
 0xb53   :  { %v7339_v31 = vadd.f32 %v7338_v22, %v7337_v25  ;;  %v7246_v22 = vmul.f32 %v13325_v43, %v13325_v43  ;;  %v7346_v54 = vsel %vm564_vm2, %v7245_v36, 0.0  ;;  %14467 = vst [vmem:[#allocation65_spill] sm:$0xff] %v13354_v2  ;;  %v13363_v36 = vadd.f32 %v12958_v60, %v12928_v49 }
 0xb54   :  { %v7146_v23 = vadd.f32 %v7145_v3, %v7144_v48  ;;  %14466 = vst [vmem:[#allocation59_spill] sm:$0xff] %v13343_v9  ;;  %v7247_v3 = vmul.f32 %v13334_v40, %v13334_v40  ;;  %v7155_v6 = vsel %vm564_vm2, %v13343_v9, 0.0  ;;  %v7157_v49 = vsel %vm564_vm2, %v13354_v2, 0.0 }
 0xb55   :  { %v7341_v10 = vadd.f32 %v7340_v14, %v7339_v31  ;;  %v7151_v14 = vsel %vm564_vm2, %v13325_v43, 0.0  ;;  %v7348_v63 = vsel %vm564_vm2, %v7246_v22, 0.0  ;;  %14468 = vst [vmem:[#allocation61_spill] sm:$0xff] %v13363_v36 }
 0xb56   :  { %v7148_v25 = vadd.f32 %v7147_v33, %v7146_v23  ;;  %v7248_v33 = vmul.f32 %v13343_v9, %v13343_v9  ;;  %v7350_v43 = vsel %vm564_vm2, %v7247_v3, 0.0 }
 0xb57   :  { %v13269_v20 = vpop.f32.mrf.mxu3  ;;  %v7343_v39 = vadd.f32 %v7342_v53, %v7341_v10  ;;  %v7153_v53 = vsel %vm564_vm2, %v13334_v40, 0.0 }
 0xb58   :  { %v7150_v48 = vadd.f32 %v7149_v30, %v7148_v25  ;;  %v13372_v30 = vadd.f32 %v12958_v60, %v12936_v13  ;;  %v7352_v25 = vsel %vm564_vm2, %v7248_v33, 0.0  ;;  %v13392_v33 = vadd.f32 %v12958_v60, %v12952_v51 }
 0xb59   :  { %v7345_v31 = vadd.f32 %v7344_v11, %v7343_v39  ;;  %v7249_v11 = vmul.f32 %v13354_v2, %v13354_v2 }
 0xb5a   :  { %v7152_v23 = vadd.f32 %v7151_v14, %v7150_v48  ;;  %14469 = vst [vmem:[#allocation16_spill] sm:$0xff] %v13372_v30  ;;  %v13381_v14 = vadd.f32 %v12958_v60, %v12944_v0 }
 0xb5b   :  { %v7347_v10 = vadd.f32 %v7346_v54, %v7345_v31  ;;  %v7250_v54 = vmul.f32 %v13363_v36, %v13363_v36  ;;  %v7354_v13 = vsel %vm564_vm2, %v7249_v11, 0.0  ;;  %14471 = vst [vmem:[#allocation38_spill] sm:$0xff] %v13392_v33  ;;  %v13401_v11 = vadd.f32 %v12958_v60, %v12969_v38 }
 0xb5c   :  { %v7154_v39 = vadd.f32 %v7153_v53, %v7152_v23  ;;  %14470 = vst [vmem:[#allocation18_spill] sm:$0xff] %v13381_v14  ;;  %v7251_v53 = vmul.f32 %v13372_v30, %v13372_v30  ;;  %v7163_v51 = vsel %vm564_vm2, %v13381_v14, 0.0  ;;  %v7165_v38 = vsel %vm564_vm2, %v13392_v33, 0.0 }
 0xb5d   :  { %v7349_v22 = vadd.f32 %v7348_v63, %v7347_v10  ;;  %v7159_v63 = vsel %vm564_vm2, %v13363_v36, 0.0  ;;  %v7356_v0 = vsel %vm564_vm2, %v7250_v54, 0.0  ;;  %14472 = vst [vmem:[#allocation20_spill] sm:$0xff] %v13401_v11 }
 0xb5e   :  { %v7156_v31 = vadd.f32 %v7155_v6, %v7154_v39  ;;  %v7252_v6 = vmul.f32 %v13381_v14, %v13381_v14  ;;  %v7358_v36 = vsel %vm564_vm2, %v7251_v53, 0.0 }
 0xb5f   :  { %v13307_v47 = vpop.f32.mrf.mxu3  ;;  %v7351_v3 = vadd.f32 %v7350_v43, %v7349_v22  ;;  %v7161_v43 = vsel %vm564_vm2, %v13372_v30, 0.0 }
 0xb60   :  { %v7158_v23 = vadd.f32 %v7157_v49, %v7156_v31  ;;  %v13410_v49 = vadd.f32 %v12958_v60, %v13003_v15  ;;  %v7360_v31 = vsel %vm564_vm2, %v7252_v6, 0.0  ;;  %v13428_v6 = vadd.f32 %v12958_v60, %v13079_v17 }
 0xb61   :  { %v7353_v10 = vadd.f32 %v7352_v25, %v7351_v3  ;;  %v7253_v25 = vmul.f32 %v13392_v33, %v13392_v33 }
 0xb62   :  { %v7160_v39 = vadd.f32 %v7159_v63, %v7158_v23  ;;  %14473 = vst [vmem:[#allocation40_spill] sm:$0xff] %v13410_v49  ;;  %v13419_v63 = vadd.f32 %v12958_v60, %v13041_v32 }
 0xb63   :  { %v7355_v22 = vadd.f32 %v7354_v13, %v7353_v10  ;;  %v7254_v13 = vmul.f32 %v13401_v11, %v13401_v11  ;;  %v7362_v15 = vsel %vm564_vm2, %v7253_v25, 0.0  ;;  %v13437_v25 = vadd.f32 %v12958_v60, %v13117_v16 }
 0xb64   :  { %v7162_v3 = vadd.f32 %v7161_v43, %v7160_v39  ;;  %v7255_v43 = vmul.f32 %v13410_v49, %v13410_v49  ;;  %v7171_v17 = vsel %vm564_vm2, %v13419_v63, 0.0  ;;  %v7173_v16 = vsel %vm564_vm2, %v13428_v6, 0.0 }
 0xb65   :  { %v7357_v54 = vadd.f32 %v7356_v0, %v7355_v22  ;;  %v7167_v0 = vsel %vm564_vm2, %v13401_v11, 0.0  ;;  %v7364_v32 = vsel %vm564_vm2, %v7254_v13, 0.0 }
 0xb66   :  { %v7164_v10 = vadd.f32 %v7163_v51, %v7162_v3  ;;  %v7256_v51 = vmul.f32 %v13419_v63, %v13419_v63  ;;  %v7366_v11 = vsel %vm564_vm2, %v7255_v43, 0.0 }
 0xb67   :  { %v13345_v45 = vpop.f32.mrf.mxu3  ;;  %v7359_v53 = vadd.f32 %v7358_v36, %v7357_v54  ;;  %v7169_v36 = vsel %vm564_vm2, %v13410_v49, 0.0 }
 0xb68   :  { %v7166_v39 = vadd.f32 %v7165_v38, %v7164_v10  ;;  %v13446_v38 = vadd.f32 %v12958_v60, %v13155_v61  ;;  %v7368_v10 = vsel %vm564_vm2, %v7256_v51, 0.0  ;;  %v13464_v51 = vadd.f32 %v12958_v60, %v13231_v44 }
 0xb69   :  { %v7361_v22 = vadd.f32 %v7360_v31, %v7359_v53  ;;  %v7257_v31 = vmul.f32 %v13428_v6, %v13428_v6 }
 0xb6a   :  { %v7168_v3 = vadd.f32 %v7167_v0, %v7166_v39  ;;  %v13455_v0 = vadd.f32 %v12958_v60, %v13193_v24 }
 0xb6b   :  { %v7363_v54 = vadd.f32 %v7362_v15, %v7361_v22  ;;  %v7258_v15 = vmul.f32 %v13437_v25, %v13437_v25  ;;  %v7370_v61 = vsel %vm564_vm2, %v7257_v31, 0.0  ;;  %v13473_v31 = vadd.f32 %v12958_v60, %v13269_v20 }
 0xb6c   :  { %v7170_v53 = vadd.f32 %v7169_v36, %v7168_v3  ;;  %v7259_v36 = vmul.f32 %v13446_v38, %v13446_v38  ;;  %v7179_v44 = vsel %vm564_vm2, %v13455_v0, 0.0  ;;  %v7181_v20 = vsel %vm564_vm2, %v13464_v51, 0.0 }
 0xb6d   :  { %v7365_v13 = vadd.f32 %v7364_v32, %v7363_v54  ;;  %v7175_v32 = vsel %vm564_vm2, %v13437_v25, 0.0  ;;  %v7372_v24 = vsel %vm564_vm2, %v7258_v15, 0.0 }
 0xb6e   :  { %v7172_v22 = vadd.f32 %v7171_v17, %v7170_v53  ;;  %v7260_v17 = vmul.f32 %v13455_v0, %v13455_v0  ;;  %v7374_v49 = vsel %vm564_vm2, %v7259_v36, 0.0 }
 0xb6f   :  { %v13383_v48 = vpop.f32.mrf.mxu3  ;;  %v7367_v43 = vadd.f32 %v7366_v11, %v7365_v13  ;;  %v7177_v11 = vsel %vm564_vm2, %v13446_v38, 0.0 }
 0xb70   :  { %v7174_v3 = vadd.f32 %v7173_v16, %v7172_v22  ;;  %v13482_v16 = vadd.f32 %v12958_v60, %v13307_v47  ;;  %v7376_v22 = vsel %vm564_vm2, %v7260_v17, 0.0  ;;  %v13500_v17 = vadd.f32 %v12958_v60, %v13383_v48 }
 0xb71   :  { %v7369_v54 = vadd.f32 %v7368_v10, %v7367_v43  ;;  %v7261_v10 = vmul.f32 %v13464_v51, %v13464_v51 }
 0xb72   :  { %v7176_v53 = vadd.f32 %v7175_v32, %v7174_v3  ;;  %v13491_v32 = vadd.f32 %v12958_v60, %v13345_v45 }
 0xb73   :  { %v7371_v13 = vadd.f32 %v7370_v61, %v7369_v54  ;;  %v7262_v61 = vmul.f32 %v13473_v31, %v13473_v31  ;;  %v7378_v47 = vsel %vm564_vm2, %v7261_v10, 0.0 }
 0xb74   :  { %v7178_v43 = vadd.f32 %v7177_v11, %v7176_v53  ;;  %v7263_v11 = vmul.f32 %v13482_v16, %v13482_v16  ;;  %v7187_v48 = vsel %vm564_vm2, %v13491_v32, 0.0 }
 0xb75   :  { %v7373_v15 = vadd.f32 %v7372_v24, %v7371_v13  ;;  %v7183_v24 = vsel %vm564_vm2, %v13473_v31, 0.0  ;;  %v7380_v45 = vsel %vm564_vm2, %v7262_v61, 0.0 }
 0xb76   :  { %v7180_v54 = vadd.f32 %v7179_v44, %v7178_v43  ;;  %v7264_v44 = vmul.f32 %v13491_v32, %v13491_v32  ;;  %v7382_v33 = vsel %vm564_vm2, %v7263_v11, 0.0 }
 0xb77   :  { %v7059_v23 = vpop.f32.mrf.mxu3  ;;  %v7375_v36 = vadd.f32 %v7374_v49, %v7373_v15  ;;  %v7185_v49 = vsel %vm564_vm2, %v13482_v16, 0.0 }
 0xb78   :  { %v7182_v53 = vadd.f32 %v7181_v20, %v7180_v54  ;;  %v13508_v10 = vadd.f32 %v12958_v60, %v7059_v23  ;;  %v7384_v54 = vsel %vm564_vm2, %v7264_v44, 0.0  ;;  %v7189_v23 = vsel %vm564_vm2, %v13500_v17, 0.0 }
 0xb79   :  { %v7377_v13 = vadd.f32 %v7376_v22, %v7375_v36  ;;  %v7265_v22 = vmul.f32 %v13500_v17, %v13500_v17 }
 0xb7a   :  { %v7184_v43 = vadd.f32 %v7183_v24, %v7182_v53 }
 0xb7b   :  { %v7379_v15 = vadd.f32 %v7378_v47, %v7377_v13  ;;  %v7266_v47 = vmul.f32 %v13508_v10, %v13508_v10  ;;  %v7386_v14 = vsel %vm564_vm2, %v7265_v22, 0.0 }
 0xb7c   :  { %v7186_v36 = vadd.f32 %v7185_v49, %v7184_v43 }
 0xb7d   :  { %v7381_v61 = vadd.f32 %v7380_v45, %v7379_v15  ;;  %v7388_v43 = vsel %vm564_vm2, %v7266_v47, 0.0 }
 0xb7e   :  { %v7188_v13 = vadd.f32 %v7187_v48, %v7186_v36 }
 0xb7f   :  { %v7062_v39 = vpop.f32.mrf.mxu3  ;;  %v7383_v11 = vadd.f32 %v7382_v33, %v7381_v61 }
 0xb80   :  { %v13516_v20 = vadd.f32 %v12958_v60, %v7062_v39  ;;  %v7191_v39 = vsel %vm564_vm2, %v13508_v10, 0.0  ;;  %v7190_v15 = vadd.f32 %v7189_v23, %v7188_v13 }
 0xb81   :  { %v7385_v44 = vadd.f32 %v7384_v54, %v7383_v11 }
 0xb82   :  { %v7267_v45 = vmul.f32 %v13516_v20, %v13516_v20  ;;  %v7193_v33 = vsel %vm564_vm2, %v13516_v20, 0.0  ;;  %v7192_v22 = vadd.f32 %v7191_v39, %v7190_v15 }
 0xb83   :  { %v7387_v48 = vadd.f32 %v7386_v14, %v7385_v44 }
 0xb84   :  { %v7390_v61 = vsel %vm564_vm2, %v7267_v45, 0.0  ;;  %v7194_v23 = vadd.f32 %v7193_v33, %v7192_v22 }
 0xb85   :  { %v7389_v54 = vadd.f32 %v7388_v43, %v7387_v48 }
 0xb87   :  { %v7065_v3 = vpop.f32.mrf.mxu3  ;;  %v7391_v13 = vadd.f32 %v7390_v61, %v7389_v54 }
 0xb88   :  { %v13524_v24 = vadd.f32 %v12958_v60, %v7065_v3 }
 0xb8a   :  { %v7268_v3 = vmul.f32 %v13524_v24, %v13524_v24  ;;  %v7195_v36 = vsel %vm564_vm2, %v13524_v24, 0.0 }
 0xb8b   :  { %v7196_v30 = vadd.f32 %v7195_v36, %v7194_v23 }
 0xb8c   :  { %v7392_v47 = vsel %vm564_vm2, %v7268_v3, 0.0 }
 0xb8d   :  { %v7393_v45 = vadd.f32 %v7392_v47, %v7391_v13 }
 0xb8f   :  { %v7068_v53 = vpop.f32.mrf.mxu3 }
 0xb90   :  { %v13532_v49 = vadd.f32 %v12958_v60, %v7068_v53 }
 0xb92   :  { %v7269_v53 = vmul.f32 %v13532_v49, %v13532_v49  ;;  %v7197_v11 = vsel %vm564_vm2, %v13532_v49, 0.0 }
 0xb93   :  { %v7198_v44 = vadd.f32 %v7197_v11, %v7196_v30 }
 0xb94   :  { %v7394_v14 = vsel %vm564_vm2, %v7269_v53, 0.0 }
 0xb95   :  { %v7395_v40 = vadd.f32 %v7394_v14, %v7393_v45 }
 0xb97   :  { %v7071_v2 = vpop.f32.mrf.mxu3 }
 0xb98   :  { %v7072_v39 = vadd.f32 %v12958_v60, %v7071_v2 }
 0xb9a   :  { %v7199_v15 = vsel %vm564_vm2, %v7072_v39, 0.0  ;;  %v7270_v9 = vmul.f32 %v7072_v39, %v7072_v39 }
 0xb9b   :  { %v7200_v43 = vadd.f32 %v7199_v15, %v7198_v44 }
 0xb9c   :  { %v7396_v33 = vsel %vm564_vm2, %v7270_v9, 0.0 }
 0xb9d   :  { %v7201_v3 = vrot.slane %v7200_v43, 4  ;;  %v7397_v48 = vadd.f32 %v7396_v33, %v7395_v40 }
 0xb9f   :  { %v7202_v22 = vadd.f32 %v7201_v3, %v7200_v43  ;;  %v7398_v55 = vrot.slane %v7397_v48, 4  ;;  %v6670_v3 = vld [vmem:[%s13975_s4 + $0x7] sm:$0x1] }
 0xba1   :  { %v7203_v61 = vrot.slane %v7202_v22, 2  ;;  %v7399_v36 = vadd.f32 %v7398_v55, %v7397_v48 }
 0xba3   :  { %v7204_v54 = vadd.f32 %v7203_v61, %v7202_v22  ;;  %v7400_v23 = vrot.slane %v7399_v36, 2 }
 0xba5   :  { %v7205_v53 = vrot.slane %v7204_v54, 1  ;;  %v7401_v50 = vadd.f32 %v7400_v23, %v7399_v36  ;;  %v14474_v23 = vld [vmem:[#allocation45_spill] sm:$0xff] }
 0xba7   :  { %v7206_v60 = vadd.f32 %v7205_v53, %v7204_v54  ;;  %v7402_v2 = vrot.slane %v7401_v50, 1 }
 0xba9   :  { %v7403_v30 = vadd.f32 %v7402_v2, %v7401_v50  ;;  %v13551_v47 = vmul.f32 0.001953125, %v7206_v60  ;;  %v14475_v60 = vld [vmem:[#allocation68_spill] sm:$0xff] }
 0xbab   :  { %v7405_v11 = vmul.f32 0.001953125, %v7403_v30  ;;  %v7406_v13 = vmul.f32 %v13551_v47, %v13551_v47  ;;  %v7468_v15 = vsub.f32 %v13516_v20, %v13551_v47  ;;  %v7469_v43 = vsub.f32 %v13524_v24, %v13551_v47  ;;  %v13567_v20 = vld [vmem:[%s13975_s4 + $0x8] ss:$0 sm:$0xff]  ;;  %v14476_v30 = vld [vmem:[#allocation69_spill] sm:$0xff]  ;;  %s8489_s4 = smov [#allocation3]  }
 0xbac   :  { %v7470_v50 = vsub.f32 %v13532_v49, %v13551_v47  ;;  %v7471_v24 = vsub.f32 %v7072_v39, %v13551_v47  ;;  %v7408_v53 = vsub.f32 %v14474_v23, %v13551_v47  ;;  %v7409_v2 = vsub.f32 %v14475_v60, %v13551_v47  ;;  %s7682_s16 = sshll.u32 %s8489_s4, 4  ;;  %s7683_s16 = int_to_ptr.vmem [resolvable:$true] %s7682_s16 }
 0xbad   :  { %v7407_v9 = vsub.f32 %v7405_v11, %v7406_v13  ;;  %v7410_v11 = vsub.f32 %v14476_v30, %v13551_v47  ;;  %v14477_v13 = vld [vmem:[#allocation70_spill] sm:$0xff] }
 0xbae   :  { %v7411_v39 = vsub.f32 %v14477_v13, %v13551_v47 }
 0xbaf   :  { %v7472_v14 = vadd.f32 1e-05, %v7407_v9  ;;  %v7412_v9 = vsub.f32 %v12989_v7, %v13551_v47  ;;  %v7459_v7 = vsub.f32 %v13437_v25, %v13551_v47  ;;  %v7466_v25 = vsub.f32 %v13500_v17, %v13551_v47 }
 0xbb1   :  { %8459 = vrsqrt.f32 %v7472_v14  ;;  %vm7479_vm11 = vweird.f32 %v7472_v14 }
 0xbb7   :  { %v8460_v40 = vpop.eup %8459 }
 0xbb8   :  { %v7474_v45 = vmul.f32 %v8460_v40, %v7472_v14  ;;  %vm7480_vm10 = vweird.f32 %v8460_v40  ;;  %v7413_v14 = vsub.f32 %v13000_v29, %v13551_v47  ;;  %v7460_v29 = vsub.f32 %v13446_v38, %v13551_v47 }
 0xbb9   :  { %vm7481_vm12 = vmor %vm7479_vm11, %vm7480_vm10  ;;  %v7467_v38 = vsub.f32 %v13508_v10, %v13551_v47 }
 0xbba   :  { %v7475_v44 = vmul.f32 %v8460_v40, %v7474_v45  ;;  %v14478_v45 = vld [vmem:[#allocation47_spill] sm:$0xff] }
 0xbbc   :  { %v7476_v55 = vmul.f32 0.5, %v7475_v44  ;;  %v7415_v44 = vsub.f32 %v14478_v45, %v13551_v47 }
 0xbbe   :  { %v7477_v33 = vsub.f32 1.5, %v7476_v55  ;;  %v7416_v55 = vsub.f32 %v13030_v1, %v13551_v47  ;;  %v7463_v1 = vsub.f32 %v13473_v31, %v13551_v47 }
 0xbc0   :  { %v7478_v48 = vmul.f32 %v8460_v40, %v7477_v33  ;;  %v7457_v33 = vsub.f32 %v13419_v63, %v13551_v47  ;;  %v7464_v63 = vsub.f32 %v13482_v16, %v13551_v47 }
 0xbc2   :  { %v7482_v22 = vsel %vm7481_vm12, %v8460_v40, %v7478_v48  ;;  %v7414_v40 = vsub.f32 %v13012_v27, %v13551_v47  ;;  %v7461_v27 = vsub.f32 %v13455_v0, %v13551_v47  ;;  %v7462_v48 = vsub.f32 %v13464_v51, %v13551_v47 }
 0xbc3   :  { %v7483_v61 = vmul.f32 %v7482_v22, %v6670_v3  ;;  %v7458_v3 = vsub.f32 %v13428_v6, %v13551_v47  ;;  %v7465_v6 = vsub.f32 %v13491_v32, %v13551_v47 }
 0xbc5   :  { %v13570_v36 = vperm.slane %v7483_v61, 0 }
 0xbc7   :  { %v7548_v49 = vmul.f32 %v13570_v36, %v7471_v24  ;;  %v7485_v0 = vmul.f32 %v13570_v36, %v7408_v53  ;;  %v7486_v22 = vmul.f32 %v13570_v36, %v7409_v2  ;;  %v7487_v51 = vmul.f32 %v13570_v36, %v7410_v11 }
 0xbc8   :  { %v7488_v31 = vmul.f32 %v13570_v36, %v7411_v39  ;;  %v7489_v61 = vmul.f32 %v13570_v36, %v7412_v9  ;;  %v7490_v16 = vmul.f32 %v13570_v36, %v7413_v14  ;;  %v7491_v32 = vmul.f32 %v13570_v36, %v7414_v40 }
 0xbc9   :  { %v7613_v54 = vadd.f32 %v13567_v20, %v7548_v49  ;;  %v13623_v24 = vmul.f32 %v13570_v36, %v7457_v33  ;;  %v13626_v17 = vmul.f32 %v13570_v36, %v7458_v3  ;;  %v13629_v10 = vmul.f32 %v13570_v36, %v7459_v7  ;;  %v14479_v7 = vld [vmem:[#allocation72_spill] sm:$0xff] }
 0xbca   :  { %v13632_v49 = vmul.f32 %v13570_v36, %v7460_v29  ;;  %v13638_v23 = vmul.f32 %v13570_v36, %v7462_v48  ;;  %v13641_v53 = vmul.f32 %v13570_v36, %v7463_v1  ;;  %v13644_v60 = vmul.f32 %v13570_v36, %v7464_v63 }
 0xbcb   :  { %7677 = vst.msk [vmem:[#allocation3 + $0x1f8] sm:$0xff] %vm564_vm2, %v7613_v54  ;;  %v13635_v54 = vmul.f32 %v13570_v36, %v7461_v27  ;;  %v13647_v2 = vmul.f32 %v13570_v36, %v7465_v6  ;;  %v13650_v30 = vmul.f32 %v13570_v36, %v7466_v25  ;;  %v13653_v11 = vmul.f32 %v13570_v36, %v7467_v38 }
 0xbcc   :  { %v13656_v13 = vmul.f32 %v13570_v36, %v7468_v15  ;;  %v13659_v39 = vmul.f32 %v13570_v36, %v7469_v43  ;;  %v13662_v9 = vmul.f32 %v13570_v36, %v7470_v50  ;;  %v7550_v14 = vadd.f32 %v13567_v20, %v7485_v0 }
 0xbcd   :  { %v7551_v40 = vadd.f32 %v13567_v20, %v7486_v22  ;;  %v7552_v45 = vadd.f32 %v13567_v20, %v7487_v51  ;;  %v7417_v33 = vsub.f32 %v13039_v8, %v13551_v47  ;;  %v7492_v3 = vmul.f32 %v13570_v36, %v7415_v44  ;;  %v14481_v22 = vld [vmem:[#allocation49_spill] sm:$0xff] }
 0xbce   :  { %v7553_v15 = vadd.f32 %v13567_v20, %v7488_v31  ;;  %v7418_v43 = vsub.f32 %v13050_v41, %v13551_v47  ;;  %v7419_v50 = vsub.f32 %v14479_v7, %v13551_v47  ;;  %v7493_v29 = vmul.f32 %v13570_v36, %v7416_v55  ;;  %7614 = vst.msk [vmem:[#allocation3] sm:$0xff] %vm564_vm2, %v7550_v14  ;;  %v14480_v55 = vld [vmem:[#allocation73_spill] sm:$0xff] }
 0xbcf   :  { %v7554_v27 = vadd.f32 %v13567_v20, %v7489_v61  ;;  %v7420_v48 = vsub.f32 %v13068_v34, %v13551_v47  ;;  %v7421_v8 = vsub.f32 %v13077_v62, %v13551_v47  ;;  %v7494_v44 = vmul.f32 %v13570_v36, %v7417_v33  ;;  %7615 = vst.msk [vmem:[#allocation3 + $0x8] sm:$0xff] %vm564_vm2, %v7551_v40 }
 0xbd0   :  { %v7555_v1 = vadd.f32 %v13567_v20, %v7490_v16  ;;  %v7422_v41 = vsub.f32 %v13088_v12, %v13551_v47  ;;  %v7423_v63 = vsub.f32 %v14480_v55, %v13551_v47  ;;  %v7495_v6 = vmul.f32 %v13570_v36, %v7418_v43  ;;  %7616 = vst.msk [vmem:[#allocation3 + $0x10] sm:$0xff] %vm564_vm2, %v7552_v45 }
 0xbd1   :  { %v7556_v25 = vadd.f32 %v13567_v20, %v7491_v32  ;;  %v7424_v34 = vsub.f32 %v13106_v56, %v13551_v47  ;;  %v7425_v62 = vsub.f32 %v13115_v57, %v13551_v47  ;;  %v7496_v38 = vmul.f32 %v13570_v36, %v7419_v50  ;;  %7617 = vst.msk [vmem:[#allocation3 + $0x18] sm:$0xff] %vm564_vm2, %v7553_v15  ;;  %v14482_v15 = vld [vmem:[#allocation62_spill] sm:$0xff] }
 0xbd2   :  { %v7557_v0 = vadd.f32 %v13567_v20, %v7492_v3  ;;  %v7426_v12 = vsub.f32 %v13126_v58, %v13551_v47  ;;  %v7427_v51 = vsub.f32 %v14481_v22, %v13551_v47  ;;  %v7497_v31 = vmul.f32 %v13570_v36, %v7420_v48  ;;  %7618 = vst.msk [vmem:[#allocation3 + $0x20] sm:$0xff] %vm564_vm2, %v7554_v27 }
 0xbd3   :  { %v7558_v61 = vadd.f32 %v13567_v20, %v7493_v29  ;;  %v7498_v56 = vmul.f32 %v13570_v36, %v7421_v8  ;;  %v7499_v57 = vmul.f32 %v13570_v36, %v7422_v41  ;;  %v7500_v16 = vmul.f32 %v13570_v36, %v7423_v63  ;;  %7619 = vst.msk [vmem:[#allocation3 + $0x28] sm:$0xff] %vm564_vm2, %v7555_v1 }
 0xbd4   :  { %v7559_v32 = vadd.f32 %v13567_v20, %v7494_v44  ;;  %v7428_v58 = vsub.f32 %v13144_v5, %v13551_v47  ;;  %v7501_v14 = vmul.f32 %v13570_v36, %v7424_v34  ;;  %v7502_v40 = vmul.f32 %v13570_v36, %v7425_v62  ;;  %7620 = vst.msk [vmem:[#allocation3 + $0x30] sm:$0xff] %vm564_vm2, %v7556_v25 }
 0xbd5   :  { %v7560_v45 = vadd.f32 %v13567_v20, %v7495_v6  ;;  %v7429_v33 = vsub.f32 %v13153_v28, %v13551_v47  ;;  %v7430_v3 = vsub.f32 %v13164_v19, %v13551_v47  ;;  %v7431_v43 = vsub.f32 %v14482_v15, %v13551_v47  ;;  %7621 = vst.msk [vmem:[#allocation3 + $0x38] sm:$0xff] %vm564_vm2, %v7557_v0  ;;  %v14483_v0 = vld [vmem:[#allocation75_spill] sm:$0xff] }
 0xbd6   :  { %v7561_v7 = vadd.f32 %v13567_v20, %v7496_v38  ;;  %v7503_v5 = vmul.f32 %v13570_v36, %v7426_v12  ;;  %v7504_v50 = vmul.f32 %v13570_v36, %v7427_v51  ;;  %v7505_v29 = vmul.f32 %v13570_v36, %v7428_v58  ;;  %7622 = vst.msk [vmem:[#allocation3 + $0x40] sm:$0xff] %vm564_vm2, %v7558_v61  ;;  %v14484_v58 = vld [vmem:[#allocation50_spill] sm:$0xff] }
 0xbd7   :  { %v7562_v27 = vadd.f32 %v13567_v20, %v7497_v31  ;;  %v7506_v28 = vmul.f32 %v13570_v36, %v7429_v33  ;;  %v7563_v19 = vadd.f32 %v13567_v20, %v7498_v56  ;;  %v7564_v48 = vadd.f32 %v13567_v20, %v7499_v57  ;;  %7623 = vst.msk [vmem:[#allocation3 + $0x48] sm:$0xff] %vm564_vm2, %v7559_v32 }
 0xbd8   :  { %v7565_v8 = vadd.f32 %v13567_v20, %v7500_v16  ;;  %v7566_v44 = vadd.f32 %v13567_v20, %v7501_v14  ;;  %v7567_v1 = vadd.f32 %v13567_v20, %v7502_v40  ;;  %v13739_v41 = vadd.f32 %v13567_v20, %v13623_v24  ;;  %7624 = vst.msk [vmem:[#allocation3 + $0x50] sm:$0xff] %vm564_vm2, %v7560_v45 }
 0xbd9   :  { %v13743_v55 = vadd.f32 %v13567_v20, %v13626_v17  ;;  %v13748_v63 = vadd.f32 %v13567_v20, %v13629_v10  ;;  %v13752_v6 = vadd.f32 %v13567_v20, %v13632_v49  ;;  %v13756_v25 = vadd.f32 %v13567_v20, %v13635_v54  ;;  %7625 = vst.msk [vmem:[#allocation3 + $0x58] sm:$0xff] %vm564_vm2, %v7561_v7 }
 0xbda   :  { %v13760_v24 = vadd.f32 %v13567_v20, %v13638_v23  ;;  %v13765_v17 = vadd.f32 %v13567_v20, %v13641_v53  ;;  %v13769_v10 = vadd.f32 %v13567_v20, %v13644_v60  ;;  %v13773_v49 = vadd.f32 %v13567_v20, %v13647_v2  ;;  %7626 = vst.msk [vmem:[#allocation3 + $0x60] sm:$0xff] %vm564_vm2, %v7562_v27 }
 0xbdb   :  { %v13777_v54 = vadd.f32 %v13567_v20, %v13650_v30  ;;  %v13782_v23 = vadd.f32 %v13567_v20, %v13653_v11  ;;  %v13786_v53 = vadd.f32 %v13567_v20, %v13656_v13  ;;  %v13790_v60 = vadd.f32 %v13567_v20, %v13659_v39  ;;  %7627 = vst.msk [vmem:[#allocation3 + $0x68] sm:$0xff] %vm564_vm2, %v7563_v19 }
 0xbdc   :  { %v13794_v2 = vadd.f32 %v13567_v20, %v13662_v9  ;;  %v7432_v30 = vsub.f32 %v13182_v26, %v13551_v47  ;;  %v7507_v11 = vmul.f32 %v13570_v36, %v7430_v3  ;;  %v7568_v34 = vadd.f32 %v13567_v20, %v7503_v5  ;;  %7628 = vst.msk [vmem:[#allocation3 + $0x70] sm:$0xff] %vm564_vm2, %v7564_v48  ;;  %v14486_v48 = vld [vmem:[#allocation58_spill] sm:$0xff] }
 0xbdd   :  { %v7433_v13 = vsub.f32 %v13191_v46, %v13551_v47  ;;  %v7508_v39 = vmul.f32 %v13570_v36, %v7431_v43  ;;  %v7569_v62 = vadd.f32 %v13567_v20, %v7504_v50  ;;  %7629 = vst.msk [vmem:[#allocation3 + $0x78] sm:$0xff] %vm564_vm2, %v7565_v8  ;;  %v7434_v9 = vsub.f32 %v13202_v59, %v13551_v47  ;;  %v14485_v50 = vld [vmem:[#allocation56_spill] sm:$0xff] }
 0xbde   :  { %v7509_v26 = vmul.f32 %v13570_v36, %v7432_v30  ;;  %v7570_v38 = vadd.f32 %v13567_v20, %v7505_v29  ;;  %7630 = vst.msk [vmem:[#allocation3 + $0x80] sm:$0xff] %vm564_vm2, %v7566_v44  ;;  %v7435_v12 = vsub.f32 %v14483_v0, %v13551_v47  ;;  %v7571_v22 = vadd.f32 %v13567_v20, %v7506_v28  ;;  %v14487_v30 = vld [vmem:[#allocation63_spill] sm:$0xff] }
 0xbdf   :  { %v7510_v46 = vmul.f32 %v13570_v36, %v7433_v13  ;;  %7631 = vst.msk [vmem:[#allocation3 + $0x88] sm:$0xff] %vm564_vm2, %v7567_v1  ;;  %v7436_v51 = vsub.f32 %v13220_v35, %v13551_v47  ;;  %v7511_v59 = vmul.f32 %v13570_v36, %v7434_v9  ;;  %v7572_v31 = vadd.f32 %v13567_v20, %v7507_v11  ;;  %v14488_v13 = vld [vmem:[#allocation76_spill] sm:$0xff] }
 0xbe0   :  { %7632 = vst.msk [vmem:[#allocation3 + $0x90] sm:$0xff] %vm564_vm2, %v7568_v34  ;;  %v7437_v61 = vsub.f32 %v13229_v4, %v13551_v47  ;;  %v7512_v56 = vmul.f32 %v13570_v36, %v7435_v12  ;;  %v7573_v57 = vadd.f32 %v13567_v20, %v7508_v39  ;;  %v7438_v16 = vsub.f32 %v13240_v21, %v13551_v47 }
 0xbe1   :  { %7633 = vst.msk [vmem:[#allocation3 + $0x98] sm:$0xff] %vm564_vm2, %v7569_v62  ;;  %v7513_v35 = vmul.f32 %v13570_v36, %v7436_v51  ;;  %v7574_v32 = vadd.f32 %v13567_v20, %v7509_v26  ;;  %v7439_v14 = vsub.f32 %v14484_v58, %v13551_v47  ;;  %v7575_v40 = vadd.f32 %v13567_v20, %v7510_v46  ;;  %v14489_v26 = vld [vmem:[#allocation64_spill] sm:$0xff]  ;;  %v14490_v46 = vld [vmem:[#allocation59_spill] sm:$0xff] }
 0xbe2   :  { %7634 = vst.msk [vmem:[#allocation3 + $0xa0] sm:$0xff] %vm564_vm2, %v7570_v38  ;;  %v7514_v4 = vmul.f32 %v13570_v36, %v7437_v61  ;;  %v7440_v45 = vsub.f32 %v13258_v37, %v13551_v47  ;;  %v7515_v21 = vmul.f32 %v13570_v36, %v7438_v16  ;;  %v7576_v33 = vadd.f32 %v13567_v20, %v7511_v59  ;;  %v14492_v16 = vld [vmem:[#allocation61_spill] sm:$0xff] }
 0xbe3   :  { %7635 = vst.msk [vmem:[#allocation3 + $0xa8] sm:$0xff] %vm564_vm2, %v7571_v22  ;;  %v7441_v3 = vsub.f32 %v13267_v18, %v13551_v47  ;;  %v7516_v15 = vmul.f32 %v13570_v36, %v7439_v14  ;;  %v7577_v43 = vadd.f32 %v13567_v20, %v7512_v56  ;;  %v7442_v7 = vsub.f32 %v13278_v42, %v13551_v47  ;;  %v14493_v14 = vld [vmem:[#allocation16_spill] sm:$0xff] }
 0xbe4   :  { %7636 = vst.msk [vmem:[#allocation3 + $0xb0] sm:$0xff] %vm564_vm2, %v7572_v31  ;;  %v7517_v37 = vmul.f32 %v13570_v36, %v7440_v45  ;;  %v7578_v5 = vadd.f32 %v13567_v20, %v7513_v35  ;;  %v7443_v29 = vsub.f32 %v14485_v50, %v13551_v47  ;;  %v7579_v27 = vadd.f32 %v13567_v20, %v7514_v4  ;;  %v14491_v31 = vld [vmem:[#allocation65_spill] sm:$0xff]  ;;  %v14496_v50 = vld [vmem:[#allocation20_spill] sm:$0xff] }
 0xbe5   :  { %7637 = vst.msk [vmem:[#allocation3 + $0xb8] sm:$0xff] %vm564_vm2, %v7573_v57  ;;  %v7518_v18 = vmul.f32 %v13570_v36, %v7441_v3  ;;  %v7444_v28 = vsub.f32 %v13296_v52, %v13551_v47  ;;  %v7519_v42 = vmul.f32 %v13570_v36, %v7442_v7  ;;  %v7580_v19 = vadd.f32 %v13567_v20, %v7515_v21  ;;  %v14494_v21 = vld [vmem:[#allocation18_spill] sm:$0xff] }
 0xbe6   :  { %7638 = vst.msk [vmem:[#allocation3 + $0xc0] sm:$0xff] %vm564_vm2, %v7574_v32  ;;  %v7445_v8 = vsub.f32 %v14486_v48, %v13551_v47  ;;  %v7520_v44 = vmul.f32 %v13570_v36, %v7443_v29  ;;  %v7581_v1 = vadd.f32 %v13567_v20, %v7516_v15  ;;  %v7446_v11 = vsub.f32 %v14487_v30, %v13551_v47 }
 0xbe7   :  { %7639 = vst.msk [vmem:[#allocation3 + $0xc8] sm:$0xff] %vm564_vm2, %v7575_v40  ;;  %v7521_v52 = vmul.f32 %v13570_v36, %v7444_v28  ;;  %v7582_v34 = vadd.f32 %v13567_v20, %v7517_v37  ;;  %v7447_v39 = vsub.f32 %v14488_v13, %v13551_v47  ;;  %v7583_v9 = vadd.f32 %v13567_v20, %v7518_v18  ;;  %v14497_v28 = vld [vmem:[#allocation40_spill] sm:$0xff] }
 0xbe8   :  { %7640 = vst.msk [vmem:[#allocation3 + $0xd0] sm:$0xff] %vm564_vm2, %v7576_v33  ;;  %v7522_v62 = vmul.f32 %v13570_v36, %v7445_v8  ;;  %v7448_v38 = vsub.f32 %v14489_v26, %v13551_v47  ;;  %v7523_v0 = vmul.f32 %v13570_v36, %v7446_v11  ;;  %v7584_v12 = vadd.f32 %v13567_v20, %v7519_v42 }
 0xbe9   :  { %7641 = vst.msk [vmem:[#allocation3 + $0xd8] sm:$0xff] %vm564_vm2, %v7577_v43  ;;  %v7449_v22 = vsub.f32 %v14490_v46, %v13551_v47  ;;  %v7524_v51 = vmul.f32 %v13570_v36, %v7447_v39  ;;  %v7585_v59 = vadd.f32 %v13567_v20, %v7520_v44  ;;  %v7450_v61 = vsub.f32 %v14491_v31, %v13551_v47  ;;  %v14495_v43 = vld [vmem:[#allocation38_spill] sm:$0xff] }
 0xbea   :  { %7642 = vst.msk [vmem:[#allocation3 + $0xe0] sm:$0xff] %vm564_vm2, %v7578_v5  ;;  %v7525_v56 = vmul.f32 %v13570_v36, %v7448_v38  ;;  %v7586_v57 = vadd.f32 %v13567_v20, %v7521_v52  ;;  %v7451_v35 = vsub.f32 %v14492_v16, %v13551_v47  ;;  %v7587_v58 = vadd.f32 %v13567_v20, %v7522_v62 }
 0xbeb   :  { %7643 = vst.msk [vmem:[#allocation3 + $0xe8] sm:$0xff] %vm564_vm2, %v7579_v27  ;;  %v7526_v32 = vmul.f32 %v13570_v36, %v7449_v22  ;;  %v7452_v4 = vsub.f32 %v14493_v14, %v13551_v47  ;;  %v7527_v40 = vmul.f32 %v13570_v36, %v7450_v61  ;;  %v7588_v45 = vadd.f32 %v13567_v20, %v7523_v0 }
 0xbec   :  { %7644 = vst.msk [vmem:[#allocation3 + $0xf0] sm:$0xff] %vm564_vm2, %v7580_v19  ;;  %v7453_v33 = vsub.f32 %v14494_v21, %v13551_v47  ;;  %v7528_v3 = vmul.f32 %v13570_v36, %v7451_v35  ;;  %v7589_v15 = vadd.f32 %v13567_v20, %v7524_v51  ;;  %v7454_v7 = vsub.f32 %v14495_v43, %v13551_v47 }
 0xbed   :  { %7645 = vst.msk [vmem:[#allocation3 + $0xf8] sm:$0xff] %vm564_vm2, %v7581_v1  ;;  %v7529_v37 = vmul.f32 %v13570_v36, %v7452_v4  ;;  %v7590_v5 = vadd.f32 %v13567_v20, %v7525_v56  ;;  %v7455_v29 = vsub.f32 %v14496_v50, %v13551_v47  ;;  %v7591_v27 = vadd.f32 %v13567_v20, %v7526_v32 }
 0xbee   :  { %7646 = vst.msk [vmem:[#allocation3 + $0x100] sm:$0xff] %vm564_vm2, %v7582_v34  ;;  %v7530_v18 = vmul.f32 %v13570_v36, %v7453_v33  ;;  %v7456_v42 = vsub.f32 %v14497_v28, %v13551_v47  ;;  %v7531_v19 = vmul.f32 %v13570_v36, %v7454_v7  ;;  %v7592_v48 = vadd.f32 %v13567_v20, %v7527_v40 }
 0xbef   :  { %7647 = vst.msk [vmem:[#allocation3 + $0x108] sm:$0xff] %vm564_vm2, %v7583_v9  ;;  %v7532_v8 = vmul.f32 %v13570_v36, %v7455_v29  ;;  %v7593_v44 = vadd.f32 %v13567_v20, %v7528_v3  ;;  %v7594_v30 = vadd.f32 %v13567_v20, %v7529_v37 }
 0xbf0   :  { %7648 = vst.msk [vmem:[#allocation3 + $0x110] sm:$0xff] %vm564_vm2, %v7584_v12  ;;  %v7533_v1 = vmul.f32 %v13570_v36, %v7456_v42  ;;  %v7595_v47 = vadd.f32 %v13567_v20, %v7530_v18  ;;  %v7596_v11 = vadd.f32 %v13567_v20, %v7531_v19 }
 0xbf1   :  { %7649 = vst.msk [vmem:[#allocation3 + $0x118] sm:$0xff] %vm564_vm2, %v7585_v59  ;;  %v7597_v52 = vadd.f32 %v13567_v20, %v7532_v8 }
 0xbf2   :  { %7650 = vst.msk [vmem:[#allocation3 + $0x120] sm:$0xff] %vm564_vm2, %v7586_v57  ;;  %v7598_v34 = vadd.f32 %v13567_v20, %v7533_v1 }
 0xbf3   :  { %7651 = vst.msk [vmem:[#allocation3 + $0x128] sm:$0xff] %vm564_vm2, %v7587_v58 }
 0xbf4   :  { %7652 = vst.msk [vmem:[#allocation3 + $0x130] sm:$0xff] %vm564_vm2, %v7588_v45 }
 0xbf5   :  { %7653 = vst.msk [vmem:[#allocation3 + $0x138] sm:$0xff] %vm564_vm2, %v7589_v15 }
 0xbf6   :  { %7654 = vst.msk [vmem:[#allocation3 + $0x140] sm:$0xff] %vm564_vm2, %v7590_v5 }
 0xbf7   :  { %7655 = vst.msk [vmem:[#allocation3 + $0x148] sm:$0xff] %vm564_vm2, %v7591_v27 }
 0xbf8   :  { %7656 = vst.msk [vmem:[#allocation3 + $0x150] sm:$0xff] %vm564_vm2, %v7592_v48 }
 0xbf9   :  { %7657 = vst.msk [vmem:[#allocation3 + $0x158] sm:$0xff] %vm564_vm2, %v7593_v44 }
 0xbfa   :  { %7658 = vst.msk [vmem:[#allocation3 + $0x160] sm:$0xff] %vm564_vm2, %v7594_v30 }
 0xbfb   :  { %7659 = vst.msk [vmem:[#allocation3 + $0x168] sm:$0xff] %vm564_vm2, %v7595_v47 }
 0xbfc   :  { %7660 = vst.msk [vmem:[#allocation3 + $0x170] sm:$0xff] %vm564_vm2, %v7596_v11 }
 0xbfd   :  { %7661 = vst.msk [vmem:[#allocation3 + $0x178] sm:$0xff] %vm564_vm2, %v7597_v52 }
 0xbfe   :  { %7662 = vst.msk [vmem:[#allocation3 + $0x180] sm:$0xff] %vm564_vm2, %v7598_v34 }
 0xbff   :  { %7663 = vst.msk [vmem:[#allocation3 + $0x188] sm:$0xff] %vm564_vm2, %v13739_v41 }
 0xc00   :  { %7664 = vst.msk [vmem:[#allocation3 + $0x190] sm:$0xff] %vm564_vm2, %v13743_v55 }
 0xc01   :  { %7665 = vst.msk [vmem:[#allocation3 + $0x198] sm:$0xff] %vm564_vm2, %v13748_v63 }
 0xc02   :  { %7666 = vst.msk [vmem:[#allocation3 + $0x1a0] sm:$0xff] %vm564_vm2, %v13752_v6 }
 0xc03   :  { %7667 = vst.msk [vmem:[#allocation3 + $0x1a8] sm:$0xff] %vm564_vm2, %v13756_v25 }
 0xc04   :  { %7668 = vst.msk [vmem:[#allocation3 + $0x1b0] sm:$0xff] %vm564_vm2, %v13760_v24 }
 0xc05   :  { %7669 = vst.msk [vmem:[#allocation3 + $0x1b8] sm:$0xff] %vm564_vm2, %v13765_v17 }
 0xc06   :  { %7670 = vst.msk [vmem:[#allocation3 + $0x1c0] sm:$0xff] %vm564_vm2, %v13769_v10 }
 0xc07   :  { %7671 = vst.msk [vmem:[#allocation3 + $0x1c8] sm:$0xff] %vm564_vm2, %v13773_v49 }
 0xc08   :  { %7672 = vst.msk [vmem:[#allocation3 + $0x1d0] sm:$0xff] %vm564_vm2, %v13777_v54 }
 0xc09   :  { %7673 = vst.msk [vmem:[#allocation3 + $0x1d8] sm:$0xff] %vm564_vm2, %v13782_v23 }
 0xc0a   :  { %7674 = vst.msk [vmem:[#allocation3 + $0x1e0] sm:$0xff] %vm564_vm2, %v13786_v53 }
 0xc0b   :  { %7675 = vst.msk [vmem:[#allocation3 + $0x1e8] sm:$0xff] %vm564_vm2, %v13790_v60 }
 0xc0c   :  { %7676 = vst.msk [vmem:[#allocation3 + $0x1f0] sm:$0xff] %vm564_vm2, %v13794_v2 }
 0xc0d   :  { %7690 = dma.vmem_to_hbm [thread:$0]  %s7683_s16, 8192, %s7685_s19, [#allocation4], %s8490_s5, %s8490_s5, %s8491_s20  }
 0xc0e   :  { %8486 = dma.done.wait [#allocation4], 8192  }
 0xc0f   :  { %8487 = vsyncadd [#allocation4], 4294959104 }
 0xc10   :  { %7695 = vsyncpa [#allocation4], 1 }

</bundles_post_ra>
